<compile_context>
chip_gen: v5e
topology: v5e:2x2
jax: 0.10.0
libtpu: 0.0.40
codegen_flags: <defaults>
</compile_context>

<pallas_src>
import functools
import math

import jax
import jax.numpy as jnp
from jax.experimental import pallas as pl
from jax.experimental.pallas import tpu as pltpu

BN_EPS = 1e-5
VMEM_LIMIT = 48 * 1024 * 1024   # <= v7x 64 MiB physical VMEM


def _pick(dim, prefs):
    for t in prefs:
        if t <= dim and dim % t == 0:
            return t
    return dim


# ---------- kernel A: 1x1-conv matmul + BN stats (optional fused input BN-normalize + ReLU) ----

def _matmul_stats_kernel(*refs, fuse_in, inv_m_in):
    if fuse_in:
        x_ref, xs_ref, w_ref, y_ref, stats_ref, acc_ref = refs
    else:
        x_ref, w_ref, y_ref, stats_ref, acc_ref = refs
        xs_ref = None

    i = pl.program_id(1)            # M tile
    k = pl.program_id(2)            # K tile (reduction, innermost)
    nk = pl.num_programs(2)

    @pl.when(k == 0)
    def _():
        acc_ref[...] = jnp.zeros_like(acc_ref)

    if fuse_in:
        # Normalize + ReLU the raw output of the previous conv on the fly (training-mode BN).
        s = xs_ref[...]                                   # (2, tk): [sum, sumsq]
        mean = s[0:1, :] * inv_m_in
        var = jnp.maximum(s[1:2, :] * inv_m_in - mean * mean, 0.0)
        rstd = jax.lax.rsqrt(var + BN_EPS)
        lhs = jnp.maximum((x_ref[...].astype(jnp.float32) - mean) * rstd, 0.0)
        lhs = lhs.astype(jnp.bfloat16)
    else:
        lhs = x_ref[...]

    acc_ref[...] += jnp.dot(lhs, w_ref[...], preferred_element_type=jnp.float32)

    @pl.when(jnp.logical_and(k == nk - 1, i == 0))
    def _():
        stats_ref[...] = jnp.zeros_like(stats_ref)

    @pl.when(k == nk - 1)
    def _():
        acc = acc_ref[...]
        y_ref[...] = acc.astype(y_ref.dtype)
        stats_ref[...] += jnp.concatenate(
            [jnp.sum(acc, axis=0, keepdims=True),
             jnp.sum(acc * acc, axis=0, keepdims=True)], axis=0)


def matmul_stats(x, w, *, in_stats=None, in_count=None):
    """x:(M,K), w:(K,N) bf16 -> (y:(M,N) f32 raw conv output, stats:(2,N) f32 [sum, sumsq]).
    If in_stats is given, x is the RAW previous-conv output and is BN-normalized + ReLU'd
    inside the kernel before the matmul (fused epilogue of the previous layer)."""
    M, K = x.shape
    K2, N = w.shape
    assert K == K2
    tm = _pick(M, (512, 256, 128, 8))
    tk = _pick(K, (512, 256, 128))
    tn = 128 if N % 128 == 0 else N
    grid = (N // tn, M // tm, K // tk)      # stats block (0, j) stays resident across (i, k)

    fuse = in_stats is not None
    kernel = functools.partial(
        _matmul_stats_kernel, fuse_in=fuse,
        inv_m_in=(1.0 / float(in_count)) if fuse else 1.0)

    in_specs = [pl.BlockSpec((tm, tk), lambda j, i, k: (i, k))]
    args = [x]
    if fuse:
        in_specs.append(pl.BlockSpec((2, tk), lambda j, i, k: (0, k)))
        args.append(in_stats)
    in_specs.append(pl.BlockSpec((tk, tn), lambda j, i, k: (k, j)))
    args.append(w)

    x_bytes = x.size * x.dtype.itemsize
    return pl.pallas_call(
        kernel,
        out_shape=[jax.ShapeDtypeStruct((M, N), jnp.float32),
                   jax.ShapeDtypeStruct((2, N), jnp.float32)],
        grid=grid,
        in_specs=in_specs,
        out_specs=[pl.BlockSpec((tm, tn), lambda j, i, k: (i, j)),
                   pl.BlockSpec((2, tn), lambda j, i, k: (0, j))],
        scratch_shapes=[pltpu.VMEM((tm, tn), jnp.float32)],
        compiler_params=pltpu.CompilerParams(
            dimension_semantics=("parallel", "arbitrary", "arbitrary"),
            vmem_limit_bytes=VMEM_LIMIT),
        cost_estimate=pl.CostEstimate(
            flops=2 * M * K * N, transcendentals=0,
            bytes_accessed=x_bytes + K * N * 2 + (M * N + 2 * N) * 4),
    )(*args)


# ------------------------ kernel B: 3x3 conv (tap reduction, no HBM im2col) --------------------

def _conv3x3_stats_kernel(x_ref, w_ref, y_ref, stats_ref, acc_ref, *, ho, wo):
    n = pl.program_id(1)            # image index
    dj = pl.program_id(2)           # kernel-column tap (reduction, innermost)

    @pl.when(dj == 0)
    def _():
        acc_ref[...] = jnp.zeros_like(acc_ref)

    x = x_ref[...]                  # ((ho+2)*wo, C) bf16: column-shifted, spatially padded slab
    w = w_ref[...]                  # (3*C, tn) bf16: rows = (kernel-row di, cin)
    c = w.shape[0] // 3
    for di in range(3):             # static unroll: 3 row-shifted matmuls per tap
        lhs = x[di * wo: di * wo + ho * wo, :]
        acc_ref[...] += jnp.dot(lhs, w[di * c:(di + 1) * c, :],
                                preferred_element_type=jnp.float32)

    @pl.when(jnp.logical_and(dj == 2, n == 0))
    def _():
        stats_ref[...] = jnp.zeros_like(stats_ref)

    @pl.when(dj == 2)
    def _():
        acc = acc_ref[...]
        y_ref[...] = acc.astype(y_ref.dtype)
        stats_ref[...] += jnp.concatenate(
            [jnp.sum(acc, axis=0, keepdims=True),
             jnp.sum(acc * acc, axis=0, keepdims=True)], axis=0)


def conv3x3_stats(x_nhwc, w):
    """3x3, stride 1, pad 1 conv.  x_nhwc:(N,H,W,C) bf16, w torch-layout (Cout,Cin,3,3).
    Returns raw conv output (N, H*W, Cout) f32 and BN stats (2, Cout) f32."""
    N, H, W, C = x_nhwc.shape
    Cout = w.shape[0]
    Hp = H + 2
    xp = jnp.pad(x_nhwc, ((0, 0), (1, 1), (1, 1), (0, 0)))
    # Only 3 column-shifted views (3x activation volume), not 9x im2col.
    xcols = jnp.stack([xp[:, :, dj:dj + W, :] for dj in range(3)], axis=0)
    xcols = xcols.reshape(3, N, Hp * W, C).astype(jnp.bfloat16)
    # (Cout, Cin, kh, kw) -> (kw, kh, Cin, Cout) -> (3, 3*Cin, Cout)
    wm = jnp.transpose(w, (3, 2, 1, 0)).reshape(3, 3 * C, Cout).astype(jnp.bfloat16)

    tn = 128 if Cout % 128 == 0 else Cout
    grid = (Cout // tn, N, 3)
    kernel = functools.partial(_conv3x3_stats_kernel, ho=H, wo=W)

    return pl.pallas_call(
        kernel,
        out_shape=[jax.ShapeDtypeStruct((N, H * W, Cout), jnp.float32),
                   jax.ShapeDtypeStruct((2, Cout), jnp.float32)],
        grid=grid,
        in_specs=[pl.BlockSpec((None, None, Hp * W, C), lambda j, n, dj: (dj, n, 0, 0)),
                  pl.BlockSpec((None, 3 * C, tn), lambda j, n, dj: (dj, 0, j))],
        out_specs=[pl.BlockSpec((None, H * W, tn), lambda j, n, dj: (n, 0, j)),
                   pl.BlockSpec((2, tn), lambda j, n, dj: (0, j))],
        scratch_shapes=[pltpu.VMEM((H * W, tn), jnp.float32)],
        compiler_params=pltpu.CompilerParams(
            dimension_semantics=("parallel", "arbitrary", "arbitrary"),
            vmem_limit_bytes=VMEM_LIMIT),
        cost_estimate=pl.CostEstimate(
            flops=2 * N * H * W * 9 * C * Cout, transcendentals=0,
            bytes_accessed=(3 * N * Hp * W * C + 9 * C * Cout) * 2
                           + (N * H * W * Cout + 2 * Cout) * 4),
    )(xcols, wm)


# ---------------- kernel C: BN normalize epilogue (+ fused residual add + ReLU) ----------------

def _bn_epilogue_kernel(*refs, m_total, relu, res_mode):
    if res_mode == "bn":
        y_ref, s_ref, r_ref, rs_ref, o_ref = refs
    elif res_mode == "plain":
        y_ref, s_ref, r_ref, o_ref = refs
        rs_ref = None
    else:
        y_ref, s_ref, o_ref = refs
        r_ref = rs_ref = None

    inv_m = 1.0 / m_total

    def norm(v_ref, stat_ref):
        s = stat_ref[...]                                   # (2, tn): [sum, sumsq]
        mean = s[0:1, :] * inv_m
        var = jnp.maximum(s[1:2, :] * inv_m - mean * mean, 0.0)
        return (v_ref[...].astype(jnp.float32) - mean) * jax.lax.rsqrt(var + BN_EPS)

    out = norm(y_ref, s_ref)
    if res_mode == "bn":        # downsample branch: BN of the raw downsample conv output
        out = out + norm(r_ref, rs_ref)
    elif res_mode == "plain":   # identity branch: plain residual
        out = out + r_ref[...].astype(jnp.float32)
    if relu:
        out = jnp.maximum(out, 0.0)
    o_ref[...] = out.astype(o_ref.dtype)


def bn_epilogue(y, stats, *, relu, residual=None, res_stats=None, out_dtype=jnp.float32):
    M, C = y.shape
    tm = _pick(M, (512, 256, 128, 8))
    tn = 128 if C % 128 == 0 else C
    grid = (M // tm, C // tn)

    if res_stats is not None:
        res_mode = "bn"
    elif residual is not None:
        res_mode = "plain"
    else:
        res_mode = None

    y_spec = pl.BlockSpec((tm, tn), lambda i, j: (i, j))
    s_spec = pl.BlockSpec((2, tn), lambda i, j: (0, j))
    in_specs = [y_spec, s_spec]
    args = [y, stats]
    if res_mode == "bn":
        in_specs += [y_spec, s_spec]
        args += [residual, res_stats]
    elif res_mode == "plain":
        in_specs += [y_spec]
        args += [residual]

    kernel = functools.partial(_bn_epilogue_kernel, m_total=float(M),
                               relu=relu, res_mode=res_mode)
    return pl.pallas_call(
        kernel,
        out_shape=jax.ShapeDtypeStruct((M, C), out_dtype),
        grid=grid,
        in_specs=in_specs,
        out_specs=pl.BlockSpec((tm, tn), lambda i, j: (i, j)),
        compiler_params=pltpu.CompilerParams(
            dimension_semantics=("parallel", "parallel"),
            vmem_limit_bytes=VMEM_LIMIT),
    )(*args)


# --------------------------------------- BottleBlock -------------------------------------------

def _w1x1(w):
    # torch (Cout, Cin, 1, 1) -> (Cin, Cout) bf16 for the MXU
    return jnp.transpose(w[:, :, 0, 0], (1, 0)).astype(jnp.bfloat16)


def bottle_block_forward(params, x_nchw):
    x = jnp.transpose(x_nchw, (0, 2, 3, 1)).astype(jnp.float32)     # NCHW -> NHWC
    N, H, W, in_c = x.shape
    M = N * H * W
    out_c = params['w1'].shape[0]
    x2d = x.reshape(M, in_c)
    x_bf = x2d.astype(jnp.bfloat16)

    # conv1 (1x1) + BN stats   (conv bias cancelled exactly by training-mode BN)
    y1, s1 = matmul_stats(x_bf, _w1x1(params['w1']))
    # bn1 + ReLU applied before padding (padding must pad the *normalized* activations).
    h1 = bn_epilogue(y1, s1, relu=True, out_dtype=jnp.bfloat16)

    # conv2 (3x3, pad 1) + BN stats
    y2, s2 = conv3x3_stats(h1.reshape(N, H, W, out_c), params['w2'])

    # conv3 (1x1) with bn2+ReLU fused onto its input, + BN stats
    y3, s3 = matmul_stats(y2.reshape(M, out_c), _w1x1(params['w3']),
                          in_stats=s2, in_count=M)

    # bn3 + residual branch + final ReLU, all in one epilogue pass
    if 'wd' in params:
        # downsample = Conv1x1 + BN: normalize both branches inside the epilogue kernel
        yd, sd = matmul_stats(x_bf, _w1x1(params['wd']))
        out = bn_epilogue(y3, s3, relu=True, residual=yd, res_stats=sd,
                          out_dtype=jnp.float32)
    else:
        out = bn_epilogue(y3, s3, relu=True, residual=x2d, out_dtype=jnp.float32)

    c4 = 4 * out_c
    return jnp.transpose(out.reshape(N, H, W, c4), (0, 3, 1, 2))    # back to NCHW


# ------------------------------------- parameter init ------------------------------------------

def init_params(key, in_c, out_c):
    def conv_w(k, cout, cin, ksz):
        fan_in = cin * ksz * ksz
        return jax.random.normal(k, (cout, cin, ksz, ksz), jnp.float32) / math.sqrt(fan_in)

    ks = jax.random.split(key, 4)
    p = {
        'w1': conv_w(ks[0], out_c, in_c, 1),
        'w2': conv_w(ks[1], out_c, out_c, 3),
        'w3': conv_w(ks[2], out_c * 4, out_c, 1),
    }
    if in_c != out_c * 4:
        p['wd'] = conv_w(ks[3], out_c * 4, in_c, 1)
    # Conv biases intentionally omitted: each conv is immediately followed by BatchNorm2d in
    # training mode with default affine init (gamma=1, beta=0); the per-channel bias is exactly
    # cancelled by the batch-mean subtraction and never affects the forward output.
    # TODO(synk): BN running_mean/running_var buffer updates (training bookkeeping, not part of
    # the forward output) are not modeled.
    return p


# ------------------------------------------- main ----------------------------------------------

if __name__ == "__main__":
    key = jax.random.PRNGKey(0)
    in_c, out_c = 64, 64                        # in_c != 4*out_c -> downsample branch exercised
    params = init_params(key, in_c, out_c)
    x = jax.random.normal(jax.random.fold_in(key, 999), (2, in_c, 16, 16), jnp.float32)

    fwd = jax.jit(bottle_block_forward)
    out = fwd(params, x)
    out = jax.block_until_ready(out)

    assert out.shape == (2, 4 * out_c, 16, 16), out.shape
    assert bool(jnp.all(jnp.isfinite(out)))
    assert bool(jnp.all(out >= 0))              # final ReLU
    print("KERNEL_OK")
</pallas_src>

<mosaic_0001>
module attributes {stable_mosaic.version = 11 : i64} {
  func.func @_matmul_stats_kernel(%arg0: i32, %arg1: i32, %arg2: i32, %arg3: memref<512x64xbf16, #tpu.memory_space<vmem>>, %arg4: memref<64x64xbf16, #tpu.memory_space<vmem>>, %arg5: memref<512x64xf32, #tpu.memory_space<vmem>>, %arg6: memref<2x64xf32, #tpu.memory_space<vmem>>, %arg7: memref<512x64xf32, #tpu.memory_space<vmem>>) attributes {dimension_semantics = [#tpu.dimension_semantics<parallel>, #tpu.dimension_semantics<arbitrary>, #tpu.dimension_semantics<arbitrary>], iteration_bounds = array<i64: 1, 1, 1>, scalar_prefetch = 0 : i64, scratch_operands = 1 : i64, tpu.core_type = #tpu.core_type<tc>, window_params = [{transform_indices = @transform_0, window_bounds = array<i64: 512, 64>}, {transform_indices = @transform_1, window_bounds = array<i64: 64, 64>}, {transform_indices = @transform_2, window_bounds = array<i64: 512, 64>}, {transform_indices = @transform_3, window_bounds = array<i64: 2, 64>}]} {
    %c0_i32 = arith.constant 0 : i32
    %0 = arith.cmpi eq, %arg2, %c0_i32 : i32
    %1 = arith.extui %0 : i1 to i32
    %c0_i32_0 = arith.constant 0 : i32
    %2 = arith.cmpi ne, %1, %c0_i32_0 : i32
    scf.if %2 {
      %cst_13 = arith.constant 0.000000e+00 : f32
      %17 = vector.broadcast %cst_13 : f32 to vector<512x64xf32>
      %c0_14 = arith.constant 0 : index
      %c0_15 = arith.constant 0 : index
      %18 = vector.load %arg7[%c0_14, %c0_15] : memref<512x64xf32, #tpu.memory_space<vmem>>, vector<512x64xf32>
      tpu.vector_store %arg7[%c0_14, %c0_15], %17 {strides = array<i32>} : memref<512x64xf32, #tpu.memory_space<vmem>>, vector<512x64xf32>,
    } else {
    }
    %c0 = arith.constant 0 : index
    %c0_1 = arith.constant 0 : index
    %3 = vector.load %arg3[%c0, %c0_1] : memref<512x64xbf16, #tpu.memory_space<vmem>>, vector<512x64xbf16>
    %c0_2 = arith.constant 0 : index
    %c0_3 = arith.constant 0 : index
    %4 = vector.load %arg7[%c0_2, %c0_3] : memref<512x64xf32, #tpu.memory_space<vmem>>, vector<512x64xf32>
    %c0_4 = arith.constant 0 : index
    %c0_5 = arith.constant 0 : index
    %5 = vector.load %arg4[%c0_4, %c0_5] : memref<64x64xbf16, #tpu.memory_space<vmem>>, vector<64x64xbf16>
    %cst = arith.constant dense<0.000000e+00> : vector<512x64xf32>
    %6 = tpu.matmul %3, %5, %cst {dimension_numbers = #tpu.dot_dimension_numbers<[1], [0], [0], [1], [0, 0, 1, 1], [], []>} : vector<512x64xbf16>, vector<64x64xbf16>, vector<512x64xf32> -> vector<512x64xf32>
    %7 = arith.addf %4, %6 : vector<512x64xf32>
    %c0_6 = arith.constant 0 : index
    %c0_7 = arith.constant 0 : index
    %8 = vector.load %arg7[%c0_6, %c0_7] : memref<512x64xf32, #tpu.memory_space<vmem>>, vector<512x64xf32>
    tpu.vector_store %arg7[%c0_6, %c0_7], %7 {strides = array<i32>} : memref<512x64xf32, #tpu.memory_space<vmem>>, vector<512x64xf32>,
    %c0_i32_8 = arith.constant 0 : i32
    %9 = arith.cmpi eq, %arg2, %c0_i32_8 : i32
    %c0_i32_9 = arith.constant 0 : i32
    %10 = arith.cmpi eq, %arg1, %c0_i32_9 : i32
    %11 = arith.andi %9, %10 : i1
    %12 = arith.extui %11 : i1 to i32
    %c0_i32_10 = arith.constant 0 : i32
    %13 = arith.cmpi ne, %12, %c0_i32_10 : i32
    scf.if %13 {
      %cst_13 = arith.constant 0.000000e+00 : f32
      %17 = vector.broadcast %cst_13 : f32 to vector<2x64xf32>
      %c0_14 = arith.constant 0 : index
      %c0_15 = arith.constant 0 : index
      %18 = vector.load %arg6[%c0_14, %c0_15] : memref<2x64xf32, #tpu.memory_space<vmem>>, vector<2x64xf32>
      tpu.vector_store %arg6[%c0_14, %c0_15], %17 {strides = array<i32>} : memref<2x64xf32, #tpu.memory_space<vmem>>, vector<2x64xf32>,
    } else {
    }
    %c0_i32_11 = arith.constant 0 : i32
    %14 = arith.cmpi eq, %arg2, %c0_i32_11 : i32
    %15 = arith.extui %14 : i1 to i32
    %c0_i32_12 = arith.constant 0 : i32
    %16 = arith.cmpi ne, %15, %c0_i32_12 : i32
    scf.if %16 {
      %c0_13 = arith.constant 0 : index
      %c0_14 = arith.constant 0 : index
      %17 = vector.load %arg7[%c0_13, %c0_14] : memref<512x64xf32, #tpu.memory_space<vmem>>, vector<512x64xf32>
      %c0_15 = arith.constant 0 : index
      %c0_16 = arith.constant 0 : index
      %18 = vector.load %arg5[%c0_15, %c0_16] : memref<512x64xf32, #tpu.memory_space<vmem>>, vector<512x64xf32>
      tpu.vector_store %arg5[%c0_15, %c0_16], %17 {strides = array<i32>} : memref<512x64xf32, #tpu.memory_space<vmem>>, vector<512x64xf32>,
      %c0_17 = arith.constant 0 : index
      %c0_18 = arith.constant 0 : index
      %19 = vector.load %arg6[%c0_17, %c0_18] : memref<2x64xf32, #tpu.memory_space<vmem>>, vector<2x64xf32>
      %cst_19 = arith.constant dense<0.000000e+00> : vector<64xf32>
      %20 = vector.multi_reduction <add>, %17, %cst_19 [0] : vector<512x64xf32> to vector<64xf32>
      %21 = vector.shape_cast %20 : vector<64xf32> to vector<1x64xf32>
      %22 = arith.mulf %17, %17 : vector<512x64xf32>
      %cst_20 = arith.constant dense<0.000000e+00> : vector<64xf32>
      %23 = vector.multi_reduction <add>, %22, %cst_20 [0] : vector<512x64xf32> to vector<64xf32>
      %24 = vector.shape_cast %23 : vector<64xf32> to vector<1x64xf32>
      %25 = tpu.concatenate %21, %24 in 0 : vector<1x64xf32>, vector<1x64xf32> -> vector<2x64xf32>
      %26 = arith.addf %19, %25 : vector<2x64xf32>
      %c0_21 = arith.constant 0 : index
      %c0_22 = arith.constant 0 : index
      %27 = vector.load %arg6[%c0_21, %c0_22] : memref<2x64xf32, #tpu.memory_space<vmem>>, vector<2x64xf32>
      tpu.vector_store %arg6[%c0_21, %c0_22], %26 {strides = array<i32>} : memref<2x64xf32, #tpu.memory_space<vmem>>, vector<2x64xf32>,
    } else {
    }
    return
  }
  func.func @transform_0(%arg0: i32, %arg1: i32, %arg2: i32) -> (i32, i32) {
    %c0_i32 = arith.constant 0 : i32
    return %arg1, %arg2 : i32, i32
  }
  func.func @transform_1(%arg0: i32, %arg1: i32, %arg2: i32) -> (i32, i32) {
    %c0_i32 = arith.constant 0 : i32
    return %arg2, %arg0 : i32, i32
  }
  func.func @transform_2(%arg0: i32, %arg1: i32, %arg2: i32) -> (i32, i32) {
    %c0_i32 = arith.constant 0 : i32
    return %arg1, %arg0 : i32, i32
  }
  func.func @transform_3(%arg0: i32, %arg1: i32, %arg2: i32) -> (i32, i32) {
    %c0_i32 = arith.constant 0 : i32
    %c0_i32_0 = arith.constant 0 : i32
    return %c0_i32, %arg0 : i32, i32
  }
}

module attributes {stable_mosaic.version = 11 : i64} {
  func.func @_bn_epilogue_kernel(%arg0: i32, %arg1: i32, %arg2: memref<512x64xf32, #tpu.memory_space<vmem>>, %arg3: memref<2x64xf32, #tpu.memory_space<vmem>>, %arg4: memref<512x64xbf16, #tpu.memory_space<vmem>>) attributes {dimension_semantics = [#tpu.dimension_semantics<parallel>, #tpu.dimension_semantics<parallel>], iteration_bounds = array<i64: 1, 1>, scalar_prefetch = 0 : i64, scratch_operands = 0 : i64, tpu.core_type = #tpu.core_type<tc>, window_params = [{transform_indices = @transform_0, window_bounds = array<i64: 512, 64>}, {transform_indices = @transform_1, window_bounds = array<i64: 2, 64>}, {transform_indices = @transform_2, window_bounds = array<i64: 512, 64>}]} {
    %c0 = arith.constant 0 : index
    %c0_0 = arith.constant 0 : index
    %0 = vector.load %arg3[%c0, %c0_0] : memref<2x64xf32, #tpu.memory_space<vmem>>, vector<2x64xf32>
    %1 = vector.extract_strided_slice %0 {offsets = [0, 0], sizes = [1, 64], strides = [1, 1]} : vector<2x64xf32> to vector<1x64xf32>
    %cst = arith.constant 0.001953125 : f32
    %2 = vector.broadcast %cst : f32 to vector<1x64xf32>
    %3 = arith.mulf %1, %2 : vector<1x64xf32>
    %4 = vector.extract_strided_slice %0 {offsets = [1, 0], sizes = [1, 64], strides = [1, 1]} : vector<2x64xf32> to vector<1x64xf32>
    %cst_1 = arith.constant 0.001953125 : f32
    %5 = vector.broadcast %cst_1 : f32 to vector<1x64xf32>
    %6 = arith.mulf %4, %5 : vector<1x64xf32>
    %7 = arith.mulf %3, %3 : vector<1x64xf32>
    %8 = arith.subf %6, %7 : vector<1x64xf32>
    %cst_2 = arith.constant 0.000000e+00 : f32
    %9 = vector.broadcast %cst_2 : f32 to vector<1x64xf32>
    %10 = arith.maximumf %8, %9 : vector<1x64xf32>
    %c0_3 = arith.constant 0 : index
    %c0_4 = arith.constant 0 : index
    %11 = vector.load %arg2[%c0_3, %c0_4] : memref<512x64xf32, #tpu.memory_space<vmem>>, vector<512x64xf32>
    %12 = vector.broadcast %3 : vector<1x64xf32> to vector<512x64xf32>
    %13 = arith.subf %11, %12 : vector<512x64xf32>
    %cst_5 = arith.constant 9.99999974E-6 : f32
    %14 = vector.broadcast %cst_5 : f32 to vector<1x64xf32>
    %15 = arith.addf %10, %14 : vector<1x64xf32>
    %16 = math.rsqrt %15 : vector<1x64xf32>
    %17 = vector.broadcast %16 : vector<1x64xf32> to vector<512x64xf32>
    %18 = arith.mulf %13, %17 : vector<512x64xf32>
    %cst_6 = arith.constant 0.000000e+00 : f32
    %19 = vector.broadcast %cst_6 : f32 to vector<512x64xf32>
    %20 = arith.maximumf %18, %19 : vector<512x64xf32>
    %21 = arith.truncf %20 : vector<512x64xf32> to vector<512x64xbf16>
    %c0_7 = arith.constant 0 : index
    %c0_8 = arith.constant 0 : index
    %22 = vector.load %arg4[%c0_7, %c0_8] : memref<512x64xbf16, #tpu.memory_space<vmem>>, vector<512x64xbf16>
    tpu.vector_store %arg4[%c0_7, %c0_8], %21 {strides = array<i32>} : memref<512x64xbf16, #tpu.memory_space<vmem>>, vector<512x64xbf16>,
    return
  }
  func.func @transform_0(%arg0: i32, %arg1: i32) -> (i32, i32) {
    %c0_i32 = arith.constant 0 : i32
    return %arg0, %arg1 : i32, i32
  }
  func.func @transform_1(%arg0: i32, %arg1: i32) -> (i32, i32) {
    %c0_i32 = arith.constant 0 : i32
    %c0_i32_0 = arith.constant 0 : i32
    return %c0_i32, %arg1 : i32, i32
  }
  func.func @transform_2(%arg0: i32, %arg1: i32) -> (i32, i32) {
    %c0_i32 = arith.constant 0 : i32
    return %arg0, %arg1 : i32, i32
  }
}

module attributes {stable_mosaic.version = 11 : i64} {
  func.func @_conv3x3_stats_kernel(%arg0: i32, %arg1: i32, %arg2: i32, %arg3: memref<1x1x288x64xbf16, #tpu.memory_space<vmem>>, %arg4: memref<1x192x64xbf16, #tpu.memory_space<vmem>>, %arg5: memref<1x256x64xf32, #tpu.memory_space<vmem>>, %arg6: memref<2x64xf32, #tpu.memory_space<vmem>>, %arg7: memref<256x64xf32, #tpu.memory_space<vmem>>) attributes {dimension_semantics = [#tpu.dimension_semantics<parallel>, #tpu.dimension_semantics<arbitrary>, #tpu.dimension_semantics<arbitrary>], iteration_bounds = array<i64: 1, 2, 3>, scalar_prefetch = 0 : i64, scratch_operands = 1 : i64, tpu.core_type = #tpu.core_type<tc>, window_params = [{transform_indices = @transform_0, window_bounds = array<i64: 1, 1, 288, 64>}, {transform_indices = @transform_1, window_bounds = array<i64: 1, 192, 64>}, {transform_indices = @transform_2, window_bounds = array<i64: 1, 256, 64>}, {transform_indices = @transform_3, window_bounds = array<i64: 2, 64>}]} {
    %c0_i32 = arith.constant 0 : i32
    %0 = arith.cmpi eq, %arg2, %c0_i32 : i32
    %1 = arith.extui %0 : i1 to i32
    %c0_i32_0 = arith.constant 0 : i32
    %2 = arith.cmpi ne, %1, %c0_i32_0 : i32
    scf.if %2 {
      %cst_25 = arith.constant 0.000000e+00 : f32
      %33 = vector.broadcast %cst_25 : f32 to vector<256x64xf32>
      %c0_26 = arith.constant 0 : index
      %c0_27 = arith.constant 0 : index
      %34 = vector.load %arg7[%c0_26, %c0_27] : memref<256x64xf32, #tpu.memory_space<vmem>>, vector<256x64xf32>
      tpu.vector_store %arg7[%c0_26, %c0_27], %33 {strides = array<i32>} : memref<256x64xf32, #tpu.memory_space<vmem>>, vector<256x64xf32>,
    } else {
    }
    %c0 = arith.constant 0 : index
    %c0_1 = arith.constant 0 : index
    %c0_2 = arith.constant 0 : index
    %c0_3 = arith.constant 0 : index
    %3 = vector.load %arg3[%c0, %c0_1, %c0_2, %c0_3] : memref<1x1x288x64xbf16, #tpu.memory_space<vmem>>, vector<1x1x288x64xbf16>
    %4 = vector.shape_cast %3 : vector<1x1x288x64xbf16> to vector<288x64xbf16>
    %c0_4 = arith.constant 0 : index
    %c0_5 = arith.constant 0 : index
    %c0_6 = arith.constant 0 : index
    %5 = vector.load %arg4[%c0_4, %c0_5, %c0_6] : memref<1x192x64xbf16, #tpu.memory_space<vmem>>, vector<1x192x64xbf16>
    %6 = vector.shape_cast %5 : vector<1x192x64xbf16> to vector<192x64xbf16>
    %7 = vector.extract_strided_slice %4 {offsets = [0, 0], sizes = [256, 64], strides = [1, 1]} : vector<288x64xbf16> to vector<256x64xbf16>
    %c0_7 = arith.constant 0 : index
    %c0_8 = arith.constant 0 : index
    %8 = vector.load %arg7[%c0_7, %c0_8] : memref<256x64xf32, #tpu.memory_space<vmem>>, vector<256x64xf32>
    %9 = vector.extract_strided_slice %6 {offsets = [0, 0], sizes = [64, 64], strides = [1, 1]} : vector<192x64xbf16> to vector<64x64xbf16>
    %cst = arith.constant dense<0.000000e+00> : vector<256x64xf32>
    %10 = tpu.matmul %7, %9, %cst {dimension_numbers = #tpu.dot_dimension_numbers<[1], [0], [0], [1], [0, 0, 1, 1], [], []>} : vector<256x64xbf16>, vector<64x64xbf16>, vector<256x64xf32> -> vector<256x64xf32>
    %11 = arith.addf %8, %10 : vector<256x64xf32>
    %c0_9 = arith.constant 0 : index
    %c0_10 = arith.constant 0 : index
    %12 = vector.load %arg7[%c0_9, %c0_10] : memref<256x64xf32, #tpu.memory_space<vmem>>, vector<256x64xf32>
    tpu.vector_store %arg7[%c0_9, %c0_10], %11 {strides = array<i32>} : memref<256x64xf32, #tpu.memory_space<vmem>>, vector<256x64xf32>,
    %13 = vector.extract_strided_slice %4 {offsets = [16, 0], sizes = [256, 64], strides = [1, 1]} : vector<288x64xbf16> to vector<256x64xbf16>
    %c0_11 = arith.constant 0 : index
    %c0_12 = arith.constant 0 : index
    %14 = vector.load %arg7[%c0_11, %c0_12] : memref<256x64xf32, #tpu.memory_space<vmem>>, vector<256x64xf32>
    %15 = vector.extract_strided_slice %6 {offsets = [64, 0], sizes = [64, 64], strides = [1, 1]} : vector<192x64xbf16> to vector<64x64xbf16>
    %cst_13 = arith.constant dense<0.000000e+00> : vector<256x64xf32>
    %16 = tpu.matmul %13, %15, %cst_13 {dimension_numbers = #tpu.dot_dimension_numbers<[1], [0], [0], [1], [0, 0, 1, 1], [], []>} : vector<256x64xbf16>, vector<64x64xbf16>, vector<256x64xf32> -> vector<256x64xf32>
    %17 = arith.addf %14, %16 : vector<256x64xf32>
    %c0_14 = arith.constant 0 : index
    %c0_15 = arith.constant 0 : index
    %18 = vector.load %arg7[%c0_14, %c0_15] : memref<256x64xf32, #tpu.memory_space<vmem>>, vector<256x64xf32>
    tpu.vector_store %arg7[%c0_14, %c0_15], %17 {strides = array<i32>} : memref<256x64xf32, #tpu.memory_space<vmem>>, vector<256x64xf32>,
    %19 = vector.extract_strided_slice %4 {offsets = [32, 0], sizes = [256, 64], strides = [1, 1]} : vector<288x64xbf16> to vector<256x64xbf16>
    %c0_16 = arith.constant 0 : index
    %c0_17 = arith.constant 0 : index
    %20 = vector.load %arg7[%c0_16, %c0_17] : memref<256x64xf32, #tpu.memory_space<vmem>>, vector<256x64xf32>
    %21 = vector.extract_strided_slice %6 {offsets = [128, 0], sizes = [64, 64], strides = [1, 1]} : vector<192x64xbf16> to vector<64x64xbf16>
    %cst_18 = arith.constant dense<0.000000e+00> : vector<256x64xf32>
    %22 = tpu.matmul %19, %21, %cst_18 {dimension_numbers = #tpu.dot_dimension_numbers<[1], [0], [0], [1], [0, 0, 1, 1], [], []>} : vector<256x64xbf16>, vector<64x64xbf16>, vector<256x64xf32> -> vector<256x64xf32>
    %23 = arith.addf %20, %22 : vector<256x64xf32>
    %c0_19 = arith.constant 0 : index
    %c0_20 = arith.constant 0 : index
    %24 = vector.load %arg7[%c0_19, %c0_20] : memref<256x64xf32, #tpu.memory_space<vmem>>, vector<256x64xf32>
    tpu.vector_store %arg7[%c0_19, %c0_20], %23 {strides = array<i32>} : memref<256x64xf32, #tpu.memory_space<vmem>>, vector<256x64xf32>,
    %c2_i32 = arith.constant 2 : i32
    %25 = arith.cmpi eq, %arg2, %c2_i32 : i32
    %c0_i32_21 = arith.constant 0 : i32
    %26 = arith.cmpi eq, %arg1, %c0_i32_21 : i32
    %27 = arith.andi %25, %26 : i1
    %28 = arith.extui %27 : i1 to i32
    %c0_i32_22 = arith.constant 0 : i32
    %29 = arith.cmpi ne, %28, %c0_i32_22 : i32
    scf.if %29 {
      %cst_25 = arith.constant 0.000000e+00 : f32
      %33 = vector.broadcast %cst_25 : f32 to vector<2x64xf32>
      %c0_26 = arith.constant 0 : index
      %c0_27 = arith.constant 0 : index
      %34 = vector.load %arg6[%c0_26, %c0_27] : memref<2x64xf32, #tpu.memory_space<vmem>>, vector<2x64xf32>
      tpu.vector_store %arg6[%c0_26, %c0_27], %33 {strides = array<i32>} : memref<2x64xf32, #tpu.memory_space<vmem>>, vector<2x64xf32>,
    } else {
    }
    %c2_i32_23 = arith.constant 2 : i32
    %30 = arith.cmpi eq, %arg2, %c2_i32_23 : i32
    %31 = arith.extui %30 : i1 to i32
    %c0_i32_24 = arith.constant 0 : i32
    %32 = arith.cmpi ne, %31, %c0_i32_24 : i32
    scf.if %32 {
      %c0_25 = arith.constant 0 : index
      %c0_26 = arith.constant 0 : index
      %33 = vector.load %arg7[%c0_25, %c0_26] : memref<256x64xf32, #tpu.memory_space<vmem>>, vector<256x64xf32>
      %c0_27 = arith.constant 0 : index
      %c0_28 = arith.constant 0 : index
      %c0_29 = arith.constant 0 : index
      %34 = vector.load %arg5[%c0_27, %c0_28, %c0_29] : memref<1x256x64xf32, #tpu.memory_space<vmem>>, vector<1x256x64xf32>
      %35 = vector.shape_cast %34 : vector<1x256x64xf32> to vector<256x64xf32>
      %36 = vector.shape_cast %33 : vector<256x64xf32> to vector<1x256x64xf32>
      tpu.vector_store %arg5[%c0_27, %c0_28, %c0_29], %36 {strides = array<i32>} : memref<1x256x64xf32, #tpu.memory_space<vmem>>, vector<1x256x64xf32>,
      %c0_30 = arith.constant 0 : index
      %c0_31 = arith.constant 0 : index
      %37 = vector.load %arg6[%c0_30, %c0_31] : memref<2x64xf32, #tpu.memory_space<vmem>>, vector<2x64xf32>
      %cst_32 = arith.constant dense<0.000000e+00> : vector<64xf32>
      %38 = vector.multi_reduction <add>, %33, %cst_32 [0] : vector<256x64xf32> to vector<64xf32>
      %39 = vector.shape_cast %38 : vector<64xf32> to vector<1x64xf32>
      %40 = arith.mulf %33, %33 : vector<256x64xf32>
      %cst_33 = arith.constant dense<0.000000e+00> : vector<64xf32>
      %41 = vector.multi_reduction <add>, %40, %cst_33 [0] : vector<256x64xf32> to vector<64xf32>
      %42 = vector.shape_cast %41 : vector<64xf32> to vector<1x64xf32>
      %43 = tpu.concatenate %39, %42 in 0 : vector<1x64xf32>, vector<1x64xf32> -> vector<2x64xf32>
      %44 = arith.addf %37, %43 : vector<2x64xf32>
      %c0_34 = arith.constant 0 : index
      %c0_35 = arith.constant 0 : index
      %45 = vector.load %arg6[%c0_34, %c0_35] : memref<2x64xf32, #tpu.memory_space<vmem>>, vector<2x64xf32>
      tpu.vector_store %arg6[%c0_34, %c0_35], %44 {strides = array<i32>} : memref<2x64xf32, #tpu.memory_space<vmem>>, vector<2x64xf32>,
    } else {
    }
    return
  }
  func.func @transform_0(%arg0: i32, %arg1: i32, %arg2: i32) -> (i32, i32, i32, i32) {
    %c0_i32 = arith.constant 0 : i32
    %c0_i32_0 = arith.constant 0 : i32
    %c0_i32_1 = arith.constant 0 : i32
    return %arg2, %arg1, %c0_i32, %c0_i32_0 : i32, i32, i32, i32
  }
  func.func @transform_1(%arg0: i32, %arg1: i32, %arg2: i32) -> (i32, i32, i32) {
    %c0_i32 = arith.constant 0 : i32
    %c0_i32_0 = arith.constant 0 : i32
    return %arg2, %c0_i32, %arg0 : i32, i32, i32
  }
  func.func @transform_2(%arg0: i32, %arg1: i32, %arg2: i32) -> (i32, i32, i32) {
    %c0_i32 = arith.constant 0 : i32
    %c0_i32_0 = arith.constant 0 : i32
    return %arg1, %c0_i32, %arg0 : i32, i32, i32
  }
  func.func @transform_3(%arg0: i32, %arg1: i32, %arg2: i32) -> (i32, i32) {
    %c0_i32 = arith.constant 0 : i32
    %c0_i32_0 = arith.constant 0 : i32
    return %c0_i32, %arg0 : i32, i32
  }
}

module attributes {stable_mosaic.version = 11 : i64} {
  func.func @_matmul_stats_kernel(%arg0: i32, %arg1: i32, %arg2: i32, %arg3: memref<512x64xf32, #tpu.memory_space<vmem>>, %arg4: memref<2x64xf32, #tpu.memory_space<vmem>>, %arg5: memref<64x128xbf16, #tpu.memory_space<vmem>>, %arg6: memref<512x128xf32, #tpu.memory_space<vmem>>, %arg7: memref<2x128xf32, #tpu.memory_space<vmem>>, %arg8: memref<512x128xf32, #tpu.memory_space<vmem>>) attributes {dimension_semantics = [#tpu.dimension_semantics<parallel>, #tpu.dimension_semantics<arbitrary>, #tpu.dimension_semantics<arbitrary>], iteration_bounds = array<i64: 2, 1, 1>, scalar_prefetch = 0 : i64, scratch_operands = 1 : i64, tpu.core_type = #tpu.core_type<tc>, window_params = [{transform_indices = @transform_0, window_bounds = array<i64: 512, 64>}, {transform_indices = @transform_1, window_bounds = array<i64: 2, 64>}, {transform_indices = @transform_2, window_bounds = array<i64: 64, 128>}, {transform_indices = @transform_3, window_bounds = array<i64: 512, 128>}, {transform_indices = @transform_4, window_bounds = array<i64: 2, 128>}]} {
    %c0_i32 = arith.constant 0 : i32
    %0 = arith.cmpi eq, %arg2, %c0_i32 : i32
    %1 = arith.extui %0 : i1 to i32
    %c0_i32_0 = arith.constant 0 : i32
    %2 = arith.cmpi ne, %1, %c0_i32_0 : i32
    scf.if %2 {
      %cst_20 = arith.constant 0.000000e+00 : f32
      %38 = vector.broadcast %cst_20 : f32 to vector<512x128xf32>
      %c0_21 = arith.constant 0 : index
      %c0_22 = arith.constant 0 : index
      %39 = vector.load %arg8[%c0_21, %c0_22] : memref<512x128xf32, #tpu.memory_space<vmem>>, vector<512x128xf32>
      tpu.vector_store %arg8[%c0_21, %c0_22], %38 {strides = array<i32>} : memref<512x128xf32, #tpu.memory_space<vmem>>, vector<512x128xf32>,
    } else {
    }
    %c0 = arith.constant 0 : index
    %c0_1 = arith.constant 0 : index
    %3 = vector.load %arg4[%c0, %c0_1] : memref<2x64xf32, #tpu.memory_space<vmem>>, vector<2x64xf32>
    %4 = vector.extract_strided_slice %3 {offsets = [0, 0], sizes = [1, 64], strides = [1, 1]} : vector<2x64xf32> to vector<1x64xf32>
    %cst = arith.constant 0.001953125 : f32
    %5 = vector.broadcast %cst : f32 to vector<1x64xf32>
    %6 = arith.mulf %4, %5 : vector<1x64xf32>
    %7 = vector.extract_strided_slice %3 {offsets = [1, 0], sizes = [1, 64], strides = [1, 1]} : vector<2x64xf32> to vector<1x64xf32>
    %cst_2 = arith.constant 0.001953125 : f32
    %8 = vector.broadcast %cst_2 : f32 to vector<1x64xf32>
    %9 = arith.mulf %7, %8 : vector<1x64xf32>
    %10 = arith.mulf %6, %6 : vector<1x64xf32>
    %11 = arith.subf %9, %10 : vector<1x64xf32>
    %cst_3 = arith.constant 0.000000e+00 : f32
    %12 = vector.broadcast %cst_3 : f32 to vector<1x64xf32>
    %13 = arith.maximumf %11, %12 : vector<1x64xf32>
    %cst_4 = arith.constant 9.99999974E-6 : f32
    %14 = vector.broadcast %cst_4 : f32 to vector<1x64xf32>
    %15 = arith.addf %13, %14 : vector<1x64xf32>
    %16 = math.rsqrt %15 : vector<1x64xf32>
    %c0_5 = arith.constant 0 : index
    %c0_6 = arith.constant 0 : index
    %17 = vector.load %arg3[%c0_5, %c0_6] : memref<512x64xf32, #tpu.memory_space<vmem>>, vector<512x64xf32>
    %18 = vector.broadcast %6 : vector<1x64xf32> to vector<512x64xf32>
    %19 = arith.subf %17, %18 : vector<512x64xf32>
    %20 = vector.broadcast %16 : vector<1x64xf32> to vector<512x64xf32>
    %21 = arith.mulf %19, %20 : vector<512x64xf32>
    %cst_7 = arith.constant 0.000000e+00 : f32
    %22 = vector.broadcast %cst_7 : f32 to vector<512x64xf32>
    %23 = arith.maximumf %21, %22 : vector<512x64xf32>
    %24 = arith.truncf %23 : vector<512x64xf32> to vector<512x64xbf16>
    %c0_8 = arith.constant 0 : index
    %c0_9 = arith.constant 0 : index
    %25 = vector.load %arg8[%c0_8, %c0_9] : memref<512x128xf32, #tpu.memory_space<vmem>>, vector<512x128xf32>
    %c0_10 = arith.constant 0 : index
    %c0_11 = arith.constant 0 : index
    %26 = vector.load %arg5[%c0_10, %c0_11] : memref<64x128xbf16, #tpu.memory_space<vmem>>, vector<64x128xbf16>
    %cst_12 = arith.constant dense<0.000000e+00> : vector<512x128xf32>
    %27 = tpu.matmul %24, %26, %cst_12 {dimension_numbers = #tpu.dot_dimension_numbers<[1], [0], [0], [1], [0, 0, 1, 1], [], []>} : vector<512x64xbf16>, vector<64x128xbf16>, vector<512x128xf32> -> vector<512x128xf32>
    %28 = arith.addf %25, %27 : vector<512x128xf32>
    %c0_13 = arith.constant 0 : index
    %c0_14 = arith.constant 0 : index
    %29 = vector.load %arg8[%c0_13, %c0_14] : memref<512x128xf32, #tpu.memory_space<vmem>>, vector<512x128xf32>
    tpu.vector_store %arg8[%c0_13, %c0_14], %28 {strides = array<i32>} : memref<512x128xf32, #tpu.memory_space<vmem>>, vector<512x128xf32>,
    %c0_i32_15 = arith.constant 0 : i32
    %30 = arith.cmpi eq, %arg2, %c0_i32_15 : i32
    %c0_i32_16 = arith.constant 0 : i32
    %31 = arith.cmpi eq, %arg1, %c0_i32_16 : i32
    %32 = arith.andi %30, %31 : i1
    %33 = arith.extui %32 : i1 to i32
    %c0_i32_17 = arith.constant 0 : i32
    %34 = arith.cmpi ne, %33, %c0_i32_17 : i32
    scf.if %34 {
      %cst_20 = arith.constant 0.000000e+00 : f32
      %38 = vector.broadcast %cst_20 : f32 to vector<2x128xf32>
      %c0_21 = arith.constant 0 : index
      %c0_22 = arith.constant 0 : index
      %39 = vector.load %arg7[%c0_21, %c0_22] : memref<2x128xf32, #tpu.memory_space<vmem>>, vector<2x128xf32>
      tpu.vector_store %arg7[%c0_21, %c0_22], %38 {strides = array<i32>} : memref<2x128xf32, #tpu.memory_space<vmem>>, vector<2x128xf32>,
    } else {
    }
    %c0_i32_18 = arith.constant 0 : i32
    %35 = arith.cmpi eq, %arg2, %c0_i32_18 : i32
    %36 = arith.extui %35 : i1 to i32
    %c0_i32_19 = arith.constant 0 : i32
    %37 = arith.cmpi ne, %36, %c0_i32_19 : i32
    scf.if %37 {
      %c0_20 = arith.constant 0 : index
      %c0_21 = arith.constant 0 : index
      %38 = vector.load %arg8[%c0_20, %c0_21] : memref<512x128xf32, #tpu.memory_space<vmem>>, vector<512x128xf32>
      %c0_22 = arith.constant 0 : index
      %c0_23 = arith.constant 0 : index
      %39 = vector.load %arg6[%c0_22, %c0_23] : memref<512x128xf32, #tpu.memory_space<vmem>>, vector<512x128xf32>
      tpu.vector_store %arg6[%c0_22, %c0_23], %38 {strides = array<i32>} : memref<512x128xf32, #tpu.memory_space<vmem>>, vector<512x128xf32>,
      %c0_24 = arith.constant 0 : index
      %c0_25 = arith.constant 0 : index
      %40 = vector.load %arg7[%c0_24, %c0_25] : memref<2x128xf32, #tpu.memory_space<vmem>>, vector<2x128xf32>
      %cst_26 = arith.constant dense<0.000000e+00> : vector<128xf32>
      %41 = vector.multi_reduction <add>, %38, %cst_26 [0] : vector<512x128xf32> to vector<128xf32>
      %42 = vector.shape_cast %41 : vector<128xf32> to vector<1x128xf32>
      %43 = arith.mulf %38, %38 : vector<512x128xf32>
      %cst_27 = arith.constant dense<0.000000e+00> : vector<128xf32>
      %44 = vector.multi_reduction <add>, %43, %cst_27 [0] : vector<512x128xf32> to vector<128xf32>
      %45 = vector.shape_cast %44 : vector<128xf32> to vector<1x128xf32>
      %46 = tpu.concatenate %42, %45 in 0 : vector<1x128xf32>, vector<1x128xf32> -> vector<2x128xf32>
      %47 = arith.addf %40, %46 : vector<2x128xf32>
      %c0_28 = arith.constant 0 : index
      %c0_29 = arith.constant 0 : index
      %48 = vector.load %arg7[%c0_28, %c0_29] : memref<2x128xf32, #tpu.memory_space<vmem>>, vector<2x128xf32>
      tpu.vector_store %arg7[%c0_28, %c0_29], %47 {strides = array<i32>} : memref<2x128xf32, #tpu.memory_space<vmem>>, vector<2x128xf32>,
    } else {
    }
    return
  }
  func.func @transform_0(%arg0: i32, %arg1: i32, %arg2: i32) -> (i32, i32) {
    %c0_i32 = arith.constant 0 : i32
    return %arg1, %arg2 : i32, i32
  }
  func.func @transform_1(%arg0: i32, %arg1: i32, %arg2: i32) -> (i32, i32) {
    %c0_i32 = arith.constant 0 : i32
    %c0_i32_0 = arith.constant 0 : i32
    return %c0_i32, %arg2 : i32, i32
  }
  func.func @transform_2(%arg0: i32, %arg1: i32, %arg2: i32) -> (i32, i32) {
    %c0_i32 = arith.constant 0 : i32
    return %arg2, %arg0 : i32, i32
  }
  func.func @transform_3(%arg0: i32, %arg1: i32, %arg2: i32) -> (i32, i32) {
    %c0_i32 = arith.constant 0 : i32
    return %arg1, %arg0 : i32, i32
  }
  func.func @transform_4(%arg0: i32, %arg1: i32, %arg2: i32) -> (i32, i32) {
    %c0_i32 = arith.constant 0 : i32
    %c0_i32_0 = arith.constant 0 : i32
    return %c0_i32, %arg0 : i32, i32
  }
}

module attributes {stable_mosaic.version = 11 : i64} {
  func.func @_matmul_stats_kernel(%arg0: i32, %arg1: i32, %arg2: i32, %arg3: memref<512x64xbf16, #tpu.memory_space<vmem>>, %arg4: memref<64x128xbf16, #tpu.memory_space<vmem>>, %arg5: memref<512x128xf32, #tpu.memory_space<vmem>>, %arg6: memref<2x128xf32, #tpu.memory_space<vmem>>, %arg7: memref<512x128xf32, #tpu.memory_space<vmem>>) attributes {dimension_semantics = [#tpu.dimension_semantics<parallel>, #tpu.dimension_semantics<arbitrary>, #tpu.dimension_semantics<arbitrary>], iteration_bounds = array<i64: 2, 1, 1>, scalar_prefetch = 0 : i64, scratch_operands = 1 : i64, tpu.core_type = #tpu.core_type<tc>, window_params = [{transform_indices = @transform_0, window_bounds = array<i64: 512, 64>}, {transform_indices = @transform_1, window_bounds = array<i64: 64, 128>}, {transform_indices = @transform_2, window_bounds = array<i64: 512, 128>}, {transform_indices = @transform_3, window_bounds = array<i64: 2, 128>}]} {
    %c0_i32 = arith.constant 0 : i32
    %0 = arith.cmpi eq, %arg2, %c0_i32 : i32
    %1 = arith.extui %0 : i1 to i32
    %c0_i32_0 = arith.constant 0 : i32
    %2 = arith.cmpi ne, %1, %c0_i32_0 : i32
    scf.if %2 {
      %cst_13 = arith.constant 0.000000e+00 : f32
      %17 = vector.broadcast %cst_13 : f32 to vector<512x128xf32>
      %c0_14 = arith.constant 0 : index
      %c0_15 = arith.constant 0 : index
      %18 = vector.load %arg7[%c0_14, %c0_15] : memref<512x128xf32, #tpu.memory_space<vmem>>, vector<512x128xf32>
      tpu.vector_store %arg7[%c0_14, %c0_15], %17 {strides = array<i32>} : memref<512x128xf32, #tpu.memory_space<vmem>>, vector<512x128xf32>,
    } else {
    }
    %c0 = arith.constant 0 : index
    %c0_1 = arith.constant 0 : index
    %3 = vector.load %arg3[%c0, %c0_1] : memref<512x64xbf16, #tpu.memory_space<vmem>>, vector<512x64xbf16>
    %c0_2 = arith.constant 0 : index
    %c0_3 = arith.constant 0 : index
    %4 = vector.load %arg7[%c0_2, %c0_3] : memref<512x128xf32, #tpu.memory_space<vmem>>, vector<512x128xf32>
    %c0_4 = arith.constant 0 : index
    %c0_5 = arith.constant 0 : index
    %5 = vector.load %arg4[%c0_4, %c0_5] : memref<64x128xbf16, #tpu.memory_space<vmem>>, vector<64x128xbf16>
    %cst = arith.constant dense<0.000000e+00> : vector<512x128xf32>
    %6 = tpu.matmul %3, %5, %cst {dimension_numbers = #tpu.dot_dimension_numbers<[1], [0], [0], [1], [0, 0, 1, 1], [], []>} : vector<512x64xbf16>, vector<64x128xbf16>, vector<512x128xf32> -> vector<512x128xf32>
    %7 = arith.addf %4, %6 : vector<512x128xf32>
    %c0_6 = arith.constant 0 : index
    %c0_7 = arith.constant 0 : index
    %8 = vector.load %arg7[%c0_6, %c0_7] : memref<512x128xf32, #tpu.memory_space<vmem>>, vector<512x128xf32>
    tpu.vector_store %arg7[%c0_6, %c0_7], %7 {strides = array<i32>} : memref<512x128xf32, #tpu.memory_space<vmem>>, vector<512x128xf32>,
    %c0_i32_8 = arith.constant 0 : i32
    %9 = arith.cmpi eq, %arg2, %c0_i32_8 : i32
    %c0_i32_9 = arith.constant 0 : i32
    %10 = arith.cmpi eq, %arg1, %c0_i32_9 : i32
    %11 = arith.andi %9, %10 : i1
    %12 = arith.extui %11 : i1 to i32
    %c0_i32_10 = arith.constant 0 : i32
    %13 = arith.cmpi ne, %12, %c0_i32_10 : i32
    scf.if %13 {
      %cst_13 = arith.constant 0.000000e+00 : f32
      %17 = vector.broadcast %cst_13 : f32 to vector<2x128xf32>
      %c0_14 = arith.constant 0 : index
      %c0_15 = arith.constant 0 : index
      %18 = vector.load %arg6[%c0_14, %c0_15] : memref<2x128xf32, #tpu.memory_space<vmem>>, vector<2x128xf32>
      tpu.vector_store %arg6[%c0_14, %c0_15], %17 {strides = array<i32>} : memref<2x128xf32, #tpu.memory_space<vmem>>, vector<2x128xf32>,
    } else {
    }
    %c0_i32_11 = arith.constant 0 : i32
    %14 = arith.cmpi eq, %arg2, %c0_i32_11 : i32
    %15 = arith.extui %14 : i1 to i32
    %c0_i32_12 = arith.constant 0 : i32
    %16 = arith.cmpi ne, %15, %c0_i32_12 : i32
    scf.if %16 {
      %c0_13 = arith.constant 0 : index
      %c0_14 = arith.constant 0 : index
      %17 = vector.load %arg7[%c0_13, %c0_14] : memref<512x128xf32, #tpu.memory_space<vmem>>, vector<512x128xf32>
      %c0_15 = arith.constant 0 : index
      %c0_16 = arith.constant 0 : index
      %18 = vector.load %arg5[%c0_15, %c0_16] : memref<512x128xf32, #tpu.memory_space<vmem>>, vector<512x128xf32>
      tpu.vector_store %arg5[%c0_15, %c0_16], %17 {strides = array<i32>} : memref<512x128xf32, #tpu.memory_space<vmem>>, vector<512x128xf32>,
      %c0_17 = arith.constant 0 : index
      %c0_18 = arith.constant 0 : index
      %19 = vector.load %arg6[%c0_17, %c0_18] : memref<2x128xf32, #tpu.memory_space<vmem>>, vector<2x128xf32>
      %cst_19 = arith.constant dense<0.000000e+00> : vector<128xf32>
      %20 = vector.multi_reduction <add>, %17, %cst_19 [0] : vector<512x128xf32> to vector<128xf32>
      %21 = vector.shape_cast %20 : vector<128xf32> to vector<1x128xf32>
      %22 = arith.mulf %17, %17 : vector<512x128xf32>
      %cst_20 = arith.constant dense<0.000000e+00> : vector<128xf32>
      %23 = vector.multi_reduction <add>, %22, %cst_20 [0] : vector<512x128xf32> to vector<128xf32>
      %24 = vector.shape_cast %23 : vector<128xf32> to vector<1x128xf32>
      %25 = tpu.concatenate %21, %24 in 0 : vector<1x128xf32>, vector<1x128xf32> -> vector<2x128xf32>
      %26 = arith.addf %19, %25 : vector<2x128xf32>
      %c0_21 = arith.constant 0 : index
      %c0_22 = arith.constant 0 : index
      %27 = vector.load %arg6[%c0_21, %c0_22] : memref<2x128xf32, #tpu.memory_space<vmem>>, vector<2x128xf32>
      tpu.vector_store %arg6[%c0_21, %c0_22], %26 {strides = array<i32>} : memref<2x128xf32, #tpu.memory_space<vmem>>, vector<2x128xf32>,
    } else {
    }
    return
  }
  func.func @transform_0(%arg0: i32, %arg1: i32, %arg2: i32) -> (i32, i32) {
    %c0_i32 = arith.constant 0 : i32
    return %arg1, %arg2 : i32, i32
  }
  func.func @transform_1(%arg0: i32, %arg1: i32, %arg2: i32) -> (i32, i32) {
    %c0_i32 = arith.constant 0 : i32
    return %arg2, %arg0 : i32, i32
  }
  func.func @transform_2(%arg0: i32, %arg1: i32, %arg2: i32) -> (i32, i32) {
    %c0_i32 = arith.constant 0 : i32
    return %arg1, %arg0 : i32, i32
  }
  func.func @transform_3(%arg0: i32, %arg1: i32, %arg2: i32) -> (i32, i32) {
    %c0_i32 = arith.constant 0 : i32
    %c0_i32_0 = arith.constant 0 : i32
    return %c0_i32, %arg0 : i32, i32
  }
}

module attributes {stable_mosaic.version = 11 : i64} {
  func.func @_bn_epilogue_kernel(%arg0: i32, %arg1: i32, %arg2: memref<512x128xf32, #tpu.memory_space<vmem>>, %arg3: memref<2x128xf32, #tpu.memory_space<vmem>>, %arg4: memref<512x128xf32, #tpu.memory_space<vmem>>, %arg5: memref<2x128xf32, #tpu.memory_space<vmem>>, %arg6: memref<512x128xf32, #tpu.memory_space<vmem>>) attributes {dimension_semantics = [#tpu.dimension_semantics<parallel>, #tpu.dimension_semantics<parallel>], iteration_bounds = array<i64: 1, 2>, scalar_prefetch = 0 : i64, scratch_operands = 0 : i64, tpu.core_type = #tpu.core_type<tc>, window_params = [{transform_indices = @transform_0, window_bounds = array<i64: 512, 128>}, {transform_indices = @transform_1, window_bounds = array<i64: 2, 128>}, {transform_indices = @transform_2, window_bounds = array<i64: 512, 128>}, {transform_indices = @transform_3, window_bounds = array<i64: 2, 128>}, {transform_indices = @transform_4, window_bounds = array<i64: 512, 128>}]} {
    %c0 = arith.constant 0 : index
    %c0_0 = arith.constant 0 : index
    %0 = vector.load %arg3[%c0, %c0_0] : memref<2x128xf32, #tpu.memory_space<vmem>>, vector<2x128xf32>
    %1 = vector.extract_strided_slice %0 {offsets = [0, 0], sizes = [1, 128], strides = [1, 1]} : vector<2x128xf32> to vector<1x128xf32>
    %cst = arith.constant 0.001953125 : f32
    %2 = vector.broadcast %cst : f32 to vector<1x128xf32>
    %3 = arith.mulf %1, %2 : vector<1x128xf32>
    %4 = vector.extract_strided_slice %0 {offsets = [1, 0], sizes = [1, 128], strides = [1, 1]} : vector<2x128xf32> to vector<1x128xf32>
    %cst_1 = arith.constant 0.001953125 : f32
    %5 = vector.broadcast %cst_1 : f32 to vector<1x128xf32>
    %6 = arith.mulf %4, %5 : vector<1x128xf32>
    %7 = arith.mulf %3, %3 : vector<1x128xf32>
    %8 = arith.subf %6, %7 : vector<1x128xf32>
    %cst_2 = arith.constant 0.000000e+00 : f32
    %9 = vector.broadcast %cst_2 : f32 to vector<1x128xf32>
    %10 = arith.maximumf %8, %9 : vector<1x128xf32>
    %c0_3 = arith.constant 0 : index
    %c0_4 = arith.constant 0 : index
    %11 = vector.load %arg2[%c0_3, %c0_4] : memref<512x128xf32, #tpu.memory_space<vmem>>, vector<512x128xf32>
    %12 = vector.broadcast %3 : vector<1x128xf32> to vector<512x128xf32>
    %13 = arith.subf %11, %12 : vector<512x128xf32>
    %cst_5 = arith.constant 9.99999974E-6 : f32
    %14 = vector.broadcast %cst_5 : f32 to vector<1x128xf32>
    %15 = arith.addf %10, %14 : vector<1x128xf32>
    %16 = math.rsqrt %15 : vector<1x128xf32>
    %17 = vector.broadcast %16 : vector<1x128xf32> to vector<512x128xf32>
    %18 = arith.mulf %13, %17 : vector<512x128xf32>
    %c0_6 = arith.constant 0 : index
    %c0_7 = arith.constant 0 : index
    %19 = vector.load %arg5[%c0_6, %c0_7] : memref<2x128xf32, #tpu.memory_space<vmem>>, vector<2x128xf32>
    %20 = vector.extract_strided_slice %19 {offsets = [0, 0], sizes = [1, 128], strides = [1, 1]} : vector<2x128xf32> to vector<1x128xf32>
    %cst_8 = arith.constant 0.001953125 : f32
    %21 = vector.broadcast %cst_8 : f32 to vector<1x128xf32>
    %22 = arith.mulf %20, %21 : vector<1x128xf32>
    %23 = vector.extract_strided_slice %19 {offsets = [1, 0], sizes = [1, 128], strides = [1, 1]} : vector<2x128xf32> to vector<1x128xf32>
    %cst_9 = arith.constant 0.001953125 : f32
    %24 = vector.broadcast %cst_9 : f32 to vector<1x128xf32>
    %25 = arith.mulf %23, %24 : vector<1x128xf32>
    %26 = arith.mulf %22, %22 : vector<1x128xf32>
    %27 = arith.subf %25, %26 : vector<1x128xf32>
    %cst_10 = arith.constant 0.000000e+00 : f32
    %28 = vector.broadcast %cst_10 : f32 to vector<1x128xf32>
    %29 = arith.maximumf %27, %28 : vector<1x128xf32>
    %c0_11 = arith.constant 0 : index
    %c0_12 = arith.constant 0 : index
    %30 = vector.load %arg4[%c0_11, %c0_12] : memref<512x128xf32, #tpu.memory_space<vmem>>, vector<512x128xf32>
    %31 = vector.broadcast %22 : vector<1x128xf32> to vector<512x128xf32>
    %32 = arith.subf %30, %31 : vector<512x128xf32>
    %cst_13 = arith.constant 9.99999974E-6 : f32
    %33 = vector.broadcast %cst_13 : f32 to vector<1x128xf32>
    %34 = arith.addf %29, %33 : vector<1x128xf32>
    %35 = math.rsqrt %34 : vector<1x128xf32>
    %36 = vector.broadcast %35 : vector<1x128xf32> to vector<512x128xf32>
    %37 = arith.mulf %32, %36 : vector<512x128xf32>
    %38 = arith.addf %18, %37 : vector<512x128xf32>
    %cst_14 = arith.constant 0.000000e+00 : f32
    %39 = vector.broadcast %cst_14 : f32 to vector<512x128xf32>
    %40 = arith.maximumf %38, %39 : vector<512x128xf32>
    %c0_15 = arith.constant 0 : index
    %c0_16 = arith.constant 0 : index
    %41 = vector.load %arg6[%c0_15, %c0_16] : memref<512x128xf32, #tpu.memory_space<vmem>>, vector<512x128xf32>
    tpu.vector_store %arg6[%c0_15, %c0_16], %40 {strides = array<i32>} : memref<512x128xf32, #tpu.memory_space<vmem>>, vector<512x128xf32>,
    return
  }
  func.func @transform_0(%arg0: i32, %arg1: i32) -> (i32, i32) {
    %c0_i32 = arith.constant 0 : i32
    return %arg0, %arg1 : i32, i32
  }
  func.func @transform_1(%arg0: i32, %arg1: i32) -> (i32, i32) {
    %c0_i32 = arith.constant 0 : i32
    %c0_i32_0 = arith.constant 0 : i32
    return %c0_i32, %arg1 : i32, i32
  }
  func.func @transform_2(%arg0: i32, %arg1: i32) -> (i32, i32) {
    %c0_i32 = arith.constant 0 : i32
    return %arg0, %arg1 : i32, i32
  }
  func.func @transform_3(%arg0: i32, %arg1: i32) -> (i32, i32) {
    %c0_i32 = arith.constant 0 : i32
    %c0_i32_0 = arith.constant 0 : i32
    return %c0_i32, %arg1 : i32, i32
  }
  func.func @transform_4(%arg0: i32, %arg1: i32) -> (i32, i32) {
    %c0_i32 = arith.constant 0 : i32
    return %arg0, %arg1 : i32, i32
  }
}

</mosaic_0001>

<bundles_post_ra>
// kernel: bottle_block_forward.7
= control target key start
LH: loop header
LB: loop body
LE: loop exit
PB: predicated region body
PF: predicated region fallthrough
CT: control target
= control target key end

     0   :  { %vm352_vm3 = vcmask 519168   ;;  %s1057_s1 = inlined_call_operand.vmem [shape: f32[2,64], index: 1, kind: input, shape index: {}]   ;;  %s1058_s0 = inlined_call_operand.vmem [shape: f32[512,64], index: 0, kind: input, shape index: {}]   ;;  %s1059_s2 = inlined_call_operand.vmem [shape: bf16[512,64], index: 2, kind: output, shape index: {}]  }
   0x1   :  { %v11_v0 = vld [vmem:[%s1057_s1] sm:$0x3]  ;;  %v20_v13 = vld [vmem:[%s1058_s0 + $0x8] sm:$0xff]  ;;  %v21_v14 = vld [vmem:[%s1058_s0 + $0x10] sm:$0xff] }
   0x2   :  { %v12_v1 = vmul.f32 0.001953125, %v11_v0  ;;  %v19_v10 = vld [vmem:[%s1058_s0] sm:$0xff]  ;;  %v22_v15 = vld [vmem:[%s1058_s0 + $0x18] sm:$0xff]  ;;  %v24_v17 = vld [vmem:[%s1058_s0 + $0x28] sm:$0xff] }
   0x3   :  { %v23_v16 = vld [vmem:[%s1058_s0 + $0x20] sm:$0xff]  ;;  %v25_v18 = vld [vmem:[%s1058_s0 + $0x30] sm:$0xff]  ;;  %v26_v20 = vld [vmem:[%s1058_s0 + $0x38] sm:$0xff] }
   0x4   :  { %v13_v2 = vmul.f32 %v12_v1, %v12_v1  ;;  %v444_v11 = vperm.slane %v12_v1, 0  ;;  %v470_v21 = vld [vmem:[%s1058_s0 + $0x40] sm:$0xff]  ;;  %v475_v22 = vld [vmem:[%s1058_s0 + $0x48] sm:$0xff]  ;;  %v29_v25 = vld [vmem:[%s1058_s0 + $0x50] sm:$0xff] }
   0x5   :  { %v30_v26 = vld [vmem:[%s1058_s0 + $0x58] sm:$0xff]  ;;  %v31_v31 = vld [vmem:[%s1058_s0 + $0x60] sm:$0xff]  ;;  %v32_v32 = vld [vmem:[%s1058_s0 + $0x68] sm:$0xff] }
   0x6   :  { %v15_v3 = vrot.slane %v13_v2, 7  ;;  %v84_v23 = vsub.f32 %v19_v10, %v444_v11  ;;  %v85_v28 = vsub.f32 %v20_v13, %v444_v11  ;;  %v86_v29 = vsub.f32 %v21_v14, %v444_v11  ;;  %v33_v33 = vld [vmem:[%s1058_s0 + $0x70] sm:$0xff]  ;;  %v507_v38 = vld [vmem:[%s1058_s0 + $0x78] sm:$0xff]  ;;  %v512_v39 = vld [vmem:[%s1058_s0 + $0x80] sm:$0xff] }
   0x7   :  { %v87_v30 = vsub.f32 %v22_v15, %v444_v11  ;;  %v88_v34 = vsub.f32 %v23_v16, %v444_v11  ;;  %v89_v35 = vsub.f32 %v24_v17, %v444_v11  ;;  %v90_v36 = vsub.f32 %v25_v18, %v444_v11  ;;  %v517_v40 = vld [vmem:[%s1058_s0 + $0x88] sm:$0xff]  ;;  %v545_v57 = vld [vmem:[%s1058_s0 + $0x90] sm:$0xff]  ;;  %v550_v58 = vld [vmem:[%s1058_s0 + $0x98] sm:$0xff] }
   0x8   :  { %v17_v4 = vsub.f32 %v12_v1, %v15_v3  ;;  %v91_v37 = vsub.f32 %v26_v20, %v444_v11  ;;  %v92_v42 = vsub.f32 %v470_v21, %v444_v11  ;;  %v93_v43 = vsub.f32 %v475_v22, %v444_v11  ;;  %v559_v3 = vld [vmem:[%s1058_s0 + $0xa0] sm:$0xff]  ;;  %v40_v21 = vld [vmem:[%s1058_s0 + $0xa8] sm:$0xff] }
   0x9   :  { %v94_v44 = vsub.f32 %v29_v25, %v444_v11  ;;  %v95_v46 = vsub.f32 %v30_v26, %v444_v11  ;;  %v96_v47 = vsub.f32 %v31_v31, %v444_v11  ;;  %v97_v48 = vsub.f32 %v32_v32, %v444_v11  ;;  %v41_v26 = vld [vmem:[%s1058_s0 + $0xb0] sm:$0xff]  ;;  %v43_v32 = vld [vmem:[%s1058_s0 + $0xc0] sm:$0xff] }
   0xa   :  { %v18_v5 = vmax.f32 %v17_v4, 0.0  ;;  %v98_v49 = vsub.f32 %v33_v33, %v444_v11  ;;  %v99_v50 = vsub.f32 %v507_v38, %v444_v11  ;;  %v100_v51 = vsub.f32 %v512_v39, %v444_v11 }
   0xb   :  { %v101_v52 = vsub.f32 %v517_v40, %v444_v11  ;;  %v104_v16 = vsub.f32 %v559_v3, %v444_v11  ;;  %v49_v3 = vld [vmem:[%s1058_s0 + $0xf0] sm:$0xff] }
   0xc   :  { %v148_v6 = vadd.f32 1e-05, %v18_v5 }
   0xe   :  { %421 = vrsqrt.f32 %v148_v6  ;;  %vm155_vm0 = vweird.f32 %v148_v6 }
  0x14   :  { %v422_v7 = vpop.eup %421 }
  0x15   :  { %v150_v8 = vmul.f32 %v422_v7, %v148_v6  ;;  %vm156_vm1 = vweird.f32 %v422_v7  ;;  %v102_v6 = vsub.f32 %v545_v57, %v444_v11 }
  0x16   :  { %vm478_vm2 = vmor %vm155_vm0, %vm156_vm1 }
  0x17   :  { %v151_v9 = vmul.f32 %v422_v7, %v150_v8 }
  0x19   :  { %v152_v12 = vmul.f32 0.5, %v151_v9 }
  0x1b   :  { %v153_v19 = vsub.f32 1.5, %v152_v12 }
  0x1d   :  { %v154_v27 = vmul.f32 %v422_v7, %v153_v19 }
  0x1f   :  { %v158_v41 = vsel %vm478_vm2, %v422_v7, %v154_v27  ;;  %v103_v7 = vsub.f32 %v550_v58, %v444_v11  ;;  %v42_v27 = vld [vmem:[%s1058_s0 + $0xb8] sm:$0xff] }
  0x20   :  { %v526_v45 = vperm.slane %v158_v41, 1  ;;  %v106_v41 = vsub.f32 %v41_v26, %v444_v11 }
  0x22   :  { %v160_v53 = vmul.f32 %v526_v45, %v84_v23  ;;  %v161_v54 = vmul.f32 %v526_v45, %v85_v28  ;;  %v162_v55 = vmul.f32 %v526_v45, %v86_v29  ;;  %v163_v56 = vmul.f32 %v526_v45, %v87_v30 }
  0x23   :  { %v164_v59 = vmul.f32 %v526_v45, %v88_v34  ;;  %v165_v60 = vmul.f32 %v526_v45, %v89_v35  ;;  %v166_v61 = vmul.f32 %v526_v45, %v90_v36  ;;  %v167_v62 = vmul.f32 %v526_v45, %v91_v37 }
  0x24   :  { %v224_v63 = vmax.f32 %v160_v53, 0.0  ;;  %v225_v0 = vmax.f32 %v161_v54, 0.0  ;;  %v226_v1 = vmax.f32 %v162_v55, 0.0  ;;  %v227_v2 = vmax.f32 %v163_v56, 0.0  ;;  %v46_v56 = vld [vmem:[%s1058_s0 + $0xd8] sm:$0xff] }
  0x25   :  { %v228_v4 = vmax.f32 %v164_v59, 0.0  ;;  %v229_v5 = vmax.f32 %v165_v60, 0.0  ;;  %v230_v12 = vmax.f32 %v166_v61, 0.0  ;;  %v231_v15 = vmax.f32 %v167_v62, 0.0  ;;  %v47_v61 = vld [vmem:[%s1058_s0 + $0xe0] sm:$0xff]  ;;  %v48_v62 = vld [vmem:[%s1058_s0 + $0xe8] sm:$0xff] }
  0x26   :  { %v288_v8 = vpack.c.bf16 %v224_v63, %v224_v63  ;;  %v289_v9 = vpack.c.bf16 %v225_v0, %v225_v0  ;;  %v290_v10 = vpack.c.bf16 %v226_v1, %v226_v1  ;;  %v291_v13 = vpack.c.bf16 %v227_v2, %v227_v2 }
  0x27   :  { %v292_v14 = vpack.c.bf16 %v228_v4, %v228_v4  ;;  %v168_v17 = vmul.f32 %v526_v45, %v92_v42  ;;  %v169_v18 = vmul.f32 %v526_v45, %v93_v43  ;;  %v170_v19 = vmul.f32 %v526_v45, %v94_v44  ;;  %v44_v43 = vld [vmem:[%s1058_s0 + $0xc8] sm:$0xff] }
  0x28   :  { %353 = vst.msk [vmem:[%s1059_s2] sm:$0xf] %vm352_vm3, %v288_v8  ;;  %v171_v20 = vmul.f32 %v526_v45, %v95_v46  ;;  %v293_v22 = vpack.c.bf16 %v229_v5, %v229_v5  ;;  %v172_v23 = vmul.f32 %v526_v45, %v96_v47  ;;  %v173_v24 = vmul.f32 %v526_v45, %v97_v48  ;;  %v50_v8 = vld [vmem:[%s1058_s0 + $0xf8] sm:$0xff] }
  0x29   :  { %354 = vst.msk [vmem:[%s1059_s2 + $0x4] sm:$0xf] %vm352_vm3, %v289_v9  ;;  %v174_v25 = vmul.f32 %v526_v45, %v98_v49  ;;  %v294_v28 = vpack.c.bf16 %v230_v12, %v230_v12  ;;  %v232_v29 = vmax.f32 %v168_v17, 0.0  ;;  %v233_v30 = vmax.f32 %v169_v18, 0.0  ;;  %v45_v49 = vld [vmem:[%s1058_s0 + $0xd0] sm:$0xff]  ;;  %v51_v18 = vld [vmem:[%s1058_s0 + $0x100] sm:$0xff] }
  0x2a   :  { %355 = vst.msk [vmem:[%s1059_s2 + $0x8] sm:$0xf] %vm352_vm3, %v290_v10  ;;  %v234_v31 = vmax.f32 %v170_v19, 0.0  ;;  %v295_v33 = vpack.c.bf16 %v231_v15, %v231_v15  ;;  %v235_v34 = vmax.f32 %v171_v20, 0.0  ;;  %v175_v35 = vmul.f32 %v526_v45, %v99_v50 }
  0x2b   :  { %356 = vst.msk [vmem:[%s1059_s2 + $0xc] sm:$0xf] %vm352_vm3, %v291_v13  ;;  %v105_v36 = vsub.f32 %v40_v21, %v444_v11  ;;  %v296_v37 = vpack.c.bf16 %v232_v29, %v232_v29  ;;  %v236_v38 = vmax.f32 %v172_v23, 0.0  ;;  %v107_v42 = vsub.f32 %v42_v27, %v444_v11  ;;  %v52_v23 = vld [vmem:[%s1058_s0 + $0x108] sm:$0xff] }
  0x2c   :  { %357 = vst.msk [vmem:[%s1059_s2 + $0x10] sm:$0xf] %vm352_vm3, %v292_v14  ;;  %v297_v44 = vpack.c.bf16 %v233_v30, %v233_v30  ;;  %v237_v46 = vmax.f32 %v173_v24, 0.0  ;;  %v238_v47 = vmax.f32 %v174_v25, 0.0  ;;  %v108_v48 = vsub.f32 %v43_v32, %v444_v11  ;;  %v53_v32 = vld [vmem:[%s1058_s0 + $0x110] sm:$0xff] }
  0x2d   :  { %358 = vst.msk [vmem:[%s1059_s2 + $0x14] sm:$0xf] %vm352_vm3, %v293_v22  ;;  %v298_v50 = vpack.c.bf16 %v234_v31, %v234_v31  ;;  %v176_v53 = vmul.f32 %v526_v45, %v100_v51  ;;  %v177_v54 = vmul.f32 %v526_v45, %v101_v52  ;;  %v178_v55 = vmul.f32 %v526_v45, %v102_v6 }
  0x2e   :  { %359 = vst.msk [vmem:[%s1059_s2 + $0x18] sm:$0xf] %vm352_vm3, %v294_v28  ;;  %v299_v57 = vpack.c.bf16 %v235_v34, %v235_v34  ;;  %v239_v39 = vmax.f32 %v175_v35, 0.0  ;;  %v179_v51 = vmul.f32 %v526_v45, %v103_v7  ;;  %v109_v58 = vsub.f32 %v44_v43, %v444_v11 }
  0x2f   :  { %360 = vst.msk [vmem:[%s1059_s2 + $0x1c] sm:$0xf] %vm352_vm3, %v295_v33  ;;  %v300_v40 = vpack.c.bf16 %v236_v38, %v236_v38  ;;  %v240_v52 = vmax.f32 %v176_v53, 0.0  ;;  %v180_v59 = vmul.f32 %v526_v45, %v104_v16  ;;  %v110_v60 = vsub.f32 %v45_v49, %v444_v11  ;;  %v55_v38 = vld [vmem:[%s1058_s0 + $0x120] sm:$0xff] }
  0x30   :  { %361 = vst.msk [vmem:[%s1059_s2 + $0x20] sm:$0xf] %vm352_vm3, %v296_v37  ;;  %v301_v63 = vpack.c.bf16 %v237_v46, %v237_v46  ;;  %v241_v0 = vmax.f32 %v177_v54, 0.0  ;;  %v181_v1 = vmul.f32 %v526_v45, %v105_v36  ;;  %v111_v2 = vsub.f32 %v46_v56, %v444_v11  ;;  %v54_v37 = vld [vmem:[%s1058_s0 + $0x118] sm:$0xff] }
  0x31   :  { %362 = vst.msk [vmem:[%s1059_s2 + $0x24] sm:$0xf] %vm352_vm3, %v297_v44  ;;  %v302_v4 = vpack.c.bf16 %v238_v47, %v238_v47  ;;  %v242_v5 = vmax.f32 %v178_v55, 0.0  ;;  %v182_v6 = vmul.f32 %v526_v45, %v106_v41  ;;  %v183_v7 = vmul.f32 %v526_v45, %v107_v42 }
  0x32   :  { %363 = vst.msk [vmem:[%s1059_s2 + $0x28] sm:$0xf] %vm352_vm3, %v298_v50  ;;  %v303_v9 = vpack.c.bf16 %v239_v39, %v239_v39  ;;  %v243_v10 = vmax.f32 %v179_v51, 0.0  ;;  %v112_v12 = vsub.f32 %v47_v61, %v444_v11  ;;  %v113_v13 = vsub.f32 %v48_v62, %v444_v11  ;;  %v56_v50 = vld [vmem:[%s1058_s0 + $0x128] sm:$0xff]  ;;  %v58_v39 = vld [vmem:[%s1058_s0 + $0x138] sm:$0xff] }
  0x33   :  { %364 = vst.msk [vmem:[%s1059_s2 + $0x2c] sm:$0xf] %vm352_vm3, %v299_v57  ;;  %v304_v14 = vpack.c.bf16 %v240_v52, %v240_v52  ;;  %v244_v15 = vmax.f32 %v180_v59, 0.0  ;;  %v184_v16 = vmul.f32 %v526_v45, %v108_v48  ;;  %v114_v17 = vsub.f32 %v49_v3, %v444_v11  ;;  %v57_v57 = vld [vmem:[%s1058_s0 + $0x130] sm:$0xff] }
  0x34   :  { %365 = vst.msk [vmem:[%s1059_s2 + $0x30] sm:$0xf] %vm352_vm3, %v300_v40  ;;  %v305_v19 = vpack.c.bf16 %v241_v0, %v241_v0  ;;  %v245_v20 = vmax.f32 %v181_v1, 0.0  ;;  %v185_v21 = vmul.f32 %v526_v45, %v109_v58  ;;  %v115_v22 = vsub.f32 %v50_v8, %v444_v11 }
  0x35   :  { %366 = vst.msk [vmem:[%s1059_s2 + $0x34] sm:$0xf] %vm352_vm3, %v301_v63  ;;  %v306_v24 = vpack.c.bf16 %v242_v5, %v242_v5  ;;  %v246_v25 = vmax.f32 %v182_v6, 0.0  ;;  %v247_v26 = vmax.f32 %v183_v7, 0.0  ;;  %v186_v27 = vmul.f32 %v526_v45, %v110_v60  ;;  %v59_v63 = vld [vmem:[%s1058_s0 + $0x140] sm:$0xff] }
  0x36   :  { %367 = vst.msk [vmem:[%s1059_s2 + $0x38] sm:$0xf] %vm352_vm3, %v302_v4  ;;  %v307_v28 = vpack.c.bf16 %v243_v10, %v243_v10  ;;  %v187_v29 = vmul.f32 %v526_v45, %v111_v2  ;;  %v188_v30 = vmul.f32 %v526_v45, %v112_v12  ;;  %v116_v31 = vsub.f32 %v51_v18, %v444_v11  ;;  %v60_v4 = vld [vmem:[%s1058_s0 + $0x148] sm:$0xff] }
  0x37   :  { %368 = vst.msk [vmem:[%s1059_s2 + $0x3c] sm:$0xf] %vm352_vm3, %v303_v9  ;;  %v308_v33 = vpack.c.bf16 %v244_v15, %v244_v15  ;;  %v248_v34 = vmax.f32 %v184_v16, 0.0  ;;  %v189_v35 = vmul.f32 %v526_v45, %v113_v13  ;;  %v117_v36 = vsub.f32 %v52_v23, %v444_v11  ;;  %v61_v9 = vld [vmem:[%s1058_s0 + $0x150] sm:$0xff]  ;;  %v62_v15 = vld [vmem:[%s1058_s0 + $0x158] sm:$0xff]  ;;  %v63_v16 = vld [vmem:[%s1058_s0 + $0x160] sm:$0xff] }
  0x38   :  { %369 = vst.msk [vmem:[%s1059_s2 + $0x40] sm:$0xf] %vm352_vm3, %v304_v14  ;;  %v309_v41 = vpack.c.bf16 %v245_v20, %v245_v20  ;;  %v249_v42 = vmax.f32 %v185_v21, 0.0  ;;  %v190_v43 = vmul.f32 %v526_v45, %v114_v17  ;;  %v191_v44 = vmul.f32 %v526_v45, %v115_v22  ;;  %v64_v21 = vld [vmem:[%s1058_s0 + $0x168] sm:$0xff] }
  0x39   :  { %370 = vst.msk [vmem:[%s1059_s2 + $0x44] sm:$0xf] %vm352_vm3, %v305_v19  ;;  %v310_v46 = vpack.c.bf16 %v246_v25, %v246_v25  ;;  %v311_v47 = vpack.c.bf16 %v247_v26, %v247_v26  ;;  %v250_v48 = vmax.f32 %v186_v27, 0.0  ;;  %v118_v49 = vsub.f32 %v53_v32, %v444_v11  ;;  %v65_v26 = vld [vmem:[%s1058_s0 + $0x170] sm:$0xff]  ;;  %v66_v27 = vld [vmem:[%s1058_s0 + $0x178] sm:$0xff] }
  0x3a   :  { %371 = vst.msk [vmem:[%s1059_s2 + $0x48] sm:$0xf] %vm352_vm3, %v306_v24  ;;  %v251_v53 = vmax.f32 %v187_v29, 0.0  ;;  %v252_v54 = vmax.f32 %v188_v30, 0.0  ;;  %v119_v55 = vsub.f32 %v54_v37, %v444_v11  ;;  %v120_v56 = vsub.f32 %v55_v38, %v444_v11 }
  0x3b   :  { %372 = vst.msk [vmem:[%s1059_s2 + $0x4c] sm:$0xf] %vm352_vm3, %v307_v28  ;;  %v312_v51 = vpack.c.bf16 %v248_v34, %v248_v34  ;;  %v253_v58 = vmax.f32 %v189_v35, 0.0  ;;  %v192_v40 = vmul.f32 %v526_v45, %v116_v31  ;;  %v193_v52 = vmul.f32 %v526_v45, %v117_v36 }
  0x3c   :  { %373 = vst.msk [vmem:[%s1059_s2 + $0x50] sm:$0xf] %vm352_vm3, %v308_v33  ;;  %v313_v59 = vpack.c.bf16 %v249_v42, %v249_v42  ;;  %v254_v60 = vmax.f32 %v190_v43, 0.0  ;;  %v255_v61 = vmax.f32 %v191_v44, 0.0  ;;  %v121_v62 = vsub.f32 %v56_v50, %v444_v11  ;;  %v67_v42 = vld [vmem:[%s1058_s0 + $0x180] sm:$0xff]  ;;  %v68_v43 = vld [vmem:[%s1058_s0 + $0x188] sm:$0xff] }
  0x3d   :  { %374 = vst.msk [vmem:[%s1059_s2 + $0x54] sm:$0xf] %vm352_vm3, %v309_v41  ;;  %v314_v0 = vpack.c.bf16 %v250_v48, %v250_v48  ;;  %v194_v1 = vmul.f32 %v526_v45, %v118_v49  ;;  %v122_v2 = vsub.f32 %v57_v57, %v444_v11  ;;  %v123_v3 = vsub.f32 %v58_v39, %v444_v11 }
  0x3e   :  { %375 = vst.msk [vmem:[%s1059_s2 + $0x58] sm:$0xf] %vm352_vm3, %v310_v46  ;;  %v315_v5 = vpack.c.bf16 %v251_v53, %v251_v53  ;;  %v316_v6 = vpack.c.bf16 %v252_v54, %v252_v54  ;;  %v195_v7 = vmul.f32 %v526_v45, %v119_v55  ;;  %v196_v8 = vmul.f32 %v526_v45, %v120_v56  ;;  %v69_v55 = vld [vmem:[%s1058_s0 + $0x190] sm:$0xff] }
  0x3f   :  { %376 = vst.msk [vmem:[%s1059_s2 + $0x5c] sm:$0xf] %vm352_vm3, %v311_v47  ;;  %v317_v10 = vpack.c.bf16 %v253_v58, %v253_v58  ;;  %v256_v12 = vmax.f32 %v192_v40, 0.0  ;;  %v257_v13 = vmax.f32 %v193_v52, 0.0  ;;  %v124_v14 = vsub.f32 %v59_v63, %v444_v11  ;;  %v70_v58 = vld [vmem:[%s1058_s0 + $0x198] sm:$0xff] }
  0x40   :  { %377 = vst.msk [vmem:[%s1059_s2 + $0x60] sm:$0xf] %vm352_vm3, %v312_v51  ;;  %v318_v17 = vpack.c.bf16 %v254_v60, %v254_v60  ;;  %v319_v18 = vpack.c.bf16 %v255_v61, %v255_v61  ;;  %v197_v19 = vmul.f32 %v526_v45, %v121_v62  ;;  %v125_v20 = vsub.f32 %v60_v4, %v444_v11  ;;  %v71_v61 = vld [vmem:[%s1058_s0 + $0x1a0] sm:$0xff] }
  0x41   :  { %378 = vst.msk [vmem:[%s1059_s2 + $0x64] sm:$0xf] %vm352_vm3, %v313_v59  ;;  %v258_v22 = vmax.f32 %v194_v1, 0.0  ;;  %v198_v23 = vmul.f32 %v526_v45, %v122_v2  ;;  %v199_v24 = vmul.f32 %v526_v45, %v123_v3  ;;  %v126_v25 = vsub.f32 %v61_v9, %v444_v11  ;;  %v72_v2 = vld [vmem:[%s1058_s0 + $0x1a8] sm:$0xff] }
  0x42   :  { %379 = vst.msk [vmem:[%s1059_s2 + $0x68] sm:$0xf] %vm352_vm3, %v314_v0  ;;  %v259_v28 = vmax.f32 %v195_v7, 0.0  ;;  %v260_v29 = vmax.f32 %v196_v8, 0.0  ;;  %v127_v30 = vsub.f32 %v62_v15, %v444_v11  ;;  %v128_v31 = vsub.f32 %v63_v16, %v444_v11  ;;  %v73_v7 = vld [vmem:[%s1058_s0 + $0x1b0] sm:$0xff]  ;;  %v74_v8 = vld [vmem:[%s1058_s0 + $0x1b8] sm:$0xff] }
  0x43   :  { %380 = vst.msk [vmem:[%s1059_s2 + $0x6c] sm:$0xf] %vm352_vm3, %v315_v5  ;;  %v320_v32 = vpack.c.bf16 %v256_v12, %v256_v12  ;;  %v321_v33 = vpack.c.bf16 %v257_v13, %v257_v13  ;;  %v200_v34 = vmul.f32 %v526_v45, %v124_v14  ;;  %v129_v35 = vsub.f32 %v64_v21, %v444_v11 }
  0x44   :  { %381 = vst.msk [vmem:[%s1059_s2 + $0x70] sm:$0xf] %vm352_vm3, %v316_v6  ;;  %v261_v36 = vmax.f32 %v197_v19, 0.0  ;;  %v201_v37 = vmul.f32 %v526_v45, %v125_v20  ;;  %v130_v38 = vsub.f32 %v65_v26, %v444_v11  ;;  %v131_v41 = vsub.f32 %v66_v27, %v444_v11 }
  0x45   :  { %382 = vst.msk [vmem:[%s1059_s2 + $0x74] sm:$0xf] %vm352_vm3, %v317_v10  ;;  %v322_v44 = vpack.c.bf16 %v258_v22, %v258_v22  ;;  %v262_v46 = vmax.f32 %v198_v23, 0.0  ;;  %v263_v47 = vmax.f32 %v199_v24, 0.0  ;;  %v202_v48 = vmul.f32 %v526_v45, %v126_v25  ;;  %v76_v23 = vld [vmem:[%s1058_s0 + $0x1c8] sm:$0xff] }
  0x46   :  { %383 = vst.msk [vmem:[%s1059_s2 + $0x78] sm:$0xf] %vm352_vm3, %v318_v17  ;;  %v323_v49 = vpack.c.bf16 %v259_v28, %v259_v28  ;;  %v324_v50 = vpack.c.bf16 %v260_v29, %v260_v29  ;;  %v203_v53 = vmul.f32 %v526_v45, %v127_v30  ;;  %v204_v54 = vmul.f32 %v526_v45, %v128_v31  ;;  %v77_v28 = vld [vmem:[%s1058_s0 + $0x1d0] sm:$0xff] }
  0x47   :  { %384 = vst.msk [vmem:[%s1059_s2 + $0x7c] sm:$0xf] %vm352_vm3, %v319_v18  ;;  %v264_v56 = vmax.f32 %v200_v34, 0.0  ;;  %v205_v57 = vmul.f32 %v526_v45, %v129_v35  ;;  %v132_v39 = vsub.f32 %v67_v42, %v444_v11  ;;  %v133_v51 = vsub.f32 %v68_v43, %v444_v11  ;;  %v75_v18 = vld [vmem:[%s1058_s0 + $0x1c0] sm:$0xff]  ;;  %v82_v34 = vld [vmem:[%s1058_s0 + $0x1f8] sm:$0xff] }
  0x48   :  { %385 = vst.msk [vmem:[%s1059_s2 + $0x80] sm:$0xf] %vm352_vm3, %v320_v32  ;;  %v325_v40 = vpack.c.bf16 %v261_v36, %v261_v36  ;;  %v265_v52 = vmax.f32 %v201_v37, 0.0  ;;  %v206_v59 = vmul.f32 %v526_v45, %v130_v38  ;;  %v207_v60 = vmul.f32 %v526_v45, %v131_v41  ;;  %v79_v41 = vld [vmem:[%s1058_s0 + $0x1e0] sm:$0xff] }
  0x49   :  { %386 = vst.msk [vmem:[%s1059_s2 + $0x84] sm:$0xf] %vm352_vm3, %v321_v33  ;;  %v326_v62 = vpack.c.bf16 %v262_v46, %v262_v46  ;;  %v327_v63 = vpack.c.bf16 %v263_v47, %v263_v47  ;;  %v266_v0 = vmax.f32 %v202_v48, 0.0  ;;  %v134_v1 = vsub.f32 %v69_v55, %v444_v11  ;;  %v78_v33 = vld [vmem:[%s1058_s0 + $0x1d8] sm:$0xff]  ;;  %v80_v47 = vld [vmem:[%s1058_s0 + $0x1e8] sm:$0xff] }
  0x4a   :  { %387 = vst.msk [vmem:[%s1059_s2 + $0x88] sm:$0xf] %vm352_vm3, %v322_v44  ;;  %v267_v3 = vmax.f32 %v203_v53, 0.0  ;;  %v268_v4 = vmax.f32 %v204_v54, 0.0  ;;  %v208_v5 = vmul.f32 %v526_v45, %v132_v39  ;;  %v135_v6 = vsub.f32 %v70_v58, %v444_v11  ;;  %v81_v53 = vld [vmem:[%s1058_s0 + $0x1f0] sm:$0xff] }
  0x4b   :  { %388 = vst.msk [vmem:[%s1059_s2 + $0x8c] sm:$0xf] %vm352_vm3, %v323_v49  ;;  %v328_v9 = vpack.c.bf16 %v264_v56, %v264_v56  ;;  %v269_v10 = vmax.f32 %v205_v57, 0.0  ;;  %v209_v12 = vmul.f32 %v526_v45, %v133_v51  ;;  %v136_v13 = vsub.f32 %v71_v61, %v444_v11 }
  0x4c   :  { %389 = vst.msk [vmem:[%s1059_s2 + $0x90] sm:$0xf] %vm352_vm3, %v324_v50  ;;  %v329_v14 = vpack.c.bf16 %v265_v52, %v265_v52  ;;  %v270_v15 = vmax.f32 %v206_v59, 0.0  ;;  %v271_v16 = vmax.f32 %v207_v60, 0.0  ;;  %v137_v17 = vsub.f32 %v72_v2, %v444_v11 }
  0x4d   :  { %390 = vst.msk [vmem:[%s1059_s2 + $0x94] sm:$0xf] %vm352_vm3, %v325_v40  ;;  %v330_v19 = vpack.c.bf16 %v266_v0, %v266_v0  ;;  %v210_v20 = vmul.f32 %v526_v45, %v134_v1  ;;  %v138_v21 = vsub.f32 %v73_v7, %v444_v11  ;;  %v139_v22 = vsub.f32 %v74_v8, %v444_v11 }
  0x4e   :  { %391 = vst.msk [vmem:[%s1059_s2 + $0x98] sm:$0xf] %vm352_vm3, %v326_v62  ;;  %v331_v24 = vpack.c.bf16 %v267_v3, %v267_v3  ;;  %v332_v25 = vpack.c.bf16 %v268_v4, %v268_v4  ;;  %v272_v26 = vmax.f32 %v208_v5, 0.0  ;;  %v211_v27 = vmul.f32 %v526_v45, %v135_v6 }
  0x4f   :  { %392 = vst.msk [vmem:[%s1059_s2 + $0x9c] sm:$0xf] %vm352_vm3, %v327_v63  ;;  %v333_v29 = vpack.c.bf16 %v269_v10, %v269_v10  ;;  %v273_v30 = vmax.f32 %v209_v12, 0.0  ;;  %v212_v31 = vmul.f32 %v526_v45, %v136_v13  ;;  %v140_v32 = vsub.f32 %v75_v18, %v444_v11 }
  0x50   :  { %393 = vst.msk [vmem:[%s1059_s2 + $0xa0] sm:$0xf] %vm352_vm3, %v328_v9  ;;  %v334_v35 = vpack.c.bf16 %v270_v15, %v270_v15  ;;  %v335_v36 = vpack.c.bf16 %v271_v16, %v271_v16  ;;  %v213_v37 = vmul.f32 %v526_v45, %v137_v17  ;;  %v141_v38 = vsub.f32 %v76_v23, %v444_v11 }
  0x51   :  { %394 = vst.msk [vmem:[%s1059_s2 + $0xa4] sm:$0xf] %vm352_vm3, %v329_v14  ;;  %v274_v42 = vmax.f32 %v210_v20, 0.0  ;;  %v214_v43 = vmul.f32 %v526_v45, %v138_v21  ;;  %v215_v44 = vmul.f32 %v526_v45, %v139_v22  ;;  %v142_v46 = vsub.f32 %v77_v28, %v444_v11 }
  0x52   :  { %395 = vst.msk [vmem:[%s1059_s2 + $0xa8] sm:$0xf] %vm352_vm3, %v330_v19  ;;  %v336_v48 = vpack.c.bf16 %v272_v26, %v272_v26  ;;  %v275_v49 = vmax.f32 %v211_v27, 0.0  ;;  %v143_v50 = vsub.f32 %v78_v33, %v444_v11  ;;  %v147_v54 = vsub.f32 %v82_v34, %v444_v11 }
  0x53   :  { %396 = vst.msk [vmem:[%s1059_s2 + $0xac] sm:$0xf] %vm352_vm3, %v331_v24  ;;  %v337_v55 = vpack.c.bf16 %v273_v30, %v273_v30  ;;  %v276_v56 = vmax.f32 %v212_v31, 0.0  ;;  %v216_v57 = vmul.f32 %v526_v45, %v140_v32  ;;  %v144_v39 = vsub.f32 %v79_v41, %v444_v11 }
  0x54   :  { %397 = vst.msk [vmem:[%s1059_s2 + $0xb0] sm:$0xf] %vm352_vm3, %v332_v25  ;;  %v277_v51 = vmax.f32 %v213_v37, 0.0  ;;  %v217_v58 = vmul.f32 %v526_v45, %v141_v38  ;;  %v145_v40 = vsub.f32 %v80_v47, %v444_v11  ;;  %v223_v52 = vmul.f32 %v526_v45, %v147_v54 }
  0x55   :  { %398 = vst.msk [vmem:[%s1059_s2 + $0xb4] sm:$0xf] %vm352_vm3, %v333_v29  ;;  %v338_v59 = vpack.c.bf16 %v274_v42, %v274_v42  ;;  %v278_v60 = vmax.f32 %v214_v43, 0.0  ;;  %v218_v61 = vmul.f32 %v526_v45, %v142_v46  ;;  %v146_v62 = vsub.f32 %v81_v53, %v444_v11 }
  0x56   :  { %399 = vst.msk [vmem:[%s1059_s2 + $0xb8] sm:$0xf] %vm352_vm3, %v334_v35  ;;  %v339_v63 = vpack.c.bf16 %v275_v49, %v275_v49  ;;  %v279_v0 = vmax.f32 %v215_v44, 0.0  ;;  %v219_v1 = vmul.f32 %v526_v45, %v143_v50  ;;  %v340_v2 = vpack.c.bf16 %v276_v56, %v276_v56 }
  0x57   :  { %400 = vst.msk [vmem:[%s1059_s2 + $0xbc] sm:$0xf] %vm352_vm3, %v335_v36  ;;  %v280_v3 = vmax.f32 %v216_v57, 0.0  ;;  %v220_v4 = vmul.f32 %v526_v45, %v144_v39  ;;  %v341_v11 = vpack.c.bf16 %v277_v51, %v277_v51  ;;  %v281_v5 = vmax.f32 %v217_v58, 0.0 }
  0x58   :  { %401 = vst.msk [vmem:[%s1059_s2 + $0xc0] sm:$0xf] %vm352_vm3, %v336_v48  ;;  %v221_v6 = vmul.f32 %v526_v45, %v145_v40  ;;  %v342_v7 = vpack.c.bf16 %v278_v60, %v278_v60  ;;  %v282_v8 = vmax.f32 %v218_v61, 0.0  ;;  %v222_v9 = vmul.f32 %v526_v45, %v146_v62 }
  0x59   :  { %402 = vst.msk [vmem:[%s1059_s2 + $0xc4] sm:$0xf] %vm352_vm3, %v337_v55  ;;  %v343_v10 = vpack.c.bf16 %v279_v0, %v279_v0  ;;  %v283_v12 = vmax.f32 %v219_v1, 0.0  ;;  %v344_v13 = vpack.c.bf16 %v280_v3, %v280_v3  ;;  %v284_v14 = vmax.f32 %v220_v4, 0.0 }
  0x5a   :  { %403 = vst.msk [vmem:[%s1059_s2 + $0xc8] sm:$0xf] %vm352_vm3, %v338_v59  ;;  %v345_v45 = vpack.c.bf16 %v281_v5, %v281_v5  ;;  %v285_v15 = vmax.f32 %v221_v6, 0.0  ;;  %v346_v16 = vpack.c.bf16 %v282_v8, %v282_v8  ;;  %v286_v17 = vmax.f32 %v222_v9, 0.0 }
  0x5b   :  { %404 = vst.msk [vmem:[%s1059_s2 + $0xcc] sm:$0xf] %vm352_vm3, %v339_v63  ;;  %v347_v18 = vpack.c.bf16 %v283_v12, %v283_v12  ;;  %v287_v19 = vmax.f32 %v223_v52, 0.0  ;;  %v348_v20 = vpack.c.bf16 %v284_v14, %v284_v14 }
  0x5c   :  { %405 = vst.msk [vmem:[%s1059_s2 + $0xd0] sm:$0xf] %vm352_vm3, %v340_v2  ;;  %v349_v21 = vpack.c.bf16 %v285_v15, %v285_v15  ;;  %v350_v22 = vpack.c.bf16 %v286_v17, %v286_v17 }
  0x5d   :  { %406 = vst.msk [vmem:[%s1059_s2 + $0xd4] sm:$0xf] %vm352_vm3, %v341_v11  ;;  %v351_v23 = vpack.c.bf16 %v287_v19, %v287_v19 }
  0x5e   :  { %407 = vst.msk [vmem:[%s1059_s2 + $0xd8] sm:$0xf] %vm352_vm3, %v342_v7 }
  0x5f   :  { %408 = vst.msk [vmem:[%s1059_s2 + $0xdc] sm:$0xf] %vm352_vm3, %v343_v10 }
  0x60   :  { %409 = vst.msk [vmem:[%s1059_s2 + $0xe0] sm:$0xf] %vm352_vm3, %v344_v13 }
  0x61   :  { %410 = vst.msk [vmem:[%s1059_s2 + $0xe4] sm:$0xf] %vm352_vm3, %v345_v45 }
  0x62   :  { %411 = vst.msk [vmem:[%s1059_s2 + $0xe8] sm:$0xf] %vm352_vm3, %v346_v16 }
  0x63   :  { %412 = vst.msk [vmem:[%s1059_s2 + $0xec] sm:$0xf] %vm352_vm3, %v347_v18 }
  0x64   :  { %413 = vst.msk [vmem:[%s1059_s2 + $0xf0] sm:$0xf] %vm352_vm3, %v348_v20 }
  0x65   :  { %414 = vst.msk [vmem:[%s1059_s2 + $0xf4] sm:$0xf] %vm352_vm3, %v349_v21 }
  0x66   :  { %415 = vst.msk [vmem:[%s1059_s2 + $0xf8] sm:$0xf] %vm352_vm3, %v350_v22 }
  0x67   :  { %416 = vst.msk [vmem:[%s1059_s2 + $0xfc] sm:$0xf] %vm352_vm3, %v351_v23 }

// kernel: bottle_block_forward.6
= control target key start
LH: loop header
LB: loop body
LE: loop exit
PB: predicated region body
PF: predicated region fallthrough
CT: control target
= control target key end

     0   :  { %vm18_vm0 = vcmask 523264   ;;  %v1504_v24 = vmov 0.0   ;;  %vm802_vm1 = vcmask 517120   ;;  %vm1266_vm2 = vcmask 1040384   ;;  %s2595_s1 = inlined_call_operand.vmem [shape: bf16[64,64], index: 1, kind: input, shape index: {}]   ;;  %s2596_s0 = inlined_call_operand.vmem [shape: bf16[512,64], index: 0, kind: input, shape index: {}]   ;;  %s2597_s2 = inlined_call_operand.vmem [shape: f32[512,64], index: 2, kind: output, shape index: {0}]   ;;  %s2598_s3 = inlined_call_operand.vmem [shape: f32[2,64], index: 3, kind: output, shape index: {1}]  }
   0x1   :  { %v1490_v0 = vld [vmem:[%s2595_s1 + $0x18] sm:$0xff]  ;;  %v1489_v1 = vld [vmem:[%s2595_s1 + $0x10] sm:$0xff]  ;;  %v1488_v2 = vld [vmem:[%s2595_s1 + $0x8] sm:$0xff]  ;;  %19 = vst.msk [vmem:[#allocation2] sm:$0xff] %vm18_vm0, %v1504_v24 }
   0x2   :  { %504 = vmatpush.bf16.msra.mxu0 %v1490_v0  ;;  %1491 = vmatpush.bf16.msra.mxu1 %v1490_v0  ;;  %v1487_v3 = vld [vmem:[%s2595_s1] sm:$0xff]  ;;  %v1456_v6 = vld [vmem:[%s2596_s0 + $0x8] sm:$0xff]  ;;  %v1457_v9 = vld [vmem:[%s2596_s0 + $0x10] sm:$0xff]  ;;  %20 = vst.msk [vmem:[#allocation2 + $0x8] sm:$0xff] %vm18_vm0, %v1504_v24 }
   0x3   :  { %1492 = vmatpush.bf16.msra.mxu2 %v1490_v0  ;;  %1493 = vmatpush.bf16.msra.mxu3 %v1490_v0  ;;  %v1455_v4 = vld [vmem:[%s2596_s0] sm:$0xff]  ;;  %v1464_v7 = vld [vmem:[%s2596_s0 + $0x48] sm:$0xff]  ;;  %v1465_v10 = vld [vmem:[%s2596_s0 + $0x50] sm:$0xff]  ;;  %21 = vst.msk [vmem:[#allocation2 + $0x10] sm:$0xff] %vm18_vm0, %v1504_v24 }
   0x4   :  { %v1463_v5 = vld [vmem:[%s2596_s0 + $0x40] sm:$0xff]  ;;  %v1472_v11 = vld [vmem:[%s2596_s0 + $0x88] sm:$0xff]  ;;  %v1458_v12 = vld [vmem:[%s2596_s0 + $0x18] sm:$0xff]  ;;  %22 = vst.msk [vmem:[#allocation2 + $0x18] sm:$0xff] %vm18_vm0, %v1504_v24 }
   0x5   :  { %v1471_v8 = vld [vmem:[%s2596_s0 + $0x80] sm:$0xff]  ;;  %v1466_v13 = vld [vmem:[%s2596_s0 + $0x58] sm:$0xff]  ;;  %v1473_v14 = vld [vmem:[%s2596_s0 + $0x90] sm:$0xff]  ;;  %23 = vst.msk [vmem:[#allocation2 + $0x20] sm:$0xff] %vm18_vm0, %v1504_v24 }
   0x6   :  { %505 = vmatpush.bf16.msra.mxu0 %v1489_v1  ;;  %1494 = vmatpush.bf16.msra.mxu1 %v1489_v1  ;;  %v1479_v15 = vld [vmem:[%s2596_s0 + $0xc0] sm:$0xff]  ;;  %v1474_v18 = vld [vmem:[%s2596_s0 + $0x98] sm:$0xff]  ;;  %v1480_v19 = vld [vmem:[%s2596_s0 + $0xc8] sm:$0xff]  ;;  %24 = vst.msk [vmem:[#allocation2 + $0x28] sm:$0xff] %vm18_vm0, %v1504_v24 }
   0x7   :  { %1495 = vmatpush.bf16.msra.mxu2 %v1489_v1  ;;  %1496 = vmatpush.bf16.msra.mxu3 %v1489_v1  ;;  %v1459_v16 = vld [vmem:[%s2596_s0 + $0x20] sm:$0xff]  ;;  %v1460_v20 = vld [vmem:[%s2596_s0 + $0x28] sm:$0xff]  ;;  %v1481_v23 = vld [vmem:[%s2596_s0 + $0xd0] sm:$0xff]  ;;  %25 = vst.msk [vmem:[#allocation2 + $0x30] sm:$0xff] %vm18_vm0, %v1504_v24 }
   0x8   :  { %v1467_v17 = vld [vmem:[%s2596_s0 + $0x60] sm:$0xff]  ;;  %v1468_v21 = vld [vmem:[%s2596_s0 + $0x68] sm:$0xff]  ;;  %26 = vst.msk [vmem:[#allocation2 + $0x38] sm:$0xff] %vm18_vm0, %v1504_v24  ;;  %v1461_v25 = vld [vmem:[%s2596_s0 + $0x30] sm:$0xff] }
   0x9   :  { %v1475_v22 = vld [vmem:[%s2596_s0 + $0xa0] sm:$0xff]  ;;  %27 = vst.msk [vmem:[#allocation2 + $0x40] sm:$0xff] %vm18_vm0, %v1504_v24  ;;  %v1469_v26 = vld [vmem:[%s2596_s0 + $0x70] sm:$0xff]  ;;  %v1476_v27 = vld [vmem:[%s2596_s0 + $0xa8] sm:$0xff] }
   0xa   :  { %506 = vmatpush.bf16.msra.mxu0 %v1488_v2  ;;  %1497 = vmatpush.bf16.msra.mxu1 %v1488_v2  ;;  %28 = vst.msk [vmem:[#allocation2 + $0x48] sm:$0xff] %vm18_vm0, %v1504_v24  ;;  %v1482_v28 = vld [vmem:[%s2596_s0 + $0xd8] sm:$0xff]  ;;  %v147_v31 = vld [vmem:[#allocation2] sm:$0xff]  ;;  %v1477_v32 = vld [vmem:[%s2596_s0 + $0xb0] sm:$0xff] }
   0xb   :  { %1498 = vmatpush.bf16.msra.mxu2 %v1488_v2  ;;  %1499 = vmatpush.bf16.msra.mxu3 %v1488_v2  ;;  %29 = vst.msk [vmem:[#allocation2 + $0x50] sm:$0xff] %vm18_vm0, %v1504_v24  ;;  %v1462_v29 = vld [vmem:[%s2596_s0 + $0x38] sm:$0xff]  ;;  %v1483_v33 = vld [vmem:[%s2596_s0 + $0xe0] sm:$0xff]  ;;  %v1484_v41 = vld [vmem:[%s2596_s0 + $0xe8] sm:$0xff] }
   0xc   :  { %30 = vst.msk [vmem:[#allocation2 + $0x58] sm:$0xff] %vm18_vm0, %v1504_v24  ;;  %v1470_v30 = vld [vmem:[%s2596_s0 + $0x78] sm:$0xff]  ;;  %v148_v42 = vld [vmem:[#allocation2 + $0x8] sm:$0xff]  ;;  %v149_v43 = vld [vmem:[#allocation2 + $0x10] sm:$0xff] }
   0xd   :  { %31 = vst.msk [vmem:[#allocation2 + $0x60] sm:$0xff] %vm18_vm0, %v1504_v24  ;;  %v1478_v40 = vld [vmem:[%s2596_s0 + $0xb8] sm:$0xff]  ;;  %v151_v1 = vld [vmem:[#allocation2 + $0x20] sm:$0xff]  ;;  %v1485_v2 = vld [vmem:[%s2596_s0 + $0xf0] sm:$0xff] }
   0xe   :  { %507 = vmatpush.bf16.msra.mxu0 %v1487_v3  ;;  %1500 = vmatpush.bf16.msra.mxu1 %v1487_v3  ;;  %32 = vst.msk [vmem:[#allocation2 + $0x68] sm:$0xff] %vm18_vm0, %v1504_v24  ;;  %v150_v52 = vld [vmem:[#allocation2 + $0x18] sm:$0xff] }
   0xf   :  { %1501 = vmatpush.bf16.msra.mxu2 %v1487_v3  ;;  %1502 = vmatpush.bf16.msra.mxu3 %v1487_v3  ;;  %33 = vst.msk [vmem:[#allocation2 + $0x70] sm:$0xff] %vm18_vm0, %v1504_v24 }
  0x10   :  { %34 = vst.msk [vmem:[#allocation2 + $0x78] sm:$0xff] %vm18_vm0, %v1504_v24 }
  0x11   :  { %1423 = vmatmul.msk.bf16.vlgmr.msra.gmra.mxu0 %vm18_vm0, %v1455_v4  ;;  %1431 = vmatmul.msk.bf16.vlgmr.msra.gmra.mxu1 %vm18_vm0, %v1463_v5  ;;  %35 = vst.msk [vmem:[#allocation2 + $0x80] sm:$0xff] %vm18_vm0, %v1504_v24 }
  0x12   :  { %1439 = vmatmul.msk.bf16.vlgmr.msra.gmra.mxu2 %vm18_vm0, %v1471_v8  ;;  %1447 = vmatmul.msk.bf16.vlgmr.msra.gmra.mxu3 %vm18_vm0, %v1479_v15  ;;  %36 = vst.msk [vmem:[#allocation2 + $0x88] sm:$0xff] %vm18_vm0, %v1504_v24 }
  0x13   :  { %37 = vst.msk [vmem:[#allocation2 + $0x90] sm:$0xff] %vm18_vm0, %v1504_v24 }
  0x14   :  { %38 = vst.msk [vmem:[#allocation2 + $0x98] sm:$0xff] %vm18_vm0, %v1504_v24 }
  0x15   :  { %39 = vst.msk [vmem:[#allocation2 + $0xa0] sm:$0xff] %vm18_vm0, %v1504_v24 }
  0x16   :  { %40 = vst.msk [vmem:[#allocation2 + $0xa8] sm:$0xff] %vm18_vm0, %v1504_v24 }
  0x17   :  { %41 = vst.msk [vmem:[#allocation2 + $0xb0] sm:$0xff] %vm18_vm0, %v1504_v24 }
  0x18   :  { %42 = vst.msk [vmem:[#allocation2 + $0xb8] sm:$0xff] %vm18_vm0, %v1504_v24  ;;  %v163_v45 = vld [vmem:[#allocation2 + $0x80] sm:$0xff] }
  0x19   :  { %43 = vst.msk [vmem:[#allocation2 + $0xc0] sm:$0xff] %vm18_vm0, %v1504_v24  ;;  %v164_v47 = vld [vmem:[#allocation2 + $0x88] sm:$0xff] }
  0x1a   :  { %44 = vst.msk [vmem:[#allocation2 + $0xc8] sm:$0xff] %vm18_vm0, %v1504_v24  ;;  %v165_v53 = vld [vmem:[#allocation2 + $0x90] sm:$0xff] }
  0x1b   :  { %45 = vst.msk [vmem:[#allocation2 + $0xd0] sm:$0xff] %vm18_vm0, %v1504_v24  ;;  %v166_v60 = vld [vmem:[#allocation2 + $0x98] sm:$0xff] }
  0x1c   :  { %46 = vst.msk [vmem:[#allocation2 + $0xd8] sm:$0xff] %vm18_vm0, %v1504_v24 }
  0x1d   :  { %47 = vst.msk [vmem:[#allocation2 + $0xe0] sm:$0xff] %vm18_vm0, %v1504_v24 }
  0x1e   :  { %48 = vst.msk [vmem:[#allocation2 + $0xe8] sm:$0xff] %vm18_vm0, %v1504_v24 }
  0x1f   :  { %49 = vst.msk [vmem:[#allocation2 + $0xf0] sm:$0xff] %vm18_vm0, %v1504_v24 }
  0x20   :  { %50 = vst.msk [vmem:[#allocation2 + $0xf8] sm:$0xff] %vm18_vm0, %v1504_v24 }
  0x21   :  { %1424 = vmatmul.msk.bf16.gmra.mxu0 %vm18_vm0, %v1456_v6  ;;  %1432 = vmatmul.msk.bf16.gmra.mxu1 %vm18_vm0, %v1464_v7  ;;  %51 = vst.msk [vmem:[#allocation2 + $0x100] sm:$0xff] %vm18_vm0, %v1504_v24 }
  0x22   :  { %1440 = vmatmul.msk.bf16.gmra.mxu2 %vm18_vm0, %v1472_v11  ;;  %1448 = vmatmul.msk.bf16.gmra.mxu3 %vm18_vm0, %v1480_v19  ;;  %52 = vst.msk [vmem:[#allocation2 + $0x108] sm:$0xff] %vm18_vm0, %v1504_v24 }
  0x23   :  { %53 = vst.msk [vmem:[#allocation2 + $0x110] sm:$0xff] %vm18_vm0, %v1504_v24 }
  0x24   :  { %54 = vst.msk [vmem:[#allocation2 + $0x118] sm:$0xff] %vm18_vm0, %v1504_v24 }
  0x25   :  { %55 = vst.msk [vmem:[#allocation2 + $0x120] sm:$0xff] %vm18_vm0, %v1504_v24 }
  0x26   :  { %56 = vst.msk [vmem:[#allocation2 + $0x128] sm:$0xff] %vm18_vm0, %v1504_v24 }
  0x27   :  { %57 = vst.msk [vmem:[#allocation2 + $0x130] sm:$0xff] %vm18_vm0, %v1504_v24 }
  0x28   :  { %58 = vst.msk [vmem:[#allocation2 + $0x138] sm:$0xff] %vm18_vm0, %v1504_v24 }
  0x29   :  { %59 = vst.msk [vmem:[#allocation2 + $0x140] sm:$0xff] %vm18_vm0, %v1504_v24 }
  0x2a   :  { %60 = vst.msk [vmem:[#allocation2 + $0x148] sm:$0xff] %vm18_vm0, %v1504_v24 }
  0x2b   :  { %61 = vst.msk [vmem:[#allocation2 + $0x150] sm:$0xff] %vm18_vm0, %v1504_v24 }
  0x2c   :  { %62 = vst.msk [vmem:[#allocation2 + $0x158] sm:$0xff] %vm18_vm0, %v1504_v24 }
  0x2d   :  { %63 = vst.msk [vmem:[#allocation2 + $0x160] sm:$0xff] %vm18_vm0, %v1504_v24 }
  0x2e   :  { %64 = vst.msk [vmem:[#allocation2 + $0x168] sm:$0xff] %vm18_vm0, %v1504_v24 }
  0x2f   :  { %65 = vst.msk [vmem:[#allocation2 + $0x170] sm:$0xff] %vm18_vm0, %v1504_v24 }
  0x30   :  { %66 = vst.msk [vmem:[#allocation2 + $0x178] sm:$0xff] %vm18_vm0, %v1504_v24 }
  0x31   :  { %1425 = vmatmul.msk.bf16.gmra.mxu0 %vm18_vm0, %v1457_v9  ;;  %1433 = vmatmul.msk.bf16.gmra.mxu1 %vm18_vm0, %v1465_v10  ;;  %67 = vst.msk [vmem:[#allocation2 + $0x180] sm:$0xff] %vm18_vm0, %v1504_v24 }
  0x32   :  { %1441 = vmatmul.msk.bf16.gmra.mxu2 %vm18_vm0, %v1473_v14  ;;  %1449 = vmatmul.msk.bf16.gmra.mxu3 %vm18_vm0, %v1481_v23  ;;  %68 = vst.msk [vmem:[#allocation2 + $0x188] sm:$0xff] %vm18_vm0, %v1504_v24 }
  0x33   :  { %69 = vst.msk [vmem:[#allocation2 + $0x190] sm:$0xff] %vm18_vm0, %v1504_v24 }
  0x34   :  { %70 = vst.msk [vmem:[#allocation2 + $0x198] sm:$0xff] %vm18_vm0, %v1504_v24 }
  0x35   :  { %71 = vst.msk [vmem:[#allocation2 + $0x1a0] sm:$0xff] %vm18_vm0, %v1504_v24 }
  0x36   :  { %72 = vst.msk [vmem:[#allocation2 + $0x1a8] sm:$0xff] %vm18_vm0, %v1504_v24 }
  0x37   :  { %73 = vst.msk [vmem:[#allocation2 + $0x1b0] sm:$0xff] %vm18_vm0, %v1504_v24 }
  0x38   :  { %74 = vst.msk [vmem:[#allocation2 + $0x1b8] sm:$0xff] %vm18_vm0, %v1504_v24 }
  0x39   :  { %75 = vst.msk [vmem:[#allocation2 + $0x1c0] sm:$0xff] %vm18_vm0, %v1504_v24 }
  0x3a   :  { %76 = vst.msk [vmem:[#allocation2 + $0x1c8] sm:$0xff] %vm18_vm0, %v1504_v24 }
  0x3b   :  { %77 = vst.msk [vmem:[#allocation2 + $0x1d0] sm:$0xff] %vm18_vm0, %v1504_v24 }
  0x3c   :  { %78 = vst.msk [vmem:[#allocation2 + $0x1d8] sm:$0xff] %vm18_vm0, %v1504_v24 }
  0x3d   :  { %79 = vst.msk [vmem:[#allocation2 + $0x1e0] sm:$0xff] %vm18_vm0, %v1504_v24 }
  0x3e   :  { %80 = vst.msk [vmem:[#allocation2 + $0x1e8] sm:$0xff] %vm18_vm0, %v1504_v24 }
  0x3f   :  { %81 = vst.msk [vmem:[#allocation2 + $0x1f0] sm:$0xff] %vm18_vm0, %v1504_v24 }
  0x40   :  { %82 = vst.msk [vmem:[#allocation2 + $0x1f8] sm:$0xff] %vm18_vm0, %v1504_v24 }
  0x41   :  { %1426 = vmatmul.msk.bf16.gmra.mxu0 %vm18_vm0, %v1458_v12  ;;  %1434 = vmatmul.msk.bf16.gmra.mxu1 %vm18_vm0, %v1466_v13  ;;  %803 = vst.msk [vmem:[%s2598_s3] sm:$0x3] %vm802_vm1, %v1504_v24 }
  0x42   :  { %1442 = vmatmul.msk.bf16.gmra.mxu2 %vm18_vm0, %v1474_v18  ;;  %1450 = vmatmul.msk.bf16.gmra.mxu3 %vm18_vm0, %v1482_v28  ;;  %v167_v28 = vld [vmem:[#allocation2 + $0xa0] sm:$0xff] }
  0x51   :  { %1427 = vmatmul.msk.bf16.gmra.mxu0 %vm18_vm0, %v1459_v16  ;;  %1435 = vmatmul.msk.bf16.gmra.mxu1 %vm18_vm0, %v1467_v17 }
  0x52   :  { %1443 = vmatmul.msk.bf16.gmra.mxu2 %vm18_vm0, %v1475_v22  ;;  %1451 = vmatmul.msk.bf16.gmra.mxu3 %vm18_vm0, %v1483_v33 }
  0x61   :  { %1428 = vmatmul.msk.bf16.gmra.mxu0 %vm18_vm0, %v1460_v20  ;;  %1436 = vmatmul.msk.bf16.gmra.mxu1 %vm18_vm0, %v1468_v21 }
  0x62   :  { %1444 = vmatmul.msk.bf16.gmra.mxu2 %vm18_vm0, %v1476_v27  ;;  %1452 = vmatmul.msk.bf16.gmra.mxu3 %vm18_vm0, %v1484_v41  ;;  %v152_v27 = vld [vmem:[#allocation2 + $0x28] sm:$0xff] }
  0x71   :  { %1429 = vmatmul.msk.bf16.gmra.mxu0 %vm18_vm0, %v1461_v25  ;;  %1437 = vmatmul.msk.bf16.gmra.mxu1 %vm18_vm0, %v1469_v26 }
  0x72   :  { %1445 = vmatmul.msk.bf16.gmra.mxu2 %vm18_vm0, %v1477_v32  ;;  %1453 = vmatmul.msk.bf16.gmra.mxu3 %vm18_vm0, %v1485_v2  ;;  %v170_v2 = vld [vmem:[#allocation2 + $0xb8] sm:$0xff] }
  0x81   :  { %1430 = vmatmul.msk.bf16.gmra.mxu0 %vm18_vm0, %v1462_v29  ;;  %1438 = vmatmul.msk.bf16.gmra.mxu1 %vm18_vm0, %v1470_v30  ;;  %v179_v29 = vld [vmem:[#allocation2 + $0x100] sm:$0xff] }
  0x82   :  { %1446 = vmatmul.msk.bf16.gmra.mxu2 %vm18_vm0, %v1478_v40 }
  0x8e   :  { %v509_v34 = vpop.f32.mrf.mxu0  ;;  %v549_v36 = vpop.f32.mrf.mxu1 }
  0x8f   :  { %v669_v35 = vadd.f32 %v509_v34, %v147_v31  ;;  %v685_v50 = vadd.f32 %v549_v36, %v163_v45 }
  0x91   :  { %733 = vst.msk [vmem:[#allocation2] sm:$0xff] %vm18_vm0, %v669_v35  ;;  %v168_v35 = vld [vmem:[#allocation2 + $0xa8] sm:$0xff] }
  0x92   :  { %749 = vst.msk [vmem:[#allocation2 + $0x80] sm:$0xff] %vm18_vm0, %v685_v50 }
  0x95   :  { %v589_v22 = vpop.f32.mrf.mxu2 }
  0x96   :  { %v511_v37 = vpop.f32.mrf.mxu0  ;;  %v551_v39 = vpop.f32.mrf.mxu1  ;;  %v701_v31 = vadd.f32 %v589_v22, %v179_v29 }
  0x97   :  { %v670_v46 = vadd.f32 %v511_v37, %v148_v42  ;;  %v686_v51 = vadd.f32 %v551_v39, %v164_v47  ;;  %v180_v37 = vld [vmem:[#allocation2 + $0x108] sm:$0xff]  ;;  %v1486_v47 = vld [vmem:[%s2596_s0 + $0xf8] sm:$0xff] }
  0x98   :  { %v807_v38 = vld [vmem:[#allocation2] sm:$0xff]  ;;  %765 = vst.msk [vmem:[#allocation2 + $0x100] sm:$0xff] %vm18_vm0, %v701_v31  ;;  %1454 = vmatmul.msk.bf16.gmra.mxu3 %vm18_vm0, %v1486_v47 }
  0x99   :  { %871 = vst.msk [vmem:[%s2597_s2] sm:$0xff] %vm18_vm0, %v807_v38  ;;  %v1069_v58 = vmul.f32 %v807_v38, %v807_v38  ;;  %v936_v61 = vsel %vm18_vm0, %v807_v38, 0.0  ;;  %v1810_v6 = vld [vmem:[#allocation2 + $0x80] sm:$0xff] }
  0x9a   :  { %734 = vst.msk [vmem:[#allocation2 + $0x8] sm:$0xff] %vm18_vm0, %v670_v46  ;;  %v153_v46 = vld [vmem:[#allocation2 + $0x30] sm:$0xff] }
  0x9b   :  { %750 = vst.msk [vmem:[#allocation2 + $0x88] sm:$0xff] %vm18_vm0, %v686_v51  ;;  %v1133_v7 = vsel %vm18_vm0, %v1069_v58, 0.0 }
  0x9c   :  { %887 = vst.msk [vmem:[%s2597_s2 + $0x80] sm:$0xff] %vm18_vm0, %v1810_v6 }
  0x9d   :  { %v591_v38 = vpop.f32.mrf.mxu2 }
  0x9e   :  { %v514_v44 = vpop.f32.mrf.mxu0  ;;  %v554_v49 = vpop.f32.mrf.mxu1 }
  0x9f   :  { %v671_v48 = vadd.f32 %v514_v44, %v149_v43  ;;  %v687_v54 = vadd.f32 %v554_v49, %v165_v53  ;;  %v702_v43 = vadd.f32 %v591_v38, %v180_v37 }
  0xa1   :  { %735 = vst.msk [vmem:[#allocation2 + $0x10] sm:$0xff] %vm18_vm0, %v671_v48  ;;  %v808_v59 = vld [vmem:[#allocation2 + $0x8] sm:$0xff] }
  0xa2   :  { %751 = vst.msk [vmem:[#allocation2 + $0x90] sm:$0xff] %vm18_vm0, %v687_v54  ;;  %v937_v62 = vsel %vm18_vm0, %v808_v59, 0.0  ;;  %v1070_v63 = vmul.f32 %v808_v59, %v808_v59  ;;  %v1819_v10 = vld [vmem:[#allocation2 + $0x88] sm:$0xff] }
  0xa3   :  { %872 = vst.msk [vmem:[%s2597_s2 + $0x8] sm:$0xff] %vm18_vm0, %v808_v59  ;;  %v938_v3 = vadd.f32 %v937_v62, %v936_v61  ;;  %v169_v59 = vld [vmem:[#allocation2 + $0xb0] sm:$0xff] }
  0xa4   :  { %v1134_v8 = vsel %vm18_vm0, %v1070_v63, 0.0  ;;  %888 = vst.msk [vmem:[%s2597_s2 + $0x88] sm:$0xff] %vm18_vm0, %v1819_v10 }
  0xa5   :  { %v1135_v12 = vadd.f32 %v1134_v8, %v1133_v7  ;;  %766 = vst.msk [vmem:[#allocation2 + $0x108] sm:$0xff] %vm18_vm0, %v702_v43  ;;  %v157_v43 = vld [vmem:[#allocation2 + $0x50] sm:$0xff] }
  0xa6   :  { %v516_v55 = vpop.f32.mrf.mxu0  ;;  %v556_v57 = vpop.f32.mrf.mxu1 }
  0xa7   :  { %v672_v56 = vadd.f32 %v516_v55, %v150_v52  ;;  %v688_v11 = vadd.f32 %v556_v57, %v166_v60  ;;  %v1876_v52 = vld [vmem:[#allocation2 + $0x100] sm:$0xff]  ;;  %v594_v55 = vpop.f32.mrf.mxu2  ;;  %v181_v60 = vld [vmem:[#allocation2 + $0x110] sm:$0xff] }
  0xa8   :  { %v809_v0 = vld [vmem:[#allocation2 + $0x10] sm:$0xff]  ;;  %903 = vst.msk [vmem:[%s2597_s2 + $0x100] sm:$0xff] %vm18_vm0, %v1876_v52  ;;  %v703_v62 = vadd.f32 %v594_v55, %v181_v60  ;;  %v158_v60 = vld [vmem:[#allocation2 + $0x58] sm:$0xff] }
  0xa9   :  { %736 = vst.msk [vmem:[#allocation2 + $0x18] sm:$0xff] %vm18_vm0, %v672_v56  ;;  %v939_v4 = vsel %vm18_vm0, %v809_v0, 0.0  ;;  %v1071_v5 = vmul.f32 %v809_v0, %v809_v0  ;;  %v1828_v16 = vld [vmem:[#allocation2 + $0x90] sm:$0xff]  ;;  %v154_v56 = vld [vmem:[#allocation2 + $0x38] sm:$0xff] }
  0xaa   :  { %873 = vst.msk [vmem:[%s2597_s2 + $0x10] sm:$0xff] %vm18_vm0, %v809_v0  ;;  %v940_v13 = vadd.f32 %v939_v4, %v938_v3  ;;  %v182_v4 = vld [vmem:[#allocation2 + $0x118] sm:$0xff] }
  0xab   :  { %v1136_v14 = vsel %vm18_vm0, %v1071_v5, 0.0  ;;  %889 = vst.msk [vmem:[%s2597_s2 + $0x90] sm:$0xff] %vm18_vm0, %v1828_v16 }
  0xac   :  { %v1137_v18 = vadd.f32 %v1136_v14, %v1135_v12  ;;  %752 = vst.msk [vmem:[#allocation2 + $0x98] sm:$0xff] %vm18_vm0, %v688_v11  ;;  %v1898_v58 = vld [vmem:[#allocation2 + $0x108] sm:$0xff] }
  0xad   :  { %904 = vst.msk [vmem:[%s2597_s2 + $0x108] sm:$0xff] %vm18_vm0, %v1898_v58 }
  0xae   :  { %v519_v9 = vpop.f32.mrf.mxu0  ;;  %v559_v21 = vpop.f32.mrf.mxu1  ;;  %767 = vst.msk [vmem:[#allocation2 + $0x110] sm:$0xff] %vm18_vm0, %v703_v62 }
  0xaf   :  { %v673_v15 = vadd.f32 %v519_v9, %v151_v1  ;;  %v689_v30 = vadd.f32 %v559_v21, %v167_v28  ;;  %v596_v5 = vpop.f32.mrf.mxu2  ;;  %v155_v9 = vld [vmem:[#allocation2 + $0x40] sm:$0xff] }
  0xb0   :  { %v810_v17 = vld [vmem:[#allocation2 + $0x18] sm:$0xff]  ;;  %v704_v8 = vadd.f32 %v596_v5, %v182_v4  ;;  %v195_v28 = vld [vmem:[#allocation2 + $0x180] sm:$0xff]  ;;  %v197_v4 = vld [vmem:[#allocation2 + $0x190] sm:$0xff] }
  0xb1   :  { %874 = vst.msk [vmem:[%s2597_s2 + $0x18] sm:$0xff] %vm18_vm0, %v810_v17  ;;  %v941_v19 = vsel %vm18_vm0, %v810_v17, 0.0  ;;  %v1072_v20 = vmul.f32 %v810_v17, %v810_v17 }
  0xb2   :  { %v942_v23 = vadd.f32 %v941_v19, %v940_v13  ;;  %737 = vst.msk [vmem:[#allocation2 + $0x20] sm:$0xff] %vm18_vm0, %v673_v15  ;;  %v629_v19 = vpop.f32.mrf.mxu3 }
  0xb3   :  { %v1138_v25 = vsel %vm18_vm0, %v1072_v20, 0.0  ;;  %753 = vst.msk [vmem:[#allocation2 + $0xa0] sm:$0xff] %vm18_vm0, %v689_v30  ;;  %v1851_v41 = vld [vmem:[#allocation2 + $0x98] sm:$0xff]  ;;  %v156_v20 = vld [vmem:[#allocation2 + $0x48] sm:$0xff]  ;;  %v717_v31 = vadd.f32 %v629_v19, %v195_v28  ;;  %v159_v28 = vld [vmem:[#allocation2 + $0x60] sm:$0xff] }
  0xb4   :  { %v1139_v26 = vadd.f32 %v1138_v25, %v1137_v18  ;;  %890 = vst.msk [vmem:[%s2597_s2 + $0x98] sm:$0xff] %vm18_vm0, %v1851_v41  ;;  %v183_v25 = vld [vmem:[#allocation2 + $0x120] sm:$0xff] }
  0xb5   :  { %768 = vst.msk [vmem:[#allocation2 + $0x118] sm:$0xff] %vm18_vm0, %v704_v8  ;;  %v1924_v14 = vld [vmem:[#allocation2 + $0x110] sm:$0xff] }
  0xb6   :  { %v521_v32 = vpop.f32.mrf.mxu0  ;;  %v561_v36 = vpop.f32.mrf.mxu1  ;;  %905 = vst.msk [vmem:[%s2597_s2 + $0x110] sm:$0xff] %vm18_vm0, %v1924_v14 }
  0xb7   :  { %v674_v33 = vadd.f32 %v521_v32, %v152_v27  ;;  %v690_v42 = vadd.f32 %v561_v36, %v168_v35  ;;  %v599_v18 = vpop.f32.mrf.mxu2  ;;  %v184_v35 = vld [vmem:[#allocation2 + $0x128] sm:$0xff]  ;;  %781 = vst.msk [vmem:[#allocation2 + $0x180] sm:$0xff] %vm18_vm0, %v717_v31 }
  0xb8   :  { %v705_v27 = vadd.f32 %v599_v18, %v183_v25  ;;  %v186_v18 = vld [vmem:[#allocation2 + $0x138] sm:$0xff] }
  0xb9   :  { %v811_v34 = vld [vmem:[#allocation2 + $0x20] sm:$0xff]  ;;  %738 = vst.msk [vmem:[#allocation2 + $0x28] sm:$0xff] %vm18_vm0, %v674_v33  ;;  %v172_v33 = vld [vmem:[#allocation2 + $0xc8] sm:$0xff]  ;;  %v198_v25 = vld [vmem:[#allocation2 + $0x198] sm:$0xff] }
  0xba   :  { %875 = vst.msk [vmem:[%s2597_s2 + $0x20] sm:$0xff] %vm18_vm0, %v811_v34  ;;  %v943_v39 = vsel %vm18_vm0, %v811_v34, 0.0  ;;  %v1073_v40 = vmul.f32 %v811_v34, %v811_v34  ;;  %v1868_v50 = vld [vmem:[#allocation2 + $0xa0] sm:$0xff] }
  0xbb   :  { %v1853_v44 = vadd.f32 %v943_v39, %v942_v23  ;;  %754 = vst.msk [vmem:[#allocation2 + $0xa8] sm:$0xff] %vm18_vm0, %v690_v42  ;;  %v171_v23 = vld [vmem:[#allocation2 + $0xc0] sm:$0xff]  ;;  %v196_v39 = vld [vmem:[#allocation2 + $0x188] sm:$0xff] }
  0xbc   :  { %v1140_v45 = vsel %vm18_vm0, %v1073_v40, 0.0  ;;  %891 = vst.msk [vmem:[%s2597_s2 + $0xa0] sm:$0xff] %vm18_vm0, %v1868_v50  ;;  %v1946_v22 = vld [vmem:[#allocation2 + $0x118] sm:$0xff]  ;;  %v631_v40 = vpop.f32.mrf.mxu3 }
  0xbd   :  { %v1865_v48 = vadd.f32 %v1140_v45, %v1139_v26  ;;  %906 = vst.msk [vmem:[%s2597_s2 + $0x118] sm:$0xff] %vm18_vm0, %v1946_v22  ;;  %v718_v42 = vadd.f32 %v631_v40, %v196_v39  ;;  %v160_v40 = vld [vmem:[#allocation2 + $0x68] sm:$0xff] }
  0xbe   :  { %v524_v49 = vpop.f32.mrf.mxu0  ;;  %v564_v54 = vpop.f32.mrf.mxu1  ;;  %769 = vst.msk [vmem:[#allocation2 + $0x120] sm:$0xff] %vm18_vm0, %v705_v27 }
  0xbf   :  { %v675_v51 = vadd.f32 %v524_v49, %v153_v46  ;;  %v691_v61 = vadd.f32 %v564_v54, %v169_v59  ;;  %v601_v36 = vpop.f32.mrf.mxu2  ;;  %782 = vst.msk [vmem:[#allocation2 + $0x188] sm:$0xff] %vm18_vm0, %v718_v42 }
  0xc0   :  { %v1878_v53 = vld [vmem:[#allocation2 + $0x28] sm:$0xff]  ;;  %v706_v38 = vadd.f32 %v601_v36, %v184_v35 }
  0xc1   :  { %876 = vst.msk [vmem:[%s2597_s2 + $0x28] sm:$0xff] %vm18_vm0, %v1878_v53 }
  0xc2   :  { %739 = vst.msk [vmem:[#allocation2 + $0x30] sm:$0xff] %vm18_vm0, %v675_v51  ;;  %v1891_v57 = vld [vmem:[#allocation2 + $0xa8] sm:$0xff] }
  0xc3   :  { %892 = vst.msk [vmem:[%s2597_s2 + $0xa8] sm:$0xff] %vm18_vm0, %v1891_v57 }
  0xc4   :  { %755 = vst.msk [vmem:[#allocation2 + $0xb0] sm:$0xff] %vm18_vm0, %v691_v61  ;;  %v634_v59 = vpop.f32.mrf.mxu3 }
  0xc5   :  { %770 = vst.msk [vmem:[#allocation2 + $0x128] sm:$0xff] %vm18_vm0, %v706_v38  ;;  %v1974_v49 = vld [vmem:[#allocation2 + $0x120] sm:$0xff] }
  0xc6   :  { %v526_v63 = vpop.f32.mrf.mxu0  ;;  %v566_v3 = vpop.f32.mrf.mxu1  ;;  %907 = vst.msk [vmem:[%s2597_s2 + $0x120] sm:$0xff] %vm18_vm0, %v1974_v49 }
  0xc7   :  { %v676_v0 = vadd.f32 %v526_v63, %v154_v56  ;;  %v692_v7 = vadd.f32 %v566_v3, %v170_v2  ;;  %v604_v55 = vpop.f32.mrf.mxu2  ;;  %v1989_v56 = vld [vmem:[#allocation2 + $0x180] sm:$0xff]  ;;  %v173_v63 = vld [vmem:[#allocation2 + $0xd0] sm:$0xff]  ;;  %v2010_v2 = vld [vmem:[#allocation2 + $0x188] sm:$0xff] }
  0xc8   :  { %919 = vst.msk [vmem:[%s2597_s2 + $0x180] sm:$0xff] %vm18_vm0, %v1989_v56 }
  0xc9   :  { %v1907_v1 = vld [vmem:[#allocation2 + $0x30] sm:$0xff]  ;;  %740 = vst.msk [vmem:[#allocation2 + $0x38] sm:$0xff] %vm18_vm0, %v676_v0 }
  0xca   :  { %877 = vst.msk [vmem:[%s2597_s2 + $0x30] sm:$0xff] %vm18_vm0, %v1907_v1  ;;  %v185_v0 = vld [vmem:[#allocation2 + $0x130] sm:$0xff] }
  0xcb   :  { %756 = vst.msk [vmem:[#allocation2 + $0xb8] sm:$0xff] %vm18_vm0, %v692_v7  ;;  %v1917_v12 = vld [vmem:[#allocation2 + $0xb0] sm:$0xff]  ;;  %v707_v7 = vadd.f32 %v604_v55, %v185_v0  ;;  %v1075_v55 = vmul.f32 %v1907_v1, %v1907_v1 }
  0xcc   :  { %893 = vst.msk [vmem:[%s2597_s2 + $0xb0] sm:$0xff] %vm18_vm0, %v1917_v12  ;;  %v2003_v62 = vld [vmem:[#allocation2 + $0x128] sm:$0xff] }
  0xcd   :  { %908 = vst.msk [vmem:[%s2597_s2 + $0x128] sm:$0xff] %vm18_vm0, %v2003_v62 }
  0xce   :  { %v529_v11 = vpop.f32.mrf.mxu0  ;;  %v569_v17 = vpop.f32.mrf.mxu1  ;;  %920 = vst.msk [vmem:[%s2597_s2 + $0x188] sm:$0xff] %vm18_vm0, %v2010_v2 }
  0xcf   :  { %v677_v13 = vadd.f32 %v529_v11, %v155_v9  ;;  %v693_v26 = vadd.f32 %v569_v17, %v171_v23  ;;  %v719_v9 = vadd.f32 %v634_v59, %v197_v4  ;;  %771 = vst.msk [vmem:[#allocation2 + $0x130] sm:$0xff] %vm18_vm0, %v707_v7  ;;  %v606_v19 = vpop.f32.mrf.mxu2  ;;  %v945_v4 = vsel %vm18_vm0, %v1878_v53, 0.0 }
  0xd0   :  { %v1926_v15 = vld [vmem:[#allocation2 + $0x38] sm:$0xff]  ;;  %v708_v23 = vadd.f32 %v606_v19, %v186_v18 }
  0xd1   :  { %878 = vst.msk [vmem:[%s2597_s2 + $0x38] sm:$0xff] %vm18_vm0, %v1926_v15  ;;  %v1076_v19 = vmul.f32 %v1926_v15, %v1926_v15 }
  0xd2   :  { %741 = vst.msk [vmem:[#allocation2 + $0x40] sm:$0xff] %vm18_vm0, %v677_v13  ;;  %v1939_v21 = vld [vmem:[#allocation2 + $0xb8] sm:$0xff] }
  0xd3   :  { %894 = vst.msk [vmem:[%s2597_s2 + $0xb8] sm:$0xff] %vm18_vm0, %v1939_v21  ;;  %v174_v13 = vld [vmem:[#allocation2 + $0xd8] sm:$0xff] }
  0xd4   :  { %757 = vst.msk [vmem:[#allocation2 + $0xc0] sm:$0xff] %vm18_vm0, %v693_v26  ;;  %v636_v26 = vpop.f32.mrf.mxu3 }
  0xd5   :  { %783 = vst.msk [vmem:[#allocation2 + $0x190] sm:$0xff] %vm18_vm0, %v719_v9  ;;  %v720_v27 = vadd.f32 %v636_v26, %v198_v25  ;;  %v176_v9 = vld [vmem:[#allocation2 + $0xe8] sm:$0xff] }
  0xd6   :  { %v531_v29 = vpop.f32.mrf.mxu0  ;;  %v571_v34 = vpop.f32.mrf.mxu1  ;;  %772 = vst.msk [vmem:[#allocation2 + $0x138] sm:$0xff] %vm18_vm0, %v708_v23  ;;  %v200_v26 = vld [vmem:[#allocation2 + $0x1a8] sm:$0xff] }
  0xd7   :  { %v678_v30 = vadd.f32 %v531_v29, %v156_v20  ;;  %v694_v37 = vadd.f32 %v571_v34, %v172_v33  ;;  %784 = vst.msk [vmem:[#allocation2 + $0x198] sm:$0xff] %vm18_vm0, %v720_v27  ;;  %v2038_v33 = vld [vmem:[#allocation2 + $0x130] sm:$0xff]  ;;  %v609_v36 = vpop.f32.mrf.mxu2  ;;  %v947_v27 = vsel %vm18_vm0, %v1907_v1, 0.0 }
  0xd8   :  { %909 = vst.msk [vmem:[%s2597_s2 + $0x130] sm:$0xff] %vm18_vm0, %v2038_v33 }
  0xd9   :  { %v1955_v32 = vld [vmem:[#allocation2 + $0x40] sm:$0xff]  ;;  %742 = vst.msk [vmem:[#allocation2 + $0x48] sm:$0xff] %vm18_vm0, %v678_v30 }
  0xda   :  { %879 = vst.msk [vmem:[%s2597_s2 + $0x40] sm:$0xff] %vm18_vm0, %v1955_v32 }
  0xdb   :  { %758 = vst.msk [vmem:[#allocation2 + $0xc8] sm:$0xff] %vm18_vm0, %v694_v37  ;;  %v1966_v46 = vld [vmem:[#allocation2 + $0xc0] sm:$0xff] }
  0xdc   :  { %895 = vst.msk [vmem:[%s2597_s2 + $0xc0] sm:$0xff] %vm18_vm0, %v1966_v46  ;;  %v2053_v37 = vld [vmem:[#allocation2 + $0x190] sm:$0xff]  ;;  %v639_v38 = vpop.f32.mrf.mxu3 }
  0xdd   :  { %921 = vst.msk [vmem:[%s2597_s2 + $0x190] sm:$0xff] %vm18_vm0, %v2053_v37  ;;  %v2067_v42 = vld [vmem:[#allocation2 + $0x138] sm:$0xff] }
  0xde   :  { %v534_v45 = vpop.f32.mrf.mxu0  ;;  %v574_v54 = vpop.f32.mrf.mxu1  ;;  %910 = vst.msk [vmem:[%s2597_s2 + $0x138] sm:$0xff] %vm18_vm0, %v2067_v42 }
  0xdf   :  { %v679_v47 = vadd.f32 %v534_v45, %v157_v43  ;;  %v695_v3 = vadd.f32 %v574_v54, %v173_v63  ;;  %v2074_v43 = vld [vmem:[#allocation2 + $0x198] sm:$0xff]  ;;  %v187_v63 = vld [vmem:[#allocation2 + $0x140] sm:$0xff] }
  0xe0   :  { %v1976_v51 = vld [vmem:[#allocation2 + $0x48] sm:$0xff]  ;;  %922 = vst.msk [vmem:[%s2597_s2 + $0x198] sm:$0xff] %vm18_vm0, %v2074_v43  ;;  %v709_v7 = vadd.f32 %v609_v36, %v187_v63  ;;  %v949_v36 = vsel %vm18_vm0, %v1926_v15, 0.0 }
  0xe1   :  { %880 = vst.msk [vmem:[%s2597_s2 + $0x48] sm:$0xff] %vm18_vm0, %v1976_v51  ;;  %v1078_v1 = vmul.f32 %v1976_v51, %v1976_v51 }
  0xe2   :  { %743 = vst.msk [vmem:[#allocation2 + $0x50] sm:$0xff] %vm18_vm0, %v679_v47  ;;  %v1996_v61 = vld [vmem:[#allocation2 + $0xc8] sm:$0xff]  ;;  %v1074_v47 = vmul.f32 %v1878_v53, %v1878_v53  ;;  %v161_v53 = vld [vmem:[#allocation2 + $0x70] sm:$0xff] }
  0xe3   :  { %896 = vst.msk [vmem:[%s2597_s2 + $0xc8] sm:$0xff] %vm18_vm0, %v1996_v61 }
  0xe4   :  { %759 = vst.msk [vmem:[#allocation2 + $0xd0] sm:$0xff] %vm18_vm0, %v695_v3  ;;  %v611_v3 = vpop.f32.mrf.mxu2  ;;  %v1142_v18 = vsel %vm18_vm0, %v1074_v47, 0.0 }
  0xe5   :  { %773 = vst.msk [vmem:[#allocation2 + $0x140] sm:$0xff] %vm18_vm0, %v709_v7  ;;  %v1150_v7 = vsel %vm18_vm0, %v1078_v1, 0.0 }
  0xe6   :  { %v536_v5 = vpop.f32.mrf.mxu0  ;;  %v576_v17 = vpop.f32.mrf.mxu1 }
  0xe7   :  { %v680_v8 = vadd.f32 %v536_v5, %v158_v60  ;;  %v696_v20 = vadd.f32 %v576_v17, %v174_v13  ;;  %v175_v60 = vld [vmem:[#allocation2 + $0xe0] sm:$0xff]  ;;  %v188_v13 = vld [vmem:[#allocation2 + $0x148] sm:$0xff]  ;;  %v641_v17 = vpop.f32.mrf.mxu3 }
  0xe8   :  { %v710_v25 = vadd.f32 %v611_v3, %v188_v13  ;;  %v722_v47 = vadd.f32 %v641_v17, %v200_v26 }
  0xe9   :  { %v2019_v11 = vld [vmem:[#allocation2 + $0x50] sm:$0xff]  ;;  %744 = vst.msk [vmem:[#allocation2 + $0x58] sm:$0xff] %vm18_vm0, %v680_v8  ;;  %v199_v8 = vld [vmem:[#allocation2 + $0x1a0] sm:$0xff] }
  0xea   :  { %881 = vst.msk [vmem:[%s2597_s2 + $0x50] sm:$0xff] %vm18_vm0, %v2019_v11 }
  0xeb   :  { %760 = vst.msk [vmem:[#allocation2 + $0xd8] sm:$0xff] %vm18_vm0, %v696_v20  ;;  %v2030_v30 = vld [vmem:[#allocation2 + $0xd0] sm:$0xff]  ;;  %v721_v20 = vadd.f32 %v639_v38, %v199_v8 }
  0xec   :  { %897 = vst.msk [vmem:[%s2597_s2 + $0xd0] sm:$0xff] %vm18_vm0, %v2030_v30 }
  0xed   :  { %785 = vst.msk [vmem:[#allocation2 + $0x1a0] sm:$0xff] %vm18_vm0, %v721_v20 }
  0xee   :  { %v539_v29 = vpop.f32.mrf.mxu0  ;;  %v579_v35 = vpop.f32.mrf.mxu1  ;;  %774 = vst.msk [vmem:[#allocation2 + $0x148] sm:$0xff] %vm18_vm0, %v710_v25 }
  0xef   :  { %v681_v31 = vadd.f32 %v539_v29, %v159_v28  ;;  %v697_v5 = vadd.f32 %v579_v35, %v175_v60  ;;  %v1144_v28 = vsel %vm18_vm0, %v1075_v55, 0.0  ;;  %v1077_v29 = vmul.f32 %v1955_v32, %v1955_v32  ;;  %786 = vst.msk [vmem:[#allocation2 + $0x1a8] sm:$0xff] %vm18_vm0, %v722_v47  ;;  %v189_v47 = vld [vmem:[#allocation2 + $0x150] sm:$0xff] }
  0xf0   :  { %v2040_v34 = vld [vmem:[#allocation2 + $0x58] sm:$0xff]  ;;  %v1143_v35 = vadd.f32 %v1142_v18, %v1865_v48  ;;  %v951_v48 = vsel %vm18_vm0, %v1955_v32, 0.0  ;;  %v1079_v60 = vmul.f32 %v2019_v11, %v2019_v11  ;;  %v953_v32 = vsel %vm18_vm0, %v1976_v51, 0.0 }
  0xf1   :  { %882 = vst.msk [vmem:[%s2597_s2 + $0x58] sm:$0xff] %vm18_vm0, %v2040_v34  ;;  %v1148_v15 = vsel %vm18_vm0, %v1077_v29, 0.0  ;;  %v1080_v8 = vmul.f32 %v2040_v34, %v2040_v34  ;;  %v162_v18 = vld [vmem:[#allocation2 + $0x78] sm:$0xff]  ;;  %v955_v51 = vsel %vm18_vm0, %v2019_v11, 0.0 }
  0xf2   :  { %745 = vst.msk [vmem:[#allocation2 + $0x60] sm:$0xff] %vm18_vm0, %v681_v31  ;;  %v2060_v39 = vld [vmem:[#allocation2 + $0xd8] sm:$0xff]  ;;  %v946_v31 = vadd.f32 %v945_v4, %v1853_v44  ;;  %v1145_v55 = vadd.f32 %v1144_v28, %v1143_v35  ;;  %v1152_v20 = vsel %vm18_vm0, %v1079_v60, 0.0 }
  0xf3   :  { %898 = vst.msk [vmem:[%s2597_s2 + $0xd8] sm:$0xff] %vm18_vm0, %v2060_v39  ;;  %v1154_v28 = vsel %vm18_vm0, %v1080_v8, 0.0 }
  0xf4   :  { %761 = vst.msk [vmem:[#allocation2 + $0xe0] sm:$0xff] %vm18_vm0, %v697_v5  ;;  %v644_v5 = vpop.f32.mrf.mxu3 }
  0xf5   :  { %v2167_v35 = vld [vmem:[#allocation2 + $0x148] sm:$0xff] }
  0xf6   :  { %v541_v45 = vpop.f32.mrf.mxu0  ;;  %v581_v0 = vpop.f32.mrf.mxu1  ;;  %912 = vst.msk [vmem:[%s2597_s2 + $0x148] sm:$0xff] %vm18_vm0, %v2167_v35  ;;  %v2181_v60 = vld [vmem:[#allocation2 + $0x1a8] sm:$0xff] }
  0xf7   :  { %v682_v54 = vadd.f32 %v541_v45, %v160_v40  ;;  %v698_v23 = vadd.f32 %v581_v0, %v176_v9  ;;  %v1146_v40 = vsel %vm18_vm0, %v1076_v19, 0.0  ;;  %v614_v0 = vpop.f32.mrf.mxu2  ;;  %v2138_v19 = vld [vmem:[#allocation2 + $0x140] sm:$0xff]  ;;  %924 = vst.msk [vmem:[%s2597_s2 + $0x1a8] sm:$0xff] %vm18_vm0, %v2181_v60 }
  0xf8   :  { %v1147_v4 = vadd.f32 %v1146_v40, %v1145_v55  ;;  %911 = vst.msk [vmem:[%s2597_s2 + $0x140] sm:$0xff] %vm18_vm0, %v2138_v19 }
  0xf9   :  { %v2085_v59 = vld [vmem:[#allocation2 + $0x60] sm:$0xff]  ;;  %746 = vst.msk [vmem:[#allocation2 + $0x68] sm:$0xff] %vm18_vm0, %v682_v54  ;;  %v948_v54 = vadd.f32 %v947_v27, %v946_v31  ;;  %v957_v27 = vsel %vm18_vm0, %v2040_v34, 0.0 }
  0xfa   :  { %883 = vst.msk [vmem:[%s2597_s2 + $0x60] sm:$0xff] %vm18_vm0, %v2085_v59  ;;  %v1149_v17 = vadd.f32 %v1148_v15, %v1147_v4  ;;  %v1081_v29 = vmul.f32 %v2085_v59, %v2085_v59  ;;  %v959_v34 = vsel %vm18_vm0, %v2085_v59, 0.0  ;;  %v201_v4 = vld [vmem:[#allocation2 + $0x1b0] sm:$0xff]  ;;  %v178_v59 = vld [vmem:[#allocation2 + $0xf8] sm:$0xff] }
  0xfb   :  { %762 = vst.msk [vmem:[#allocation2 + $0xe8] sm:$0xff] %vm18_vm0, %v698_v23  ;;  %v950_v3 = vadd.f32 %v949_v36, %v948_v54  ;;  %v2130_v9 = vld [vmem:[#allocation2 + $0xe0] sm:$0xff] }
  0xfc   :  { %899 = vst.msk [vmem:[%s2597_s2 + $0xe0] sm:$0xff] %vm18_vm0, %v2130_v9  ;;  %v2148_v23 = vld [vmem:[#allocation2 + $0x1a0] sm:$0xff]  ;;  %v1151_v25 = vadd.f32 %v1150_v7, %v1149_v17  ;;  %v1156_v7 = vsel %vm18_vm0, %v1081_v29, 0.0  ;;  %v711_v17 = vadd.f32 %v614_v0, %v189_v47 }
  0xfd   :  { %v952_v13 = vadd.f32 %v951_v48, %v950_v3  ;;  %923 = vst.msk [vmem:[%s2597_s2 + $0x1a0] sm:$0xff] %vm18_vm0, %v2148_v23 }
  0xfe   :  { %v544_v38 = vpop.f32.mrf.mxu0  ;;  %v584_v63 = vpop.f32.mrf.mxu1  ;;  %775 = vst.msk [vmem:[#allocation2 + $0x150] sm:$0xff] %vm18_vm0, %v711_v17  ;;  %v1088_v17 = vmul.f32 %v1851_v41, %v1851_v41 }
  0xff   :  { %v683_v45 = vadd.f32 %v544_v38, %v161_v53  ;;  %v954_v53 = vadd.f32 %v953_v32, %v952_v13  ;;  %v1153_v38 = vadd.f32 %v1152_v20, %v1151_v25  ;;  %v616_v55 = vpop.f32.mrf.mxu2  ;;  %v646_v32 = vpop.f32.mrf.mxu3 }
 0x100   :  { %v820_v44 = vld [vmem:[#allocation2 + $0x68] sm:$0xff] }
 0x101   :  { %884 = vst.msk [vmem:[%s2597_s2 + $0x68] sm:$0xff] %vm18_vm0, %v820_v44  ;;  %v956_v36 = vadd.f32 %v955_v51, %v954_v53  ;;  %v1082_v40 = vmul.f32 %v820_v44, %v820_v44  ;;  %v1155_v15 = vadd.f32 %v1154_v28, %v1153_v38  ;;  %v961_v8 = vsel %vm18_vm0, %v820_v44, 0.0  ;;  %v202_v51 = vld [vmem:[#allocation2 + $0x1b8] sm:$0xff] }
 0x102   :  { %747 = vst.msk [vmem:[#allocation2 + $0x70] sm:$0xff] %vm18_vm0, %v683_v45  ;;  %v2155_v11 = vld [vmem:[#allocation2 + $0xe8] sm:$0xff]  ;;  %v177_v45 = vld [vmem:[#allocation2 + $0xf0] sm:$0xff]  ;;  %v724_v29 = vadd.f32 %v646_v32, %v202_v51  ;;  %v1085_v38 = vmul.f32 %v1810_v6, %v1810_v6 }
 0x103   :  { %900 = vst.msk [vmem:[%s2597_s2 + $0xe8] sm:$0xff] %vm18_vm0, %v2155_v11  ;;  %v958_v48 = vadd.f32 %v957_v27, %v956_v36  ;;  %v699_v3 = vadd.f32 %v584_v63, %v177_v45  ;;  %v723_v63 = vadd.f32 %v644_v5, %v201_v4  ;;  %v1157_v27 = vadd.f32 %v1156_v7, %v1155_v15 }
 0x104   :  { %788 = vst.msk [vmem:[#allocation2 + $0x1b8] sm:$0xff] %vm18_vm0, %v724_v29  ;;  %v1164_v7 = vsel %vm18_vm0, %v1085_v38, 0.0  ;;  %v191_v29 = vld [vmem:[#allocation2 + $0x160] sm:$0xff] }
 0x105   :  { %v960_v20 = vadd.f32 %v959_v34, %v958_v48  ;;  %763 = vst.msk [vmem:[#allocation2 + $0xf0] sm:$0xff] %vm18_vm0, %v699_v3  ;;  %v1086_v48 = vmul.f32 %v1819_v10, %v1819_v10  ;;  %v2218_v32 = vld [vmem:[#allocation2 + $0x150] sm:$0xff] }
 0x106   :  { %v546_v26 = vpop.f32.mrf.mxu0  ;;  %v586_v54 = vpop.f32.mrf.mxu1  ;;  %787 = vst.msk [vmem:[#allocation2 + $0x1b0] sm:$0xff] %vm18_vm0, %v723_v63  ;;  %v971_v63 = vsel %vm18_vm0, %v1828_v16, 0.0 }
 0x107   :  { %v684_v31 = vadd.f32 %v546_v26, %v162_v18  ;;  %v190_v18 = vld [vmem:[#allocation2 + $0x158] sm:$0xff]  ;;  %v700_v53 = vadd.f32 %v586_v54, %v178_v59  ;;  %v1158_v26 = vsel %vm18_vm0, %v1082_v40, 0.0  ;;  %v962_v28 = vadd.f32 %v961_v8, %v960_v20  ;;  %v649_v54 = vpop.f32.mrf.mxu3  ;;  %913 = vst.msk [vmem:[%s2597_s2 + $0x150] sm:$0xff] %vm18_vm0, %v2218_v32 }
 0x108   :  { %v712_v25 = vadd.f32 %v616_v55, %v190_v18  ;;  %v967_v55 = vsel %vm18_vm0, %v1810_v6, 0.0  ;;  %v969_v6 = vsel %vm18_vm0, %v1819_v10, 0.0  ;;  %v1087_v8 = vmul.f32 %v1828_v16, %v1828_v16 }
 0x109   :  { %v821_v1 = vld [vmem:[#allocation2 + $0x70] sm:$0xff]  ;;  %748 = vst.msk [vmem:[#allocation2 + $0x78] sm:$0xff] %vm18_vm0, %v684_v31  ;;  %v1159_v31 = vadd.f32 %v1158_v26, %v1157_v27  ;;  %v1166_v20 = vsel %vm18_vm0, %v1086_v48, 0.0  ;;  %v973_v16 = vsel %vm18_vm0, %v1851_v41, 0.0  ;;  %v1089_v27 = vmul.f32 %v1868_v50, %v1868_v50  ;;  %v192_v41 = vld [vmem:[#allocation2 + $0x168] sm:$0xff] }
 0x10a   :  { %885 = vst.msk [vmem:[%s2597_s2 + $0x70] sm:$0xff] %vm18_vm0, %v821_v1  ;;  %v1083_v13 = vmul.f32 %v821_v1, %v821_v1  ;;  %v963_v44 = vsel %vm18_vm0, %v821_v1, 0.0  ;;  %v619_v1 = vpop.f32.mrf.mxu2 }
 0x10b   :  { %764 = vst.msk [vmem:[#allocation2 + $0xf8] sm:$0xff] %vm18_vm0, %v700_v53  ;;  %v964_v36 = vadd.f32 %v963_v44, %v962_v28  ;;  %v1168_v44 = vsel %vm18_vm0, %v1087_v8, 0.0  ;;  %v2261_v28 = vld [vmem:[#allocation2 + $0x1b8] sm:$0xff]  ;;  %v1091_v8 = vmul.f32 %v1917_v12, %v1917_v12 }
 0x10c   :  { %v1160_v0 = vsel %vm18_vm0, %v1083_v13, 0.0  ;;  %776 = vst.msk [vmem:[#allocation2 + $0x158] sm:$0xff] %vm18_vm0, %v712_v25  ;;  %v2211_v3 = vld [vmem:[#allocation2 + $0xf0] sm:$0xff] }
 0x10d   :  { %v1161_v45 = vadd.f32 %v1160_v0, %v1159_v31  ;;  %901 = vst.msk [vmem:[%s2597_s2 + $0xf0] sm:$0xff] %vm18_vm0, %v2211_v3  ;;  %v2230_v13 = vld [vmem:[#allocation2 + $0x1b0] sm:$0xff]  ;;  %v203_v0 = vld [vmem:[#allocation2 + $0x1c0] sm:$0xff] }
 0x10e   :  { %925 = vst.msk [vmem:[%s2597_s2 + $0x1b0] sm:$0xff] %vm18_vm0, %v2230_v13  ;;  %v725_v48 = vadd.f32 %v649_v54, %v203_v0  ;;  %v979_v54 = vsel %vm18_vm0, %v1917_v12, 0.0  ;;  %v983_v0 = vsel %vm18_vm0, %v1966_v46, 0.0 }
 0x10f   :  { %926 = vst.msk [vmem:[%s2597_s2 + $0x1b8] sm:$0xff] %vm18_vm0, %v2261_v28 }
 0x110   :  { %v822_v5 = vld [vmem:[#allocation2 + $0x78] sm:$0xff]  ;;  %789 = vst.msk [vmem:[#allocation2 + $0x1c0] sm:$0xff] %vm18_vm0, %v725_v48  ;;  %v987_v48 = vsel %vm18_vm0, %v2030_v30, 0.0 }
 0x111   :  { %886 = vst.msk [vmem:[%s2597_s2 + $0x78] sm:$0xff] %vm18_vm0, %v822_v5  ;;  %v965_v34 = vsel %vm18_vm0, %v822_v5, 0.0  ;;  %v1084_v40 = vmul.f32 %v822_v5, %v822_v5  ;;  %v975_v5 = vsel %vm18_vm0, %v1868_v50, 0.0 }
 0x112   :  { %v966_v47 = vadd.f32 %v965_v34, %v964_v36  ;;  %v2239_v10 = vld [vmem:[#allocation2 + $0xf8] sm:$0xff]  ;;  %v621_v31 = vpop.f32.mrf.mxu2  ;;  %v1170_v36 = vsel %vm18_vm0, %v1088_v17, 0.0 }
 0x113   :  { %v1162_v15 = vsel %vm18_vm0, %v1084_v40, 0.0  ;;  %902 = vst.msk [vmem:[%s2597_s2 + $0xf8] sm:$0xff] %vm18_vm0, %v2239_v10  ;;  %v2249_v53 = vld [vmem:[#allocation2 + $0x158] sm:$0xff]  ;;  %v204_v40 = vld [vmem:[#allocation2 + $0x1c8] sm:$0xff] }
 0x114   :  { %v968_v4 = vadd.f32 %v967_v55, %v966_v47  ;;  %v1163_v59 = vadd.f32 %v1162_v15, %v1161_v45  ;;  %914 = vst.msk [vmem:[%s2597_s2 + $0x158] sm:$0xff] %vm18_vm0, %v2249_v53  ;;  %v651_v45 = vpop.f32.mrf.mxu3  ;;  %v1090_v47 = vmul.f32 %v1891_v57, %v1891_v57  ;;  %v713_v55 = vadd.f32 %v619_v1, %v191_v29 }
 0x115   :  { %v714_v15 = vadd.f32 %v621_v31, %v192_v41  ;;  %v726_v50 = vadd.f32 %v651_v45, %v204_v40  ;;  %v1094_v31 = vmul.f32 %v1996_v61, %v1996_v61  ;;  %v1095_v41 = vmul.f32 %v2030_v30, %v2030_v30 }
 0x116   :  { %v970_v18 = vadd.f32 %v969_v6, %v968_v4  ;;  %v1165_v51 = vadd.f32 %v1164_v7, %v1163_v59  ;;  %v1172_v7 = vsel %vm18_vm0, %v1089_v27, 0.0  ;;  %v977_v6 = vsel %vm18_vm0, %v1891_v57, 0.0  ;;  %777 = vst.msk [vmem:[#allocation2 + $0x160] sm:$0xff] %vm18_vm0, %v713_v55 }
 0x117   :  { %v1174_v1 = vsel %vm18_vm0, %v1090_v47, 0.0  ;;  %778 = vst.msk [vmem:[#allocation2 + $0x168] sm:$0xff] %vm18_vm0, %v714_v15  ;;  %v1096_v40 = vmul.f32 %v2060_v39, %v2060_v39  ;;  %v1182_v55 = vsel %vm18_vm0, %v1094_v31, 0.0  ;;  %v989_v30 = vsel %vm18_vm0, %v2060_v39, 0.0 }
 0x118   :  { %v972_v25 = vadd.f32 %v971_v63, %v970_v18  ;;  %v1167_v26 = vadd.f32 %v1166_v20, %v1165_v51  ;;  %v1092_v51 = vmul.f32 %v1939_v21, %v1939_v21  ;;  %790 = vst.msk [vmem:[#allocation2 + $0x1c8] sm:$0xff] %vm18_vm0, %v726_v50  ;;  %v1176_v63 = vsel %vm18_vm0, %v1091_v8, 0.0  ;;  %v193_v8 = vld [vmem:[#allocation2 + $0x170] sm:$0xff] }
 0x119   :  { %v1184_v50 = vsel %vm18_vm0, %v1095_v41, 0.0  ;;  %v1098_v39 = vmul.f32 %v2155_v11, %v2155_v11 }
 0x11a   :  { %v974_v38 = vadd.f32 %v973_v16, %v972_v25  ;;  %v1169_v34 = vadd.f32 %v1168_v44, %v1167_v26  ;;  %v981_v25 = vsel %vm18_vm0, %v1939_v21, 0.0  ;;  %v1093_v26 = vmul.f32 %v1966_v46, %v1966_v46  ;;  %v624_v44 = vpop.f32.mrf.mxu2  ;;  %v2311_v46 = vld [vmem:[#allocation2 + $0x1c0] sm:$0xff] }
 0x11b   :  { %v1178_v29 = vsel %vm18_vm0, %v1092_v51, 0.0  ;;  %927 = vst.msk [vmem:[%s2597_s2 + $0x1c0] sm:$0xff] %vm18_vm0, %v2311_v46 }
 0x11c   :  { %v976_v4 = vadd.f32 %v975_v5, %v974_v38  ;;  %v1171_v59 = vadd.f32 %v1170_v36, %v1169_v34  ;;  %v654_v27 = vpop.f32.mrf.mxu3  ;;  %v1180_v21 = vsel %vm18_vm0, %v1093_v26, 0.0  ;;  %v985_v34 = vsel %vm18_vm0, %v1996_v61, 0.0 }
 0x11d   :  { %v2297_v38 = vld [vmem:[#allocation2 + $0x160] sm:$0xff]  ;;  %v991_v26 = vsel %vm18_vm0, %v2130_v9, 0.0 }
 0x11e   :  { %v978_v17 = vadd.f32 %v977_v6, %v976_v4  ;;  %v1173_v18 = vadd.f32 %v1172_v7, %v1171_v59  ;;  %915 = vst.msk [vmem:[%s2597_s2 + $0x160] sm:$0xff] %vm18_vm0, %v2297_v38  ;;  %v2318_v61 = vld [vmem:[#allocation2 + $0x168] sm:$0xff]  ;;  %v1186_v7 = vsel %vm18_vm0, %v1096_v40, 0.0  ;;  %v1097_v6 = vmul.f32 %v2130_v9, %v2130_v9 }
 0x11f   :  { %916 = vst.msk [vmem:[%s2597_s2 + $0x168] sm:$0xff] %vm18_vm0, %v2318_v61  ;;  %v2328_v15 = vld [vmem:[#allocation2 + $0x1c8] sm:$0xff]  ;;  %v1101_v40 = vmul.f32 %v1876_v52, %v1876_v52 }
 0x120   :  { %v1175_v57 = vadd.f32 %v1174_v1, %v1173_v18  ;;  %v980_v20 = vadd.f32 %v979_v54, %v978_v17  ;;  %928 = vst.msk [vmem:[%s2597_s2 + $0x1c8] sm:$0xff] %vm18_vm0, %v2328_v15  ;;  %v205_v17 = vld [vmem:[#allocation2 + $0x1d0] sm:$0xff]  ;;  %v194_v18 = vld [vmem:[#allocation2 + $0x178] sm:$0xff]  ;;  %v1188_v31 = vsel %vm18_vm0, %v1097_v6, 0.0 }
 0x122   :  { %v982_v16 = vadd.f32 %v981_v25, %v980_v20  ;;  %v1177_v12 = vadd.f32 %v1176_v63, %v1175_v57  ;;  %v626_v1 = vpop.f32.mrf.mxu2  ;;  %v715_v57 = vadd.f32 %v624_v44, %v193_v8  ;;  %v727_v20 = vadd.f32 %v654_v27, %v205_v17  ;;  %v206_v63 = vld [vmem:[#allocation2 + $0x1d8] sm:$0xff] }
 0x123   :  { %v993_v44 = vsel %vm18_vm0, %v2155_v11, 0.0  ;;  %v1099_v27 = vmul.f32 %v2211_v3, %v2211_v3  ;;  %v1196_v8 = vsel %vm18_vm0, %v1101_v40, 0.0  ;;  %v1103_v17 = vmul.f32 %v1924_v14, %v1924_v14 }
 0x124   :  { %v984_v36 = vadd.f32 %v983_v0, %v982_v16  ;;  %v1179_v5 = vadd.f32 %v1178_v29, %v1177_v12  ;;  %v656_v25 = vpop.f32.mrf.mxu3  ;;  %v716_v16 = vadd.f32 %v626_v1, %v194_v18  ;;  %779 = vst.msk [vmem:[#allocation2 + $0x170] sm:$0xff] %vm18_vm0, %v715_v57  ;;  %v1003_v57 = vsel %vm18_vm0, %v1924_v14, 0.0  ;;  %v207_v14 = vld [vmem:[#allocation2 + $0x1e0] sm:$0xff] }
 0x125   :  { %v728_v12 = vadd.f32 %v656_v25, %v206_v63  ;;  %791 = vst.msk [vmem:[#allocation2 + $0x1d0] sm:$0xff] %vm18_vm0, %v727_v20  ;;  %v1104_v20 = vmul.f32 %v1946_v22, %v1946_v22 }
 0x126   :  { %v986_v45 = vadd.f32 %v985_v34, %v984_v36  ;;  %v1181_v47 = vadd.f32 %v1180_v21, %v1179_v5  ;;  %780 = vst.msk [vmem:[#allocation2 + $0x178] sm:$0xff] %vm18_vm0, %v716_v16  ;;  %v1190_v5 = vsel %vm18_vm0, %v1098_v39, 0.0  ;;  %v995_v21 = vsel %vm18_vm0, %v2211_v3, 0.0 }
 0x127   :  { %v1100_v34 = vmul.f32 %v2239_v10, %v2239_v10  ;;  %792 = vst.msk [vmem:[#allocation2 + $0x1d8] sm:$0xff] %vm18_vm0, %v728_v12  ;;  %v999_v3 = vsel %vm18_vm0, %v1876_v52, 0.0  ;;  %v1001_v52 = vsel %vm18_vm0, %v1898_v58, 0.0  ;;  %v1005_v39 = vsel %vm18_vm0, %v1946_v22, 0.0  ;;  %v208_v12 = vld [vmem:[#allocation2 + $0x1e8] sm:$0xff] }
 0x128   :  { %v988_v4 = vadd.f32 %v987_v48, %v986_v45  ;;  %v1183_v59 = vadd.f32 %v1182_v55, %v1181_v47  ;;  %v1192_v45 = vsel %vm18_vm0, %v1099_v27, 0.0  ;;  %v997_v47 = vsel %vm18_vm0, %v2239_v10, 0.0 }
 0x129   :  { %v1105_v16 = vmul.f32 %v1974_v49, %v1974_v49  ;;  %v1202_v27 = vsel %vm18_vm0, %v1104_v20, 0.0 }
 0x12a   :  { %v990_v54 = vadd.f32 %v989_v30, %v988_v4  ;;  %v1185_v51 = vadd.f32 %v1184_v50, %v1183_v59  ;;  %v1102_v59 = vmul.f32 %v1898_v58, %v1898_v58  ;;  %v1194_v50 = vsel %vm18_vm0, %v1100_v34, 0.0 }
 0x12b   :  { %v2369_v30 = vld [vmem:[#allocation2 + $0x170] sm:$0xff]  ;;  %v1204_v34 = vsel %vm18_vm0, %v1105_v16, 0.0 }
 0x12c   :  { %v992_v29 = vadd.f32 %v991_v26, %v990_v54  ;;  %v1187_v0 = vadd.f32 %v1186_v7, %v1185_v51  ;;  %v659_v4 = vpop.f32.mrf.mxu3  ;;  %917 = vst.msk [vmem:[%s2597_s2 + $0x170] sm:$0xff] %vm18_vm0, %v2369_v30  ;;  %v2376_v10 = vld [vmem:[#allocation2 + $0x1d0] sm:$0xff]  ;;  %v1198_v51 = vsel %vm18_vm0, %v1102_v59, 0.0  ;;  %v1200_v26 = vsel %vm18_vm0, %v1103_v17, 0.0 }
 0x12d   :  { %929 = vst.msk [vmem:[%s2597_s2 + $0x1d0] sm:$0xff] %vm18_vm0, %v2376_v10  ;;  %v2388_v18 = vld [vmem:[#allocation2 + $0x178] sm:$0xff]  ;;  %v1109_v59 = vmul.f32 %v2138_v19, %v2138_v19 }
 0x12e   :  { %v1189_v9 = vadd.f32 %v1188_v31, %v1187_v0  ;;  %v994_v36 = vadd.f32 %v993_v44, %v992_v29  ;;  %918 = vst.msk [vmem:[%s2597_s2 + $0x178] sm:$0xff] %vm18_vm0, %v2388_v18  ;;  %v2395_v58 = vld [vmem:[#allocation2 + $0x1d8] sm:$0xff]  ;;  %v729_v31 = vadd.f32 %v659_v4, %v207_v14 }
 0x12f   :  { %930 = vst.msk [vmem:[%s2597_s2 + $0x1d8] sm:$0xff] %vm18_vm0, %v2395_v58 }
 0x130   :  { %v1191_v11 = vadd.f32 %v1190_v5, %v1189_v9  ;;  %v996_v41 = vadd.f32 %v995_v21, %v994_v36  ;;  %v1007_v9 = vsel %vm18_vm0, %v1974_v49, 0.0  ;;  %v1106_v36 = vmul.f32 %v2003_v62, %v2003_v62  ;;  %793 = vst.msk [vmem:[#allocation2 + $0x1e0] sm:$0xff] %vm18_vm0, %v729_v31  ;;  %v210_v31 = vld [vmem:[#allocation2 + $0x1f8] sm:$0xff] }
 0x132   :  { %v1193_v55 = vadd.f32 %v1192_v45, %v1191_v11  ;;  %v998_v48 = vadd.f32 %v997_v47, %v996_v41  ;;  %v1009_v11 = vsel %vm18_vm0, %v2003_v62, 0.0  ;;  %v1107_v41 = vmul.f32 %v2038_v33, %v2038_v33 }
 0x133   :  { %v1206_v45 = vsel %vm18_vm0, %v1106_v36, 0.0  ;;  %v1011_v47 = vsel %vm18_vm0, %v2038_v33, 0.0  ;;  %v1013_v62 = vsel %vm18_vm0, %v2067_v42, 0.0  ;;  %v1015_v33 = vsel %vm18_vm0, %v2138_v19, 0.0 }
 0x134   :  { %v1000_v7 = vadd.f32 %v999_v3, %v998_v48  ;;  %v1195_v6 = vadd.f32 %v1194_v50, %v1193_v55  ;;  %v661_v44 = vpop.f32.mrf.mxu3  ;;  %v1108_v55 = vmul.f32 %v2067_v42, %v2067_v42  ;;  %v1208_v3 = vsel %vm18_vm0, %v1107_v41, 0.0 }
 0x135   :  { %v730_v5 = vadd.f32 %v661_v44, %v208_v12  ;;  %v1017_v19 = vsel %vm18_vm0, %v2167_v35, 0.0  ;;  %v1021_v12 = vsel %vm18_vm0, %v2249_v53, 0.0  ;;  %v1025_v41 = vsel %vm18_vm0, %v2318_v61, 0.0 }
 0x136   :  { %v1002_v1 = vadd.f32 %v1001_v52, %v1000_v7  ;;  %v1197_v54 = vadd.f32 %v1196_v8, %v1195_v6  ;;  %v1210_v8 = vsel %vm18_vm0, %v1108_v55, 0.0  ;;  %v1110_v52 = vmul.f32 %v2167_v35, %v2167_v35 }
 0x137   :  { %794 = vst.msk [vmem:[#allocation2 + $0x1e8] sm:$0xff] %vm18_vm0, %v730_v5  ;;  %v2439_v17 = vld [vmem:[#allocation2 + $0x1e0] sm:$0xff]  ;;  %v1023_v5 = vsel %vm18_vm0, %v2297_v38, 0.0  ;;  %v1116_v55 = vmul.f32 %v2388_v18, %v2388_v18 }
 0x138   :  { %v1004_v63 = vadd.f32 %v1003_v57, %v1002_v1  ;;  %v1199_v25 = vadd.f32 %v1198_v51, %v1197_v54  ;;  %931 = vst.msk [vmem:[%s2597_s2 + $0x1e0] sm:$0xff] %vm18_vm0, %v2439_v17  ;;  %v1212_v51 = vsel %vm18_vm0, %v1109_v59, 0.0  ;;  %v1111_v57 = vmul.f32 %v2218_v32, %v2218_v32 }
 0x13a   :  { %v1006_v29 = vadd.f32 %v1005_v39, %v1004_v63  ;;  %v1201_v0 = vadd.f32 %v1200_v26, %v1199_v25  ;;  %v1214_v25 = vsel %vm18_vm0, %v1110_v52, 0.0  ;;  %v1019_v26 = vsel %vm18_vm0, %v2218_v32, 0.0 }
 0x13b   :  { %v1112_v39 = vmul.f32 %v2249_v53, %v2249_v53  ;;  %v1216_v14 = vsel %vm18_vm0, %v1111_v57, 0.0  ;;  %v1035_v57 = vsel %vm18_vm0, %v2053_v37, 0.0 }
 0x13c   :  { %v1008_v21 = vadd.f32 %v1007_v9, %v1006_v29  ;;  %v1203_v22 = vadd.f32 %v1202_v27, %v1201_v0  ;;  %v664_v6 = vpop.f32.mrf.mxu3  ;;  %v1113_v29 = vmul.f32 %v2297_v38, %v2297_v38  ;;  %v209_v0 = vld [vmem:[#allocation2 + $0x1f0] sm:$0xff] }
 0x13d   :  { %v731_v9 = vadd.f32 %v664_v6, %v209_v0  ;;  %v1218_v32 = vsel %vm18_vm0, %v1112_v39, 0.0  ;;  %v1226_v6 = vsel %vm18_vm0, %v1116_v55, 0.0  ;;  %v1121_v39 = vmul.f32 %v2148_v23, %v2148_v23 }
 0x13e   :  { %v1205_v40 = vadd.f32 %v1204_v34, %v1203_v22  ;;  %v1010_v49 = vadd.f32 %v1009_v11, %v1008_v21  ;;  %v2446_v42 = vld [vmem:[#allocation2 + $0x1e8] sm:$0xff]  ;;  %v1114_v21 = vmul.f32 %v2318_v61, %v2318_v61  ;;  %v1220_v11 = vsel %vm18_vm0, %v1113_v29, 0.0 }
 0x13f   :  { %932 = vst.msk [vmem:[%s2597_s2 + $0x1e8] sm:$0xff] %vm18_vm0, %v2446_v42  ;;  %v1117_v61 = vmul.f32 %v1989_v56, %v1989_v56 }
 0x140   :  { %v1012_v48 = vadd.f32 %v1011_v47, %v1010_v49  ;;  %v1207_v4 = vadd.f32 %v1206_v45, %v1205_v40  ;;  %795 = vst.msk [vmem:[#allocation2 + $0x1f0] sm:$0xff] %vm18_vm0, %v731_v9  ;;  %v1115_v40 = vmul.f32 %v2369_v30, %v2369_v30  ;;  %v1222_v45 = vsel %vm18_vm0, %v1114_v21, 0.0 }
 0x141   :  { %v1027_v47 = vsel %vm18_vm0, %v2369_v30, 0.0  ;;  %v1118_v30 = vmul.f32 %v2010_v2, %v2010_v2  ;;  %v1228_v52 = vsel %vm18_vm0, %v1117_v61, 0.0  ;;  %v1128_v61 = vmul.f32 %v2395_v58, %v2395_v58 }
 0x142   :  { %v1014_v50 = vadd.f32 %v1013_v62, %v1012_v48  ;;  %v1209_v7 = vadd.f32 %v1208_v3, %v1207_v4  ;;  %v1224_v3 = vsel %vm18_vm0, %v1115_v40, 0.0  ;;  %v1029_v62 = vsel %vm18_vm0, %v2388_v18, 0.0 }
 0x143   :  { %v1126_v40 = vmul.f32 %v2328_v15, %v2328_v15 }
 0x144   :  { %v1016_v1 = vadd.f32 %v1015_v33, %v1014_v50  ;;  %v1211_v54 = vadd.f32 %v1210_v8, %v1209_v7  ;;  %v666_v36 = vpop.f32.mrf.mxu3  ;;  %v1031_v7 = vsel %vm18_vm0, %v1989_v56, 0.0 }
 0x145   :  { %v732_v22 = vadd.f32 %v666_v36, %v210_v31  ;;  %v1236_v31 = vsel %vm18_vm0, %v1121_v39, 0.0 }
 0x146   :  { %v1018_v20 = vadd.f32 %v1017_v19, %v1016_v1  ;;  %v1213_v63 = vadd.f32 %v1212_v51, %v1211_v54  ;;  %v1033_v1 = vsel %vm18_vm0, %v2010_v2, 0.0  ;;  %v1119_v54 = vmul.f32 %v2053_v37, %v2053_v37 }
 0x147   :  { %796 = vst.msk [vmem:[#allocation2 + $0x1f8] sm:$0xff] %vm18_vm0, %v732_v22  ;;  %v2495_v8 = vld [vmem:[#allocation2 + $0x1f0] sm:$0xff]  ;;  %v1230_v19 = vsel %vm18_vm0, %v1118_v30, 0.0  ;;  %v1039_v37 = vsel %vm18_vm0, %v2148_v23, 0.0  ;;  %v1043_v23 = vsel %vm18_vm0, %v2230_v13, 0.0 }
 0x148   :  { %v1020_v35 = vadd.f32 %v1019_v26, %v1018_v20  ;;  %v1215_v16 = vadd.f32 %v1214_v25, %v1213_v63  ;;  %933 = vst.msk [vmem:[%s2597_s2 + $0x1f0] sm:$0xff] %vm18_vm0, %v2495_v8  ;;  %v1120_v20 = vmul.f32 %v2074_v43, %v2074_v43  ;;  %v1232_v25 = vsel %vm18_vm0, %v1119_v54, 0.0 }
 0x149   :  { %v1037_v26 = vsel %vm18_vm0, %v2074_v43, 0.0  ;;  %v1041_v43 = vsel %vm18_vm0, %v2181_v60, 0.0  ;;  %v1131_v54 = vmul.f32 %v2495_v8, %v2495_v8 }
 0x14a   :  { %v1022_v44 = vadd.f32 %v1021_v12, %v1020_v35  ;;  %v1217_v27 = vadd.f32 %v1216_v14, %v1215_v16  ;;  %v1234_v14 = vsel %vm18_vm0, %v1120_v20, 0.0  ;;  %v1122_v12 = vmul.f32 %v2181_v60, %v2181_v60 }
 0x14b   :  { %v1045_v60 = vsel %vm18_vm0, %v2261_v28, 0.0 }
 0x14c   :  { %v1219_v34 = vadd.f32 %v1218_v32, %v1217_v27  ;;  %v1024_v53 = vadd.f32 %v1023_v5, %v1022_v44  ;;  %v1123_v44 = vmul.f32 %v2230_v13, %v2230_v13  ;;  %v1238_v36 = vsel %vm18_vm0, %v1122_v12, 0.0 }
 0x14d   :  { %v1124_v32 = vmul.f32 %v2261_v28, %v2261_v28  ;;  %v1047_v13 = vsel %vm18_vm0, %v2311_v46, 0.0  ;;  %v1049_v28 = vsel %vm18_vm0, %v2328_v15, 0.0  ;;  %v1053_v15 = vsel %vm18_vm0, %v2395_v58, 0.0 }
 0x14e   :  { %v1221_v49 = vadd.f32 %v1220_v11, %v1219_v34  ;;  %v1026_v38 = vadd.f32 %v1025_v41, %v1024_v53  ;;  %v2507_v56 = vld [vmem:[#allocation2 + $0x1f8] sm:$0xff]  ;;  %v1240_v22 = vsel %vm18_vm0, %v1123_v44, 0.0  ;;  %v1125_v34 = vmul.f32 %v2311_v46, %v2311_v46 }
 0x14f   :  { %934 = vst.msk [vmem:[%s2597_s2 + $0x1f8] sm:$0xff] %vm18_vm0, %v2507_v56  ;;  %v1242_v41 = vsel %vm18_vm0, %v1124_v32, 0.0  ;;  %v1051_v46 = vsel %vm18_vm0, %v2376_v10, 0.0  ;;  %v1057_v58 = vsel %vm18_vm0, %v2446_v42, 0.0 }
 0x150   :  { %v1223_v48 = vadd.f32 %v1222_v45, %v1221_v49  ;;  %v1028_v4 = vadd.f32 %v1027_v47, %v1026_v38  ;;  %v1244_v45 = vsel %vm18_vm0, %v1125_v34, 0.0  ;;  %v1127_v47 = vmul.f32 %v2376_v10, %v2376_v10 }
 0x151   :  { %v1055_v10 = vsel %vm18_vm0, %v2439_v17, 0.0 }
 0x152   :  { %v1225_v59 = vadd.f32 %v1224_v3, %v1223_v48  ;;  %v1030_v50 = vadd.f32 %v1029_v62, %v1028_v4  ;;  %v1246_v4 = vsel %vm18_vm0, %v1126_v40, 0.0 }
 0x154   :  { %v1032_v18 = vadd.f32 %v1031_v7, %v1030_v50  ;;  %v1227_v33 = vadd.f32 %v1226_v6, %v1225_v59  ;;  %v1248_v59 = vsel %vm18_vm0, %v1127_v47, 0.0  ;;  %v1129_v50 = vmul.f32 %v2439_v17, %v2439_v17 }
 0x155   :  { %v1250_v6 = vsel %vm18_vm0, %v1128_v61, 0.0  ;;  %v1059_v17 = vsel %vm18_vm0, %v2495_v8, 0.0 }
 0x156   :  { %v1034_v24 = vadd.f32 %v1033_v1, %v1032_v18  ;;  %v1229_v51 = vadd.f32 %v1228_v52, %v1227_v33  ;;  %v1130_v18 = vmul.f32 %v2446_v42, %v2446_v42  ;;  %v1252_v1 = vsel %vm18_vm0, %v1129_v50, 0.0 }
 0x157   :  { %v1061_v42 = vsel %vm18_vm0, %v2507_v56, 0.0 }
 0x158   :  { %v1036_v2 = vadd.f32 %v1035_v57, %v1034_v24  ;;  %v1231_v63 = vadd.f32 %v1230_v19, %v1229_v51  ;;  %v1254_v19 = vsel %vm18_vm0, %v1130_v18, 0.0  ;;  %v1132_v57 = vmul.f32 %v2507_v56, %v2507_v56  ;;  %v935_v56 = vld [vmem:[%s2598_s3] sm:$0x3] }
 0x15a   :  { %v1038_v35 = vadd.f32 %v1037_v26, %v1036_v2  ;;  %v1233_v16 = vadd.f32 %v1232_v25, %v1231_v63  ;;  %v1256_v63 = vsel %vm18_vm0, %v1131_v54, 0.0  ;;  %v1258_v39 = vsel %vm18_vm0, %v1132_v57, 0.0 }
 0x15c   :  { %v1040_v29 = vadd.f32 %v1039_v37, %v1038_v35  ;;  %v1235_v0 = vadd.f32 %v1234_v14, %v1233_v16 }
 0x15e   :  { %v1237_v27 = vadd.f32 %v1236_v31, %v1235_v0  ;;  %v1042_v9 = vadd.f32 %v1041_v43, %v1040_v29 }
 0x160   :  { %v1044_v5 = vadd.f32 %v1043_v23, %v1042_v9  ;;  %v1239_v21 = vadd.f32 %v1238_v36, %v1237_v27 }
 0x162   :  { %v1046_v53 = vadd.f32 %v1045_v60, %v1044_v5  ;;  %v1241_v11 = vadd.f32 %v1240_v22, %v1239_v21 }
 0x164   :  { %v1048_v49 = vadd.f32 %v1047_v13, %v1046_v53  ;;  %v1243_v38 = vadd.f32 %v1242_v41, %v1241_v11 }
 0x166   :  { %v1050_v55 = vadd.f32 %v1049_v28, %v1048_v49  ;;  %v1245_v48 = vadd.f32 %v1244_v45, %v1243_v38 }
 0x168   :  { %v1052_v3 = vadd.f32 %v1051_v46, %v1050_v55  ;;  %v1247_v62 = vadd.f32 %v1246_v4, %v1245_v48 }
 0x16a   :  { %v1054_v7 = vadd.f32 %v1053_v15, %v1052_v3  ;;  %v1249_v30 = vadd.f32 %v1248_v59, %v1247_v62 }
 0x16c   :  { %v1251_v33 = vadd.f32 %v1250_v6, %v1249_v30  ;;  %v1056_v52 = vadd.f32 %v1055_v10, %v1054_v7 }
 0x16e   :  { %v1253_v24 = vadd.f32 %v1252_v1, %v1251_v33  ;;  %v1058_v51 = vadd.f32 %v1057_v58, %v1056_v52 }
 0x170   :  { %v1255_v20 = vadd.f32 %v1254_v19, %v1253_v24  ;;  %v1060_v2 = vadd.f32 %v1059_v17, %v1058_v51 }
 0x172   :  { %v1257_v25 = vadd.f32 %v1256_v63, %v1255_v20  ;;  %v1062_v26 = vadd.f32 %v1061_v42, %v1060_v2 }
 0x174   :  { %v1063_v35 = vrot.slane %v1062_v26, 4  ;;  %v1259_v16 = vadd.f32 %v1258_v39, %v1257_v25 }
 0x176   :  { %v1064_v14 = vadd.f32 %v1063_v35, %v1062_v26  ;;  %v1260_v37 = vrot.slane %v1259_v16, 4 }
 0x178   :  { %v1065_v12 = vrot.slane %v1064_v14, 2  ;;  %v1261_v8 = vadd.f32 %v1260_v37, %v1259_v16 }
 0x17a   :  { %v1066_v29 = vadd.f32 %v1065_v12, %v1064_v14  ;;  %v1262_v0 = vrot.slane %v1261_v8, 2 }
 0x17c   :  { %v1067_v31 = vrot.slane %v1066_v29, 1  ;;  %v1263_v43 = vadd.f32 %v1262_v0, %v1261_v8 }
 0x17e   :  { %v1264_v44 = vrot.slane %v1263_v43, 1  ;;  %v1068_v27 = vadd.f32 %v1067_v31, %v1066_v29 }
 0x180   :  { %v1265_v9 = vadd.f32 %v1264_v44, %v1263_v43 }
 0x182   :  { %v1267_v36 = vsel %vm1266_vm2, %v1068_v27, %v1265_v9 }
 0x183   :  { %v1268_v23 = vadd.f32 %v1267_v36, %v935_v56 }
 0x185   :  { %1270 = vst.msk [vmem:[%s2598_s3] sm:$0x3] %vm802_vm1, %v1268_v23 }

// kernel: bottle_block_forward.9
= control target key start
LH: loop header
LB: loop body
LE: loop exit
PB: predicated region body
PF: predicated region fallthrough
CT: control target
= control target key end

     0   :  { %s2186_s15 = smov 0   ;;  %s2188_s16 = smov 0   ;;  %s3121_s0 = inlined_call_operand.vmem [shape: f32[512,64], index: 0, kind: input, shape index: {}]   ;;  %s3122_s1 = inlined_call_operand.vmem [shape: f32[2,64], index: 1, kind: input, shape index: {}]   ;;  %s3123_s2 = inlined_call_operand.vmem [shape: bf16[64,256], index: 2, kind: input, shape index: {}]   ;;  %s3124_s3 = inlined_call_operand.vmem [shape: f32[512,256], index: 3, kind: output, shape index: {0}]   ;;  %s3125_s4 = inlined_call_operand.vmem [shape: f32[2,256], index: 4, kind: output, shape index: {1}]  }
   0x1   :  { %s2190_s17 = smov 0   ;;  %s2192_s18 = smov 0  }
   0x2   :  { %s2194_s19 = smov 0  }
   0x3 LB: > { %s34_s20 = sadd.s32 1, %s2154_s18  ;;  %s1997_s21 = sadd.s32 4294967295, %s2158_s19   ;;  %s2158_s19 = sphi %s2194_s19, %s15_s19   ;;  %s2154_s18 = sphi %s2192_s18, %s3130_s18   ;;  %s2150_s17 = sphi %s2190_s17, %s3129_s17   ;;  %s2146_s16 = sphi %s2188_s16, %s3128_s16   ;;  %s2142_s15 = sphi %s2186_s15, %s3127_s15  }
   0x4   : > { %p36_p0 = scmp.ge.s32.totalorder %s34_s20, 2  ;;  %p104_p1 = scmp.ne.s32.totalorder %s2146_s16, %s2142_s15 }
   0x5   : > { %p105_p2 = scmp.eq.s32.totalorder %s2158_s19, 0  ;;  %p136_p4 = scmp.eq.s32.totalorder %s1997_s21, 1 }
   0x6   : > { %s3132_s20 = smov (%p36_p0, %s34_s20), 0  ;;  %s97_s23 = sadd.s32 1, %s2146_s16 }
   0x7   : > { %p106_p3 = por %p105_p2, %p104_p1  ;;  %s93_s22 = ssub.s32 %s2154_s18, %s3132_s20 }
   0x8   : > { %p95_p5 = scmp.eq.s32.totalorder %s93_s22, 0  ;;  %p2221_p6 = por %p136_p4, %p104_p1 }
   0x9   : > { %p2002_p7 = scmp.ge.s32.totalorder %s2158_s19, 2 }
   0xa   : > { %s2226_s25 = scalar_select %p95_p5, %s2146_s16, %s97_s23  }
   0xb   : > { %203 = sbr.rel (%p2002_p7) target bundleno = 28 (0x1c), region = 24 }
  0x10   : > { %206 = sbr.rel (!%p106_p3) target bundleno = 28 (0x1c), region = 28  ;;  %s208_s26 = sand.u32 (%p106_p3), 1, %s2146_s16  }
  0x11   : > { %s2004_s27 = sshll.u32 (%p106_p3), %s2154_s18, 2  ;;  %s2003_s28 = sshll.u32 (%p106_p3), %s208_s26, 5 }
  0x12   : > { %s215_s5 = scalar_lea.vmem (%p106_p3), %s3123_s2, %s2004_s27  ;;  %s210_s6 = scalar_lea.vmem (%p106_p3), [#allocation3], %s2003_s28 }
  0x13   : > { %v232_v0 = vld [vmem:[%s215_s5] sm:$0xf] (%p106_p3)  ;;  %v234_v1 = vld [vmem:[%s215_s5 + $0x8] sm:$0xf] (%p106_p3)  ;;  %v236_v2 = vld [vmem:[%s215_s5 + $0x10] sm:$0xf] (%p106_p3) }
  0x14   : > { %233 = vst [vmem:[%s210_s6] sm:$0xf] (%p106_p3), %v232_v0  ;;  %v238_v3 = vld [vmem:[%s215_s5 + $0x18] sm:$0xf] (%p106_p3)  ;;  %v240_v4 = vld [vmem:[%s215_s5 + $0x20] sm:$0xf] (%p106_p3) }
  0x15   : > { %235 = vst [vmem:[%s210_s6 + $0x4] sm:$0xf] %v234_v1  ;;  %v242_v5 = vld [vmem:[%s215_s5 + $0x28] sm:$0xf]  ;;  %v244_v6 = vld [vmem:[%s215_s5 + $0x30] sm:$0xf] }
  0x16   : > { %237 = vst [vmem:[%s210_s6 + $0x8] sm:$0xf] %v236_v2  ;;  %v246_v7 = vld [vmem:[%s215_s5 + $0x38] sm:$0xf] }
  0x17   : > { %239 = vst [vmem:[%s210_s6 + $0xc] sm:$0xf] %v238_v3 }
  0x18   : > { %241 = vst [vmem:[%s210_s6 + $0x10] sm:$0xf] %v240_v4 }
  0x19   : > { %243 = vst [vmem:[%s210_s6 + $0x14] sm:$0xf] %v242_v5 }
  0x1a   : > { %245 = vst [vmem:[%s210_s6 + $0x18] sm:$0xf] %v244_v6 }
  0x1b   : > { %247 = vst [vmem:[%s210_s6 + $0x1c] sm:$0xf] %v246_v7 }
  0x1c PF: > { %p2005_p8 = scmp.ge.s32.totalorder %s2158_s19, 1  ;;  %p286_p9 = scmp.lt.s32.totalorder %s2158_s19, 3 }
  0x1e   : > { %p287_p10 = pnand %p2005_p8, %p286_p9 }
  0x1f   : > { %s293_s7 = sand.u32 (!%p287_p10), 1, %s2142_s15   ;;  %p348_p11 = scmp.lt.s32.totalorder (!%p287_p10), %s2150_s17, 1 }
  0x20   : > { %290 = sbr.rel (%p287_p10) target bundleno = 456 (0x1c8), region = 69  ;;  %s2006_s10 = sshll.u32 (!%p287_p10), %s293_s7, 5 }
  0x21   : > { %s295_s11 = scalar_lea.vmem (!%p287_p10), [#allocation3], %s2006_s10  ;;  %s2007_s30 = sshll.u32 (!%p287_p10), %s293_s7, 9 }
  0x22   : > { %s2576_s15 = scalar_lea.vmem (!%p287_p10), [#allocation4], %s2007_s30 }
  0x25   : > { %v421_v8 = vld [vmem:[%s3122_s1] sm:$0x3]  ;;  %v2064_v10 = vld [vmem:[%s295_s11 + $0x18] sm:$0xff]  ;;  %v2063_v12 = vld [vmem:[%s295_s11 + $0x10] sm:$0xff]  ;;  %vm826_vm3 = vcmask 523264   ;;  %s349_s29 = scalar_select %p348_p11, %s2150_s17, 1 }
  0x26   : > { %v422_v9 = vmul.f32 0.001953125, %v421_v8  ;;  %927 = vmatpush.bf16.msra.mxu0 %v2064_v10  ;;  %2065 = vmatpush.bf16.msra.mxu1 %v2064_v10  ;;  %v2062_v15 = vld [vmem:[%s295_s11 + $0x8] sm:$0xff]  ;;  %v2061_v18 = vld [vmem:[%s295_s11] sm:$0xff]  ;;  %v442_v42 = vld [vmem:[%s3121_s0 + $0x10] sm:$0xff]  ;;  %vm1560_vm4 = vcmask 1040384   ;;  %s2058_s9 = sshll.u32 (%p2221_p6), %s2150_s17, 3 }
  0x27   : > { %2066 = vmatpush.bf16.msra.mxu2 %v2064_v10  ;;  %2067 = vmatpush.bf16.msra.mxu3 %v2064_v10  ;;  %v440_v25 = vld [vmem:[%s3121_s0] sm:$0xff]  ;;  %v441_v26 = vld [vmem:[%s3121_s0 + $0x8] sm:$0xff]  ;;  %v443_v43 = vld [vmem:[%s3121_s0 + $0x18] sm:$0xff]  ;;  %s2008_s30 = sshll.u32 %s349_s29, 1  ;;  %s2978_s12 = scalar_lea.vmem (%p2221_p6), %s3124_s3, %s2058_s9 }
  0x28   : > { %v423_v11 = vmul.f32 %v422_v9, %v422_v9  ;;  %v2242_v23 = vperm.slane %v422_v9, 0  ;;  %v456_v27 = vld [vmem:[%s3121_s0 + $0x80] sm:$0xff]  ;;  %v457_v28 = vld [vmem:[%s3121_s0 + $0x88] sm:$0xff]  ;;  %v458_v48 = vld [vmem:[%s3121_s0 + $0x90] sm:$0xff]  ;;  %s2914_s8 = scalar_lea.vmem %s3125_s4, %s2008_s30 }
  0x29   : > { %v459_v49 = vld [vmem:[%s3121_s0 + $0x98] sm:$0xff]  ;;  %v472_v62 = vld [vmem:[%s3121_s0 + $0x100] sm:$0xff]  ;;  %v473_v63 = vld [vmem:[%s3121_s0 + $0x108] sm:$0xff] }
  0x2a   : > { %v425_v13 = vrot.slane %v423_v11, 7  ;;  %928 = vmatpush.bf16.msra.mxu0 %v2063_v12  ;;  %2068 = vmatpush.bf16.msra.mxu1 %v2063_v12  ;;  %v505_v30 = vsub.f32 %v440_v25, %v2242_v23  ;;  %v506_v31 = vsub.f32 %v441_v26, %v2242_v23  ;;  %v521_v33 = vsub.f32 %v456_v27, %v2242_v23  ;;  %v444_v5 = vld [vmem:[%s3121_s0 + $0x20] sm:$0xff]  ;;  %v445_v6 = vld [vmem:[%s3121_s0 + $0x28] sm:$0xff]  ;;  %v474_v26 = vld [vmem:[%s3121_s0 + $0x110] sm:$0xff] }
  0x2b   : > { %2069 = vmatpush.bf16.msra.mxu2 %v2063_v12  ;;  %2070 = vmatpush.bf16.msra.mxu3 %v2063_v12  ;;  %v522_v34 = vsub.f32 %v457_v28, %v2242_v23  ;;  %v507_v50 = vsub.f32 %v442_v42, %v2242_v23  ;;  %v508_v51 = vsub.f32 %v443_v43, %v2242_v23  ;;  %v460_v10 = vld [vmem:[%s3121_s0 + $0xa0] sm:$0xff]  ;;  %v461_v11 = vld [vmem:[%s3121_s0 + $0xa8] sm:$0xff]  ;;  %v475_v27 = vld [vmem:[%s3121_s0 + $0x118] sm:$0xff] }
  0x2c   : > { %v427_v14 = vsub.f32 %v422_v9, %v425_v13  ;;  %v523_v52 = vsub.f32 %v458_v48, %v2242_v23  ;;  %v524_v53 = vsub.f32 %v459_v49, %v2242_v23  ;;  %v537_v0 = vsub.f32 %v472_v62, %v2242_v23 }
  0x2d   : > { %v538_v1 = vsub.f32 %v473_v63, %v2242_v23  ;;  %v509_v12 = vsub.f32 %v444_v5, %v2242_v23  ;;  %v510_v13 = vsub.f32 %v445_v6, %v2242_v23  ;;  %v539_v28 = vsub.f32 %v474_v26, %v2242_v23 }
  0x2e   : > { %v428_v16 = vmax.f32 %v427_v14, 0.0  ;;  %929 = vmatpush.bf16.msra.mxu0 %v2062_v15  ;;  %2071 = vmatpush.bf16.msra.mxu1 %v2062_v15 }
  0x2f   : > { %2072 = vmatpush.bf16.msra.mxu2 %v2062_v15  ;;  %2073 = vmatpush.bf16.msra.mxu3 %v2062_v15  ;;  %v525_v15 = vsub.f32 %v460_v10, %v2242_v23  ;;  %v464_v10 = vld [vmem:[%s3121_s0 + $0xc0] sm:$0xff] }
  0x30   : > { %v429_v17 = vadd.f32 1e-05, %v428_v16  ;;  %v526_v16 = vsub.f32 %v461_v11, %v2242_v23  ;;  %v465_v11 = vld [vmem:[%s3121_s0 + $0xc8] sm:$0xff] }
  0x32   : > { %2118 = vrsqrt.f32 %v429_v17  ;;  %930 = vmatpush.bf16.msra.mxu0 %v2061_v18  ;;  %2074 = vmatpush.bf16.msra.mxu1 %v2061_v18  ;;  %vm436_vm0 = vweird.f32 %v429_v17 }
  0x33   : > { %2075 = vmatpush.bf16.msra.mxu2 %v2061_v18  ;;  %2076 = vmatpush.bf16.msra.mxu3 %v2061_v18 }
  0x38   : > { %v2119_v19 = vpop.eup %2118 }
  0x39   : > { %v431_v20 = vmul.f32 %v2119_v19, %v429_v17  ;;  %vm437_vm1 = vweird.f32 %v2119_v19 }
  0x3a   : > { %vm438_vm2 = vmor %vm436_vm0, %vm437_vm1 }
  0x3b   : > { %v432_v21 = vmul.f32 %v2119_v19, %v431_v20 }
  0x3d   : > { %v433_v22 = vmul.f32 0.5, %v432_v21 }
  0x3f   : > { %v434_v24 = vsub.f32 1.5, %v433_v22 }
  0x41   : > { %v435_v29 = vmul.f32 %v2119_v19, %v434_v24 }
  0x43   : > { %v439_v32 = vsel %vm438_vm2, %v2119_v19, %v435_v29  ;;  %v540_v29 = vsub.f32 %v475_v27, %v2242_v23  ;;  %v478_v27 = vld [vmem:[%s3121_s0 + $0x130] sm:$0xff] }
  0x44   : > { %v2260_v35 = vperm.slane %v439_v32, 1 }
  0x46   : > { %v570_v36 = vmul.f32 %v2260_v35, %v505_v30  ;;  %v571_v37 = vmul.f32 %v2260_v35, %v506_v31  ;;  %v586_v38 = vmul.f32 %v2260_v35, %v521_v33  ;;  %v587_v39 = vmul.f32 %v2260_v35, %v522_v34  ;;  %v446_v33 = vld [vmem:[%s3121_s0 + $0x30] sm:$0xff]  ;;  %v447_v34 = vld [vmem:[%s3121_s0 + $0x38] sm:$0xff] }
  0x47   : > { %v572_v54 = vmul.f32 %v2260_v35, %v507_v50  ;;  %v573_v55 = vmul.f32 %v2260_v35, %v508_v51  ;;  %v588_v56 = vmul.f32 %v2260_v35, %v523_v52  ;;  %v589_v57 = vmul.f32 %v2260_v35, %v524_v53 }
  0x48   : > { %v634_v40 = vmax.f32 %v570_v36, 0.0  ;;  %v635_v41 = vmax.f32 %v571_v37, 0.0  ;;  %v650_v44 = vmax.f32 %v586_v38, 0.0  ;;  %v651_v45 = vmax.f32 %v587_v39, 0.0  ;;  %v462_v39 = vld [vmem:[%s3121_s0 + $0xb0] sm:$0xff] }
  0x49   : > { %v636_v58 = vmax.f32 %v572_v54, 0.0  ;;  %v637_v59 = vmax.f32 %v573_v55, 0.0  ;;  %v652_v60 = vmax.f32 %v588_v56, 0.0  ;;  %v653_v61 = vmax.f32 %v589_v57, 0.0  ;;  %v476_v54 = vld [vmem:[%s3121_s0 + $0x120] sm:$0xff]  ;;  %v477_v55 = vld [vmem:[%s3121_s0 + $0x128] sm:$0xff] }
  0x4a   : > { %v698_v46 = vpack.c.bf16 %v635_v41, %v634_v40  ;;  %v706_v47 = vpack.c.bf16 %v651_v45, %v650_v44  ;;  %v602_v3 = vmul.f32 %v2260_v35, %v537_v0  ;;  %v603_v4 = vmul.f32 %v2260_v35, %v538_v1  ;;  %v463_v40 = vld [vmem:[%s3121_s0 + $0xb8] sm:$0xff]  ;;  %v488_v56 = vld [vmem:[%s3121_s0 + $0x180] sm:$0xff] }
  0x4b   : > { %v699_v2 = vpack.c.bf16 %v637_v59, %v636_v58  ;;  %v707_v7 = vpack.c.bf16 %v653_v61, %v652_v60  ;;  %v574_v17 = vmul.f32 %v2260_v35, %v509_v12  ;;  %v575_v18 = vmul.f32 %v2260_v35, %v510_v13  ;;  %v489_v59 = vld [vmem:[%s3121_s0 + $0x188] sm:$0xff] }
  0x4c   : > { %2025 = vmatmul.msk.bf16.vlgmr.msra.gmra.mxu0 %vm826_vm3, %v698_v46  ;;  %2033 = vmatmul.msk.bf16.vlgmr.msra.gmra.mxu1 %vm826_vm3, %v706_v47  ;;  %v666_v8 = vmax.f32 %v602_v3, 0.0  ;;  %v667_v9 = vmax.f32 %v603_v4, 0.0  ;;  %v590_v19 = vmul.f32 %v2260_v35, %v525_v15  ;;  %v591_v20 = vmul.f32 %v2260_v35, %v526_v16  ;;  %v449_v3 = vld [vmem:[%s3121_s0 + $0x48] sm:$0xff] }
  0x4d   : > { %v638_v21 = vmax.f32 %v574_v17, 0.0  ;;  %v639_v22 = vmax.f32 %v575_v18, 0.0  ;;  %v604_v31 = vmul.f32 %v2260_v35, %v539_v28  ;;  %v605_v32 = vmul.f32 %v2260_v35, %v540_v29  ;;  %v479_v28 = vld [vmem:[%s3121_s0 + $0x138] sm:$0xff]  ;;  %v490_v29 = vld [vmem:[%s3121_s0 + $0x190] sm:$0xff] }
  0x4e   : > { %v714_v14 = vpack.c.bf16 %v667_v9, %v666_v8  ;;  %v654_v24 = vmax.f32 %v590_v19, 0.0  ;;  %v655_v25 = vmax.f32 %v591_v20, 0.0  ;;  %v511_v41 = vsub.f32 %v446_v33, %v2242_v23 }
  0x4f   : > { %v700_v30 = vpack.c.bf16 %v639_v22, %v638_v21  ;;  %v668_v37 = vmax.f32 %v604_v31, 0.0  ;;  %v669_v38 = vmax.f32 %v605_v32, 0.0  ;;  %v512_v42 = vsub.f32 %v447_v34, %v2242_v23  ;;  %v491_v32 = vld [vmem:[%s3121_s0 + $0x198] sm:$0xff] }
  0x50   : > { %2041 = vmatmul.msk.bf16.vlgmr.msra.gmra.mxu2 %vm826_vm3, %v714_v14  ;;  %v708_v36 = vpack.c.bf16 %v655_v25, %v654_v24  ;;  %v527_v44 = vsub.f32 %v462_v39, %v2242_v23  ;;  %v528_v45 = vsub.f32 %v463_v40, %v2242_v23  ;;  %v576_v46 = vmul.f32 %v2260_v35, %v511_v41  ;;  %v450_v40 = vld [vmem:[%s3121_s0 + $0x50] sm:$0xff]  ;;  %v451_v41 = vld [vmem:[%s3121_s0 + $0x58] sm:$0xff] }
  0x51   : > { %v715_v43 = vpack.c.bf16 %v669_v38, %v668_v37  ;;  %v577_v47 = vmul.f32 %v2260_v35, %v512_v42  ;;  %v541_v57 = vsub.f32 %v476_v54, %v2242_v23  ;;  %v542_v58 = vsub.f32 %v477_v55, %v2242_v23 }
  0x52   : > { %v592_v48 = vmul.f32 %v2260_v35, %v527_v44  ;;  %v593_v49 = vmul.f32 %v2260_v35, %v528_v45  ;;  %v640_v50 = vmax.f32 %v576_v46, 0.0  ;;  %v553_v60 = vsub.f32 %v488_v56, %v2242_v23 }
  0x53   : > { %v641_v51 = vmax.f32 %v577_v47, 0.0  ;;  %v554_v61 = vsub.f32 %v489_v59, %v2242_v23  ;;  %v606_v63 = vmul.f32 %v2260_v35, %v541_v57  ;;  %v607_v0 = vmul.f32 %v2260_v35, %v542_v58 }
  0x54   : > { %v656_v52 = vmax.f32 %v592_v48, 0.0  ;;  %v657_v53 = vmax.f32 %v593_v49, 0.0  ;;  %v618_v1 = vmul.f32 %v2260_v35, %v553_v60  ;;  %v514_v13 = vsub.f32 %v449_v3, %v2242_v23  ;;  %v466_v48 = vld [vmem:[%s3121_s0 + $0xd0] sm:$0xff]  ;;  %v467_v49 = vld [vmem:[%s3121_s0 + $0xd8] sm:$0xff] }
  0x55   : > { %v701_v62 = vpack.c.bf16 %v641_v51, %v640_v50  ;;  %v619_v5 = vmul.f32 %v2260_v35, %v554_v61  ;;  %v670_v6 = vmax.f32 %v606_v63, 0.0  ;;  %v529_v16 = vsub.f32 %v464_v10, %v2242_v23 }
  0x56   : > { %v709_v4 = vpack.c.bf16 %v657_v53, %v656_v52  ;;  %v682_v8 = vmax.f32 %v618_v1, 0.0  ;;  %v530_v17 = vsub.f32 %v465_v11, %v2242_v23  ;;  %v579_v19 = vmul.f32 %v2260_v35, %v514_v13  ;;  %v481_v1 = vld [vmem:[%s3121_s0 + $0x148] sm:$0xff] }
  0x57   : > { %v683_v9 = vmax.f32 %v619_v5, 0.0  ;;  %v594_v20 = vmul.f32 %v2260_v35, %v529_v16  ;;  %v544_v31 = vsub.f32 %v479_v28, %v2242_v23  ;;  %v555_v33 = vsub.f32 %v490_v29, %v2242_v23  ;;  %v493_v5 = vld [vmem:[%s3121_s0 + $0x1a8] sm:$0xff] }
  0x58   : > { %v595_v21 = vmul.f32 %v2260_v35, %v530_v17  ;;  %v643_v24 = vmax.f32 %v579_v19, 0.0  ;;  %v556_v34 = vsub.f32 %v491_v32, %v2242_v23  ;;  %v515_v50 = vsub.f32 %v450_v40, %v2242_v23  ;;  %v453_v13 = vld [vmem:[%s3121_s0 + $0x68] sm:$0xff]  ;;  %v494_v40 = vld [vmem:[%s3121_s0 + $0x1b0] sm:$0xff] }
  0x59   : > { %v722_v15 = vpack.c.bf16 %v683_v9, %v682_v8  ;;  %v658_v25 = vmax.f32 %v594_v20, 0.0  ;;  %v609_v38 = vmul.f32 %v2260_v35, %v544_v31  ;;  %v620_v39 = vmul.f32 %v2260_v35, %v555_v33  ;;  %v468_v20 = vld [vmem:[%s3121_s0 + $0xe0] sm:$0xff] }
  0x5a   : > { %v659_v26 = vmax.f32 %v595_v21, 0.0  ;;  %v516_v51 = vsub.f32 %v451_v41, %v2242_v23  ;;  %v531_v54 = vsub.f32 %v466_v48, %v2242_v23  ;;  %v532_v55 = vsub.f32 %v467_v49, %v2242_v23  ;;  %v469_v21 = vld [vmem:[%s3121_s0 + $0xe8] sm:$0xff] }
  0x5b   : > { %2049 = vmatmul.msk.bf16.vlgmr.msra.gmra.mxu3 %vm826_vm3, %v722_v15  ;;  %v673_v45 = vmax.f32 %v609_v38, 0.0  ;;  %v684_v46 = vmax.f32 %v620_v39, 0.0  ;;  %v580_v56 = vmul.f32 %v2260_v35, %v515_v50  ;;  %v534_v28 = vsub.f32 %v469_v21, %v2242_v23  ;;  %v482_v38 = vld [vmem:[%s3121_s0 + $0x150] sm:$0xff]  ;;  %v483_v39 = vld [vmem:[%s3121_s0 + $0x158] sm:$0xff] }
  0x5c   : > { %2026 = vmatmul.msk.bf16.gmra.mxu0 %vm826_vm3, %v699_v2  ;;  %2034 = vmatmul.msk.bf16.gmra.mxu1 %vm826_vm3, %v707_v7  ;;  %v448_v2 = vld [vmem:[%s3121_s0 + $0x40] sm:$0xff]  ;;  %v671_v7 = vmax.f32 %v607_v0, 0.0  ;;  %v710_v42 = vpack.c.bf16 %v659_v26, %v658_v25  ;;  %v581_v57 = vmul.f32 %v2260_v35, %v516_v51  ;;  %v596_v58 = vmul.f32 %v2260_v35, %v531_v54  ;;  %v454_v50 = vld [vmem:[%s3121_s0 + $0x70] sm:$0xff]  ;;  %v455_v51 = vld [vmem:[%s3121_s0 + $0x78] sm:$0xff] }
  0x5d   : > { %v513_v12 = vsub.f32 %v448_v2, %v2242_v23  ;;  %v597_v59 = vmul.f32 %v2260_v35, %v532_v55  ;;  %v644_v60 = vmax.f32 %v580_v56, 0.0  ;;  %v480_v0 = vld [vmem:[%s3121_s0 + $0x140] sm:$0xff]  ;;  %v599_v32 = vmul.f32 %v2260_v35, %v534_v28 }
  0x5e   : > { %v716_v14 = vpack.c.bf16 %v671_v7, %v670_v6  ;;  %v645_v61 = vmax.f32 %v581_v57, 0.0  ;;  %v492_v2 = vld [vmem:[%s3121_s0 + $0x1a0] sm:$0xff]  ;;  %v545_v3 = vsub.f32 %v480_v0, %v2242_v23  ;;  %v558_v7 = vsub.f32 %v493_v5, %v2242_v23 }
  0x5f   : > { %v578_v18 = vmul.f32 %v2260_v35, %v513_v12  ;;  %v661_v63 = vmax.f32 %v597_v59, 0.0  ;;  %v557_v6 = vsub.f32 %v492_v2, %v2242_v23  ;;  %v452_v12 = vld [vmem:[%s3121_s0 + $0x60] sm:$0xff]  ;;  %v547_v41 = vsub.f32 %v482_v38, %v2242_v23  ;;  %v471_v59 = vld [vmem:[%s3121_s0 + $0xf8] sm:$0xff] }
  0x60   : > { %2042 = vmatmul.msk.bf16.gmra.mxu2 %vm826_vm3, %v715_v43  ;;  %v621_v43 = vmul.f32 %v2260_v35, %v556_v34  ;;  %v703_v8 = vpack.c.bf16 %v645_v61, %v644_v60  ;;  %v610_v9 = vmul.f32 %v2260_v35, %v545_v3  ;;  %v623_v15 = vmul.f32 %v2260_v35, %v558_v7 }
  0x61   : > { %v642_v22 = vmax.f32 %v578_v18, 0.0  ;;  %v622_v11 = vmul.f32 %v2260_v35, %v557_v6  ;;  %v519_v60 = vsub.f32 %v454_v50, %v2242_v23  ;;  %v520_v61 = vsub.f32 %v455_v51, %v2242_v23 }
  0x62   : > { %v685_v47 = vmax.f32 %v621_v43, 0.0  ;;  %v674_v16 = vmax.f32 %v610_v9, 0.0  ;;  %v687_v19 = vmax.f32 %v623_v15, 0.0  ;;  %v495_v43 = vld [vmem:[%s3121_s0 + $0x1b8] sm:$0xff]  ;;  %v497_v15 = vld [vmem:[%s3121_s0 + $0x1c8] sm:$0xff] }
  0x63   : > { %v686_v18 = vmax.f32 %v622_v11, 0.0  ;;  %v584_v2 = vmul.f32 %v2260_v35, %v519_v60  ;;  %v585_v3 = vmul.f32 %v2260_v35, %v520_v61  ;;  %v485_v11 = vld [vmem:[%s3121_s0 + $0x168] sm:$0xff] }
  0x64   : > { %v723_v53 = vpack.c.bf16 %v685_v47, %v684_v46  ;;  %v612_v47 = vmul.f32 %v2260_v35, %v547_v41 }
  0x65   : > { %v724_v26 = vpack.c.bf16 %v687_v19, %v686_v18  ;;  %v648_v6 = vmax.f32 %v584_v2, 0.0  ;;  %v649_v7 = vmax.f32 %v585_v3, 0.0 }
  0x66   : > { %v676_v54 = vmax.f32 %v612_v47, 0.0 }
  0x67   : > { %v705_v18 = vpack.c.bf16 %v649_v7, %v648_v6 }
  0x6b   : > { %2050 = vmatmul.msk.bf16.gmra.mxu3 %vm826_vm3, %v723_v53 }
  0x6c   : > { %2027 = vmatmul.msk.bf16.gmra.mxu0 %vm826_vm3, %v700_v30  ;;  %2035 = vmatmul.msk.bf16.gmra.mxu1 %vm826_vm3, %v708_v36  ;;  %v543_v30 = vsub.f32 %v478_v27, %v2242_v23  ;;  %v702_v36 = vpack.c.bf16 %v643_v24, %v642_v22  ;;  %v517_v22 = vsub.f32 %v452_v12, %v2242_v23  ;;  %v496_v12 = vld [vmem:[%s3121_s0 + $0x1c0] sm:$0xff] }
  0x6d   : > { %v518_v24 = vsub.f32 %v453_v13, %v2242_v23  ;;  %v533_v27 = vsub.f32 %v468_v20, %v2242_v23 }
  0x6e   : > { %v608_v37 = vmul.f32 %v2260_v35, %v543_v30  ;;  %v582_v29 = vmul.f32 %v2260_v35, %v517_v22 }
  0x6f   : > { %v583_v30 = vmul.f32 %v2260_v35, %v518_v24  ;;  %v598_v31 = vmul.f32 %v2260_v35, %v533_v27 }
  0x70   : > { %2043 = vmatmul.msk.bf16.gmra.mxu2 %vm826_vm3, %v716_v14  ;;  %v672_v44 = vmax.f32 %v608_v37, 0.0  ;;  %v646_v33 = vmax.f32 %v582_v29, 0.0  ;;  %v663_v37 = vmax.f32 %v599_v32, 0.0  ;;  %v487_v32 = vld [vmem:[%s3121_s0 + $0x178] sm:$0xff] }
  0x71   : > { %v647_v34 = vmax.f32 %v583_v30, 0.0 }
  0x72   : > { %v717_v52 = vpack.c.bf16 %v673_v45, %v672_v44  ;;  %v559_v44 = vsub.f32 %v494_v40, %v2242_v23  ;;  %v560_v45 = vsub.f32 %v495_v43, %v2242_v23 }
  0x73   : > { %v704_v46 = vpack.c.bf16 %v647_v34, %v646_v33  ;;  %v498_v33 = vld [vmem:[%s3121_s0 + $0x1d0] sm:$0xff] }
  0x74   : > { %v624_v49 = vmul.f32 %v2260_v35, %v559_v44  ;;  %v625_v53 = vmul.f32 %v2260_v35, %v560_v45  ;;  %v563_v38 = vsub.f32 %v498_v33, %v2242_v23 }
  0x76   : > { %v688_v56 = vmax.f32 %v624_v49, 0.0  ;;  %v689_v57 = vmax.f32 %v625_v53, 0.0 }
  0x7b   : > { %2051 = vmatmul.msk.bf16.gmra.mxu3 %vm826_vm3, %v724_v26 }
  0x7c   : > { %2028 = vmatmul.msk.bf16.gmra.mxu0 %vm826_vm3, %v701_v62  ;;  %2036 = vmatmul.msk.bf16.gmra.mxu1 %vm826_vm3, %v709_v4  ;;  %v660_v62 = vmax.f32 %v596_v58, 0.0  ;;  %v546_v4 = vsub.f32 %v481_v1, %v2242_v23  ;;  %v470_v58 = vld [vmem:[%s3121_s0 + $0xf0] sm:$0xff]  ;;  %v536_v1 = vsub.f32 %v471_v59, %v2242_v23  ;;  %v501_v59 = vld [vmem:[%s3121_s0 + $0x1e8] sm:$0xff] }
  0x7d   : > { %v535_v0 = vsub.f32 %v470_v58, %v2242_v23  ;;  %v500_v58 = vld [vmem:[%s3121_s0 + $0x1e0] sm:$0xff]  ;;  %v566_v61 = vsub.f32 %v501_v59, %v2242_v23 }
  0x7e   : > { %v611_v10 = vmul.f32 %v2260_v35, %v546_v4  ;;  %v711_v14 = vpack.c.bf16 %v661_v63, %v660_v62  ;;  %v725_v63 = vpack.c.bf16 %v689_v57, %v688_v56  ;;  %v601_v5 = vmul.f32 %v2260_v35, %v536_v1 }
  0x7f   : > { %v600_v4 = vmul.f32 %v2260_v35, %v535_v0  ;;  %v565_v60 = vsub.f32 %v500_v58, %v2242_v23 }
  0x80   : > { %2044 = vmatmul.msk.bf16.gmra.mxu2 %vm826_vm3, %v717_v52  ;;  %v675_v17 = vmax.f32 %v611_v10, 0.0  ;;  %v665_v9 = vmax.f32 %v601_v5, 0.0  ;;  %v484_v10 = vld [vmem:[%s3121_s0 + $0x160] sm:$0xff] }
  0x81   : > { %v549_v13 = vsub.f32 %v484_v10, %v2242_v23 }
  0x82   : > { %v718_v25 = vpack.c.bf16 %v675_v17, %v674_v16  ;;  %v561_v16 = vsub.f32 %v496_v12, %v2242_v23  ;;  %v562_v17 = vsub.f32 %v497_v15, %v2242_v23  ;;  %v503_v15 = vld [vmem:[%s3121_s0 + $0x1f8] sm:$0xff] }
  0x83   : > { %v614_v19 = vmul.f32 %v2260_v35, %v549_v13 }
  0x84   : > { %v626_v21 = vmul.f32 %v2260_v35, %v561_v16  ;;  %v627_v24 = vmul.f32 %v2260_v35, %v562_v17  ;;  %v568_v17 = vsub.f32 %v503_v15, %v2242_v23 }
  0x86   : > { %v690_v27 = vmax.f32 %v626_v21, 0.0  ;;  %v691_v28 = vmax.f32 %v627_v24, 0.0 }
  0x88   : > { %v726_v30 = vpack.c.bf16 %v691_v28, %v690_v27 }
  0x8b   : > { %2052 = vmatmul.msk.bf16.gmra.mxu3 %vm826_vm3, %v725_v63  ;;  %v631_v63 = vmul.f32 %v2260_v35, %v566_v61 }
  0x8c   : > { %2029 = vmatmul.msk.bf16.gmra.mxu0 %vm826_vm3, %v702_v36  ;;  %2037 = vmatmul.msk.bf16.gmra.mxu1 %vm826_vm3, %v710_v42  ;;  %v662_v36 = vmax.f32 %v598_v31, 0.0  ;;  %v548_v42 = vsub.f32 %v483_v39, %v2242_v23  ;;  %v486_v31 = vld [vmem:[%s3121_s0 + $0x170] sm:$0xff] }
  0x8d   : > { %v551_v34 = vsub.f32 %v486_v31, %v2242_v23  ;;  %v695_v5 = vmax.f32 %v631_v63, 0.0 }
  0x8e   : > { %v613_v48 = vmul.f32 %v2260_v35, %v548_v42  ;;  %v712_v52 = vpack.c.bf16 %v663_v37, %v662_v36  ;;  %v552_v36 = vsub.f32 %v487_v32, %v2242_v23  ;;  %v499_v37 = vld [vmem:[%s3121_s0 + $0x1d8] sm:$0xff]  ;;  %v628_v42 = vmul.f32 %v2260_v35, %v563_v38 }
  0x8f   : > { %v564_v39 = vsub.f32 %v499_v37, %v2242_v23  ;;  %v616_v40 = vmul.f32 %v2260_v35, %v551_v34 }
  0x90   : > { %2045 = vmatmul.msk.bf16.gmra.mxu2 %vm826_vm3, %v718_v25  ;;  %v677_v55 = vmax.f32 %v613_v48, 0.0  ;;  %v678_v25 = vmax.f32 %v614_v19, 0.0  ;;  %v617_v41 = vmul.f32 %v2260_v35, %v552_v36  ;;  %v692_v48 = vmax.f32 %v628_v42, 0.0 }
  0x91   : > { %v629_v44 = vmul.f32 %v2260_v35, %v564_v39  ;;  %v633_v19 = vmul.f32 %v2260_v35, %v568_v17 }
  0x92   : > { %v719_v62 = vpack.c.bf16 %v677_v55, %v676_v54  ;;  %v681_v47 = vmax.f32 %v617_v41, 0.0 }
  0x93   : > { %v693_v49 = vmax.f32 %v629_v44, 0.0 }
  0x95   : > { %v727_v51 = vpack.c.bf16 %v693_v49, %v692_v48 }
  0x9b   : > { %2053 = vmatmul.msk.bf16.gmra.mxu3 %vm826_vm3, %v726_v30 }
  0x9c   : > { %2030 = vmatmul.msk.bf16.gmra.mxu0 %vm826_vm3, %v703_v8  ;;  %2038 = vmatmul.msk.bf16.gmra.mxu1 %vm826_vm3, %v711_v14  ;;  %v664_v8 = vmax.f32 %v600_v4, 0.0  ;;  %v550_v14 = vsub.f32 %v485_v11, %v2242_v23 }
  0x9e   : > { %v615_v20 = vmul.f32 %v2260_v35, %v550_v14  ;;  %v713_v22 = vpack.c.bf16 %v665_v9, %v664_v8  ;;  %v502_v14 = vld [vmem:[%s3121_s0 + $0x1f0] sm:$0xff] }
  0x9f   : > { %v567_v16 = vsub.f32 %v502_v14, %v2242_v23  ;;  %v697_v23 = vmax.f32 %v633_v19, 0.0 }
  0xa0   : > { %2046 = vmatmul.msk.bf16.gmra.mxu2 %vm826_vm3, %v719_v62  ;;  %v679_v26 = vmax.f32 %v615_v20, 0.0  ;;  %v630_v62 = vmul.f32 %v2260_v35, %v565_v60 }
  0xa2   : > { %v720_v29 = vpack.c.bf16 %v679_v26, %v678_v25  ;;  %v694_v4 = vmax.f32 %v630_v62, 0.0 }
  0xa4   : > { %v728_v7 = vpack.c.bf16 %v695_v5, %v694_v4 }
  0xab   : > { %2054 = vmatmul.msk.bf16.gmra.mxu3 %vm826_vm3, %v727_v51 }
  0xac   : > { %2031 = vmatmul.msk.bf16.gmra.mxu0 %vm826_vm3, %v704_v46  ;;  %2039 = vmatmul.msk.bf16.gmra.mxu1 %vm826_vm3, %v712_v52  ;;  %v680_v46 = vmax.f32 %v616_v40, 0.0 }
  0xae   : > { %v721_v50 = vpack.c.bf16 %v681_v47, %v680_v46 }
  0xb0   : > { %2047 = vmatmul.msk.bf16.gmra.mxu2 %vm826_vm3, %v720_v29 }
  0xbb   : > { %2055 = vmatmul.msk.bf16.gmra.mxu3 %vm826_vm3, %v728_v7 }
  0xbc   : > { %2032 = vmatmul.msk.bf16.gmra.mxu0 %vm826_vm3, %v705_v18  ;;  %2040 = vmatmul.msk.bf16.gmra.mxu1 %vm826_vm3, %v713_v22  ;;  %v632_v18 = vmul.f32 %v2260_v35, %v567_v16 }
  0xbe   : > { %v696_v26 = vmax.f32 %v632_v18, 0.0 }
  0xc0   : > { %2048 = vmatmul.msk.bf16.gmra.mxu2 %vm826_vm3, %v721_v50  ;;  %v729_v27 = vpack.c.bf16 %v697_v23, %v696_v26 }
  0xc9   : > { %v932_v43 = vpop.f32.mrf.mxu0  ;;  %v2579_v45 = vpop.f32.mrf.mxu1 }
  0xca   : > { %1293 = vst [vmem:[%s2576_s15] sm:$0xff] %v932_v43  ;;  %v1427_v53 = vmul.f32 %v932_v43, %v932_v43 }
  0xcb   : > { %1309 = vst [vmem:[%s2576_s15 + $0x80] sm:$0xff] %v2579_v45  ;;  %2056 = vmatmul.msk.bf16.gmra.mxu3 %vm826_vm3, %v729_v27 }
  0xd1   : > { %v934_v52 = vpop.f32.mrf.mxu0  ;;  %v2586_v56 = vpop.f32.mrf.mxu1 }
  0xd2   : > { %1294 = vst [vmem:[%s2576_s15 + $0x8] sm:$0xff] %v934_v52  ;;  %v1358_v54 = vadd.f32 %v934_v52, %v932_v43  ;;  %v1428_v55 = vmul.f32 %v934_v52, %v934_v52 }
  0xd3   : > { %1310 = vst [vmem:[%s2576_s15 + $0x88] sm:$0xff] %v2586_v56  ;;  %v2606_v9 = vpop.f32.mrf.mxu2 }
  0xd4   : > { %v1491_v57 = vadd.f32 %v1428_v55, %v1427_v53  ;;  %1325 = vst [vmem:[%s2576_s15 + $0x100] sm:$0xff] %v2606_v9 }
  0xd9   : > { %v937_v0 = vpop.f32.mrf.mxu0  ;;  %v2601_v3 = vpop.f32.mrf.mxu1 }
  0xda   : > { %1295 = vst [vmem:[%s2576_s15 + $0x10] sm:$0xff] %v937_v0  ;;  %v1359_v1 = vadd.f32 %v1358_v54, %v937_v0  ;;  %v1429_v2 = vmul.f32 %v937_v0, %v937_v0 }
  0xdb   : > { %1311 = vst [vmem:[%s2576_s15 + $0x90] sm:$0xff] %v2601_v3  ;;  %v2625_v21 = vpop.f32.mrf.mxu2 }
  0xdc   : > { %v1492_v6 = vadd.f32 %v1491_v57, %v1429_v2  ;;  %1326 = vst [vmem:[%s2576_s15 + $0x108] sm:$0xff] %v2625_v21 }
  0xde   : > { %v2662_v38 = vpop.f32.mrf.mxu3 }
  0xdf   : > { %1341 = vst [vmem:[%s2576_s15 + $0x180] sm:$0xff] %v2662_v38 }
  0xe1   : > { %v939_v8 = vpop.f32.mrf.mxu0  ;;  %v2609_v12 = vpop.f32.mrf.mxu1 }
  0xe2   : > { %1296 = vst [vmem:[%s2576_s15 + $0x18] sm:$0xff] %v939_v8  ;;  %v1360_v10 = vadd.f32 %v1359_v1, %v939_v8  ;;  %v1430_v11 = vmul.f32 %v939_v8, %v939_v8 }
  0xe3   : > { %1312 = vst [vmem:[%s2576_s15 + $0x98] sm:$0xff] %v2609_v12  ;;  %v2639_v29 = vpop.f32.mrf.mxu2 }
  0xe4   : > { %v1493_v13 = vadd.f32 %v1492_v6, %v1430_v11  ;;  %1327 = vst [vmem:[%s2576_s15 + $0x110] sm:$0xff] %v2639_v29 }
  0xe6   : > { %v2675_v42 = vpop.f32.mrf.mxu3 }
  0xe7   : > { %1342 = vst [vmem:[%s2576_s15 + $0x188] sm:$0xff] %v2675_v42 }
  0xe9   : > { %v942_v20 = vpop.f32.mrf.mxu0  ;;  %v2630_v25 = vpop.f32.mrf.mxu1 }
  0xea   : > { %1297 = vst [vmem:[%s2576_s15 + $0x20] sm:$0xff] %v942_v20  ;;  %v2628_v22 = vadd.f32 %v1360_v10, %v942_v20  ;;  %v1431_v24 = vmul.f32 %v942_v20, %v942_v20 }
  0xeb   : > { %1313 = vst [vmem:[%s2576_s15 + $0xa0] sm:$0xff] %v2630_v25  ;;  %v2648_v32 = vpop.f32.mrf.mxu2 }
  0xec   : > { %v2634_v35 = vadd.f32 %v1493_v13, %v1431_v24  ;;  %1328 = vst [vmem:[%s2576_s15 + $0x118] sm:$0xff] %v2648_v32 }
  0xee   : > { %v2688_v47 = vpop.f32.mrf.mxu3 }
  0xef   : > { %1343 = vst [vmem:[%s2576_s15 + $0x190] sm:$0xff] %v2688_v47 }
  0xf1   : > { %v944_v28 = vpop.f32.mrf.mxu0  ;;  %v2642_v30 = vpop.f32.mrf.mxu1 }
  0xf2   : > { %1298 = vst [vmem:[%s2576_s15 + $0x28] sm:$0xff] %v944_v28  ;;  %v1432_v61 = vmul.f32 %v944_v28, %v944_v28  ;;  %v1362_v62 = vadd.f32 %v2628_v22, %v944_v28 }
  0xf3   : > { %1314 = vst [vmem:[%s2576_s15 + $0xa8] sm:$0xff] %v2642_v30  ;;  %v2657_v36 = vpop.f32.mrf.mxu2 }
  0xf4   : > { %1329 = vst [vmem:[%s2576_s15 + $0x120] sm:$0xff] %v2657_v36  ;;  %v1495_v0 = vadd.f32 %v2634_v35, %v1432_v61 }
  0xf6   : > { %v2701_v51 = vpop.f32.mrf.mxu3 }
  0xf7   : > { %1344 = vst [vmem:[%s2576_s15 + $0x198] sm:$0xff] %v2701_v51 }
  0xf9   : > { %v947_v31 = vpop.f32.mrf.mxu0  ;;  %v2651_v33 = vpop.f32.mrf.mxu1 }
  0xfa   : > { %1299 = vst [vmem:[%s2576_s15 + $0x30] sm:$0xff] %v947_v31  ;;  %v1433_v63 = vmul.f32 %v947_v31, %v947_v31  ;;  %v1363_v1 = vadd.f32 %v1362_v62, %v947_v31 }
  0xfb   : > { %1315 = vst [vmem:[%s2576_s15 + $0xb0] sm:$0xff] %v2651_v33  ;;  %v2670_v40 = vpop.f32.mrf.mxu2 }
  0xfc   : > { %1330 = vst [vmem:[%s2576_s15 + $0x128] sm:$0xff] %v2670_v40  ;;  %v1496_v6 = vadd.f32 %v1495_v0, %v1433_v63 }
  0xfe   : > { %v2714_v55 = vpop.f32.mrf.mxu3 }
  0xff   : > { %1345 = vst [vmem:[%s2576_s15 + $0x1a0] sm:$0xff] %v2714_v55 }
 0x101   : > { %v949_v34 = vpop.f32.mrf.mxu0  ;;  %v2660_v37 = vpop.f32.mrf.mxu1 }
 0x102   : > { %1300 = vst [vmem:[%s2576_s15 + $0x38] sm:$0xff] %v949_v34  ;;  %v1434_v2 = vmul.f32 %v949_v34, %v949_v34  ;;  %v1364_v7 = vadd.f32 %v1363_v1, %v949_v34 }
 0x103   : > { %1316 = vst [vmem:[%s2576_s15 + $0xb8] sm:$0xff] %v2660_v37  ;;  %v2683_v44 = vpop.f32.mrf.mxu2 }
 0x104   : > { %1331 = vst [vmem:[%s2576_s15 + $0x130] sm:$0xff] %v2683_v44  ;;  %v1497_v13 = vadd.f32 %v1496_v6, %v1434_v2 }
 0x106   : > { %v2727_v60 = vpop.f32.mrf.mxu3 }
 0x107   : > { %1346 = vst [vmem:[%s2576_s15 + $0x1a8] sm:$0xff] %v2727_v60 }
 0x109   : > { %v952_v39 = vpop.f32.mrf.mxu0  ;;  %v2673_v41 = vpop.f32.mrf.mxu1 }
 0x10a   : > { %1301 = vst [vmem:[%s2576_s15 + $0x40] sm:$0xff] %v952_v39  ;;  %v1435_v8 = vmul.f32 %v952_v39, %v952_v39  ;;  %v1365_v14 = vadd.f32 %v1364_v7, %v952_v39 }
 0x10b   : > { %1317 = vst [vmem:[%s2576_s15 + $0xc0] sm:$0xff] %v2673_v41  ;;  %v2696_v49 = vpop.f32.mrf.mxu2 }
 0x10c   : > { %1332 = vst [vmem:[%s2576_s15 + $0x138] sm:$0xff] %v2696_v49  ;;  %v1498_v16 = vadd.f32 %v1497_v13, %v1435_v8 }
 0x10e   : > { %v2742_v11 = vpop.f32.mrf.mxu3 }
 0x10f   : > { %1347 = vst [vmem:[%s2576_s15 + $0x1b0] sm:$0xff] %v2742_v11 }
 0x111   : > { %v954_v43 = vpop.f32.mrf.mxu0  ;;  %v2686_v46 = vpop.f32.mrf.mxu1 }
 0x112   : > { %1302 = vst [vmem:[%s2576_s15 + $0x48] sm:$0xff] %v954_v43  ;;  %v1436_v15 = vmul.f32 %v954_v43, %v954_v43  ;;  %v1366_v17 = vadd.f32 %v1365_v14, %v954_v43 }
 0x113   : > { %1318 = vst [vmem:[%s2576_s15 + $0xc8] sm:$0xff] %v2686_v46  ;;  %v2709_v53 = vpop.f32.mrf.mxu2 }
 0x114   : > { %1333 = vst [vmem:[%s2576_s15 + $0x140] sm:$0xff] %v2709_v53  ;;  %v1499_v19 = vadd.f32 %v1498_v16, %v1436_v15  ;;  %v1444_v15 = vmul.f32 %v2586_v56, %v2586_v56 }
 0x116   : > { %v2755_v31 = vpop.f32.mrf.mxu3 }
 0x117   : > { %1348 = vst [vmem:[%s2576_s15 + $0x1b8] sm:$0xff] %v2755_v31 }
 0x119   : > { %v957_v48 = vpop.f32.mrf.mxu0  ;;  %v2699_v50 = vpop.f32.mrf.mxu1 }
 0x11a   : > { %1303 = vst [vmem:[%s2576_s15 + $0x50] sm:$0xff] %v957_v48  ;;  %v1437_v18 = vmul.f32 %v957_v48, %v957_v48  ;;  %v1367_v20 = vadd.f32 %v1366_v17, %v957_v48 }
 0x11b   : > { %1319 = vst [vmem:[%s2576_s15 + $0xd0] sm:$0xff] %v2699_v50  ;;  %v2722_v58 = vpop.f32.mrf.mxu2 }
 0x11c   : > { %1334 = vst [vmem:[%s2576_s15 + $0x148] sm:$0xff] %v2722_v58  ;;  %v1500_v23 = vadd.f32 %v1499_v19, %v1437_v18  ;;  %v1445_v18 = vmul.f32 %v2601_v3, %v2601_v3 }
 0x11e   : > { %v2768_v8 = vpop.f32.mrf.mxu3 }
 0x11f   : > { %1349 = vst [vmem:[%s2576_s15 + $0x1c0] sm:$0xff] %v2768_v8 }
 0x121   : > { %v959_v52 = vpop.f32.mrf.mxu0  ;;  %v2712_v54 = vpop.f32.mrf.mxu1 }
 0x122   : > { %1304 = vst [vmem:[%s2576_s15 + $0x58] sm:$0xff] %v959_v52  ;;  %v1438_v22 = vmul.f32 %v959_v52, %v959_v52  ;;  %v1368_v35 = vadd.f32 %v1367_v20, %v959_v52 }
 0x123   : > { %1320 = vst [vmem:[%s2576_s15 + $0xd8] sm:$0xff] %v2712_v54  ;;  %v2737_v5 = vpop.f32.mrf.mxu2 }
 0x124   : > { %1335 = vst [vmem:[%s2576_s15 + $0x150] sm:$0xff] %v2737_v5  ;;  %v1501_v34 = vadd.f32 %v1500_v23, %v1438_v22 }
 0x129   : > { %v962_v57 = vpop.f32.mrf.mxu0  ;;  %v2725_v59 = vpop.f32.mrf.mxu1 }
 0x12a   : > { %1305 = vst [vmem:[%s2576_s15 + $0x60] sm:$0xff] %v962_v57  ;;  %v1439_v27 = vmul.f32 %v962_v57, %v962_v57  ;;  %v1369_v39 = vadd.f32 %v1368_v35, %v962_v57  ;;  %v2792_v35 = vpop.f32.mrf.mxu3 }
 0x12b   : > { %1321 = vst [vmem:[%s2576_s15 + $0xe0] sm:$0xff] %v2725_v59  ;;  %v2750_v26 = vpop.f32.mrf.mxu2 }
 0x12c   : > { %1336 = vst [vmem:[%s2576_s15 + $0x158] sm:$0xff] %v2750_v26  ;;  %v1502_v48 = vadd.f32 %v1501_v34, %v1439_v27  ;;  %v1448_v34 = vmul.f32 %v2642_v30, %v2642_v30 }
 0x12d   : > { %1350 = vst [vmem:[%s2576_s15 + $0x1c8] sm:$0xff] %v2792_v35 }
 0x131   : > { %v964_v4 = vpop.f32.mrf.mxu0  ;;  %v2740_v10 = vpop.f32.mrf.mxu1 }
 0x132   : > { %1306 = vst [vmem:[%s2576_s15 + $0x68] sm:$0xff] %v964_v4  ;;  %v1440_v43 = vmul.f32 %v964_v4, %v964_v4  ;;  %v1370_v61 = vadd.f32 %v1369_v39, %v964_v4  ;;  %v1443_v4 = vmul.f32 %v2579_v45, %v2579_v45 }
 0x133   : > { %1322 = vst [vmem:[%s2576_s15 + $0xe8] sm:$0xff] %v2740_v10  ;;  %v2763_v1 = vpop.f32.mrf.mxu2 }
 0x134   : > { %v1503_v62 = vadd.f32 %v1502_v48, %v1440_v43  ;;  %1337 = vst [vmem:[%s2576_s15 + $0x160] sm:$0xff] %v2763_v1  ;;  %v1449_v43 = vmul.f32 %v2651_v33, %v2651_v33 }
 0x139   : > { %v967_v24 = vpop.f32.mrf.mxu0  ;;  %v2753_v28 = vpop.f32.mrf.mxu1 }
 0x13a   : > { %1307 = vst [vmem:[%s2576_s15 + $0x70] sm:$0xff] %v967_v24  ;;  %v1441_v52 = vmul.f32 %v967_v24, %v967_v24  ;;  %v1371_v63 = vadd.f32 %v1370_v61, %v967_v24 }
 0x13b   : > { %1323 = vst [vmem:[%s2576_s15 + $0xf0] sm:$0xff] %v2753_v28  ;;  %v2785_v22 = vpop.f32.mrf.mxu2 }
 0x13c   : > { %v1504_v2 = vadd.f32 %v1503_v62, %v1441_v52  ;;  %1338 = vst [vmem:[%s2576_s15 + $0x168] sm:$0xff] %v2785_v22  ;;  %v1450_v62 = vmul.f32 %v2660_v37, %v2660_v37 }
 0x141   : > { %v969_v0 = vpop.f32.mrf.mxu0  ;;  %v2766_v7 = vpop.f32.mrf.mxu1 }
 0x142   : > { %1308 = vst [vmem:[%s2576_s15 + $0x78] sm:$0xff] %v969_v0  ;;  %v1372_v6 = vadd.f32 %v1371_v63, %v969_v0  ;;  %v1442_v57 = vmul.f32 %v969_v0, %v969_v0  ;;  %v2812_v0 = vpop.f32.mrf.mxu3 }
 0x143   : > { %1324 = vst [vmem:[%s2576_s15 + $0xf8] sm:$0xff] %v2766_v7  ;;  %v2805_v52 = vpop.f32.mrf.mxu2 }
 0x144   : > { %v1373_v13 = vadd.f32 %v1372_v6, %v2579_v45  ;;  %v1505_v14 = vadd.f32 %v1504_v2, %v1442_v57  ;;  %v1446_v45 = vmul.f32 %v2609_v12, %v2609_v12  ;;  %1339 = vst [vmem:[%s2576_s15 + $0x170] sm:$0xff] %v2805_v52  ;;  %v1452_v6 = vmul.f32 %v2686_v46, %v2686_v46 }
 0x145   : > { %1351 = vst [vmem:[%s2576_s15 + $0x1d0] sm:$0xff] %v2812_v0 }
 0x146   : > { %v1374_v16 = vadd.f32 %v1373_v13, %v2586_v56  ;;  %v1506_v17 = vadd.f32 %v1505_v14, %v1443_v4  ;;  %v1447_v56 = vmul.f32 %v2630_v25, %v2630_v25  ;;  %v1453_v4 = vmul.f32 %v2699_v50, %v2699_v50 }
 0x148   : > { %v1375_v19 = vadd.f32 %v1374_v16, %v2601_v3  ;;  %v1507_v20 = vadd.f32 %v1506_v17, %v1444_v15  ;;  %v1454_v16 = vmul.f32 %v2712_v54, %v2712_v54 }
 0x14a   : > { %v1376_v24 = vadd.f32 %v1375_v19, %v2609_v12  ;;  %v1508_v23 = vadd.f32 %v1507_v20, %v1445_v18  ;;  %v2832_v18 = vpop.f32.mrf.mxu3 }
 0x14b   : > { %v2825_v15 = vpop.f32.mrf.mxu2  ;;  %1352 = vst [vmem:[%s2576_s15 + $0x1d8] sm:$0xff] %v2832_v18 }
 0x14c   : > { %v1377_v3 = vadd.f32 %v1376_v24, %v2630_v25  ;;  %v1509_v27 = vadd.f32 %v1508_v23, %v1446_v45  ;;  %1340 = vst [vmem:[%s2576_s15 + $0x178] sm:$0xff] %v2825_v15 }
 0x14e   : > { %v1378_v12 = vadd.f32 %v1377_v3, %v2642_v30  ;;  %v1510_v39 = vadd.f32 %v1509_v27, %v1447_v56  ;;  %v1451_v30 = vmul.f32 %v2673_v41, %v2673_v41  ;;  %v1457_v56 = vmul.f32 %v2753_v28, %v2753_v28 }
 0x150   : > { %v1511_v48 = vadd.f32 %v1510_v39, %v1448_v34  ;;  %v1379_v61 = vadd.f32 %v1378_v12, %v2651_v33  ;;  %v1458_v34 = vmul.f32 %v2766_v7, %v2766_v7 }
 0x152   : > { %v1380_v25 = vadd.f32 %v1379_v61, %v2660_v37  ;;  %v1512_v63 = vadd.f32 %v1511_v48, %v1449_v43 }
 0x154   : > { %v1381_v33 = vadd.f32 %v1380_v25, %v2673_v41  ;;  %v1513_v2 = vadd.f32 %v1512_v63, %v1450_v62  ;;  %v1462_v25 = vmul.f32 %v2648_v32, %v2648_v32 }
 0x156   : > { %v1382_v37 = vadd.f32 %v1381_v33, %v2686_v46  ;;  %v1514_v57 = vadd.f32 %v1513_v2, %v1451_v30 }
 0x158   : > { %v1383_v13 = vadd.f32 %v1382_v37, %v2699_v50  ;;  %v1515_v14 = vadd.f32 %v1514_v57, %v1452_v6  ;;  %v1455_v50 = vmul.f32 %v2725_v59, %v2725_v59 }
 0x15a   : > { %v1384_v41 = vadd.f32 %v1383_v13, %v2712_v54  ;;  %v1516_v17 = vadd.f32 %v1515_v14, %v1453_v4  ;;  %v1456_v54 = vmul.f32 %v2740_v10, %v2740_v10  ;;  %v1466_v13 = vmul.f32 %v2696_v49, %v2696_v49 }
 0x15c   : > { %v1385_v46 = vadd.f32 %v1384_v41, %v2725_v59  ;;  %v1517_v19 = vadd.f32 %v1516_v17, %v1454_v16  ;;  %v2848_v59 = vpop.f32.mrf.mxu3 }
 0x15d   : > { %1353 = vst [vmem:[%s2576_s15 + $0x1e0] sm:$0xff] %v2848_v59 }
 0x15e   : > { %v1518_v20 = vadd.f32 %v1517_v19, %v1455_v50  ;;  %v1386_v45 = vadd.f32 %v1385_v46, %v2740_v10  ;;  %v1459_v10 = vmul.f32 %v2606_v9, %v2606_v9 }
 0x160   : > { %v1519_v24 = vadd.f32 %v1518_v20, %v1456_v54  ;;  %v1387_v23 = vadd.f32 %v1386_v45, %v2753_v28  ;;  %v1460_v28 = vmul.f32 %v2625_v21, %v2625_v21 }
 0x162   : > { %v1520_v3 = vadd.f32 %v1519_v24, %v1457_v56  ;;  %v1388_v27 = vadd.f32 %v1387_v23, %v2766_v7  ;;  %v1461_v7 = vmul.f32 %v2639_v29, %v2639_v29  ;;  %v1471_v56 = vmul.f32 %v2763_v1, %v2763_v1 }
 0x164   : > { %v1389_v12 = vadd.f32 %v1388_v27, %v2606_v9  ;;  %v1521_v39 = vadd.f32 %v1520_v3, %v1458_v34  ;;  %v2864_v9 = vpop.f32.mrf.mxu3  ;;  %v1472_v27 = vmul.f32 %v2785_v22, %v2785_v22 }
 0x165   : > { %1354 = vst [vmem:[%s2576_s15 + $0x1e8] sm:$0xff] %v2864_v9 }
 0x166   : > { %v1390_v43 = vadd.f32 %v1389_v12, %v2625_v21  ;;  %v1522_v48 = vadd.f32 %v1521_v39, %v1459_v10  ;;  %v1463_v21 = vmul.f32 %v2657_v36, %v2657_v36  ;;  %v1473_v10 = vmul.f32 %v2805_v52, %v2805_v52 }
 0x167   : > { %v1474_v39 = vmul.f32 %v2825_v15, %v2825_v15 }
 0x168   : > { %v1391_v61 = vadd.f32 %v1390_v43, %v2639_v29  ;;  %v1523_v62 = vadd.f32 %v1522_v48, %v1460_v28  ;;  %v1464_v29 = vmul.f32 %v2670_v40, %v2670_v40  ;;  %v2160_v28 = vmov 0.0  }
 0x169   : > { %1225 = vst [vmem:[%s2914_s8] sm:$0x3] %v2160_v28  ;;  %v1476_v48 = vmul.f32 %v2675_v42, %v2675_v42 }
 0x16a   : > { %v1392_v63 = vadd.f32 %v1391_v61, %v2648_v32  ;;  %v1524_v30 = vadd.f32 %v1523_v62, %v1461_v7  ;;  %v1465_v32 = vmul.f32 %v2683_v44, %v2683_v44  ;;  %v1477_v62 = vmul.f32 %v2688_v47, %v2688_v47 }
 0x16c   : > { %v1393_v33 = vadd.f32 %v1392_v63, %v2657_v36  ;;  %v1525_v2 = vadd.f32 %v1524_v30, %v1462_v25  ;;  %v2880_v16 = vpop.f32.mrf.mxu3  ;;  %v1478_v63 = vmul.f32 %v2701_v51, %v2701_v51 }
 0x16d   : > { %1355 = vst [vmem:[%s2576_s15 + $0x1f0] sm:$0xff] %v2880_v16 }
 0x16e   : > { %v1394_v6 = vadd.f32 %v1393_v33, %v2670_v40  ;;  %v1526_v37 = vadd.f32 %v1525_v2, %v1463_v21  ;;  %v1467_v40 = vmul.f32 %v2709_v53, %v2709_v53 }
 0x170   : > { %v1527_v57 = vadd.f32 %v1526_v37, %v1464_v29  ;;  %v1395_v4 = vadd.f32 %v1394_v6, %v2683_v44  ;;  %v1468_v44 = vmul.f32 %v2722_v58, %v2722_v58 }
 0x172   : > { %v1396_v36 = vadd.f32 %v1395_v4, %v2696_v49  ;;  %v1528_v14 = vadd.f32 %v1527_v57, %v1465_v32  ;;  %v1469_v49 = vmul.f32 %v2737_v5, %v2737_v5 }
 0x174   : > { %v1397_v41 = vadd.f32 %v1396_v36, %v2709_v53  ;;  %v1529_v17 = vadd.f32 %v1528_v14, %v1466_v13  ;;  %v1470_v53 = vmul.f32 %v2750_v26, %v2750_v26  ;;  %v2898_v24 = vpop.f32.mrf.mxu3 }
 0x175   : > { %1356 = vst [vmem:[%s2576_s15 + $0x1f8] sm:$0xff] %v2898_v24 }
 0x176   : > { %v1398_v46 = vadd.f32 %v1397_v41, %v2722_v58  ;;  %v1530_v50 = vadd.f32 %v1529_v17, %v1467_v40 }
 0x178   : > { %v1399_v19 = vadd.f32 %v1398_v46, %v2737_v5  ;;  %v1531_v20 = vadd.f32 %v1530_v50, %v1468_v44  ;;  %v1486_v44 = vmul.f32 %v2832_v18, %v2832_v18 }
 0x17a   : > { %v1400_v45 = vadd.f32 %v1399_v19, %v2750_v26  ;;  %v1532_v54 = vadd.f32 %v1531_v20, %v1469_v49  ;;  %v1487_v49 = vmul.f32 %v2848_v59, %v2848_v59  ;;  %v1488_v20 = vmul.f32 %v2864_v9, %v2864_v9 }
 0x17c   : > { %v1533_v23 = vadd.f32 %v1532_v54, %v1470_v53  ;;  %v1401_v58 = vadd.f32 %v1400_v45, %v2763_v1  ;;  %v1489_v53 = vmul.f32 %v2880_v16, %v2880_v16 }
 0x17e   : > { %v1534_v5 = vadd.f32 %v1533_v23, %v1471_v56  ;;  %v1402_v3 = vadd.f32 %v1401_v58, %v2785_v22  ;;  %v1475_v22 = vmul.f32 %v2662_v38, %v2662_v38  ;;  %v1490_v23 = vmul.f32 %v2898_v24, %v2898_v24 }
 0x180   : > { %v1535_v34 = vadd.f32 %v1534_v5, %v1472_v27  ;;  %v1403_v26 = vadd.f32 %v1402_v3, %v2805_v52 }
 0x182   : > { %v1536_v1 = vadd.f32 %v1535_v34, %v1473_v10  ;;  %v1404_v12 = vadd.f32 %v1403_v26, %v2825_v15 }
 0x184   : > { %v1405_v43 = vadd.f32 %v1404_v12, %v2662_v38  ;;  %v1537_v52 = vadd.f32 %v1536_v1, %v1474_v39  ;;  %v1479_v38 = vmul.f32 %v2714_v55, %v2714_v55 }
 0x186   : > { %v1406_v7 = vadd.f32 %v1405_v43, %v2675_v42  ;;  %v1538_v61 = vadd.f32 %v1537_v52, %v1475_v22  ;;  %v1480_v42 = vmul.f32 %v2727_v60, %v2727_v60  ;;  %v1736_v43 = vld [vmem:[%s2576_s15 + $0x8] sm:$0xff] (%p2221_p6)  ;;  %v1738_v52 = vld [vmem:[%s2576_s15 + $0x10] sm:$0xff] (%p2221_p6) }
 0x187   : > { %1737 = vst [vmem:[%s2978_s12 + $0x10] sm:$0xff] (%p2221_p6), %v1736_v43 }
 0x188   : > { %v1407_v25 = vadd.f32 %v1406_v7, %v2688_v47  ;;  %v1539_v15 = vadd.f32 %v1538_v61, %v1476_v48  ;;  %v1481_v47 = vmul.f32 %v2742_v11, %v2742_v11  ;;  %v1740_v48 = vld [vmem:[%s2576_s15 + $0x18] sm:$0xff] (%p2221_p6)  ;;  %v1742_v7 = vld [vmem:[%s2576_s15 + $0x20] sm:$0xff] (%p2221_p6)  ;;  %1739 = vst [vmem:[%s2978_s12 + $0x20] sm:$0xff] (%p2221_p6), %v1738_v52  ;;  %v1744_v61 = vld [vmem:[%s2576_s15 + $0x28] sm:$0xff] (%p2221_p6) }
 0x189   : > { %1741 = vst [vmem:[%s2978_s12 + $0x30] sm:$0xff] (%p2221_p6), %v1740_v48 }
 0x18a   : > { %v1408_v30 = vadd.f32 %v1407_v25, %v2701_v51  ;;  %v1540_v21 = vadd.f32 %v1539_v15, %v1477_v62  ;;  %v1482_v51 = vmul.f32 %v2755_v31, %v2755_v31  ;;  %v1746_v62 = vld [vmem:[%s2576_s15 + $0x30] sm:$0xff] (%p2221_p6)  ;;  %1743 = vst [vmem:[%s2978_s12 + $0x40] sm:$0xff] (%p2221_p6), %v1742_v7  ;;  %v1748_v25 = vld [vmem:[%s2576_s15 + $0x38] sm:$0xff] (%p2221_p6)  ;;  %v1750_v15 = vld [vmem:[%s2576_s15 + $0x40] sm:$0xff] (%p2221_p6) }
 0x18b   : > { %1745 = vst [vmem:[%s2978_s12 + $0x50] sm:$0xff] (%p2221_p6), %v1744_v61 }
 0x18c   : > { %v1409_v33 = vadd.f32 %v1408_v30, %v2714_v55  ;;  %v1541_v2 = vadd.f32 %v1540_v21, %v1478_v63  ;;  %v1483_v55 = vmul.f32 %v2768_v8, %v2768_v8  ;;  %1747 = vst [vmem:[%s2978_s12 + $0x60] sm:$0xff] (%p2221_p6), %v1746_v62  ;;  %v1752_v63 = vld [vmem:[%s2576_s15 + $0x48] sm:$0xff] (%p2221_p6)  ;;  %v1754_v30 = vld [vmem:[%s2576_s15 + $0x50] sm:$0xff] (%p2221_p6)  ;;  %v1756_v21 = vld [vmem:[%s2576_s15 + $0x58] sm:$0xff] (%p2221_p6) }
 0x18d   : > { %1749 = vst [vmem:[%s2978_s12 + $0x70] sm:$0xff] (%p2221_p6), %v1748_v25 }
 0x18e   : > { %v1410_v29 = vadd.f32 %v1409_v33, %v2727_v60  ;;  %v1542_v6 = vadd.f32 %v1541_v2, %v1479_v38  ;;  %v1484_v60 = vmul.f32 %v2792_v35, %v2792_v35  ;;  %1751 = vst [vmem:[%s2978_s12 + $0x80] sm:$0xff] (%p2221_p6), %v1750_v15  ;;  %v1758_v38 = vld [vmem:[%s2576_s15 + $0x60] sm:$0xff] (%p2221_p6)  ;;  %v1760_v33 = vld [vmem:[%s2576_s15 + $0x68] sm:$0xff] (%p2221_p6)  ;;  %v1762_v2 = vld [vmem:[%s2576_s15 + $0x70] sm:$0xff] (%p2221_p6) }
 0x18f   : > { %1753 = vst [vmem:[%s2978_s12 + $0x90] sm:$0xff] (%p2221_p6), %v1752_v63 }
 0x190   : > { %v1543_v37 = vadd.f32 %v1542_v6, %v1480_v42  ;;  %v1411_v32 = vadd.f32 %v1410_v29, %v2742_v11  ;;  %v1485_v11 = vmul.f32 %v2812_v0, %v2812_v0  ;;  %1755 = vst [vmem:[%s2978_s12 + $0xa0] sm:$0xff] (%p2221_p6), %v1754_v30  ;;  %v1764_v42 = vld [vmem:[%s2576_s15 + $0x78] sm:$0xff] (%p2221_p6)  ;;  %v1766_v29 = vld [vmem:[%s2576_s15 + $0x80] sm:$0xff] (%p2221_p6)  ;;  %v1768_v6 = vld [vmem:[%s2576_s15 + $0x88] sm:$0xff] (%p2221_p6) }
 0x191   : > { %1757 = vst [vmem:[%s2978_s12 + $0xb0] sm:$0xff] (%p2221_p6), %v1756_v21 }
 0x192   : > { %v1412_v57 = vadd.f32 %v1411_v32, %v2755_v31  ;;  %v1544_v4 = vadd.f32 %v1543_v37, %v1481_v47  ;;  %1759 = vst [vmem:[%s2978_s12 + $0xc0] sm:$0xff] (%p2221_p6), %v1758_v38  ;;  %v1770_v47 = vld [vmem:[%s2576_s15 + $0x90] sm:$0xff] (%p2221_p6)  ;;  %v1772_v37 = vld [vmem:[%s2576_s15 + $0x98] sm:$0xff] (%p2221_p6)  ;;  %v1774_v32 = vld [vmem:[%s2576_s15 + $0xa0] sm:$0xff] (%p2221_p6) }
 0x193   : > { %1761 = vst [vmem:[%s2978_s12 + $0xd0] sm:$0xff] (%p2221_p6), %v1760_v33 }
 0x194   : > { %v1413_v13 = vadd.f32 %v1412_v57, %v2768_v8  ;;  %v1545_v36 = vadd.f32 %v1544_v4, %v1482_v51  ;;  %1763 = vst [vmem:[%s2978_s12 + $0xe0] sm:$0xff] (%p2221_p6), %v1762_v2  ;;  %v1776_v51 = vld [vmem:[%s2576_s15 + $0xa8] sm:$0xff] (%p2221_p6)  ;;  %v1778_v57 = vld [vmem:[%s2576_s15 + $0xb0] sm:$0xff] (%p2221_p6)  ;;  %v1780_v4 = vld [vmem:[%s2576_s15 + $0xb8] sm:$0xff] (%p2221_p6) }
 0x195   : > { %1765 = vst [vmem:[%s2978_s12 + $0xf0] sm:$0xff] (%p2221_p6), %v1764_v42 }
 0x196   : > { %v1414_v14 = vadd.f32 %v1413_v13, %v2792_v35  ;;  %v1546_v40 = vadd.f32 %v1545_v36, %v1483_v55  ;;  %1767 = vst [vmem:[%s2978_s12 + $0x100] sm:$0xff] (%p2221_p6), %v1766_v29  ;;  %v1782_v55 = vld [vmem:[%s2576_s15 + $0xc0] sm:$0xff] (%p2221_p6)  ;;  %v1784_v13 = vld [vmem:[%s2576_s15 + $0xc8] sm:$0xff] (%p2221_p6)  ;;  %v1786_v36 = vld [vmem:[%s2576_s15 + $0xd0] sm:$0xff] (%p2221_p6) }
 0x197   : > { %1769 = vst [vmem:[%s2978_s12 + $0x110] sm:$0xff] (%p2221_p6), %v1768_v6 }
 0x198   : > { %v1415_v41 = vadd.f32 %v1414_v14, %v2812_v0  ;;  %v1547_v17 = vadd.f32 %v1546_v40, %v1484_v60  ;;  %1771 = vst [vmem:[%s2978_s12 + $0x120] sm:$0xff] (%p2221_p6), %v1770_v47  ;;  %v1788_v60 = vld [vmem:[%s2576_s15 + $0xd8] sm:$0xff] (%p2221_p6)  ;;  %v1790_v14 = vld [vmem:[%s2576_s15 + $0xe0] sm:$0xff] (%p2221_p6)  ;;  %v1792_v40 = vld [vmem:[%s2576_s15 + $0xe8] sm:$0xff] (%p2221_p6) }
 0x199   : > { %1773 = vst [vmem:[%s2978_s12 + $0x130] sm:$0xff] (%p2221_p6), %v1772_v37 }
 0x19a   : > { %v1416_v31 = vadd.f32 %v1415_v41, %v2832_v18  ;;  %v1548_v46 = vadd.f32 %v1547_v17, %v1485_v11  ;;  %1775 = vst [vmem:[%s2978_s12 + $0x140] sm:$0xff] (%p2221_p6), %v1774_v32  ;;  %v1794_v11 = vld [vmem:[%s2576_s15 + $0xf0] sm:$0xff] (%p2221_p6)  ;;  %v1796_v41 = vld [vmem:[%s2576_s15 + $0xf8] sm:$0xff] (%p2221_p6)  ;;  %v1798_v17 = vld [vmem:[%s2576_s15 + $0x100] sm:$0xff] (%p2221_p6) }
 0x19b   : > { %1777 = vst [vmem:[%s2978_s12 + $0x150] sm:$0xff] (%p2221_p6), %v1776_v51 }
 0x19c   : > { %v1549_v8 = vadd.f32 %v1548_v46, %v1486_v44  ;;  %v1417_v50 = vadd.f32 %v1416_v31, %v2848_v59  ;;  %1779 = vst [vmem:[%s2978_s12 + $0x160] sm:$0xff] (%p2221_p6), %v1778_v57  ;;  %v1800_v31 = vld [vmem:[%s2576_s15 + $0x108] sm:$0xff] (%p2221_p6)  ;;  %v1802_v44 = vld [vmem:[%s2576_s15 + $0x110] sm:$0xff] (%p2221_p6)  ;;  %v1804_v46 = vld [vmem:[%s2576_s15 + $0x118] sm:$0xff] (%p2221_p6) }
 0x19d   : > { %1781 = vst [vmem:[%s2978_s12 + $0x170] sm:$0xff] (%p2221_p6), %v1780_v4 }
 0x19e   : > { %v1550_v35 = vadd.f32 %v1549_v8, %v1487_v49  ;;  %v1418_v19 = vadd.f32 %v1417_v50, %v2864_v9  ;;  %1783 = vst [vmem:[%s2978_s12 + $0x180] sm:$0xff] (%p2221_p6), %v1782_v55  ;;  %v1806_v8 = vld [vmem:[%s2576_s15 + $0x120] sm:$0xff] (%p2221_p6)  ;;  %v1808_v50 = vld [vmem:[%s2576_s15 + $0x128] sm:$0xff] (%p2221_p6)  ;;  %v1810_v49 = vld [vmem:[%s2576_s15 + $0x130] sm:$0xff] (%p2221_p6) }
 0x19f   : > { %1785 = vst [vmem:[%s2978_s12 + $0x190] sm:$0xff] (%p2221_p6), %v1784_v13 }
 0x1a0   : > { %v1551_v0 = vadd.f32 %v1550_v35, %v1488_v20  ;;  %v1419_v45 = vadd.f32 %v1418_v19, %v2880_v16  ;;  %v1357_v16 = vld [vmem:[%s2914_s8] sm:$0x3]  ;;  %1787 = vst [vmem:[%s2978_s12 + $0x1a0] sm:$0xff] (%p2221_p6), %v1786_v36  ;;  %v1812_v35 = vld [vmem:[%s2576_s15 + $0x138] sm:$0xff] (%p2221_p6)  ;;  %v1816_v20 = vld [vmem:[%s2576_s15 + $0x148] sm:$0xff] (%p2221_p6) }
 0x1a1   : > { %1789 = vst [vmem:[%s2978_s12 + $0x1b0] sm:$0xff] (%p2221_p6), %v1788_v60  ;;  %v1814_v19 = vld [vmem:[%s2576_s15 + $0x140] sm:$0xff] (%p2221_p6) }
 0x1a2   : > { %v1552_v18 = vadd.f32 %v1551_v0, %v1489_v53  ;;  %v1420_v54 = vadd.f32 %v1419_v45, %v2898_v24  ;;  %v1734_v24 = vld [vmem:[%s2576_s15] sm:$0xff] (%p2221_p6)  ;;  %1791 = vst [vmem:[%s2978_s12 + $0x1c0] sm:$0xff] (%p2221_p6), %v1790_v14  ;;  %v1818_v0 = vld [vmem:[%s2576_s15 + $0x150] sm:$0xff] (%p2221_p6)  ;;  %v1820_v45 = vld [vmem:[%s2576_s15 + $0x158] sm:$0xff] (%p2221_p6) }
 0x1a3   : > { %1735 = vst [vmem:[%s2978_s12] sm:$0xff] (%p2221_p6), %v1734_v24  ;;  %v1822_v53 = vld [vmem:[%s2576_s15 + $0x160] sm:$0xff] (%p2221_p6) }
 0x1a4   : > { %v1421_v59 = vrot.slane %v1420_v54, 4  ;;  %v1553_v58 = vadd.f32 %v1552_v18, %v1490_v23  ;;  %1793 = vst [vmem:[%s2978_s12 + $0x1d0] sm:$0xff] (%p2221_p6), %v1792_v40  ;;  %v1824_v18 = vld [vmem:[%s2576_s15 + $0x168] sm:$0xff] (%p2221_p6)  ;;  %v1828_v23 = vld [vmem:[%s2576_s15 + $0x178] sm:$0xff] (%p2221_p6) }
 0x1a5   : > { %1795 = vst [vmem:[%s2978_s12 + $0x1e0] sm:$0xff] (%p2221_p6), %v1794_v11 }
 0x1a6   : > { %v1422_v56 = vadd.f32 %v1421_v59, %v1420_v54  ;;  %v1554_v5 = vrot.slane %v1553_v58, 4  ;;  %1797 = vst [vmem:[%s2978_s12 + $0x1f0] sm:$0xff] (%p2221_p6), %v1796_v41  ;;  %v1826_v54 = vld [vmem:[%s2576_s15 + $0x170] sm:$0xff] (%p2221_p6)  ;;  %v1830_v59 = vld [vmem:[%s2576_s15 + $0x180] sm:$0xff] (%p2221_p6) }
 0x1a7   : > { %1799 = vst [vmem:[%s2978_s12 + $0x200] sm:$0xff] (%p2221_p6), %v1798_v17 }
 0x1a8   : > { %v1423_v3 = vrot.slane %v1422_v56, 2  ;;  %v1555_v9 = vadd.f32 %v1554_v5, %v1553_v58  ;;  %1801 = vst [vmem:[%s2978_s12 + $0x210] sm:$0xff] (%p2221_p6), %v1800_v31  ;;  %v1832_v58 = vld [vmem:[%s2576_s15 + $0x188] sm:$0xff] (%p2221_p6)  ;;  %v1836_v5 = vld [vmem:[%s2576_s15 + $0x198] sm:$0xff] (%p2221_p6) }
 0x1a9   : > { %1803 = vst [vmem:[%s2978_s12 + $0x220] sm:$0xff] (%p2221_p6), %v1802_v44 }
 0x1aa   : > { %v1424_v27 = vadd.f32 %v1423_v3, %v1422_v56  ;;  %v1556_v34 = vrot.slane %v1555_v9, 2  ;;  %1805 = vst [vmem:[%s2978_s12 + $0x230] sm:$0xff] (%p2221_p6), %v1804_v46  ;;  %v1834_v56 = vld [vmem:[%s2576_s15 + $0x190] sm:$0xff] (%p2221_p6)  ;;  %v1838_v3 = vld [vmem:[%s2576_s15 + $0x1a0] sm:$0xff] (%p2221_p6) }
 0x1ab   : > { %1807 = vst [vmem:[%s2978_s12 + $0x240] sm:$0xff] (%p2221_p6), %v1806_v8 }
 0x1ac   : > { %v1425_v26 = vrot.slane %v1424_v27, 1  ;;  %v1557_v10 = vadd.f32 %v1556_v34, %v1555_v9  ;;  %1809 = vst [vmem:[%s2978_s12 + $0x250] sm:$0xff] (%p2221_p6), %v1808_v50  ;;  %v1840_v9 = vld [vmem:[%s2576_s15 + $0x1a8] sm:$0xff] (%p2221_p6)  ;;  %v1844_v34 = vld [vmem:[%s2576_s15 + $0x1b8] sm:$0xff] (%p2221_p6) }
 0x1ad   : > { %1811 = vst [vmem:[%s2978_s12 + $0x260] sm:$0xff] (%p2221_p6), %v1810_v49 }
 0x1ae   : > { %v1558_v1 = vrot.slane %v1557_v10, 1  ;;  %v1426_v12 = vadd.f32 %v1425_v26, %v1424_v27  ;;  %1813 = vst [vmem:[%s2978_s12 + $0x270] sm:$0xff] (%p2221_p6), %v1812_v35  ;;  %v1842_v27 = vld [vmem:[%s2576_s15 + $0x1b0] sm:$0xff] (%p2221_p6)  ;;  %v1846_v26 = vld [vmem:[%s2576_s15 + $0x1c0] sm:$0xff] (%p2221_p6) }
 0x1af   : > { %1815 = vst [vmem:[%s2978_s12 + $0x280] sm:$0xff] (%p2221_p6), %v1814_v19 }
 0x1b0   : > { %v1559_v39 = vadd.f32 %v1558_v1, %v1557_v10  ;;  %1817 = vst [vmem:[%s2978_s12 + $0x290] sm:$0xff] (%p2221_p6), %v1816_v20  ;;  %v1848_v10 = vld [vmem:[%s2576_s15 + $0x1c8] sm:$0xff] (%p2221_p6)  ;;  %v1850_v1 = vld [vmem:[%s2576_s15 + $0x1d0] sm:$0xff] (%p2221_p6) }
 0x1b1   : > { %1574 = sbr.rel (!%p2221_p6) target bundleno = 456 (0x1c8), region = 89  ;;  %1819 = vst [vmem:[%s2978_s12 + $0x2a0] sm:$0xff] (%p2221_p6), %v1818_v0 }
 0x1b2   : > { %v1561_v28 = vsel %vm1560_vm4, %v1426_v12, %v1559_v39  ;;  %1821 = vst [vmem:[%s2978_s12 + $0x2b0] sm:$0xff] (%p2221_p6), %v1820_v45  ;;  %v1854_v12 = vld [vmem:[%s2576_s15 + $0x1e0] sm:$0xff] (%p2221_p6)  ;;  %v1856_v39 = vld [vmem:[%s2576_s15 + $0x1e8] sm:$0xff] (%p2221_p6) }
 0x1b3   : > { %v1562_v22 = vadd.f32 %v1561_v28, %v1357_v16  ;;  %1823 = vst [vmem:[%s2978_s12 + $0x2c0] sm:$0xff] (%p2221_p6), %v1822_v53  ;;  %v1852_v16 = vld [vmem:[%s2576_s15 + $0x1d8] sm:$0xff] (%p2221_p6)  ;;  %v1858_v28 = vld [vmem:[%s2576_s15 + $0x1f0] sm:$0xff] (%p2221_p6) }
 0x1b4   : > { %1825 = vst [vmem:[%s2978_s12 + $0x2d0] sm:$0xff] (%p2221_p6), %v1824_v18 }
 0x1b5   : > { %1563 = vst [vmem:[%s2914_s8] sm:$0x3] %v1562_v22  ;;  %v1860_v22 = vld [vmem:[%s2576_s15 + $0x1f8] sm:$0xff] (%p2221_p6) }
 0x1b6   : > { %1827 = vst [vmem:[%s2978_s12 + $0x2e0] sm:$0xff] %v1826_v54 }
 0x1b7   : > { %1829 = vst [vmem:[%s2978_s12 + $0x2f0] sm:$0xff] %v1828_v23 }
 0x1b8   : > { %1831 = vst [vmem:[%s2978_s12 + $0x300] sm:$0xff] %v1830_v59 }
 0x1b9   : > { %1833 = vst [vmem:[%s2978_s12 + $0x310] sm:$0xff] %v1832_v58 }
 0x1ba   : > { %1835 = vst [vmem:[%s2978_s12 + $0x320] sm:$0xff] %v1834_v56 }
 0x1bb   : > { %1837 = vst [vmem:[%s2978_s12 + $0x330] sm:$0xff] %v1836_v5 }
 0x1bc   : > { %1839 = vst [vmem:[%s2978_s12 + $0x340] sm:$0xff] %v1838_v3 }
 0x1bd   : > { %1841 = vst [vmem:[%s2978_s12 + $0x350] sm:$0xff] %v1840_v9 }
 0x1be   : > { %1843 = vst [vmem:[%s2978_s12 + $0x360] sm:$0xff] %v1842_v27 }
 0x1bf   : > { %1845 = vst [vmem:[%s2978_s12 + $0x370] sm:$0xff] %v1844_v34 }
 0x1c0   : > { %1847 = vst [vmem:[%s2978_s12 + $0x380] sm:$0xff] %v1846_v26 }
 0x1c1   : > { %1849 = vst [vmem:[%s2978_s12 + $0x390] sm:$0xff] %v1848_v10 }
 0x1c2   : > { %1851 = vst [vmem:[%s2978_s12 + $0x3a0] sm:$0xff] %v1850_v1 }
 0x1c3   : > { %1853 = vst [vmem:[%s2978_s12 + $0x3b0] sm:$0xff] %v1852_v16 }
 0x1c4   : > { %1855 = vst [vmem:[%s2978_s12 + $0x3c0] sm:$0xff] %v1854_v12 }
 0x1c5   : > { %1857 = vst [vmem:[%s2978_s12 + $0x3d0] sm:$0xff] %v1856_v39 }
 0x1c6   : > { %1859 = vst [vmem:[%s2978_s12 + $0x3e0] sm:$0xff] %v1858_v28 }
 0x1c7   : > { %1861 = vst [vmem:[%s2978_s12 + $0x3f0] sm:$0xff] %v1860_v22 }
 0x1c8 PF: > { %s15_s19 = sadd.s32 1, %s2158_s19   ;;  %s3127_s15 = smov %s2146_s16 }
 0x1c9   : > { %p12_p12 = scmp.ge.s32.totalorder %s15_s19, 4   ;;  %s3128_s16 = smov %s2226_s25 }
 0x1ca   : > { %s3129_s17 = smov %s2154_s18  ;;  %s3130_s18 = smov %s3132_s20 }
 0x1cb   :  { %14 = sbr.rel (!%p12_p12) target bundleno = 3 (0x3), region = 176 }

// kernel: bottle_block_forward.8
= control target key start
LH: loop header
LB: loop body
LE: loop exit
PB: predicated region body
PF: predicated region fallthrough
CT: control target
= control target key end

     0   :  { %s1846_s12 = smov 0   ;;  %s1848_s13 = smov 0   ;;  %s2380_s0 = inlined_call_operand.vmem [shape: bf16[3,2,288,64], index: 0, kind: input, shape index: {}]   ;;  %s2381_s1 = inlined_call_operand.vmem [shape: bf16[3,192,64], index: 1, kind: input, shape index: {}]   ;;  %s2382_s2 = inlined_call_operand.vmem [shape: f32[2,256,64], index: 2, kind: output, shape index: {0}]   ;;  %s2383_s3 = inlined_call_operand.vmem [shape: f32[2,64], index: 3, kind: output, shape index: {1}]  }
   0x1   :  { %s1850_s14 = smov 0   ;;  %s1852_s15 = smov 0  }
   0x2   :  { %s1854_s16 = smov 0  }
   0x3 LB: > { %s26_s17 = sadd.s32 1, %s1814_s14  ;;  %s29_s18 = sadd.s32 1, %s1818_s15  ;;  %s1822_s16 = sphi %s1854_s16, %s14_s16   ;;  %s1818_s15 = sphi %s1852_s15, %s2388_s15   ;;  %s1814_s14 = sphi %s1850_s14, %s2387_s14   ;;  %s1810_s13 = sphi %s1848_s13, %s2386_s13   ;;  %s1806_s12 = sphi %s1846_s12, %s2385_s12  }
   0x4   : > { %p27_p0 = scmp.ge.s32.totalorder %s26_s17, 3  ;;  %p1518_p1 = scmp.ge.s32.totalorder %s1822_s16, 1 }
   0x5   : > { %p182_p2 = scmp.lt.s32.totalorder %s1822_s16, 7 }
   0x6   : > { %s2390_s17 = smov (%p27_p0, %s26_s17), 0  ;;  %s2392_s18 = smov (!%p27_p0, %s29_s18), %s1818_s15 }
   0x7   : > { %p183_p3 = pnand %p1518_p1, %p182_p2  ;;  %p31_p4 = scmp.ge.s32.totalorder %s2392_s18, 2 }
   0x8   : > { %p225_p5 = scmp.lt.s32.totalorder (!%p183_p3), %s1806_s12, 2  ;;  %p227_p6 = scmp.lt.s32.totalorder (!%p183_p3), %s1810_s13, 1 }
   0x9   : > { %s2394_s18 = smov (%p31_p4, %s2392_s18), 0  ;;  %186 = sbr.rel (%p183_p3) target bundleno = 497 (0x1f1), region = 28 }
   0xa   : > { %p1523_p7 = scmp.ne.s32.totalorder (!%p183_p3), %s1806_s12, 0 }
   0xe   : > { %s226_s19 = scalar_select %p225_p5, %s1806_s12, 2 }
   0xf   : > { %s228_s20 = scalar_select %p227_p6, %s1810_s13, 1 }
  0x10   : > { %s1740_s21 = smul.u32 72, %s226_s19 }
  0x11   : > { %s1739_s22 = smul.u32 36, %s228_s20  ;;  %s1696_s23 = sshll.u32 %s228_s20, 8 }
  0x12   : > { %s1741_s24 = smul.u32 96, %s226_s19  ;;  %s1887_s27 = scalar_lea.vmem %s2382_s2, %s1696_s23 }
  0x13   : > { %s231_s28 = sadd.s32 %s1740_s21, %s1739_s22  ;;  %258 = sbr.rel (%p1523_p7) target bundleno = 57 (0x39), region = 32 }
  0x14   : > { %s1519_s29 = sshll.u32 %s231_s28, 2  ;;  %s1892_s5 = scalar_lea.vmem %s2381_s1, %s1741_s24 }
  0x15   : > { %s1897_s8 = scalar_lea.vmem %s2380_s0, %s1519_s29 }
  0x18   : > { %vm259_vm0 = vcmask 523264   ;;  %v1824_v0 = vmov 0.0  }
  0x19   : > { %260 = vst.msk [vmem:[#allocation2] sm:$0xff] %vm259_vm0, %v1824_v0 }
  0x1a   : > { %261 = vst.msk [vmem:[#allocation2 + $0x8] sm:$0xff] %vm259_vm0, %v1824_v0 }
  0x1b   : > { %262 = vst.msk [vmem:[#allocation2 + $0x10] sm:$0xff] %vm259_vm0, %v1824_v0 }
  0x1c   : > { %263 = vst.msk [vmem:[#allocation2 + $0x18] sm:$0xff] %vm259_vm0, %v1824_v0 }
  0x1d   : > { %264 = vst.msk [vmem:[#allocation2 + $0x20] sm:$0xff] %vm259_vm0, %v1824_v0 }
  0x1e   : > { %265 = vst.msk [vmem:[#allocation2 + $0x28] sm:$0xff] %vm259_vm0, %v1824_v0 }
  0x1f   : > { %266 = vst.msk [vmem:[#allocation2 + $0x30] sm:$0xff] %vm259_vm0, %v1824_v0 }
  0x20   : > { %267 = vst.msk [vmem:[#allocation2 + $0x38] sm:$0xff] %vm259_vm0, %v1824_v0 }
  0x21   : > { %268 = vst.msk [vmem:[#allocation2 + $0x40] sm:$0xff] %vm259_vm0, %v1824_v0 }
  0x22   : > { %269 = vst.msk [vmem:[#allocation2 + $0x48] sm:$0xff] %vm259_vm0, %v1824_v0 }
  0x23   : > { %270 = vst.msk [vmem:[#allocation2 + $0x50] sm:$0xff] %vm259_vm0, %v1824_v0 }
  0x24   : > { %271 = vst.msk [vmem:[#allocation2 + $0x58] sm:$0xff] %vm259_vm0, %v1824_v0 }
  0x25   : > { %272 = vst.msk [vmem:[#allocation2 + $0x60] sm:$0xff] %vm259_vm0, %v1824_v0 }
  0x26   : > { %273 = vst.msk [vmem:[#allocation2 + $0x68] sm:$0xff] %vm259_vm0, %v1824_v0 }
  0x27   : > { %274 = vst.msk [vmem:[#allocation2 + $0x70] sm:$0xff] %vm259_vm0, %v1824_v0 }
  0x28   : > { %275 = vst.msk [vmem:[#allocation2 + $0x78] sm:$0xff] %vm259_vm0, %v1824_v0 }
  0x29   : > { %276 = vst.msk [vmem:[#allocation2 + $0x80] sm:$0xff] %vm259_vm0, %v1824_v0 }
  0x2a   : > { %277 = vst.msk [vmem:[#allocation2 + $0x88] sm:$0xff] %vm259_vm0, %v1824_v0 }
  0x2b   : > { %278 = vst.msk [vmem:[#allocation2 + $0x90] sm:$0xff] %vm259_vm0, %v1824_v0 }
  0x2c   : > { %279 = vst.msk [vmem:[#allocation2 + $0x98] sm:$0xff] %vm259_vm0, %v1824_v0 }
  0x2d   : > { %280 = vst.msk [vmem:[#allocation2 + $0xa0] sm:$0xff] %vm259_vm0, %v1824_v0 }
  0x2e   : > { %281 = vst.msk [vmem:[#allocation2 + $0xa8] sm:$0xff] %vm259_vm0, %v1824_v0 }
  0x2f   : > { %282 = vst.msk [vmem:[#allocation2 + $0xb0] sm:$0xff] %vm259_vm0, %v1824_v0 }
  0x30   : > { %283 = vst.msk [vmem:[#allocation2 + $0xb8] sm:$0xff] %vm259_vm0, %v1824_v0 }
  0x31   : > { %284 = vst.msk [vmem:[#allocation2 + $0xc0] sm:$0xff] %vm259_vm0, %v1824_v0 }
  0x32   : > { %285 = vst.msk [vmem:[#allocation2 + $0xc8] sm:$0xff] %vm259_vm0, %v1824_v0 }
  0x33   : > { %286 = vst.msk [vmem:[#allocation2 + $0xd0] sm:$0xff] %vm259_vm0, %v1824_v0 }
  0x34   : > { %287 = vst.msk [vmem:[#allocation2 + $0xd8] sm:$0xff] %vm259_vm0, %v1824_v0 }
  0x35   : > { %288 = vst.msk [vmem:[#allocation2 + $0xe0] sm:$0xff] %vm259_vm0, %v1824_v0 }
  0x36   : > { %289 = vst.msk [vmem:[#allocation2 + $0xe8] sm:$0xff] %vm259_vm0, %v1824_v0 }
  0x37   : > { %290 = vst.msk [vmem:[#allocation2 + $0xf0] sm:$0xff] %vm259_vm0, %v1824_v0 }
  0x38   : > { %291 = vst.msk [vmem:[#allocation2 + $0xf8] sm:$0xff] %vm259_vm0, %v1824_v0 }
  0x39 PF: > { %v1718_v1 = vld [vmem:[%s1892_s5 + $0x18] sm:$0xff]  ;;  %v1717_v4 = vld [vmem:[%s1892_s5 + $0x10] sm:$0xff]  ;;  %v1716_v7 = vld [vmem:[%s1892_s5 + $0x8] sm:$0xff]  ;;  %vm488_vm1 = vcmask 523264   ;;  %p1124_p8 = scmp.eq.s32.totalorder %s1806_s12, 2  ;;  %p1125_p9 = scmp.eq.s32.totalorder %s1810_s13, 0 }
  0x3a   : > { %v1722_v2 = vld [vmem:[%s1892_s5 + $0x38] sm:$0xff]  ;;  %541 = vmatpush.bf16.msra.mxu0 %v1718_v1  ;;  %1727 = vmatpush.bf16.msra.mxu3 %v1718_v1  ;;  %v1721_v5 = vld [vmem:[%s1892_s5 + $0x30] sm:$0xff]  ;;  %v1720_v8 = vld [vmem:[%s1892_s5 + $0x28] sm:$0xff] }
  0x3b   : > { %v1726_v3 = vld [vmem:[%s1892_s5 + $0x58] sm:$0xff]  ;;  %758 = vmatpush.bf16.msra.mxu1 %v1722_v2  ;;  %v1725_v6 = vld [vmem:[%s1892_s5 + $0x50] sm:$0xff]  ;;  %v1724_v9 = vld [vmem:[%s1892_s5 + $0x48] sm:$0xff]  ;;  %p2077_p10 = pnand %p1125_p9, %p1124_p8 }
  0x3c   : > { %975 = vmatpush.bf16.msra.mxu2 %v1726_v3  ;;  %v1715_v10 = vld [vmem:[%s1892_s5] sm:$0xff]  ;;  %v1698_v15 = vld [vmem:[%s1897_s8 + $0x8] sm:$0xff]  ;;  %v1699_v16 = vld [vmem:[%s1897_s8 + $0x10] sm:$0xff] }
  0x3d   : > { %v1719_v11 = vld [vmem:[%s1892_s5 + $0x20] sm:$0xff]  ;;  %v1956_v17 = vld [vmem:[%s1897_s8 + $0x68] sm:$0xff]  ;;  %v1700_v18 = vld [vmem:[%s1897_s8 + $0x18] sm:$0xff] }
  0x3e   : > { %542 = vmatpush.bf16.msra.mxu0 %v1717_v4  ;;  %1728 = vmatpush.bf16.msra.mxu3 %v1717_v4  ;;  %v1723_v12 = vld [vmem:[%s1892_s5 + $0x40] sm:$0xff]  ;;  %v1711_v19 = vld [vmem:[%s1897_s8 + $0x70] sm:$0xff]  ;;  %v1971_v21 = vld [vmem:[%s1897_s8 + $0x78] sm:$0xff] }
  0x3f   : > { %759 = vmatpush.bf16.msra.mxu1 %v1721_v5  ;;  %v1697_v13 = vld [vmem:[%s1897_s8] sm:$0xff]  ;;  %v1702_v22 = vld [vmem:[%s1897_s8 + $0x28] sm:$0xff]  ;;  %v1703_v23 = vld [vmem:[%s1897_s8 + $0x30] sm:$0xff] }
  0x40   : > { %976 = vmatpush.bf16.msra.mxu2 %v1725_v6  ;;  %v1946_v14 = vld [vmem:[%s1897_s8 + $0x60] sm:$0xff]  ;;  %v1704_v24 = vld [vmem:[%s1897_s8 + $0x38] sm:$0xff]  ;;  %v1706_v27 = vld [vmem:[%s1897_s8 + $0x48] sm:$0xff] }
  0x41   : > { %v1701_v20 = vld [vmem:[%s1897_s8 + $0x20] sm:$0xff]  ;;  %v2006_v30 = vld [vmem:[%s1897_s8 + $0x50] sm:$0xff]  ;;  %v353_v35 = vld [vmem:[#allocation2 + $0x8] sm:$0xff] }
  0x42   : > { %543 = vmatpush.bf16.msra.mxu0 %v1716_v7  ;;  %1729 = vmatpush.bf16.msra.mxu3 %v1716_v7  ;;  %v1705_v25 = vld [vmem:[%s1897_s8 + $0x40] sm:$0xff]  ;;  %v377_v43 = vld [vmem:[#allocation2 + $0xc8] sm:$0xff]  ;;  %v354_v45 = vld [vmem:[#allocation2 + $0x10] sm:$0xff] }
  0x43   : > { %760 = vmatpush.bf16.msra.mxu1 %v1720_v8  ;;  %v1997_v26 = vld [vmem:[%s1897_s8 + $0x80] sm:$0xff]  ;;  %v2018_v49 = vld [vmem:[%s1897_s8 + $0x58] sm:$0xff]  ;;  %v378_v55 = vld [vmem:[#allocation2 + $0xd0] sm:$0xff] }
  0x44   : > { %977 = vmatpush.bf16.msra.mxu2 %v1724_v9  ;;  %v352_v28 = vld [vmem:[#allocation2] sm:$0xff]  ;;  %v355_v58 = vld [vmem:[#allocation2 + $0x18] sm:$0xff] }
  0x45   : > { %v376_v33 = vld [vmem:[#allocation2 + $0xc0] sm:$0xff] }
  0x46   : > { %544 = vmatpush.bf16.msra.mxu0 %v1715_v10  ;;  %1730 = vmatpush.bf16.msra.mxu3 %v1715_v10 }
  0x47   : > { %761 = vmatpush.bf16.msra.mxu1 %v1719_v11 }
  0x48   : > { %978 = vmatpush.bf16.msra.mxu2 %v1723_v12 }
  0x49   : > { %1604 = vmatmul.msk.bf16.vlgmr.msra.gmra.mxu0 %vm488_vm1, %v1697_v13  ;;  %1616 = vmatmul.msk.bf16.vlgmr.msra.gmra.mxu3 %vm488_vm1, %v1946_v14 }
  0x4a   : > { %1731 = vmatpush.bf16.msrb.mxu3 %v1722_v2  ;;  %1640 = vmatmul.msk.bf16.vlgmr.msra.gmra.mxu1 %vm488_vm1, %v1698_v15 }
  0x4b   : > { %1676 = vmatmul.msk.bf16.vlgmr.msra.gmra.mxu2 %vm488_vm1, %v1699_v16 }
  0x4e   : > { %1732 = vmatpush.bf16.msrb.mxu3 %v1721_v5 }
  0x52   : > { %1733 = vmatpush.bf16.msrb.mxu3 %v1720_v8 }
  0x56   : > { %1734 = vmatpush.bf16.msrb.mxu3 %v1719_v11 }
  0x59   : > { %1605 = vmatmul.msk.bf16.gmra.mxu0 %vm488_vm1, %v1698_v15  ;;  %1617 = vmatmul.msk.bf16.gmra.mxu3 %vm488_vm1, %v1956_v17 }
  0x5a   : > { %1735 = vmatpush.bf16.msra.mxu3 %v1726_v3  ;;  %1641 = vmatmul.msk.bf16.gmra.mxu1 %vm488_vm1, %v1699_v16  ;;  %v379_v3 = vld [vmem:[#allocation2 + $0xd8] sm:$0xff] }
  0x5b   : > { %1677 = vmatmul.msk.bf16.gmra.mxu2 %vm488_vm1, %v1700_v18 }
  0x5e   : > { %1736 = vmatpush.bf16.msra.mxu3 %v1725_v6  ;;  %v356_v6 = vld [vmem:[#allocation2 + $0x20] sm:$0xff] }
  0x62   : > { %1737 = vmatpush.bf16.msra.mxu3 %v1724_v9 }
  0x66   : > { %1738 = vmatpush.bf16.msra.mxu3 %v1723_v12 }
  0x69   : > { %1606 = vmatmul.msk.bf16.gmra.mxu0 %vm488_vm1, %v1699_v16  ;;  %1618 = vmatmul.msk.bf16.gmra.mxu3 %vm488_vm1, %v1711_v19  ;;  %v380_v16 = vld [vmem:[#allocation2 + $0xe0] sm:$0xff] }
  0x6a   : > { %1642 = vmatmul.msk.bf16.gmra.mxu1 %vm488_vm1, %v1700_v18 }
  0x6b   : > { %1678 = vmatmul.msk.bf16.gmra.mxu2 %vm488_vm1, %v1701_v20 }
  0x79   : > { %1607 = vmatmul.msk.bf16.gmra.mxu0 %vm488_vm1, %v1700_v18  ;;  %1619 = vmatmul.msk.bf16.gmra.mxu3 %vm488_vm1, %v1971_v21 }
  0x7a   : > { %1643 = vmatmul.msk.bf16.gmra.mxu1 %vm488_vm1, %v1701_v20 }
  0x7b   : > { %1679 = vmatmul.msk.bf16.gmra.mxu2 %vm488_vm1, %v1702_v22 }
  0x89   : > { %1608 = vmatmul.msk.bf16.gmra.mxu0 %vm488_vm1, %v1701_v20  ;;  %1652 = vmatmul.msk.bf16.vlgmr.msrb.gmra.mxu3 %vm488_vm1, %v1956_v17  ;;  %v357_v20 = vld [vmem:[#allocation2 + $0x28] sm:$0xff] }
  0x8a   : > { %1644 = vmatmul.msk.bf16.gmra.mxu1 %vm488_vm1, %v1702_v22 }
  0x8b   : > { %1680 = vmatmul.msk.bf16.gmra.mxu2 %vm488_vm1, %v1703_v23 }
  0x99   : > { %1609 = vmatmul.msk.bf16.gmra.mxu0 %vm488_vm1, %v1702_v22  ;;  %1653 = vmatmul.msk.bf16.gmra.mxu3 %vm488_vm1, %v1711_v19 }
  0x9a   : > { %1645 = vmatmul.msk.bf16.gmra.mxu1 %vm488_vm1, %v1703_v23 }
  0x9b   : > { %1681 = vmatmul.msk.bf16.gmra.mxu2 %vm488_vm1, %v1704_v24 }
  0xa9   : > { %1610 = vmatmul.msk.bf16.gmra.mxu0 %vm488_vm1, %v1703_v23  ;;  %1654 = vmatmul.msk.bf16.gmra.mxu3 %vm488_vm1, %v1971_v21 }
  0xaa   : > { %1646 = vmatmul.msk.bf16.gmra.mxu1 %vm488_vm1, %v1704_v24 }
  0xab   : > { %1682 = vmatmul.msk.bf16.gmra.mxu2 %vm488_vm1, %v1705_v25 }
  0xb9   : > { %1611 = vmatmul.msk.bf16.gmra.mxu0 %vm488_vm1, %v1704_v24  ;;  %1655 = vmatmul.msk.bf16.gmra.mxu3 %vm488_vm1, %v1997_v26 }
  0xba   : > { %1647 = vmatmul.msk.bf16.gmra.mxu1 %vm488_vm1, %v1705_v25 }
  0xbb   : > { %1683 = vmatmul.msk.bf16.gmra.mxu2 %vm488_vm1, %v1706_v27 }
  0xc6   : > { %v546_v29 = vpop.f32.mrf.mxu0 }
  0xc7   : > { %v626_v31 = vadd.f32 %v546_v29, %v352_v28  ;;  %v763_v32 = vpop.f32.mrf.mxu1  ;;  %v381_v29 = vld [vmem:[#allocation2 + $0xe8] sm:$0xff] }
  0xc9   : > { %658 = vst.msk [vmem:[#allocation2] sm:$0xff] %vm488_vm1, %v626_v31  ;;  %1612 = vmatmul.msk.bf16.gmra.mxu0 %vm488_vm1, %v1705_v25  ;;  %1688 = vmatmul.msk.bf16.vlgmr.msra.gmra.mxu3 %vm488_vm1, %v1711_v19 }
  0xca   : > { %1648 = vmatmul.msk.bf16.gmra.mxu1 %vm488_vm1, %v1706_v27 }
  0xcb   : > { %1684 = vmatmul.msk.bf16.gmra.mxu2 %vm488_vm1, %v2006_v30 }
  0xcc   : > { %v606_v34 = vpop.f32.mrf.mxu3 }
  0xcd   : > { %v650_v36 = vadd.f32 %v606_v34, %v376_v33  ;;  %v1714_v34 = vld [vmem:[%s1897_s8 + $0x88] sm:$0xff] }
  0xce   : > { %v980_v37 = vpop.f32.mrf.mxu2  ;;  %v548_v38 = vpop.f32.mrf.mxu0 }
  0xcf   : > { %682 = vst.msk [vmem:[#allocation2 + $0xc0] sm:$0xff] %vm488_vm1, %v650_v36  ;;  %v627_v39 = vadd.f32 %v548_v38, %v353_v35  ;;  %v765_v40 = vpop.f32.mrf.mxu1 }
  0xd0   : > { %v690_v41 = vld [vmem:[#allocation2] sm:$0xff] }
  0xd1   : > { %v843_v42 = vadd.f32 %v763_v32, %v690_v41  ;;  %659 = vst.msk [vmem:[#allocation2 + $0x8] sm:$0xff] %vm488_vm1, %v627_v39  ;;  %v358_v32 = vld [vmem:[#allocation2 + $0x30] sm:$0xff] }
  0xd3   : > { %875 = vst.msk [vmem:[#allocation2] sm:$0xff] %vm488_vm1, %v843_v42  ;;  %v382_v42 = vld [vmem:[#allocation2 + $0xf0] sm:$0xff] }
  0xd4   : > { %v608_v44 = vpop.f32.mrf.mxu3 }
  0xd5   : > { %v651_v46 = vadd.f32 %v608_v44, %v377_v43 }
  0xd6   : > { %v982_v47 = vpop.f32.mrf.mxu2  ;;  %v551_v48 = vpop.f32.mrf.mxu0 }
  0xd7   : > { %683 = vst.msk [vmem:[#allocation2 + $0xc8] sm:$0xff] %vm488_vm1, %v651_v46  ;;  %v628_v50 = vadd.f32 %v551_v48, %v354_v45  ;;  %v768_v51 = vpop.f32.mrf.mxu1  ;;  %v359_v45 = vld [vmem:[#allocation2 + $0x38] sm:$0xff] }
  0xd8   : > { %v691_v52 = vld [vmem:[#allocation2 + $0x8] sm:$0xff] }
  0xd9   : > { %v844_v53 = vadd.f32 %v765_v40, %v691_v52  ;;  %660 = vst.msk [vmem:[#allocation2 + $0x10] sm:$0xff] %vm488_vm1, %v628_v50  ;;  %1613 = vmatmul.msk.bf16.gmra.mxu0 %vm488_vm1, %v1706_v27  ;;  %1689 = vmatmul.msk.bf16.gmra.mxu3 %vm488_vm1, %v1971_v21 }
  0xda   : > { %v907_v54 = vld [vmem:[#allocation2] sm:$0xff]  ;;  %1649 = vmatmul.msk.bf16.gmra.mxu1 %vm488_vm1, %v2006_v30 }
  0xdb   : > { %1685 = vmatmul.msk.bf16.gmra.mxu2 %vm488_vm1, %v2018_v49  ;;  %876 = vst.msk [vmem:[#allocation2 + $0x8] sm:$0xff] %vm488_vm1, %v844_v53  ;;  %v1060_v56 = vadd.f32 %v980_v37, %v907_v54 }
  0xdc   : > { %v611_v57 = vpop.f32.mrf.mxu3 }
  0xdd   : > { %1092 = vst.msk [vmem:[#allocation2] sm:$0xff] %vm488_vm1, %v1060_v56  ;;  %v652_v59 = vadd.f32 %v611_v57, %v378_v55  ;;  %v360_v55 = vld [vmem:[#allocation2 + $0x40] sm:$0xff] }
  0xde   : > { %v985_v60 = vpop.f32.mrf.mxu2  ;;  %v553_v61 = vpop.f32.mrf.mxu0 }
  0xdf   : > { %684 = vst.msk [vmem:[#allocation2 + $0xd0] sm:$0xff] %vm488_vm1, %v652_v59  ;;  %v629_v62 = vadd.f32 %v553_v61, %v355_v58  ;;  %v770_v63 = vpop.f32.mrf.mxu1 }
  0xe0   : > { %v692_v0 = vld [vmem:[#allocation2 + $0x10] sm:$0xff] }
  0xe1   : > { %v845_v1 = vadd.f32 %v768_v51, %v692_v0  ;;  %661 = vst.msk [vmem:[#allocation2 + $0x18] sm:$0xff] %vm488_vm1, %v629_v62 }
  0xe2   : > { %v908_v2 = vld [vmem:[#allocation2 + $0x8] sm:$0xff] }
  0xe3   : > { %877 = vst.msk [vmem:[#allocation2 + $0x10] sm:$0xff] %vm488_vm1, %v845_v1  ;;  %v1061_v4 = vadd.f32 %v982_v47, %v908_v2  ;;  %v714_v1 = vld [vmem:[#allocation2 + $0xc0] sm:$0xff] }
  0xe4   : > { %v613_v5 = vpop.f32.mrf.mxu3 }
  0xe5   : > { %1093 = vst.msk [vmem:[#allocation2 + $0x8] sm:$0xff] %vm488_vm1, %v1061_v4  ;;  %v653_v7 = vadd.f32 %v613_v5, %v379_v3  ;;  %v361_v3 = vld [vmem:[#allocation2 + $0x48] sm:$0xff] }
  0xe6   : > { %v987_v8 = vpop.f32.mrf.mxu2  ;;  %v556_v9 = vpop.f32.mrf.mxu0 }
  0xe7   : > { %685 = vst.msk [vmem:[#allocation2 + $0xd8] sm:$0xff] %vm488_vm1, %v653_v7  ;;  %v630_v10 = vadd.f32 %v556_v9, %v356_v6  ;;  %v773_v11 = vpop.f32.mrf.mxu1 }
  0xe8   : > { %v693_v12 = vld [vmem:[#allocation2 + $0x18] sm:$0xff] }
  0xe9   : > { %v846_v13 = vadd.f32 %v770_v63, %v693_v12  ;;  %662 = vst.msk [vmem:[#allocation2 + $0x20] sm:$0xff] %vm488_vm1, %v630_v10  ;;  %1614 = vmatmul.msk.bf16.gmra.mxu0 %vm488_vm1, %v2006_v30  ;;  %1690 = vmatmul.msk.bf16.gmra.mxu3 %vm488_vm1, %v1997_v26 }
  0xea   : > { %v909_v15 = vld [vmem:[#allocation2 + $0x10] sm:$0xff]  ;;  %1650 = vmatmul.msk.bf16.gmra.mxu1 %vm488_vm1, %v2018_v49 }
  0xeb   : > { %1686 = vmatmul.msk.bf16.gmra.mxu2 %vm488_vm1, %v1946_v14  ;;  %878 = vst.msk [vmem:[#allocation2 + $0x18] sm:$0xff] %vm488_vm1, %v846_v13  ;;  %v1062_v18 = vadd.f32 %v985_v60, %v909_v15  ;;  %v715_v13 = vld [vmem:[#allocation2 + $0xc8] sm:$0xff] }
  0xec   : > { %v616_v19 = vpop.f32.mrf.mxu3 }
  0xed   : > { %1094 = vst.msk [vmem:[#allocation2 + $0x10] sm:$0xff] %vm488_vm1, %v1062_v18  ;;  %v654_v21 = vadd.f32 %v616_v19, %v380_v16  ;;  %v362_v16 = vld [vmem:[#allocation2 + $0x50] sm:$0xff] }
  0xee   : > { %v990_v22 = vpop.f32.mrf.mxu2  ;;  %v558_v23 = vpop.f32.mrf.mxu0 }
  0xef   : > { %686 = vst.msk [vmem:[#allocation2 + $0xe0] sm:$0xff] %vm488_vm1, %v654_v21  ;;  %v631_v24 = vadd.f32 %v558_v23, %v357_v20  ;;  %v775_v25 = vpop.f32.mrf.mxu1 }
  0xf0   : > { %v694_v26 = vld [vmem:[#allocation2 + $0x20] sm:$0xff] }
  0xf1   : > { %v847_v27 = vadd.f32 %v773_v11, %v694_v26  ;;  %663 = vst.msk [vmem:[#allocation2 + $0x28] sm:$0xff] %vm488_vm1, %v631_v24 }
  0xf2   : > { %v910_v28 = vld [vmem:[#allocation2 + $0x18] sm:$0xff] }
  0xf3   : > { %879 = vst.msk [vmem:[#allocation2 + $0x20] sm:$0xff] %vm488_vm1, %v847_v27  ;;  %v1063_v30 = vadd.f32 %v987_v8, %v910_v28  ;;  %v716_v27 = vld [vmem:[#allocation2 + $0xd0] sm:$0xff] }
  0xf4   : > { %v618_v31 = vpop.f32.mrf.mxu3 }
  0xf5   : > { %1095 = vst.msk [vmem:[#allocation2 + $0x18] sm:$0xff] %vm488_vm1, %v1063_v30  ;;  %v655_v33 = vadd.f32 %v618_v31, %v381_v29  ;;  %v363_v29 = vld [vmem:[#allocation2 + $0x58] sm:$0xff] }
  0xf6   : > { %v992_v35 = vpop.f32.mrf.mxu2  ;;  %v561_v36 = vpop.f32.mrf.mxu0 }
  0xf7   : > { %687 = vst.msk [vmem:[#allocation2 + $0xe8] sm:$0xff] %vm488_vm1, %v655_v33  ;;  %v632_v37 = vadd.f32 %v561_v36, %v358_v32  ;;  %v778_v38 = vpop.f32.mrf.mxu1 }
  0xf8   : > { %v695_v39 = vld [vmem:[#allocation2 + $0x28] sm:$0xff] }
  0xf9   : > { %v848_v40 = vadd.f32 %v775_v25, %v695_v39  ;;  %664 = vst.msk [vmem:[#allocation2 + $0x30] sm:$0xff] %vm488_vm1, %v632_v37  ;;  %1615 = vmatmul.msk.bf16.gmra.mxu0 %vm488_vm1, %v2018_v49  ;;  %1691 = vmatmul.msk.bf16.gmra.mxu3 %vm488_vm1, %v1714_v34  ;;  %v717_v39 = vld [vmem:[#allocation2 + $0xd8] sm:$0xff] }
  0xfa   : > { %v911_v41 = vld [vmem:[#allocation2 + $0x20] sm:$0xff]  ;;  %1651 = vmatmul.msk.bf16.gmra.mxu1 %vm488_vm1, %v1946_v14 }
  0xfb   : > { %1687 = vmatmul.msk.bf16.gmra.mxu2 %vm488_vm1, %v1956_v17  ;;  %880 = vst.msk [vmem:[#allocation2 + $0x28] sm:$0xff] %vm488_vm1, %v848_v40  ;;  %v1064_v43 = vadd.f32 %v990_v22, %v911_v41  ;;  %v383_v17 = vld [vmem:[#allocation2 + $0xf8] sm:$0xff]  ;;  %v364_v41 = vld [vmem:[#allocation2 + $0x60] sm:$0xff] }
  0xfc   : > { %v621_v44 = vpop.f32.mrf.mxu3 }
  0xfd   : > { %1096 = vst.msk [vmem:[#allocation2 + $0x20] sm:$0xff] %vm488_vm1, %v1064_v43  ;;  %v656_v46 = vadd.f32 %v621_v44, %v382_v42 }
  0xfe   : > { %v995_v47 = vpop.f32.mrf.mxu2  ;;  %v563_v48 = vpop.f32.mrf.mxu0 }
  0xff   : > { %688 = vst.msk [vmem:[#allocation2 + $0xf0] sm:$0xff] %vm488_vm1, %v656_v46  ;;  %v633_v49 = vadd.f32 %v563_v48, %v359_v45  ;;  %v780_v50 = vpop.f32.mrf.mxu1 }
 0x100   : > { %v696_v51 = vld [vmem:[#allocation2 + $0x30] sm:$0xff] }
 0x101   : > { %v849_v14 = vadd.f32 %v778_v38, %v696_v51  ;;  %665 = vst.msk [vmem:[#allocation2 + $0x38] sm:$0xff] %vm488_vm1, %v633_v49  ;;  %v718_v51 = vld [vmem:[#allocation2 + $0xe0] sm:$0xff] }
 0x102   : > { %v912_v52 = vld [vmem:[#allocation2 + $0x28] sm:$0xff] }
 0x103   : > { %881 = vst.msk [vmem:[#allocation2 + $0x30] sm:$0xff] %vm488_vm1, %v849_v14  ;;  %v1065_v53 = vadd.f32 %v992_v35, %v912_v52  ;;  %v365_v52 = vld [vmem:[#allocation2 + $0x68] sm:$0xff] }
 0x104   : > { %v623_v54 = vpop.f32.mrf.mxu3 }
 0x105   : > { %1097 = vst.msk [vmem:[#allocation2 + $0x28] sm:$0xff] %vm488_vm1, %v1065_v53  ;;  %v657_v56 = vadd.f32 %v623_v54, %v383_v17 }
 0x106   : > { %v997_v57 = vpop.f32.mrf.mxu2  ;;  %v566_v58 = vpop.f32.mrf.mxu0 }
 0x107   : > { %689 = vst.msk [vmem:[#allocation2 + $0xf8] sm:$0xff] %vm488_vm1, %v657_v56  ;;  %v634_v59 = vadd.f32 %v566_v58, %v360_v55  ;;  %v783_v60 = vpop.f32.mrf.mxu1 }
 0x108   : > { %v697_v61 = vld [vmem:[#allocation2 + $0x38] sm:$0xff] }
 0x109   : > { %v850_v62 = vadd.f32 %v780_v50, %v697_v61  ;;  %666 = vst.msk [vmem:[#allocation2 + $0x40] sm:$0xff] %vm488_vm1, %v634_v59  ;;  %v719_v61 = vld [vmem:[#allocation2 + $0xe8] sm:$0xff] }
 0x10a   : > { %v913_v63 = vld [vmem:[#allocation2 + $0x30] sm:$0xff] }
 0x10b   : > { %882 = vst.msk [vmem:[#allocation2 + $0x38] sm:$0xff] %vm488_vm1, %v850_v62  ;;  %v1066_v0 = vadd.f32 %v995_v47, %v913_v63  ;;  %v366_v63 = vld [vmem:[#allocation2 + $0x70] sm:$0xff] }
 0x10c   : > { %v823_v2 = vpop.f32.mrf.mxu3 }
 0x10d   : > { %1098 = vst.msk [vmem:[#allocation2 + $0x30] sm:$0xff] %vm488_vm1, %v1066_v0  ;;  %v867_v4 = vadd.f32 %v823_v2, %v714_v1 }
 0x10e   : > { %v1000_v5 = vpop.f32.mrf.mxu2  ;;  %v568_v6 = vpop.f32.mrf.mxu0 }
 0x10f   : > { %899 = vst.msk [vmem:[#allocation2 + $0xc0] sm:$0xff] %vm488_vm1, %v867_v4  ;;  %v635_v7 = vadd.f32 %v568_v6, %v361_v3  ;;  %v785_v8 = vpop.f32.mrf.mxu1 }
 0x110   : > { %v698_v9 = vld [vmem:[#allocation2 + $0x40] sm:$0xff] }
 0x111   : > { %v851_v10 = vadd.f32 %v783_v60, %v698_v9  ;;  %667 = vst.msk [vmem:[#allocation2 + $0x48] sm:$0xff] %vm488_vm1, %v635_v7  ;;  %v720_v9 = vld [vmem:[#allocation2 + $0xf0] sm:$0xff] }
 0x112   : > { %v914_v11 = vld [vmem:[#allocation2 + $0x38] sm:$0xff] }
 0x113   : > { %883 = vst.msk [vmem:[#allocation2 + $0x40] sm:$0xff] %vm488_vm1, %v851_v10  ;;  %v1067_v12 = vadd.f32 %v997_v57, %v914_v11  ;;  %v367_v11 = vld [vmem:[#allocation2 + $0x78] sm:$0xff] }
 0x114   : > { %v825_v15 = vpop.f32.mrf.mxu3 }
 0x115   : > { %1099 = vst.msk [vmem:[#allocation2 + $0x38] sm:$0xff] %vm488_vm1, %v1067_v12  ;;  %v868_v18 = vadd.f32 %v825_v15, %v715_v13 }
 0x116   : > { %v1002_v19 = vpop.f32.mrf.mxu2  ;;  %v571_v20 = vpop.f32.mrf.mxu0 }
 0x117   : > { %900 = vst.msk [vmem:[#allocation2 + $0xc8] sm:$0xff] %vm488_vm1, %v868_v18  ;;  %v636_v21 = vadd.f32 %v571_v20, %v362_v16  ;;  %v788_v22 = vpop.f32.mrf.mxu1 }
 0x118   : > { %v699_v23 = vld [vmem:[#allocation2 + $0x48] sm:$0xff] }
 0x119   : > { %v852_v24 = vadd.f32 %v785_v8, %v699_v23  ;;  %668 = vst.msk [vmem:[#allocation2 + $0x50] sm:$0xff] %vm488_vm1, %v636_v21  ;;  %v721_v23 = vld [vmem:[#allocation2 + $0xf8] sm:$0xff] }
 0x11a   : > { %v915_v25 = vld [vmem:[#allocation2 + $0x40] sm:$0xff] }
 0x11b   : > { %884 = vst.msk [vmem:[#allocation2 + $0x48] sm:$0xff] %vm488_vm1, %v852_v24  ;;  %v1068_v26 = vadd.f32 %v1000_v5, %v915_v25  ;;  %v368_v25 = vld [vmem:[#allocation2 + $0x80] sm:$0xff] }
 0x11c   : > { %v828_v28 = vpop.f32.mrf.mxu3 }
 0x11d   : > { %1100 = vst.msk [vmem:[#allocation2 + $0x40] sm:$0xff] %vm488_vm1, %v1068_v26  ;;  %v869_v30 = vadd.f32 %v828_v28, %v716_v27 }
 0x11e   : > { %v1005_v31 = vpop.f32.mrf.mxu2  ;;  %v573_v32 = vpop.f32.mrf.mxu0 }
 0x11f   : > { %901 = vst.msk [vmem:[#allocation2 + $0xd0] sm:$0xff] %vm488_vm1, %v869_v30  ;;  %v637_v33 = vadd.f32 %v573_v32, %v363_v29  ;;  %v790_v34 = vpop.f32.mrf.mxu1 }
 0x120   : > { %v700_v35 = vld [vmem:[#allocation2 + $0x50] sm:$0xff] }
 0x121   : > { %v853_v36 = vadd.f32 %v788_v22, %v700_v35  ;;  %669 = vst.msk [vmem:[#allocation2 + $0x58] sm:$0xff] %vm488_vm1, %v637_v33  ;;  %v931_v35 = vld [vmem:[#allocation2 + $0xc0] sm:$0xff] }
 0x122   : > { %v916_v37 = vld [vmem:[#allocation2 + $0x48] sm:$0xff] }
 0x123   : > { %885 = vst.msk [vmem:[#allocation2 + $0x50] sm:$0xff] %vm488_vm1, %v853_v36  ;;  %v1069_v38 = vadd.f32 %v1002_v19, %v916_v37  ;;  %v369_v37 = vld [vmem:[#allocation2 + $0x88] sm:$0xff] }
 0x124   : > { %v830_v40 = vpop.f32.mrf.mxu3 }
 0x125   : > { %1101 = vst.msk [vmem:[#allocation2 + $0x48] sm:$0xff] %vm488_vm1, %v1069_v38  ;;  %v870_v42 = vadd.f32 %v830_v40, %v717_v39 }
 0x126   : > { %v1007_v43 = vpop.f32.mrf.mxu2  ;;  %v576_v44 = vpop.f32.mrf.mxu0 }
 0x127   : > { %902 = vst.msk [vmem:[#allocation2 + $0xd8] sm:$0xff] %vm488_vm1, %v870_v42  ;;  %v638_v45 = vadd.f32 %v576_v44, %v364_v41  ;;  %v793_v46 = vpop.f32.mrf.mxu1 }
 0x128   : > { %v701_v47 = vld [vmem:[#allocation2 + $0x58] sm:$0xff] }
 0x129   : > { %v854_v48 = vadd.f32 %v790_v34, %v701_v47  ;;  %670 = vst.msk [vmem:[#allocation2 + $0x60] sm:$0xff] %vm488_vm1, %v638_v45  ;;  %v932_v47 = vld [vmem:[#allocation2 + $0xc8] sm:$0xff] }
 0x12a   : > { %v917_v49 = vld [vmem:[#allocation2 + $0x50] sm:$0xff] }
 0x12b   : > { %886 = vst.msk [vmem:[#allocation2 + $0x58] sm:$0xff] %vm488_vm1, %v854_v48  ;;  %v1070_v50 = vadd.f32 %v1005_v31, %v917_v49  ;;  %v370_v49 = vld [vmem:[#allocation2 + $0x90] sm:$0xff] }
 0x12c   : > { %v833_v14 = vpop.f32.mrf.mxu3 }
 0x12d   : > { %1102 = vst.msk [vmem:[#allocation2 + $0x50] sm:$0xff] %vm488_vm1, %v1070_v50  ;;  %v871_v17 = vadd.f32 %v833_v14, %v718_v51 }
 0x12e   : > { %v1010_v53 = vpop.f32.mrf.mxu2  ;;  %v578_v54 = vpop.f32.mrf.mxu0 }
 0x12f   : > { %903 = vst.msk [vmem:[#allocation2 + $0xe0] sm:$0xff] %vm488_vm1, %v871_v17  ;;  %v639_v55 = vadd.f32 %v578_v54, %v365_v52  ;;  %v795_v56 = vpop.f32.mrf.mxu1 }
 0x130   : > { %v702_v57 = vld [vmem:[#allocation2 + $0x60] sm:$0xff] }
 0x131   : > { %v855_v58 = vadd.f32 %v793_v46, %v702_v57  ;;  %671 = vst.msk [vmem:[#allocation2 + $0x68] sm:$0xff] %vm488_vm1, %v639_v55  ;;  %v933_v57 = vld [vmem:[#allocation2 + $0xd0] sm:$0xff] }
 0x132   : > { %v918_v59 = vld [vmem:[#allocation2 + $0x58] sm:$0xff] }
 0x133   : > { %887 = vst.msk [vmem:[#allocation2 + $0x60] sm:$0xff] %vm488_vm1, %v855_v58  ;;  %v1071_v60 = vadd.f32 %v1007_v43, %v918_v59  ;;  %v371_v59 = vld [vmem:[#allocation2 + $0x98] sm:$0xff] }
 0x134   : > { %v835_v62 = vpop.f32.mrf.mxu3 }
 0x135   : > { %1103 = vst.msk [vmem:[#allocation2 + $0x58] sm:$0xff] %vm488_vm1, %v1071_v60  ;;  %v872_v0 = vadd.f32 %v835_v62, %v719_v61 }
 0x136   : > { %v1012_v1 = vpop.f32.mrf.mxu2  ;;  %v581_v2 = vpop.f32.mrf.mxu0 }
 0x137   : > { %904 = vst.msk [vmem:[#allocation2 + $0xe8] sm:$0xff] %vm488_vm1, %v872_v0  ;;  %v640_v3 = vadd.f32 %v581_v2, %v366_v63  ;;  %v798_v4 = vpop.f32.mrf.mxu1 }
 0x138   : > { %v703_v5 = vld [vmem:[#allocation2 + $0x68] sm:$0xff] }
 0x139   : > { %v856_v6 = vadd.f32 %v795_v56, %v703_v5  ;;  %672 = vst.msk [vmem:[#allocation2 + $0x70] sm:$0xff] %vm488_vm1, %v640_v3  ;;  %v934_v5 = vld [vmem:[#allocation2 + $0xd8] sm:$0xff] }
 0x13a   : > { %v919_v7 = vld [vmem:[#allocation2 + $0x60] sm:$0xff] }
 0x13b   : > { %888 = vst.msk [vmem:[#allocation2 + $0x68] sm:$0xff] %vm488_vm1, %v856_v6  ;;  %v1072_v8 = vadd.f32 %v1010_v53, %v919_v7  ;;  %v372_v7 = vld [vmem:[#allocation2 + $0xa0] sm:$0xff] }
 0x13c   : > { %v838_v10 = vpop.f32.mrf.mxu3 }
 0x13d   : > { %1104 = vst.msk [vmem:[#allocation2 + $0x60] sm:$0xff] %vm488_vm1, %v1072_v8  ;;  %v873_v12 = vadd.f32 %v838_v10, %v720_v9 }
 0x13e   : > { %v1015_v13 = vpop.f32.mrf.mxu2  ;;  %v583_v15 = vpop.f32.mrf.mxu0 }
 0x13f   : > { %905 = vst.msk [vmem:[#allocation2 + $0xf0] sm:$0xff] %vm488_vm1, %v873_v12  ;;  %v641_v16 = vadd.f32 %v583_v15, %v367_v11  ;;  %v800_v18 = vpop.f32.mrf.mxu1 }
 0x140   : > { %v704_v19 = vld [vmem:[#allocation2 + $0x70] sm:$0xff] }
 0x141   : > { %v857_v20 = vadd.f32 %v798_v4, %v704_v19  ;;  %673 = vst.msk [vmem:[#allocation2 + $0x78] sm:$0xff] %vm488_vm1, %v641_v16  ;;  %v935_v19 = vld [vmem:[#allocation2 + $0xe0] sm:$0xff] }
 0x142   : > { %v920_v21 = vld [vmem:[#allocation2 + $0x68] sm:$0xff] }
 0x143   : > { %889 = vst.msk [vmem:[#allocation2 + $0x70] sm:$0xff] %vm488_vm1, %v857_v20  ;;  %v1073_v22 = vadd.f32 %v1012_v1, %v920_v21  ;;  %v373_v21 = vld [vmem:[#allocation2 + $0xa8] sm:$0xff] }
 0x144   : > { %v840_v24 = vpop.f32.mrf.mxu3 }
 0x145   : > { %1105 = vst.msk [vmem:[#allocation2 + $0x68] sm:$0xff] %vm488_vm1, %v1073_v22  ;;  %v874_v26 = vadd.f32 %v840_v24, %v721_v23 }
 0x146   : > { %v1017_v27 = vpop.f32.mrf.mxu2  ;;  %v586_v28 = vpop.f32.mrf.mxu0 }
 0x147   : > { %906 = vst.msk [vmem:[#allocation2 + $0xf8] sm:$0xff] %vm488_vm1, %v874_v26  ;;  %v642_v29 = vadd.f32 %v586_v28, %v368_v25  ;;  %v803_v30 = vpop.f32.mrf.mxu1 }
 0x148   : > { %v705_v31 = vld [vmem:[#allocation2 + $0x78] sm:$0xff] }
 0x149   : > { %v858_v32 = vadd.f32 %v800_v18, %v705_v31  ;;  %674 = vst.msk [vmem:[#allocation2 + $0x80] sm:$0xff] %vm488_vm1, %v642_v29  ;;  %v936_v31 = vld [vmem:[#allocation2 + $0xe8] sm:$0xff] }
 0x14a   : > { %v921_v33 = vld [vmem:[#allocation2 + $0x70] sm:$0xff] }
 0x14b   : > { %890 = vst.msk [vmem:[#allocation2 + $0x78] sm:$0xff] %vm488_vm1, %v858_v32  ;;  %v1074_v34 = vadd.f32 %v1015_v13, %v921_v33  ;;  %v374_v33 = vld [vmem:[#allocation2 + $0xb0] sm:$0xff] }
 0x14c   : > { %v1040_v36 = vpop.f32.mrf.mxu3 }
 0x14d   : > { %1106 = vst.msk [vmem:[#allocation2 + $0x70] sm:$0xff] %vm488_vm1, %v1074_v34  ;;  %v1084_v38 = vadd.f32 %v1040_v36, %v931_v35 }
 0x14e   : > { %v1020_v39 = vpop.f32.mrf.mxu2  ;;  %v588_v40 = vpop.f32.mrf.mxu0 }
 0x14f   : > { %1116 = vst.msk [vmem:[#allocation2 + $0xc0] sm:$0xff] %vm488_vm1, %v1084_v38  ;;  %v643_v41 = vadd.f32 %v588_v40, %v369_v37  ;;  %v805_v42 = vpop.f32.mrf.mxu1 }
 0x150   : > { %v706_v43 = vld [vmem:[#allocation2 + $0x80] sm:$0xff] }
 0x151   : > { %v859_v44 = vadd.f32 %v803_v30, %v706_v43  ;;  %675 = vst.msk [vmem:[#allocation2 + $0x88] sm:$0xff] %vm488_vm1, %v643_v41  ;;  %v937_v41 = vld [vmem:[#allocation2 + $0xf0] sm:$0xff]  ;;  %v375_v43 = vld [vmem:[#allocation2 + $0xb8] sm:$0xff] }
 0x152   : > { %v922_v45 = vld [vmem:[#allocation2 + $0x78] sm:$0xff] }
 0x153   : > { %891 = vst.msk [vmem:[#allocation2 + $0x80] sm:$0xff] %vm488_vm1, %v859_v44  ;;  %v1075_v46 = vadd.f32 %v1017_v27, %v922_v45 }
 0x154   : > { %v1042_v48 = vpop.f32.mrf.mxu3 }
 0x155   : > { %1107 = vst.msk [vmem:[#allocation2 + $0x78] sm:$0xff] %vm488_vm1, %v1075_v46  ;;  %v1085_v50 = vadd.f32 %v1042_v48, %v932_v47 }
 0x156   : > { %v1022_v51 = vpop.f32.mrf.mxu2  ;;  %v591_v14 = vpop.f32.mrf.mxu0 }
 0x157   : > { %1117 = vst.msk [vmem:[#allocation2 + $0xc8] sm:$0xff] %vm488_vm1, %v1085_v50  ;;  %v644_v52 = vadd.f32 %v591_v14, %v370_v49  ;;  %v808_v17 = vpop.f32.mrf.mxu1 }
 0x158   : > { %v707_v53 = vld [vmem:[#allocation2 + $0x88] sm:$0xff] }
 0x159   : > { %v860_v54 = vadd.f32 %v805_v42, %v707_v53  ;;  %676 = vst.msk [vmem:[#allocation2 + $0x90] sm:$0xff] %vm488_vm1, %v644_v52  ;;  %v938_v52 = vld [vmem:[#allocation2 + $0xf8] sm:$0xff] }
 0x15a   : > { %v923_v55 = vld [vmem:[#allocation2 + $0x80] sm:$0xff] }
 0x15b   : > { %892 = vst.msk [vmem:[#allocation2 + $0x88] sm:$0xff] %vm488_vm1, %v860_v54  ;;  %v1076_v56 = vadd.f32 %v1020_v39, %v923_v55 }
 0x15c   : > { %v1045_v58 = vpop.f32.mrf.mxu3 }
 0x15d   : > { %1108 = vst.msk [vmem:[#allocation2 + $0x80] sm:$0xff] %vm488_vm1, %v1076_v56  ;;  %v1086_v60 = vadd.f32 %v1045_v58, %v933_v57 }
 0x15e   : > { %v593_v61 = vpop.f32.mrf.mxu0  ;;  %v1025_v63 = vpop.f32.mrf.mxu2 }
 0x15f   : > { %1118 = vst.msk [vmem:[#allocation2 + $0xd0] sm:$0xff] %vm488_vm1, %v1086_v60  ;;  %v645_v62 = vadd.f32 %v593_v61, %v371_v59  ;;  %v810_v1 = vpop.f32.mrf.mxu1 }
 0x160   : > { %v708_v0 = vld [vmem:[#allocation2 + $0x90] sm:$0xff] }
 0x161   : > { %v861_v2 = vadd.f32 %v808_v17, %v708_v0  ;;  %677 = vst.msk [vmem:[#allocation2 + $0x98] sm:$0xff] %vm488_vm1, %v645_v62 }
 0x162   : > { %v924_v3 = vld [vmem:[#allocation2 + $0x88] sm:$0xff] }
 0x163   : > { %893 = vst.msk [vmem:[#allocation2 + $0x90] sm:$0xff] %vm488_vm1, %v861_v2  ;;  %v1077_v4 = vadd.f32 %v1022_v51, %v924_v3 }
 0x164   : > { %v1047_v6 = vpop.f32.mrf.mxu3 }
 0x165   : > { %1109 = vst.msk [vmem:[#allocation2 + $0x88] sm:$0xff] %vm488_vm1, %v1077_v4  ;;  %v1087_v8 = vadd.f32 %v1047_v6, %v934_v5 }
 0x166   : > { %v596_v9 = vpop.f32.mrf.mxu0  ;;  %v1027_v13 = vpop.f32.mrf.mxu2 }
 0x167   : > { %1119 = vst.msk [vmem:[#allocation2 + $0xd8] sm:$0xff] %vm488_vm1, %v1087_v8  ;;  %v646_v10 = vadd.f32 %v596_v9, %v372_v7  ;;  %v813_v16 = vpop.f32.mrf.mxu1 }
 0x168   : > { %v709_v11 = vld [vmem:[#allocation2 + $0x98] sm:$0xff] }
 0x169   : > { %v862_v12 = vadd.f32 %v810_v1, %v709_v11  ;;  %678 = vst.msk [vmem:[#allocation2 + $0xa0] sm:$0xff] %vm488_vm1, %v646_v10 }
 0x16a   : > { %v925_v15 = vld [vmem:[#allocation2 + $0x90] sm:$0xff] }
 0x16b   : > { %894 = vst.msk [vmem:[#allocation2 + $0x98] sm:$0xff] %vm488_vm1, %v862_v12  ;;  %v1078_v18 = vadd.f32 %v1025_v63, %v925_v15 }
 0x16c   : > { %v1050_v20 = vpop.f32.mrf.mxu3 }
 0x16d   : > { %1110 = vst.msk [vmem:[#allocation2 + $0x90] sm:$0xff] %vm488_vm1, %v1078_v18  ;;  %v1088_v22 = vadd.f32 %v1050_v20, %v935_v19 }
 0x16e   : > { %v598_v23 = vpop.f32.mrf.mxu0  ;;  %v1030_v29 = vpop.f32.mrf.mxu2 }
 0x16f   : > { %1120 = vst.msk [vmem:[#allocation2 + $0xe0] sm:$0xff] %vm488_vm1, %v1088_v22  ;;  %v647_v24 = vadd.f32 %v598_v23, %v373_v21  ;;  %v815_v30 = vpop.f32.mrf.mxu1 }
 0x170   : > { %v710_v25 = vld [vmem:[#allocation2 + $0xa0] sm:$0xff] }
 0x171   : > { %v863_v26 = vadd.f32 %v813_v16, %v710_v25  ;;  %679 = vst.msk [vmem:[#allocation2 + $0xa8] sm:$0xff] %vm488_vm1, %v647_v24 }
 0x172   : > { %v926_v27 = vld [vmem:[#allocation2 + $0x98] sm:$0xff] }
 0x173   : > { %895 = vst.msk [vmem:[#allocation2 + $0xa0] sm:$0xff] %vm488_vm1, %v863_v26  ;;  %v1079_v28 = vadd.f32 %v1027_v13, %v926_v27 }
 0x174   : > { %v1052_v32 = vpop.f32.mrf.mxu3 }
 0x175   : > { %1111 = vst.msk [vmem:[#allocation2 + $0x98] sm:$0xff] %vm488_vm1, %v1079_v28  ;;  %v1089_v34 = vadd.f32 %v1052_v32, %v936_v31 }
 0x176   : > { %v601_v35 = vpop.f32.mrf.mxu0  ;;  %v1032_v44 = vpop.f32.mrf.mxu2 }
 0x177   : > { %1121 = vst.msk [vmem:[#allocation2 + $0xe8] sm:$0xff] %vm488_vm1, %v1089_v34  ;;  %v648_v36 = vadd.f32 %v601_v35, %v374_v33  ;;  %v818_v46 = vpop.f32.mrf.mxu1 }
 0x178   : > { %v711_v37 = vld [vmem:[#allocation2 + $0xa8] sm:$0xff] }
 0x179   : > { %v864_v38 = vadd.f32 %v815_v30, %v711_v37  ;;  %680 = vst.msk [vmem:[#allocation2 + $0xb0] sm:$0xff] %vm488_vm1, %v648_v36 }
 0x17a   : > { %v927_v39 = vld [vmem:[#allocation2 + $0xa0] sm:$0xff] }
 0x17b   : > { %896 = vst.msk [vmem:[#allocation2 + $0xa8] sm:$0xff] %vm488_vm1, %v864_v38  ;;  %v1080_v40 = vadd.f32 %v1030_v29, %v927_v39 }
 0x17c   : > { %v1055_v42 = vpop.f32.mrf.mxu3 }
 0x17d   : > { %1112 = vst.msk [vmem:[#allocation2 + $0xa0] sm:$0xff] %vm488_vm1, %v1080_v40  ;;  %v1090_v45 = vadd.f32 %v1055_v42, %v937_v41 }
 0x17e   : > { %v603_v47 = vpop.f32.mrf.mxu0  ;;  %v1035_v56 = vpop.f32.mrf.mxu2 }
 0x17f   : > { %1122 = vst.msk [vmem:[#allocation2 + $0xf0] sm:$0xff] %vm488_vm1, %v1090_v45  ;;  %v649_v48 = vadd.f32 %v603_v47, %v375_v43  ;;  %v820_v55 = vpop.f32.mrf.mxu1 }
 0x180   : > { %v712_v49 = vld [vmem:[#allocation2 + $0xb0] sm:$0xff] }
 0x181   : > { %v865_v50 = vadd.f32 %v818_v46, %v712_v49  ;;  %681 = vst.msk [vmem:[#allocation2 + $0xb8] sm:$0xff] %vm488_vm1, %v649_v48 }
 0x182   : > { %v928_v51 = vld [vmem:[#allocation2 + $0xa8] sm:$0xff] }
 0x183   : > { %897 = vst.msk [vmem:[#allocation2 + $0xb0] sm:$0xff] %vm488_vm1, %v865_v50  ;;  %v1081_v14 = vadd.f32 %v1032_v44, %v928_v51 }
 0x184   : > { %v1057_v17 = vpop.f32.mrf.mxu3 }
 0x185   : > { %1113 = vst.msk [vmem:[#allocation2 + $0xa8] sm:$0xff] %vm488_vm1, %v1081_v14  ;;  %v1091_v53 = vadd.f32 %v1057_v17, %v938_v52 }
 0x186   : > { %v1037_v61 = vpop.f32.mrf.mxu2 }
 0x187   : > { %1123 = vst.msk [vmem:[#allocation2 + $0xf8] sm:$0xff] %vm488_vm1, %v1091_v53 }
 0x188   : > { %v713_v54 = vld [vmem:[#allocation2 + $0xb8] sm:$0xff] }
 0x189   : > { %v866_v57 = vadd.f32 %v820_v55, %v713_v54 }
 0x18a   : > { %v929_v58 = vld [vmem:[#allocation2 + $0xb0] sm:$0xff] }
 0x18b   : > { %898 = vst.msk [vmem:[#allocation2 + $0xb8] sm:$0xff] %vm488_vm1, %v866_v57  ;;  %v1082_v59 = vadd.f32 %v1035_v56, %v929_v58 }
 0x18d   : > { %1114 = vst.msk [vmem:[#allocation2 + $0xb0] sm:$0xff] %vm488_vm1, %v1082_v59 }
 0x191   : > { %1129 = sbr.rel (%p2077_p10) target bundleno = 408 (0x198), region = 36 }
 0x192   : > { %v930_v60 = vld [vmem:[#allocation2 + $0xb8] sm:$0xff] }
 0x193   : > { %v1083_v62 = vadd.f32 %v1037_v61, %v930_v60 }
 0x195   : > { %1115 = vst.msk [vmem:[#allocation2 + $0xb8] sm:$0xff] %vm488_vm1, %v1083_v62 }
 0x196   : > { %vm1130_vm2 = vcmask 517120   ;;  %v1825_v63 = vmov 0.0  }
 0x197   : > { %1131 = vst.msk [vmem:[%s2383_s3] sm:$0x3] %vm1130_vm2, %v1825_v63 }
 0x198 PF: > { %p1692_p11 = scmp.ne.s32.totalorder %s1806_s12, 2 }
 0x19a   : > { %1134 = sbr.rel (%p1692_p11) target bundleno = 497 (0x1f1), region = 40 }
 0x19f   : > { %v1135_v0 = vld [vmem:[#allocation2] sm:$0xff]  ;;  %v1136_v1 = vld [vmem:[#allocation2 + $0x8] sm:$0xff]  ;;  %v1137_v2 = vld [vmem:[#allocation2 + $0x10] sm:$0xff]  ;;  %vm1370_vm3 = vcmask 1040384   ;;  %vm1373_vm4 = vcmask 517120  }
 0x1a0   : > { %1167 = vst.msk [vmem:[%s1887_s27] sm:$0xff] %vm488_vm1, %v1135_v0  ;;  %v1200_v3 = vsel %vm488_vm1, %v1135_v0, 0.0  ;;  %v1269_v4 = vmul.f32 %v1135_v0, %v1135_v0  ;;  %v1201_v5 = vsel %vm488_vm1, %v1136_v1, 0.0  ;;  %v1270_v6 = vmul.f32 %v1136_v1, %v1136_v1  ;;  %v1138_v7 = vld [vmem:[#allocation2 + $0x18] sm:$0xff]  ;;  %v1139_v8 = vld [vmem:[#allocation2 + $0x20] sm:$0xff]  ;;  %v1140_v12 = vld [vmem:[#allocation2 + $0x28] sm:$0xff] }
 0x1a1   : > { %1168 = vst.msk [vmem:[%s1887_s27 + $0x8] sm:$0xff] %vm488_vm1, %v1136_v1  ;;  %v1202_v9 = vadd.f32 %v1201_v5, %v1200_v3  ;;  %v1203_v10 = vsel %vm488_vm1, %v1137_v2, 0.0  ;;  %v1271_v11 = vmul.f32 %v1137_v2, %v1137_v2  ;;  %v1205_v16 = vsel %vm488_vm1, %v1138_v7, 0.0  ;;  %v1141_v23 = vld [vmem:[#allocation2 + $0x30] sm:$0xff]  ;;  %v1142_v29 = vld [vmem:[#allocation2 + $0x38] sm:$0xff]  ;;  %v1143_v35 = vld [vmem:[#allocation2 + $0x40] sm:$0xff] }
 0x1a2   : > { %v1301_v13 = vsel %vm488_vm1, %v1269_v4, 0.0  ;;  %v1302_v15 = vsel %vm488_vm1, %v1270_v6, 0.0  ;;  %1169 = vst.msk [vmem:[%s1887_s27 + $0x10] sm:$0xff] %vm488_vm1, %v1137_v2  ;;  %v1272_v18 = vmul.f32 %v1138_v7, %v1138_v7  ;;  %v1273_v22 = vmul.f32 %v1139_v8, %v1139_v8  ;;  %v1144_v39 = vld [vmem:[#allocation2 + $0x48] sm:$0xff]  ;;  %v1145_v42 = vld [vmem:[#allocation2 + $0x50] sm:$0xff]  ;;  %v1146_v46 = vld [vmem:[#allocation2 + $0x58] sm:$0xff] }
 0x1a3   : > { %v1303_v19 = vadd.f32 %v1302_v15, %v1301_v13  ;;  %v1204_v20 = vadd.f32 %v1203_v10, %v1202_v9  ;;  %v1304_v21 = vsel %vm488_vm1, %v1271_v11, 0.0  ;;  %1170 = vst.msk [vmem:[%s1887_s27 + $0x18] sm:$0xff] %vm488_vm1, %v1138_v7  ;;  %v1207_v25 = vsel %vm488_vm1, %v1139_v8, 0.0  ;;  %v1147_v49 = vld [vmem:[#allocation2 + $0x60] sm:$0xff]  ;;  %v1148_v52 = vld [vmem:[#allocation2 + $0x68] sm:$0xff]  ;;  %v1149_v54 = vld [vmem:[#allocation2 + $0x70] sm:$0xff] }
 0x1a4   : > { %v1306_v24 = vsel %vm488_vm1, %v1272_v18, 0.0  ;;  %1171 = vst.msk [vmem:[%s1887_s27 + $0x20] sm:$0xff] %vm488_vm1, %v1139_v8  ;;  %v1274_v26 = vmul.f32 %v1140_v12, %v1140_v12  ;;  %v1308_v30 = vsel %vm488_vm1, %v1273_v22, 0.0  ;;  %v1209_v31 = vsel %vm488_vm1, %v1140_v12, 0.0  ;;  %v1150_v58 = vld [vmem:[#allocation2 + $0x78] sm:$0xff]  ;;  %v1151_v61 = vld [vmem:[#allocation2 + $0x80] sm:$0xff] }
 0x1a5   : > { %v1305_v27 = vadd.f32 %v1304_v21, %v1303_v19  ;;  %v1206_v28 = vadd.f32 %v1205_v16, %v1204_v20  ;;  %1172 = vst.msk [vmem:[%s1887_s27 + $0x28] sm:$0xff] %vm488_vm1, %v1140_v12  ;;  %v1275_v32 = vmul.f32 %v1141_v23, %v1141_v23  ;;  %v1211_v37 = vsel %vm488_vm1, %v1141_v23, 0.0  ;;  %v1152_v1 = vld [vmem:[#allocation2 + $0x88] sm:$0xff]  ;;  %v2204_v4 = vld [vmem:[#allocation2 + $0x90] sm:$0xff]  ;;  %v2211_v8 = vld [vmem:[#allocation2 + $0x98] sm:$0xff] }
 0x1a6   : > { %1173 = vst.msk [vmem:[%s1887_s27 + $0x30] sm:$0xff] %vm488_vm1, %v1141_v23  ;;  %v1310_v36 = vsel %vm488_vm1, %v1274_v26, 0.0  ;;  %v1276_v38 = vmul.f32 %v1142_v29, %v1142_v29  ;;  %v1213_v44 = vsel %vm488_vm1, %v1142_v29, 0.0  ;;  %v1277_v45 = vmul.f32 %v1143_v35, %v1143_v35  ;;  %v2216_v11 = vld [vmem:[#allocation2 + $0xa0] sm:$0xff]  ;;  %v2223_v16 = vld [vmem:[#allocation2 + $0xa8] sm:$0xff]  ;;  %v2228_v20 = vld [vmem:[#allocation2 + $0xb0] sm:$0xff] }
 0x1a7   : > { %v1307_v33 = vadd.f32 %v1306_v24, %v1305_v27  ;;  %v1208_v34 = vadd.f32 %v1207_v25, %v1206_v28  ;;  %1174 = vst.msk [vmem:[%s1887_s27 + $0x38] sm:$0xff] %vm488_vm1, %v1142_v29  ;;  %v1312_v43 = vsel %vm488_vm1, %v1275_v32, 0.0  ;;  %v1215_v51 = vsel %vm488_vm1, %v1143_v35, 0.0  ;;  %v2235_v24 = vld [vmem:[#allocation2 + $0xb8] sm:$0xff]  ;;  %v2240_v27 = vld [vmem:[#allocation2 + $0xc0] sm:$0xff] }
 0x1a8   : > { %1175 = vst.msk [vmem:[%s1887_s27 + $0x40] sm:$0xff] %vm488_vm1, %v1143_v35  ;;  %v1314_v50 = vsel %vm488_vm1, %v1276_v38, 0.0  ;;  %v1278_v14 = vmul.f32 %v1144_v39, %v1144_v39  ;;  %v1316_v55 = vsel %vm488_vm1, %v1277_v45, 0.0  ;;  %v1217_v56 = vsel %vm488_vm1, %v1144_v39, 0.0  ;;  %v2259_v38 = vld [vmem:[#allocation2 + $0xd8] sm:$0xff]  ;;  %v2271_v45 = vld [vmem:[#allocation2 + $0xe8] sm:$0xff] }
 0x1a9   : > { %v1309_v40 = vadd.f32 %v1308_v30, %v1307_v33  ;;  %v1210_v41 = vadd.f32 %v1209_v31, %v1208_v34  ;;  %1176 = vst.msk [vmem:[%s1887_s27 + $0x48] sm:$0xff] %vm488_vm1, %v1144_v39  ;;  %v1279_v57 = vmul.f32 %v1145_v42, %v1145_v42  ;;  %v1219_v63 = vsel %vm488_vm1, %v1145_v42, 0.0  ;;  %v2247_v31 = vld [vmem:[#allocation2 + $0xc8] sm:$0xff]  ;;  %v2252_v34 = vld [vmem:[#allocation2 + $0xd0] sm:$0xff] }
 0x1aa   : > { %1177 = vst.msk [vmem:[%s1887_s27 + $0x50] sm:$0xff] %vm488_vm1, %v1145_v42  ;;  %v1318_v62 = vsel %vm488_vm1, %v1278_v14, 0.0  ;;  %v1280_v0 = vmul.f32 %v1146_v46, %v1146_v46  ;;  %v1221_v6 = vsel %vm488_vm1, %v1146_v46, 0.0  ;;  %v1281_v7 = vmul.f32 %v1147_v49, %v1147_v49  ;;  %v2285_v14 = vld [vmem:[#allocation2 + $0xf8] sm:$0xff] }
 0x1ab   : > { %v1311_v47 = vadd.f32 %v1310_v36, %v1309_v40  ;;  %v1212_v48 = vadd.f32 %v1211_v37, %v1210_v41  ;;  %1178 = vst.msk [vmem:[%s1887_s27 + $0x58] sm:$0xff] %vm488_vm1, %v1146_v46  ;;  %v1320_v5 = vsel %vm488_vm1, %v1279_v57, 0.0  ;;  %v1223_v13 = vsel %vm488_vm1, %v1147_v49, 0.0  ;;  %v2264_v41 = vld [vmem:[#allocation2 + $0xe0] sm:$0xff] }
 0x1ac   : > { %1179 = vst.msk [vmem:[%s1887_s27 + $0x60] sm:$0xff] %vm488_vm1, %v1147_v49  ;;  %v1322_v12 = vsel %vm488_vm1, %v1280_v0, 0.0  ;;  %v1282_v15 = vmul.f32 %v1148_v52, %v1148_v52  ;;  %v1324_v21 = vsel %vm488_vm1, %v1281_v7, 0.0  ;;  %v1225_v22 = vsel %vm488_vm1, %v1148_v52, 0.0 }
 0x1ad   : > { %v1313_v17 = vadd.f32 %v1312_v43, %v1311_v47  ;;  %v1214_v53 = vadd.f32 %v1213_v44, %v1212_v48  ;;  %1180 = vst.msk [vmem:[%s1887_s27 + $0x68] sm:$0xff] %vm488_vm1, %v1148_v52  ;;  %v1283_v23 = vmul.f32 %v1149_v54, %v1149_v54  ;;  %v1227_v29 = vsel %vm488_vm1, %v1149_v54, 0.0  ;;  %v2276_v48 = vld [vmem:[#allocation2 + $0xf0] sm:$0xff] }
 0x1ae   : > { %1181 = vst.msk [vmem:[%s1887_s27 + $0x70] sm:$0xff] %vm488_vm1, %v1149_v54  ;;  %v1326_v28 = vsel %vm488_vm1, %v1282_v15, 0.0  ;;  %v1284_v30 = vmul.f32 %v1150_v58, %v1150_v58  ;;  %v1229_v36 = vsel %vm488_vm1, %v1150_v58, 0.0  ;;  %v1285_v37 = vmul.f32 %v1151_v61, %v1151_v61 }
 0x1af   : > { %v1315_v59 = vadd.f32 %v1314_v50, %v1313_v17  ;;  %v1216_v60 = vadd.f32 %v1215_v51, %v1214_v53  ;;  %1182 = vst.msk [vmem:[%s1887_s27 + $0x78] sm:$0xff] %vm488_vm1, %v1150_v58  ;;  %v1328_v35 = vsel %vm488_vm1, %v1283_v23, 0.0  ;;  %v1231_v43 = vsel %vm488_vm1, %v1151_v61, 0.0 }
 0x1b0   : > { %1183 = vst.msk [vmem:[%s1887_s27 + $0x80] sm:$0xff] %vm488_vm1, %v1151_v61  ;;  %v1330_v42 = vsel %vm488_vm1, %v1284_v30, 0.0  ;;  %v1286_v44 = vmul.f32 %v1152_v1, %v1152_v1  ;;  %v1332_v49 = vsel %vm488_vm1, %v1285_v37, 0.0  ;;  %v1233_v50 = vsel %vm488_vm1, %v1152_v1, 0.0 }
 0x1b1   : > { %v1317_v2 = vadd.f32 %v1316_v55, %v1315_v59  ;;  %v1218_v3 = vadd.f32 %v1217_v56, %v1216_v60  ;;  %1184 = vst.msk [vmem:[%s1887_s27 + $0x88] sm:$0xff] %vm488_vm1, %v1152_v1  ;;  %v1287_v51 = vmul.f32 %v2204_v4, %v2204_v4  ;;  %v1235_v54 = vsel %vm488_vm1, %v2204_v4, 0.0 }
 0x1b2   : > { %1185 = vst.msk [vmem:[%s1887_s27 + $0x90] sm:$0xff] %vm488_vm1, %v2204_v4  ;;  %v1334_v53 = vsel %vm488_vm1, %v1286_v44, 0.0  ;;  %v1288_v55 = vmul.f32 %v2211_v8, %v2211_v8  ;;  %v1237_v59 = vsel %vm488_vm1, %v2211_v8, 0.0  ;;  %v1289_v60 = vmul.f32 %v2216_v11, %v2216_v11 }
 0x1b3   : > { %v1319_v9 = vadd.f32 %v1318_v62, %v1317_v2  ;;  %v1220_v10 = vadd.f32 %v1219_v63, %v1218_v3  ;;  %1186 = vst.msk [vmem:[%s1887_s27 + $0x98] sm:$0xff] %vm488_vm1, %v2211_v8  ;;  %v1336_v58 = vsel %vm488_vm1, %v1287_v51, 0.0  ;;  %v1239_v0 = vsel %vm488_vm1, %v2216_v11, 0.0 }
 0x1b4   : > { %1187 = vst.msk [vmem:[%s1887_s27 + $0xa0] sm:$0xff] %vm488_vm1, %v2216_v11  ;;  %v1338_v63 = vsel %vm488_vm1, %v1288_v55, 0.0  ;;  %v1290_v1 = vmul.f32 %v2223_v16, %v2223_v16  ;;  %v1340_v4 = vsel %vm488_vm1, %v1289_v60, 0.0  ;;  %v1292_v11 = vmul.f32 %v2235_v24, %v2235_v24 }
 0x1b5   : > { %v1321_v18 = vadd.f32 %v1320_v5, %v1319_v9  ;;  %v1222_v19 = vadd.f32 %v1221_v6, %v1220_v10  ;;  %1188 = vst.msk [vmem:[%s1887_s27 + $0xa8] sm:$0xff] %vm488_vm1, %v2223_v16  ;;  %v1241_v5 = vsel %vm488_vm1, %v2223_v16, 0.0  ;;  %v1291_v6 = vmul.f32 %v2228_v20, %v2228_v20 }
 0x1b6   : > { %1189 = vst.msk [vmem:[%s1887_s27 + $0xb0] sm:$0xff] %vm488_vm1, %v2228_v20  ;;  %v1342_v9 = vsel %vm488_vm1, %v1290_v1, 0.0  ;;  %v1243_v10 = vsel %vm488_vm1, %v2228_v20, 0.0  ;;  %v1245_v16 = vsel %vm488_vm1, %v2235_v24, 0.0  ;;  %v1247_v20 = vsel %vm488_vm1, %v2240_v27, 0.0 }
 0x1b7   : > { %v1323_v25 = vadd.f32 %v1322_v12, %v1321_v18  ;;  %v1224_v26 = vadd.f32 %v1223_v13, %v1222_v19  ;;  %1190 = vst.msk [vmem:[%s1887_s27 + $0xb8] sm:$0xff] %vm488_vm1, %v2235_v24  ;;  %v1344_v15 = vsel %vm488_vm1, %v1291_v6, 0.0  ;;  %v1293_v18 = vmul.f32 %v2240_v27, %v2240_v27 }
 0x1b8   : > { %1191 = vst.msk [vmem:[%s1887_s27 + $0xc0] sm:$0xff] %vm488_vm1, %v2240_v27  ;;  %v1294_v23 = vmul.f32 %v2247_v31, %v2247_v31  ;;  %v1249_v24 = vsel %vm488_vm1, %v2247_v31, 0.0  ;;  %v1251_v27 = vsel %vm488_vm1, %v2252_v34, 0.0  ;;  %v1299_v51 = vmul.f32 %v2276_v48, %v2276_v48 }
 0x1b9   : > { %v1325_v32 = vadd.f32 %v1324_v21, %v1323_v25  ;;  %v1226_v33 = vadd.f32 %v1225_v22, %v1224_v26  ;;  %1192 = vst.msk [vmem:[%s1887_s27 + $0xc8] sm:$0xff] %vm488_vm1, %v2247_v31  ;;  %v1346_v22 = vsel %vm488_vm1, %v1292_v11, 0.0  ;;  %v1253_v31 = vsel %vm488_vm1, %v2259_v38, 0.0 }
 0x1ba   : > { %1193 = vst.msk [vmem:[%s1887_s27 + $0xd0] sm:$0xff] %vm488_vm1, %v2252_v34 }
 0x1bb   : > { %v1327_v39 = vadd.f32 %v1326_v28, %v1325_v32  ;;  %v1228_v40 = vadd.f32 %v1227_v29, %v1226_v33  ;;  %1194 = vst.msk [vmem:[%s1887_s27 + $0xd8] sm:$0xff] %vm488_vm1, %v2259_v38  ;;  %v1348_v28 = vsel %vm488_vm1, %v1293_v18, 0.0  ;;  %v1295_v29 = vmul.f32 %v2252_v34, %v2252_v34 }
 0x1bc   : > { %1195 = vst.msk [vmem:[%s1887_s27 + $0xe0] sm:$0xff] %vm488_vm1, %v2264_v41  ;;  %v1350_v33 = vsel %vm488_vm1, %v1294_v23, 0.0  ;;  %v1255_v34 = vsel %vm488_vm1, %v2264_v41, 0.0 }
 0x1bd   : > { %v1329_v46 = vadd.f32 %v1328_v35, %v1327_v39  ;;  %v1230_v47 = vadd.f32 %v1229_v36, %v1228_v40  ;;  %1196 = vst.msk [vmem:[%s1887_s27 + $0xe8] sm:$0xff] %vm488_vm1, %v2271_v45  ;;  %v1296_v35 = vmul.f32 %v2259_v38, %v2259_v38  ;;  %v1352_v39 = vsel %vm488_vm1, %v1295_v29, 0.0 }
 0x1be   : > { %1197 = vst.msk [vmem:[%s1887_s27 + $0xf0] sm:$0xff] %vm488_vm1, %v2276_v48  ;;  %v1297_v40 = vmul.f32 %v2264_v41, %v2264_v41  ;;  %v1257_v38 = vsel %vm488_vm1, %v2271_v45, 0.0  ;;  %v1259_v41 = vsel %vm488_vm1, %v2276_v48, 0.0 }
 0x1bf   : > { %v1331_v52 = vadd.f32 %v1330_v42, %v1329_v46  ;;  %v1232_v17 = vadd.f32 %v1231_v43, %v1230_v47  ;;  %1198 = vst.msk [vmem:[%s1887_s27 + $0xf8] sm:$0xff] %vm488_vm1, %v2285_v14  ;;  %v1354_v44 = vsel %vm488_vm1, %v1296_v35, 0.0  ;;  %v1298_v46 = vmul.f32 %v2271_v45, %v2271_v45 }
 0x1c0   : > { %v1261_v45 = vsel %vm488_vm1, %v2285_v14, 0.0 }
 0x1c1   : > { %v1333_v56 = vadd.f32 %v1332_v49, %v1331_v52  ;;  %v1234_v57 = vadd.f32 %v1233_v50, %v1232_v17  ;;  %v1356_v50 = vsel %vm488_vm1, %v1297_v40, 0.0 }
 0x1c3   : > { %v1335_v61 = vadd.f32 %v1334_v53, %v1333_v56  ;;  %v1236_v62 = vadd.f32 %v1235_v54, %v1234_v57  ;;  %v1358_v53 = vsel %vm488_vm1, %v1298_v46, 0.0  ;;  %v1300_v54 = vmul.f32 %v2285_v14, %v2285_v14  ;;  %v1199_v14 = vld [vmem:[%s2383_s3] sm:$0x3] }
 0x1c4   : > { %v1360_v57 = vsel %vm488_vm1, %v1299_v51, 0.0 }
 0x1c5   : > { %v1337_v2 = vadd.f32 %v1336_v58, %v1335_v61  ;;  %v1238_v3 = vadd.f32 %v1237_v59, %v1236_v62  ;;  %v1362_v60 = vsel %vm488_vm1, %v1300_v54, 0.0 }
 0x1c7   : > { %v1339_v7 = vadd.f32 %v1338_v63, %v1337_v2  ;;  %v1240_v8 = vadd.f32 %v1239_v0, %v1238_v3 }
 0x1c9   : > { %v1341_v12 = vadd.f32 %v1340_v4, %v1339_v7  ;;  %v1242_v13 = vadd.f32 %v1241_v5, %v1240_v8 }
 0x1cb   : > { %v1343_v19 = vadd.f32 %v1342_v9, %v1341_v12  ;;  %v1244_v21 = vadd.f32 %v1243_v10, %v1242_v13 }
 0x1cd   : > { %v1345_v25 = vadd.f32 %v1344_v15, %v1343_v19  ;;  %v1246_v26 = vadd.f32 %v1245_v16, %v1244_v21 }
 0x1cf   : > { %v1347_v30 = vadd.f32 %v1346_v22, %v1345_v25  ;;  %v1248_v32 = vadd.f32 %v1247_v20, %v1246_v26 }
 0x1d1   : > { %v1349_v36 = vadd.f32 %v1348_v28, %v1347_v30  ;;  %v1250_v37 = vadd.f32 %v1249_v24, %v1248_v32 }
 0x1d3   : > { %v1351_v42 = vadd.f32 %v1350_v33, %v1349_v36  ;;  %v1252_v43 = vadd.f32 %v1251_v27, %v1250_v37 }
 0x1d5   : > { %v1353_v47 = vadd.f32 %v1352_v39, %v1351_v42  ;;  %v1254_v49 = vadd.f32 %v1253_v31, %v1252_v43 }
 0x1d7   : > { %v1355_v52 = vadd.f32 %v1354_v44, %v1353_v47  ;;  %v1256_v17 = vadd.f32 %v1255_v34, %v1254_v49 }
 0x1d9   : > { %v1357_v55 = vadd.f32 %v1356_v50, %v1355_v52  ;;  %v1258_v56 = vadd.f32 %v1257_v38, %v1256_v17 }
 0x1db   : > { %v1359_v58 = vadd.f32 %v1358_v53, %v1357_v55  ;;  %v1260_v59 = vadd.f32 %v1259_v41, %v1258_v56 }
 0x1dd   : > { %v1361_v61 = vadd.f32 %v1360_v57, %v1359_v58  ;;  %v1262_v62 = vadd.f32 %v1261_v45, %v1260_v59 }
 0x1df   : > { %v1263_v63 = vrot.slane %v1262_v62, 4  ;;  %v1363_v0 = vadd.f32 %v1362_v60, %v1361_v61 }
 0x1e1   : > { %v1264_v1 = vadd.f32 %v1263_v63, %v1262_v62  ;;  %v1364_v48 = vrot.slane %v1363_v0, 4 }
 0x1e3   : > { %v1265_v2 = vrot.slane %v1264_v1, 2  ;;  %v1365_v3 = vadd.f32 %v1364_v48, %v1363_v0 }
 0x1e5   : > { %v1266_v4 = vadd.f32 %v1265_v2, %v1264_v1  ;;  %v1366_v5 = vrot.slane %v1365_v3, 2 }
 0x1e7   : > { %v1367_v6 = vadd.f32 %v1366_v5, %v1365_v3  ;;  %v1267_v7 = vrot.slane %v1266_v4, 1 }
 0x1e9   : > { %v1268_v8 = vadd.f32 %v1267_v7, %v1266_v4  ;;  %v1368_v9 = vrot.slane %v1367_v6, 1 }
 0x1eb   : > { %v1369_v10 = vadd.f32 %v1368_v9, %v1367_v6 }
 0x1ed   : > { %v1371_v11 = vsel %vm1370_vm3, %v1268_v8, %v1369_v10 }
 0x1ee   : > { %v1372_v12 = vadd.f32 %v1371_v11, %v1199_v14 }
 0x1f0   : > { %1374 = vst.msk [vmem:[%s2383_s3] sm:$0x3] %vm1373_vm4, %v1372_v12 }
 0x1f1 PF: > { %s14_s16 = sadd.s32 1, %s1822_s16   ;;  %s2385_s12 = smov %s1814_s14 }
 0x1f2   : > { %p11_p12 = scmp.ge.s32.totalorder %s14_s16, 8   ;;  %s2386_s13 = smov %s1818_s15 }
 0x1f3   : > { %s2387_s14 = smov %s2390_s17  ;;  %s2388_s15 = smov %s2394_s18 }
 0x1f4   :  { %13 = sbr.rel (!%p11_p12) target bundleno = 3 (0x3), region = 85 }

// kernel: bottle_block_forward.10
= control target key start
LH: loop header
LB: loop body
LE: loop exit
PB: predicated region body
PF: predicated region fallthrough
CT: control target
= control target key end

     0   :  { %s2194_s12 = smov 0   ;;  %s2196_s13 = smov 0   ;;  %s2898_s0 = inlined_call_operand.vmem [shape: bf16[512,64], index: 0, kind: input, shape index: {}]   ;;  %s2899_s1 = inlined_call_operand.vmem [shape: bf16[64,256], index: 1, kind: input, shape index: {}]   ;;  %s2900_s2 = inlined_call_operand.vmem [shape: f32[512,256], index: 2, kind: output, shape index: {0}]   ;;  %s2901_s3 = inlined_call_operand.vmem [shape: f32[2,256], index: 3, kind: output, shape index: {1}]  }
   0x1   :  { %s2198_s14 = smov 0   ;;  %s2200_s15 = smov 0  }
   0x2   :  { %s2202_s16 = smov 0  }
   0x3 LB: > { %s33_s17 = sadd.s32 1, %s2167_s15  ;;  %s1853_s18 = sadd.s32 4294967295, %s2171_s16   ;;  %s2171_s16 = sphi %s2202_s16, %s14_s16   ;;  %s2167_s15 = sphi %s2200_s15, %s2906_s15   ;;  %s2163_s14 = sphi %s2198_s14, %s2905_s14   ;;  %s2159_s13 = sphi %s2196_s13, %s2904_s13   ;;  %s2155_s12 = sphi %s2194_s12, %s2903_s12  }
   0x4   : > { %p35_p0 = scmp.ge.s32.totalorder %s33_s17, 2  ;;  %p77_p1 = scmp.ne.s32.totalorder %s2159_s13, %s2155_s12 }
   0x5   : > { %p78_p2 = scmp.eq.s32.totalorder %s2171_s16, 0  ;;  %p109_p4 = scmp.eq.s32.totalorder %s1853_s18, 1 }
   0x6   : > { %s2908_s17 = smov (%p35_p0, %s33_s17), 0  ;;  %s70_s20 = sadd.s32 1, %s2159_s13 }
   0x7   : > { %p79_p3 = por %p78_p2, %p77_p1  ;;  %s66_s19 = ssub.s32 %s2167_s15, %s2908_s17 }
   0x8   : > { %p68_p5 = scmp.eq.s32.totalorder %s66_s19, 0  ;;  %p2229_p6 = por %p109_p4, %p77_p1 }
   0x9   : > { %p1857_p7 = scmp.ge.s32.totalorder %s2171_s16, 2 }
   0xa   : > { %s2234_s22 = scalar_select %p68_p5, %s2159_s13, %s70_s20  }
   0xb   : > { %169 = sbr.rel (%p1857_p7) target bundleno = 28 (0x1c), region = 20 }
  0x10   : > { %172 = sbr.rel (!%p79_p3) target bundleno = 28 (0x1c), region = 24  ;;  %s174_s23 = sand.u32 (%p79_p3), 1, %s2159_s13  }
  0x11   : > { %s1859_s24 = sshll.u32 (%p79_p3), %s2167_s15, 2  ;;  %s1858_s25 = sshll.u32 (%p79_p3), %s174_s23, 5 }
  0x12   : > { %s181_s28 = scalar_lea.vmem (%p79_p3), %s2899_s1, %s1859_s24  ;;  %s176_s29 = scalar_lea.vmem (%p79_p3), [#allocation3], %s1858_s25 }
  0x13   : > { %v198_v0 = vld [vmem:[%s181_s28] sm:$0xf] (%p79_p3)  ;;  %v200_v1 = vld [vmem:[%s181_s28 + $0x8] sm:$0xf] (%p79_p3)  ;;  %v202_v2 = vld [vmem:[%s181_s28 + $0x10] sm:$0xf] (%p79_p3) }
  0x14   : > { %199 = vst [vmem:[%s176_s29] sm:$0xf] (%p79_p3), %v198_v0  ;;  %v204_v3 = vld [vmem:[%s181_s28 + $0x18] sm:$0xf] (%p79_p3)  ;;  %v206_v4 = vld [vmem:[%s181_s28 + $0x20] sm:$0xf] (%p79_p3) }
  0x15   : > { %201 = vst [vmem:[%s176_s29 + $0x4] sm:$0xf] %v200_v1  ;;  %v208_v5 = vld [vmem:[%s181_s28 + $0x28] sm:$0xf]  ;;  %v210_v6 = vld [vmem:[%s181_s28 + $0x30] sm:$0xf] }
  0x16   : > { %203 = vst [vmem:[%s176_s29 + $0x8] sm:$0xf] %v202_v2  ;;  %v212_v7 = vld [vmem:[%s181_s28 + $0x38] sm:$0xf] }
  0x17   : > { %205 = vst [vmem:[%s176_s29 + $0xc] sm:$0xf] %v204_v3 }
  0x18   : > { %207 = vst [vmem:[%s176_s29 + $0x10] sm:$0xf] %v206_v4 }
  0x19   : > { %209 = vst [vmem:[%s176_s29 + $0x14] sm:$0xf] %v208_v5 }
  0x1a   : > { %211 = vst [vmem:[%s176_s29 + $0x18] sm:$0xf] %v210_v6 }
  0x1b   : > { %213 = vst [vmem:[%s176_s29 + $0x1c] sm:$0xf] %v212_v7 }
  0x1c PF: > { %p1860_p8 = scmp.ge.s32.totalorder %s2171_s16, 1  ;;  %p252_p9 = scmp.lt.s32.totalorder %s2171_s16, 3 }
  0x1e   : > { %p253_p10 = pnand %p1860_p8, %p252_p9 }
  0x1f   : > { %s259_s30 = sand.u32 (!%p253_p10), 1, %s2155_s12   ;;  %p304_p11 = scmp.lt.s32.totalorder (!%p253_p10), %s2163_s14, 1 }
  0x20   : > { %256 = sbr.rel (%p253_p10) target bundleno = 433 (0x1b1), region = 65  ;;  %s1861_s4 = sshll.u32 (!%p253_p10), %s259_s30, 5 }
  0x21   : > { %s261_s5 = scalar_lea.vmem (!%p253_p10), [#allocation3], %s1861_s4  ;;  %s1862_s8 = sshll.u32 (!%p253_p10), %s259_s30, 9 }
  0x22   : > { %s2363_s9 = scalar_lea.vmem (!%p253_p10), [#allocation4], %s1862_s8 }
  0x25   : > { %v2079_v8 = vld [vmem:[%s261_s5 + $0x18] sm:$0xff]  ;;  %v2078_v9 = vld [vmem:[%s261_s5 + $0x10] sm:$0xff]  ;;  %v2077_v10 = vld [vmem:[%s261_s5 + $0x8] sm:$0xff]  ;;  %vm697_vm0 = vcmask 523264   ;;  %s305_s24 = scalar_select %p304_p11, %s2163_s14, 1  ;;  %vm1431_vm1 = vcmask 1040384  }
  0x26   : > { %798 = vmatpush.bf16.msra.mxu0 %v2079_v8  ;;  %2080 = vmatpush.bf16.msra.mxu1 %v2079_v8  ;;  %v2076_v11 = vld [vmem:[%s261_s5] sm:$0xff]  ;;  %v2045_v14 = vld [vmem:[%s2898_s0 + $0x8] sm:$0xff]  ;;  %v2046_v17 = vld [vmem:[%s2898_s0 + $0x10] sm:$0xff]  ;;  %s2041_s29 = sshll.u32 (%p2229_p6), %s2163_s14, 3 }
  0x27   : > { %2081 = vmatpush.bf16.msra.mxu2 %v2079_v8  ;;  %2082 = vmatpush.bf16.msra.mxu3 %v2079_v8  ;;  %v2044_v12 = vld [vmem:[%s2898_s0] sm:$0xff]  ;;  %v2053_v15 = vld [vmem:[%s2898_s0 + $0x48] sm:$0xff]  ;;  %v2054_v18 = vld [vmem:[%s2898_s0 + $0x50] sm:$0xff]  ;;  %s1863_s25 = sshll.u32 %s305_s24, 1  ;;  %s2755_s6 = scalar_lea.vmem (%p2229_p6), %s2900_s2, %s2041_s29 }
  0x28   : > { %v2052_v13 = vld [vmem:[%s2898_s0 + $0x40] sm:$0xff]  ;;  %v2061_v19 = vld [vmem:[%s2898_s0 + $0x88] sm:$0xff]  ;;  %v2047_v20 = vld [vmem:[%s2898_s0 + $0x18] sm:$0xff]  ;;  %s2691_s28 = scalar_lea.vmem %s2901_s3, %s1863_s25 }
  0x29   : > { %v2060_v16 = vld [vmem:[%s2898_s0 + $0x80] sm:$0xff]  ;;  %v2055_v21 = vld [vmem:[%s2898_s0 + $0x58] sm:$0xff]  ;;  %v2062_v22 = vld [vmem:[%s2898_s0 + $0x90] sm:$0xff] }
  0x2a   : > { %799 = vmatpush.bf16.msra.mxu0 %v2078_v9  ;;  %2083 = vmatpush.bf16.msra.mxu1 %v2078_v9  ;;  %v2068_v23 = vld [vmem:[%s2898_s0 + $0xc0] sm:$0xff]  ;;  %v2063_v26 = vld [vmem:[%s2898_s0 + $0x98] sm:$0xff]  ;;  %v2069_v27 = vld [vmem:[%s2898_s0 + $0xc8] sm:$0xff] }
  0x2b   : > { %2084 = vmatpush.bf16.msra.mxu2 %v2078_v9  ;;  %2085 = vmatpush.bf16.msra.mxu3 %v2078_v9  ;;  %v2048_v24 = vld [vmem:[%s2898_s0 + $0x20] sm:$0xff]  ;;  %v2049_v28 = vld [vmem:[%s2898_s0 + $0x28] sm:$0xff]  ;;  %v2070_v31 = vld [vmem:[%s2898_s0 + $0xd0] sm:$0xff] }
  0x2c   : > { %v2056_v25 = vld [vmem:[%s2898_s0 + $0x60] sm:$0xff]  ;;  %v2057_v29 = vld [vmem:[%s2898_s0 + $0x68] sm:$0xff]  ;;  %v2050_v32 = vld [vmem:[%s2898_s0 + $0x30] sm:$0xff] }
  0x2d   : > { %v2064_v30 = vld [vmem:[%s2898_s0 + $0xa0] sm:$0xff]  ;;  %v2058_v33 = vld [vmem:[%s2898_s0 + $0x70] sm:$0xff]  ;;  %v2065_v34 = vld [vmem:[%s2898_s0 + $0xa8] sm:$0xff] }
  0x2e   : > { %800 = vmatpush.bf16.msra.mxu0 %v2077_v10  ;;  %2086 = vmatpush.bf16.msra.mxu1 %v2077_v10  ;;  %v2071_v35 = vld [vmem:[%s2898_s0 + $0xd8] sm:$0xff]  ;;  %v2066_v38 = vld [vmem:[%s2898_s0 + $0xb0] sm:$0xff]  ;;  %v2072_v39 = vld [vmem:[%s2898_s0 + $0xe0] sm:$0xff] }
  0x2f   : > { %2087 = vmatpush.bf16.msra.mxu2 %v2077_v10  ;;  %2088 = vmatpush.bf16.msra.mxu3 %v2077_v10  ;;  %v2051_v36 = vld [vmem:[%s2898_s0 + $0x38] sm:$0xff]  ;;  %v2073_v43 = vld [vmem:[%s2898_s0 + $0xe8] sm:$0xff]  ;;  %v2074_v55 = vld [vmem:[%s2898_s0 + $0xf0] sm:$0xff] }
  0x30   : > { %v2059_v37 = vld [vmem:[%s2898_s0 + $0x78] sm:$0xff] }
  0x31   : > { %v2067_v42 = vld [vmem:[%s2898_s0 + $0xb8] sm:$0xff] }
  0x32   : > { %801 = vmatpush.bf16.msra.mxu0 %v2076_v11  ;;  %2089 = vmatpush.bf16.msra.mxu1 %v2076_v11  ;;  %v2075_v4 = vld [vmem:[%s2898_s0 + $0xf8] sm:$0xff] }
  0x33   : > { %2090 = vmatpush.bf16.msra.mxu2 %v2076_v11  ;;  %2091 = vmatpush.bf16.msra.mxu3 %v2076_v11 }
  0x35   : > { %2008 = vmatmul.msk.bf16.vlgmr.msra.gmra.mxu0 %vm697_vm0, %v2044_v12  ;;  %2016 = vmatmul.msk.bf16.vlgmr.msra.gmra.mxu1 %vm697_vm0, %v2052_v13 }
  0x36   : > { %2024 = vmatmul.msk.bf16.vlgmr.msra.gmra.mxu2 %vm697_vm0, %v2060_v16  ;;  %2032 = vmatmul.msk.bf16.vlgmr.msra.gmra.mxu3 %vm697_vm0, %v2068_v23 }
  0x45   : > { %2009 = vmatmul.msk.bf16.gmra.mxu0 %vm697_vm0, %v2045_v14  ;;  %2017 = vmatmul.msk.bf16.gmra.mxu1 %vm697_vm0, %v2053_v15 }
  0x46   : > { %2025 = vmatmul.msk.bf16.gmra.mxu2 %vm697_vm0, %v2061_v19  ;;  %2033 = vmatmul.msk.bf16.gmra.mxu3 %vm697_vm0, %v2069_v27 }
  0x55   : > { %2010 = vmatmul.msk.bf16.gmra.mxu0 %vm697_vm0, %v2046_v17  ;;  %2018 = vmatmul.msk.bf16.gmra.mxu1 %vm697_vm0, %v2054_v18 }
  0x56   : > { %2026 = vmatmul.msk.bf16.gmra.mxu2 %vm697_vm0, %v2062_v22  ;;  %2034 = vmatmul.msk.bf16.gmra.mxu3 %vm697_vm0, %v2070_v31 }
  0x65   : > { %2011 = vmatmul.msk.bf16.gmra.mxu0 %vm697_vm0, %v2047_v20  ;;  %2019 = vmatmul.msk.bf16.gmra.mxu1 %vm697_vm0, %v2055_v21 }
  0x66   : > { %2027 = vmatmul.msk.bf16.gmra.mxu2 %vm697_vm0, %v2063_v26  ;;  %2035 = vmatmul.msk.bf16.gmra.mxu3 %vm697_vm0, %v2071_v35 }
  0x75   : > { %2012 = vmatmul.msk.bf16.gmra.mxu0 %vm697_vm0, %v2048_v24  ;;  %2020 = vmatmul.msk.bf16.gmra.mxu1 %vm697_vm0, %v2056_v25 }
  0x76   : > { %2028 = vmatmul.msk.bf16.gmra.mxu2 %vm697_vm0, %v2064_v30  ;;  %2036 = vmatmul.msk.bf16.gmra.mxu3 %vm697_vm0, %v2072_v39 }
  0x85   : > { %2013 = vmatmul.msk.bf16.gmra.mxu0 %vm697_vm0, %v2049_v28  ;;  %2021 = vmatmul.msk.bf16.gmra.mxu1 %vm697_vm0, %v2057_v29 }
  0x86   : > { %2029 = vmatmul.msk.bf16.gmra.mxu2 %vm697_vm0, %v2065_v34  ;;  %2037 = vmatmul.msk.bf16.gmra.mxu3 %vm697_vm0, %v2073_v43 }
  0x95   : > { %2014 = vmatmul.msk.bf16.gmra.mxu0 %vm697_vm0, %v2050_v32  ;;  %2022 = vmatmul.msk.bf16.gmra.mxu1 %vm697_vm0, %v2058_v33 }
  0x96   : > { %2030 = vmatmul.msk.bf16.gmra.mxu2 %vm697_vm0, %v2066_v38  ;;  %2038 = vmatmul.msk.bf16.gmra.mxu3 %vm697_vm0, %v2074_v55 }
  0xa5   : > { %2015 = vmatmul.msk.bf16.gmra.mxu0 %vm697_vm0, %v2051_v36  ;;  %2023 = vmatmul.msk.bf16.gmra.mxu1 %vm697_vm0, %v2059_v37 }
  0xa6   : > { %2031 = vmatmul.msk.bf16.gmra.mxu2 %vm697_vm0, %v2067_v42  ;;  %2039 = vmatmul.msk.bf16.gmra.mxu3 %vm697_vm0, %v2075_v4 }
  0xb2   : > { %v803_v40 = vpop.f32.mrf.mxu0  ;;  %v2361_v41 = vpop.f32.mrf.mxu1 }
  0xb3   : > { %1164 = vst [vmem:[%s2363_s9] sm:$0xff] %v803_v40  ;;  %v1298_v46 = vmul.f32 %v803_v40, %v803_v40 }
  0xb4   : > { %1180 = vst [vmem:[%s2363_s9 + $0x80] sm:$0xff] %v2361_v41 }
  0xb9   : > { %v2393_v60 = vpop.f32.mrf.mxu2  ;;  %v2439_v14 = vpop.f32.mrf.mxu3 }
  0xba   : > { %v805_v44 = vpop.f32.mrf.mxu0  ;;  %v2376_v45 = vpop.f32.mrf.mxu1  ;;  %1196 = vst [vmem:[%s2363_s9 + $0x100] sm:$0xff] %v2393_v60 }
  0xbb   : > { %1165 = vst [vmem:[%s2363_s9 + $0x8] sm:$0xff] %v805_v44  ;;  %v1229_v47 = vadd.f32 %v805_v44, %v803_v40  ;;  %v1299_v48 = vmul.f32 %v805_v44, %v805_v44 }
  0xbc   : > { %1181 = vst [vmem:[%s2363_s9 + $0x88] sm:$0xff] %v2376_v45 }
  0xbd   : > { %v1362_v49 = vadd.f32 %v1299_v48, %v1298_v46  ;;  %1212 = vst [vmem:[%s2363_s9 + $0x180] sm:$0xff] %v2439_v14 }
  0xc1   : > { %v2404_v2 = vpop.f32.mrf.mxu2  ;;  %v2452_v18 = vpop.f32.mrf.mxu3 }
  0xc2   : > { %v808_v50 = vpop.f32.mrf.mxu0  ;;  %v2381_v51 = vpop.f32.mrf.mxu1  ;;  %1197 = vst [vmem:[%s2363_s9 + $0x108] sm:$0xff] %v2404_v2 }
  0xc3   : > { %1166 = vst [vmem:[%s2363_s9 + $0x10] sm:$0xff] %v808_v50  ;;  %v1230_v52 = vadd.f32 %v1229_v47, %v808_v50  ;;  %v1300_v53 = vmul.f32 %v808_v50, %v808_v50 }
  0xc4   : > { %1182 = vst [vmem:[%s2363_s9 + $0x90] sm:$0xff] %v2381_v51 }
  0xc5   : > { %v1363_v54 = vadd.f32 %v1362_v49, %v1300_v53  ;;  %1213 = vst [vmem:[%s2363_s9 + $0x188] sm:$0xff] %v2452_v18 }
  0xc9   : > { %v2419_v7 = vpop.f32.mrf.mxu2  ;;  %v2465_v22 = vpop.f32.mrf.mxu3 }
  0xca   : > { %v810_v56 = vpop.f32.mrf.mxu0  ;;  %v2390_v57 = vpop.f32.mrf.mxu1  ;;  %1198 = vst [vmem:[%s2363_s9 + $0x110] sm:$0xff] %v2419_v7 }
  0xcb   : > { %1167 = vst [vmem:[%s2363_s9 + $0x18] sm:$0xff] %v810_v56  ;;  %v1231_v58 = vadd.f32 %v1230_v52, %v810_v56  ;;  %v1301_v59 = vmul.f32 %v810_v56, %v810_v56 }
  0xcc   : > { %1183 = vst [vmem:[%s2363_s9 + $0x98] sm:$0xff] %v2390_v57 }
  0xcd   : > { %v1364_v61 = vadd.f32 %v1363_v54, %v1301_v59  ;;  %1214 = vst [vmem:[%s2363_s9 + $0x190] sm:$0xff] %v2465_v22 }
  0xd1   : > { %v2428_v10 = vpop.f32.mrf.mxu2  ;;  %v2478_v26 = vpop.f32.mrf.mxu3 }
  0xd2   : > { %v813_v62 = vpop.f32.mrf.mxu0  ;;  %v2399_v63 = vpop.f32.mrf.mxu1  ;;  %1199 = vst [vmem:[%s2363_s9 + $0x118] sm:$0xff] %v2428_v10 }
  0xd3   : > { %1168 = vst [vmem:[%s2363_s9 + $0x20] sm:$0xff] %v813_v62  ;;  %v2402_v0 = vadd.f32 %v1231_v58, %v813_v62  ;;  %v1302_v1 = vmul.f32 %v813_v62, %v813_v62 }
  0xd4   : > { %1184 = vst [vmem:[%s2363_s9 + $0xa0] sm:$0xff] %v2399_v63 }
  0xd5   : > { %v2408_v3 = vadd.f32 %v1364_v61, %v1302_v1  ;;  %1215 = vst [vmem:[%s2363_s9 + $0x198] sm:$0xff] %v2478_v26 }
  0xd9   : > { %v2437_v13 = vpop.f32.mrf.mxu2  ;;  %v2491_v30 = vpop.f32.mrf.mxu3 }
  0xda   : > { %v815_v5 = vpop.f32.mrf.mxu0  ;;  %v2416_v6 = vpop.f32.mrf.mxu1  ;;  %1200 = vst [vmem:[%s2363_s9 + $0x120] sm:$0xff] %v2437_v13 }
  0xdb   : > { %1169 = vst [vmem:[%s2363_s9 + $0x28] sm:$0xff] %v815_v5  ;;  %v1303_v35 = vmul.f32 %v815_v5, %v815_v5  ;;  %v1233_v36 = vadd.f32 %v2402_v0, %v815_v5 }
  0xdc   : > { %1185 = vst [vmem:[%s2363_s9 + $0xa8] sm:$0xff] %v2416_v6 }
  0xdd   : > { %1216 = vst [vmem:[%s2363_s9 + $0x1a0] sm:$0xff] %v2491_v30  ;;  %v1366_v38 = vadd.f32 %v2408_v3, %v1303_v35 }
  0xe1   : > { %v2450_v17 = vpop.f32.mrf.mxu2  ;;  %v2504_v34 = vpop.f32.mrf.mxu3 }
  0xe2   : > { %v818_v8 = vpop.f32.mrf.mxu0  ;;  %v2425_v9 = vpop.f32.mrf.mxu1  ;;  %1201 = vst [vmem:[%s2363_s9 + $0x128] sm:$0xff] %v2450_v17 }
  0xe3   : > { %1170 = vst [vmem:[%s2363_s9 + $0x30] sm:$0xff] %v818_v8  ;;  %v1304_v37 = vmul.f32 %v818_v8, %v818_v8  ;;  %v1234_v39 = vadd.f32 %v1233_v36, %v818_v8 }
  0xe4   : > { %1186 = vst [vmem:[%s2363_s9 + $0xb0] sm:$0xff] %v2425_v9 }
  0xe5   : > { %1217 = vst [vmem:[%s2363_s9 + $0x1a8] sm:$0xff] %v2504_v34  ;;  %v1367_v44 = vadd.f32 %v1366_v38, %v1304_v37 }
  0xe9   : > { %v2463_v21 = vpop.f32.mrf.mxu2  ;;  %v2519_v49 = vpop.f32.mrf.mxu3 }
  0xea   : > { %v820_v11 = vpop.f32.mrf.mxu0  ;;  %v2434_v12 = vpop.f32.mrf.mxu1  ;;  %1202 = vst [vmem:[%s2363_s9 + $0x130] sm:$0xff] %v2463_v21 }
  0xeb   : > { %1171 = vst [vmem:[%s2363_s9 + $0x38] sm:$0xff] %v820_v11  ;;  %v1305_v40 = vmul.f32 %v820_v11, %v820_v11  ;;  %v1235_v46 = vadd.f32 %v1234_v39, %v820_v11 }
  0xec   : > { %1187 = vst [vmem:[%s2363_s9 + $0xb8] sm:$0xff] %v2434_v12 }
  0xed   : > { %v1368_v50 = vadd.f32 %v1367_v44, %v1305_v40  ;;  %1218 = vst [vmem:[%s2363_s9 + $0x1b0] sm:$0xff] %v2519_v49 }
  0xf1   : > { %v2476_v25 = vpop.f32.mrf.mxu2  ;;  %v2532_v8 = vpop.f32.mrf.mxu3 }
  0xf2   : > { %v823_v15 = vpop.f32.mrf.mxu0  ;;  %v2447_v16 = vpop.f32.mrf.mxu1  ;;  %1203 = vst [vmem:[%s2363_s9 + $0x138] sm:$0xff] %v2476_v25 }
  0xf3   : > { %1172 = vst [vmem:[%s2363_s9 + $0x40] sm:$0xff] %v823_v15  ;;  %v1306_v47 = vmul.f32 %v823_v15, %v823_v15  ;;  %v1236_v52 = vadd.f32 %v1235_v46, %v823_v15 }
  0xf4   : > { %1188 = vst [vmem:[%s2363_s9 + $0xc0] sm:$0xff] %v2447_v16 }
  0xf5   : > { %v1369_v54 = vadd.f32 %v1368_v50, %v1306_v47  ;;  %1219 = vst [vmem:[%s2363_s9 + $0x1b8] sm:$0xff] %v2532_v8 }
  0xf9   : > { %v2489_v29 = vpop.f32.mrf.mxu2  ;;  %v2545_v47 = vpop.f32.mrf.mxu3 }
  0xfa   : > { %v825_v19 = vpop.f32.mrf.mxu0  ;;  %v2460_v20 = vpop.f32.mrf.mxu1  ;;  %1204 = vst [vmem:[%s2363_s9 + $0x140] sm:$0xff] %v2489_v29 }
  0xfb   : > { %1173 = vst [vmem:[%s2363_s9 + $0x48] sm:$0xff] %v825_v19  ;;  %v1307_v53 = vmul.f32 %v825_v19, %v825_v19  ;;  %v1237_v55 = vadd.f32 %v1236_v52, %v825_v19 }
  0xfc   : > { %1189 = vst [vmem:[%s2363_s9 + $0xc8] sm:$0xff] %v2460_v20 }
  0xfd   : > { %v1370_v58 = vadd.f32 %v1369_v54, %v1307_v53  ;;  %1220 = vst [vmem:[%s2363_s9 + $0x1c0] sm:$0xff] %v2545_v47  ;;  %v1315_v53 = vmul.f32 %v2376_v45, %v2376_v45 }
 0x101   : > { %v2502_v33 = vpop.f32.mrf.mxu2 }
 0x102   : > { %v828_v23 = vpop.f32.mrf.mxu0  ;;  %v2473_v24 = vpop.f32.mrf.mxu1  ;;  %1205 = vst [vmem:[%s2363_s9 + $0x148] sm:$0xff] %v2502_v33 }
 0x103   : > { %1174 = vst [vmem:[%s2363_s9 + $0x50] sm:$0xff] %v828_v23  ;;  %v1308_v56 = vmul.f32 %v828_v23, %v828_v23  ;;  %v1238_v59 = vadd.f32 %v1237_v55, %v828_v23 }
 0x104   : > { %1190 = vst [vmem:[%s2363_s9 + $0xd0] sm:$0xff] %v2473_v24 }
 0x105   : > { %v1371_v1 = vadd.f32 %v1370_v58, %v1308_v56  ;;  %v1316_v56 = vmul.f32 %v2381_v51, %v2381_v51 }
 0x109   : > { %v2517_v48 = vpop.f32.mrf.mxu2 }
 0x10a   : > { %v830_v27 = vpop.f32.mrf.mxu0  ;;  %v2486_v28 = vpop.f32.mrf.mxu1  ;;  %1206 = vst [vmem:[%s2363_s9 + $0x150] sm:$0xff] %v2517_v48 }
 0x10b   : > { %1175 = vst [vmem:[%s2363_s9 + $0x58] sm:$0xff] %v830_v27  ;;  %v1309_v61 = vmul.f32 %v830_v27, %v830_v27  ;;  %v1239_v3 = vadd.f32 %v1238_v59, %v830_v27 }
 0x10c   : > { %1191 = vst [vmem:[%s2363_s9 + $0xd8] sm:$0xff] %v2486_v28 }
 0x10d   : > { %v1372_v11 = vadd.f32 %v1371_v1, %v1309_v61 }
 0x111   : > { %v2530_v5 = vpop.f32.mrf.mxu2 }
 0x112   : > { %v833_v31 = vpop.f32.mrf.mxu0  ;;  %v2499_v32 = vpop.f32.mrf.mxu1  ;;  %1207 = vst [vmem:[%s2363_s9 + $0x158] sm:$0xff] %v2530_v5 }
 0x113   : > { %1176 = vst [vmem:[%s2363_s9 + $0x60] sm:$0xff] %v833_v31  ;;  %v1310_v4 = vmul.f32 %v833_v31, %v833_v31  ;;  %v1240_v15 = vadd.f32 %v1239_v3, %v833_v31  ;;  %v2567_v3 = vpop.f32.mrf.mxu3 }
 0x114   : > { %1192 = vst [vmem:[%s2363_s9 + $0xe0] sm:$0xff] %v2499_v32 }
 0x115   : > { %v1373_v23 = vadd.f32 %v1372_v11, %v1310_v4  ;;  %1221 = vst [vmem:[%s2363_s9 + $0x1c8] sm:$0xff] %v2567_v3 }
 0x119   : > { %v2543_v46 = vpop.f32.mrf.mxu2 }
 0x11a   : > { %v835_v42 = vpop.f32.mrf.mxu0  ;;  %v2514_v43 = vpop.f32.mrf.mxu1  ;;  %1208 = vst [vmem:[%s2363_s9 + $0x160] sm:$0xff] %v2543_v46 }
 0x11b   : > { %1177 = vst [vmem:[%s2363_s9 + $0x68] sm:$0xff] %v835_v42  ;;  %v1311_v19 = vmul.f32 %v835_v42, %v835_v42  ;;  %v1241_v35 = vadd.f32 %v1240_v15, %v835_v42  ;;  %v1314_v42 = vmul.f32 %v2361_v41, %v2361_v41 }
 0x11c   : > { %1193 = vst [vmem:[%s2363_s9 + $0xe8] sm:$0xff] %v2514_v43 }
 0x11d   : > { %v1374_v36 = vadd.f32 %v1373_v23, %v1311_v19  ;;  %v1320_v19 = vmul.f32 %v2425_v9, %v2425_v9 }
 0x121   : > { %v2565_v1 = vpop.f32.mrf.mxu2 }
 0x122   : > { %v838_v62 = vpop.f32.mrf.mxu0  ;;  %v2527_v0 = vpop.f32.mrf.mxu1  ;;  %1209 = vst [vmem:[%s2363_s9 + $0x168] sm:$0xff] %v2565_v1 }
 0x123   : > { %1178 = vst [vmem:[%s2363_s9 + $0x70] sm:$0xff] %v838_v62  ;;  %v1312_v27 = vmul.f32 %v838_v62, %v838_v62  ;;  %v1242_v37 = vadd.f32 %v1241_v35, %v838_v62 }
 0x124   : > { %1194 = vst [vmem:[%s2363_s9 + $0xf0] sm:$0xff] %v2527_v0 }
 0x125   : > { %v1375_v40 = vadd.f32 %v1374_v36, %v1312_v27  ;;  %v1321_v27 = vmul.f32 %v2434_v12, %v2434_v12 }
 0x12a   : > { %v840_v38 = vpop.f32.mrf.mxu0  ;;  %v2540_v39 = vpop.f32.mrf.mxu1 }
 0x12b   : > { %1179 = vst [vmem:[%s2363_s9 + $0x78] sm:$0xff] %v840_v38  ;;  %v1243_v44 = vadd.f32 %v1242_v37, %v840_v38  ;;  %v1313_v31 = vmul.f32 %v840_v38, %v840_v38  ;;  %v2585_v37 = vpop.f32.mrf.mxu2  ;;  %v2587_v38 = vpop.f32.mrf.mxu3 }
 0x12c   : > { %1195 = vst [vmem:[%s2363_s9 + $0xf8] sm:$0xff] %v2540_v39 }
 0x12d   : > { %v1244_v50 = vadd.f32 %v1243_v44, %v2361_v41  ;;  %v1376_v52 = vadd.f32 %v1375_v40, %v1313_v31  ;;  %v1317_v41 = vmul.f32 %v2390_v57, %v2390_v57  ;;  %1210 = vst [vmem:[%s2363_s9 + $0x170] sm:$0xff] %v2585_v37 }
 0x12e   : > { %1222 = vst [vmem:[%s2363_s9 + $0x1d0] sm:$0xff] %v2587_v38 }
 0x12f   : > { %v1245_v54 = vadd.f32 %v1244_v50, %v2376_v45  ;;  %v1377_v55 = vadd.f32 %v1376_v52, %v1314_v42  ;;  %v1318_v45 = vmul.f32 %v2399_v63, %v2399_v63  ;;  %v1324_v42 = vmul.f32 %v2473_v24, %v2473_v24 }
 0x131   : > { %v1246_v58 = vadd.f32 %v1245_v54, %v2381_v51  ;;  %v1378_v59 = vadd.f32 %v1377_v55, %v1315_v53  ;;  %v1325_v53 = vmul.f32 %v2486_v28, %v2486_v28 }
 0x133   : > { %v1247_v61 = vadd.f32 %v1246_v58, %v2390_v57  ;;  %v1379_v62 = vadd.f32 %v1378_v59, %v1316_v56  ;;  %v1319_v57 = vmul.f32 %v2416_v6, %v2416_v6  ;;  %v2605_v55 = vpop.f32.mrf.mxu2  ;;  %v2607_v56 = vpop.f32.mrf.mxu3  ;;  %v1326_v58 = vmul.f32 %v2499_v32, %v2499_v32 }
 0x134   : > { %1211 = vst [vmem:[%s2363_s9 + $0x178] sm:$0xff] %v2605_v55 }
 0x135   : > { %v1248_v4 = vadd.f32 %v1247_v61, %v2399_v63  ;;  %v1380_v51 = vadd.f32 %v1379_v62, %v1317_v41  ;;  %1223 = vst [vmem:[%s2363_s9 + $0x1d8] sm:$0xff] %v2607_v56 }
 0x137   : > { %v1249_v11 = vadd.f32 %v1248_v4, %v2416_v6  ;;  %v1381_v15 = vadd.f32 %v1380_v51, %v1318_v45  ;;  %v1322_v6 = vmul.f32 %v2447_v16, %v2447_v16  ;;  %v1328_v45 = vmul.f32 %v2527_v0, %v2527_v0 }
 0x139   : > { %v1382_v23 = vadd.f32 %v1381_v15, %v1319_v57  ;;  %v1250_v35 = vadd.f32 %v1249_v11, %v2425_v9  ;;  %v1323_v9 = vmul.f32 %v2460_v20, %v2460_v20 }
 0x13b   : > { %v1251_v63 = vadd.f32 %v1250_v35, %v2434_v12  ;;  %v1383_v36 = vadd.f32 %v1382_v23, %v1320_v19  ;;  %v2625_v57 = vpop.f32.mrf.mxu3 }
 0x13c   : > { %1224 = vst [vmem:[%s2363_s9 + $0x1e0] sm:$0xff] %v2625_v57 }
 0x13d   : > { %v1252_v40 = vadd.f32 %v1251_v63, %v2447_v16  ;;  %v1384_v44 = vadd.f32 %v1383_v36, %v1321_v27  ;;  %v1333_v63 = vmul.f32 %v2428_v10, %v2428_v10 }
 0x13f   : > { %v1253_v12 = vadd.f32 %v1252_v40, %v2460_v20  ;;  %v1385_v31 = vadd.f32 %v1384_v44, %v1322_v6 }
 0x141   : > { %v1254_v50 = vadd.f32 %v1253_v12, %v2473_v24  ;;  %v1386_v52 = vadd.f32 %v1385_v31, %v1323_v9 }
 0x143   : > { %v1255_v16 = vadd.f32 %v1254_v50, %v2486_v28  ;;  %v1387_v54 = vadd.f32 %v1386_v52, %v1324_v42  ;;  %v1327_v28 = vmul.f32 %v2514_v43, %v2514_v43  ;;  %v1337_v50 = vmul.f32 %v2476_v25, %v2476_v25 }
 0x145   : > { %v1256_v20 = vadd.f32 %v1255_v16, %v2499_v32  ;;  %v1388_v24 = vadd.f32 %v1387_v54, %v1325_v53  ;;  %v1329_v32 = vmul.f32 %v2540_v39, %v2540_v39 }
 0x147   : > { %v1389_v59 = vadd.f32 %v1388_v24, %v1326_v58  ;;  %v1257_v41 = vadd.f32 %v1256_v20, %v2514_v43  ;;  %v1330_v43 = vmul.f32 %v2393_v60, %v2393_v60 }
 0x149   : > { %v1390_v61 = vadd.f32 %v1389_v59, %v1327_v28  ;;  %v1258_v62 = vadd.f32 %v1257_v41, %v2527_v0  ;;  %v1331_v0 = vmul.f32 %v2404_v2, %v2404_v2 }
 0x14b   : > { %v1391_v4 = vadd.f32 %v1390_v61, %v1328_v45  ;;  %v1259_v51 = vadd.f32 %v1258_v62, %v2540_v39  ;;  %v1332_v39 = vmul.f32 %v2419_v7, %v2419_v7  ;;  %v1342_v45 = vmul.f32 %v2543_v46, %v2543_v46 }
 0x14d   : > { %v1260_v11 = vadd.f32 %v1259_v51, %v2393_v60  ;;  %v1392_v15 = vadd.f32 %v1391_v4, %v1329_v32  ;;  %v2641_v60 = vpop.f32.mrf.mxu3  ;;  %v1343_v51 = vmul.f32 %v2565_v1, %v2565_v1 }
 0x14e   : > { %1225 = vst [vmem:[%s2363_s9 + $0x1e8] sm:$0xff] %v2641_v60 }
 0x14f   : > { %v1261_v19 = vadd.f32 %v1260_v11, %v2404_v2  ;;  %v1393_v23 = vadd.f32 %v1392_v15, %v1330_v43  ;;  %v1334_v2 = vmul.f32 %v2437_v13, %v2437_v13  ;;  %v1344_v43 = vmul.f32 %v2585_v37, %v2585_v37 }
 0x150   : > { %v1345_v15 = vmul.f32 %v2605_v55, %v2605_v55 }
 0x151   : > { %v1262_v35 = vadd.f32 %v1261_v19, %v2419_v7  ;;  %v1394_v27 = vadd.f32 %v1393_v23, %v1331_v0  ;;  %v1335_v7 = vmul.f32 %v2450_v17, %v2450_v17  ;;  %v2173_v0 = vmov 0.0  }
 0x152   : > { %1096 = vst [vmem:[%s2691_s28] sm:$0x3] %v2173_v0  ;;  %v1347_v23 = vmul.f32 %v2452_v18, %v2452_v18 }
 0x153   : > { %v1263_v36 = vadd.f32 %v1262_v35, %v2428_v10  ;;  %v1395_v6 = vadd.f32 %v1394_v27, %v1332_v39  ;;  %v1336_v10 = vmul.f32 %v2463_v21, %v2463_v21  ;;  %v1348_v27 = vmul.f32 %v2465_v22, %v2465_v22 }
 0x155   : > { %v1264_v40 = vadd.f32 %v1263_v36, %v2437_v13  ;;  %v1396_v44 = vadd.f32 %v1395_v6, %v1333_v63  ;;  %v2657_v53 = vpop.f32.mrf.mxu3  ;;  %v1349_v36 = vmul.f32 %v2478_v26, %v2478_v26 }
 0x156   : > { %1226 = vst [vmem:[%s2363_s9 + $0x1f0] sm:$0xff] %v2657_v53 }
 0x157   : > { %v1265_v9 = vadd.f32 %v1264_v40, %v2450_v17  ;;  %v1397_v12 = vadd.f32 %v1396_v44, %v1334_v2  ;;  %v1338_v17 = vmul.f32 %v2489_v29, %v2489_v29 }
 0x159   : > { %v1398_v31 = vadd.f32 %v1397_v12, %v1335_v7  ;;  %v1266_v42 = vadd.f32 %v1265_v9, %v2463_v21  ;;  %v1339_v21 = vmul.f32 %v2502_v33, %v2502_v33 }
 0x15b   : > { %v1267_v13 = vadd.f32 %v1266_v42, %v2476_v25  ;;  %v1399_v52 = vadd.f32 %v1398_v31, %v1336_v10  ;;  %v1340_v25 = vmul.f32 %v2517_v48, %v2517_v48 }
 0x15d   : > { %v1268_v16 = vadd.f32 %v1267_v13, %v2489_v29  ;;  %v1400_v54 = vadd.f32 %v1399_v52, %v1337_v50  ;;  %v1341_v29 = vmul.f32 %v2530_v5, %v2530_v5  ;;  %v2675_v61 = vpop.f32.mrf.mxu3 }
 0x15e   : > { %1227 = vst [vmem:[%s2363_s9 + $0x1f8] sm:$0xff] %v2675_v61 }
 0x15f   : > { %v1269_v20 = vadd.f32 %v1268_v16, %v2502_v33  ;;  %v1401_v58 = vadd.f32 %v1400_v54, %v1338_v17 }
 0x161   : > { %v1270_v24 = vadd.f32 %v1269_v20, %v2517_v48  ;;  %v1402_v59 = vadd.f32 %v1401_v58, %v1339_v21  ;;  %v1357_v21 = vmul.f32 %v2607_v56, %v2607_v56 }
 0x163   : > { %v1271_v41 = vadd.f32 %v1270_v24, %v2530_v5  ;;  %v1403_v28 = vadd.f32 %v1402_v59, %v1340_v25  ;;  %v1358_v25 = vmul.f32 %v2625_v57, %v2625_v57  ;;  %v1359_v59 = vmul.f32 %v2641_v60, %v2641_v60 }
 0x165   : > { %v1404_v62 = vadd.f32 %v1403_v28, %v1341_v29  ;;  %v1272_v33 = vadd.f32 %v1271_v41, %v2543_v46  ;;  %v1360_v29 = vmul.f32 %v2657_v53, %v2657_v53 }
 0x167   : > { %v1405_v48 = vadd.f32 %v1404_v62, %v1342_v45  ;;  %v1273_v4 = vadd.f32 %v1272_v33, %v2565_v1  ;;  %v1346_v1 = vmul.f32 %v2439_v14, %v2439_v14  ;;  %v1361_v62 = vmul.f32 %v2675_v61, %v2675_v61 }
 0x169   : > { %v1406_v32 = vadd.f32 %v1405_v48, %v1343_v51  ;;  %v1274_v5 = vadd.f32 %v1273_v4, %v2585_v37 }
 0x16b   : > { %v1407_v46 = vadd.f32 %v1406_v32, %v1344_v43  ;;  %v1275_v11 = vadd.f32 %v1274_v5, %v2605_v55 }
 0x16d   : > { %v1276_v19 = vadd.f32 %v1275_v11, %v2439_v14  ;;  %v1408_v37 = vadd.f32 %v1407_v46, %v1345_v15  ;;  %v1350_v14 = vmul.f32 %v2491_v30, %v2491_v30 }
 0x16f   : > { %v1277_v39 = vadd.f32 %v1276_v19, %v2452_v18  ;;  %v1409_v35 = vadd.f32 %v1408_v37, %v1346_v1  ;;  %v1351_v18 = vmul.f32 %v2504_v34, %v2504_v34  ;;  %v1607_v19 = vld [vmem:[%s2363_s9 + $0x8] sm:$0xff] (%p2229_p6)  ;;  %v1609_v37 = vld [vmem:[%s2363_s9 + $0x10] sm:$0xff] (%p2229_p6) }
 0x170   : > { %1608 = vst [vmem:[%s2755_s6 + $0x10] sm:$0xff] (%p2229_p6), %v1607_v19 }
 0x171   : > { %v1278_v63 = vadd.f32 %v1277_v39, %v2465_v22  ;;  %v1410_v55 = vadd.f32 %v1409_v35, %v1347_v23  ;;  %v1352_v22 = vmul.f32 %v2519_v49, %v2519_v49  ;;  %v1611_v23 = vld [vmem:[%s2363_s9 + $0x18] sm:$0xff] (%p2229_p6)  ;;  %v1613_v39 = vld [vmem:[%s2363_s9 + $0x20] sm:$0xff] (%p2229_p6)  ;;  %1610 = vst [vmem:[%s2755_s6 + $0x20] sm:$0xff] (%p2229_p6), %v1609_v37  ;;  %v1615_v35 = vld [vmem:[%s2363_s9 + $0x28] sm:$0xff] (%p2229_p6) }
 0x172   : > { %1612 = vst [vmem:[%s2755_s6 + $0x30] sm:$0xff] (%p2229_p6), %v1611_v23 }
 0x173   : > { %v1279_v6 = vadd.f32 %v1278_v63, %v2478_v26  ;;  %v1411_v2 = vadd.f32 %v1410_v55, %v1348_v27  ;;  %v1353_v26 = vmul.f32 %v2532_v8, %v2532_v8  ;;  %v1617_v27 = vld [vmem:[%s2363_s9 + $0x30] sm:$0xff] (%p2229_p6)  ;;  %1614 = vst [vmem:[%s2755_s6 + $0x40] sm:$0xff] (%p2229_p6), %v1613_v39  ;;  %v1619_v63 = vld [vmem:[%s2363_s9 + $0x38] sm:$0xff] (%p2229_p6)  ;;  %v1621_v55 = vld [vmem:[%s2363_s9 + $0x40] sm:$0xff] (%p2229_p6) }
 0x174   : > { %1616 = vst [vmem:[%s2755_s6 + $0x50] sm:$0xff] (%p2229_p6), %v1615_v35 }
 0x175   : > { %v1280_v40 = vadd.f32 %v1279_v6, %v2491_v30  ;;  %v1412_v44 = vadd.f32 %v1411_v2, %v1349_v36  ;;  %v1354_v30 = vmul.f32 %v2545_v47, %v2545_v47  ;;  %1618 = vst [vmem:[%s2755_s6 + $0x60] sm:$0xff] (%p2229_p6), %v1617_v27  ;;  %v1623_v36 = vld [vmem:[%s2363_s9 + $0x48] sm:$0xff] (%p2229_p6)  ;;  %v1625_v6 = vld [vmem:[%s2363_s9 + $0x50] sm:$0xff] (%p2229_p6)  ;;  %v1627_v2 = vld [vmem:[%s2363_s9 + $0x58] sm:$0xff] (%p2229_p6) }
 0x176   : > { %1620 = vst [vmem:[%s2755_s6 + $0x70] sm:$0xff] (%p2229_p6), %v1619_v63 }
 0x177   : > { %v1281_v7 = vadd.f32 %v1280_v40, %v2504_v34  ;;  %v1413_v9 = vadd.f32 %v1412_v44, %v1350_v14  ;;  %v1355_v34 = vmul.f32 %v2567_v3, %v2567_v3  ;;  %1622 = vst [vmem:[%s2755_s6 + $0x80] sm:$0xff] (%p2229_p6), %v1621_v55  ;;  %v1629_v14 = vld [vmem:[%s2363_s9 + $0x60] sm:$0xff] (%p2229_p6)  ;;  %v1631_v40 = vld [vmem:[%s2363_s9 + $0x68] sm:$0xff] (%p2229_p6)  ;;  %v1633_v44 = vld [vmem:[%s2363_s9 + $0x70] sm:$0xff] (%p2229_p6) }
 0x178   : > { %1624 = vst [vmem:[%s2755_s6 + $0x90] sm:$0xff] (%p2229_p6), %v1623_v36 }
 0x179   : > { %v1414_v12 = vadd.f32 %v1413_v9, %v1351_v18  ;;  %v1282_v10 = vadd.f32 %v1281_v7, %v2519_v49  ;;  %v1356_v49 = vmul.f32 %v2587_v38, %v2587_v38  ;;  %1626 = vst [vmem:[%s2755_s6 + $0xa0] sm:$0xff] (%p2229_p6), %v1625_v6  ;;  %v1635_v18 = vld [vmem:[%s2363_s9 + $0x78] sm:$0xff] (%p2229_p6)  ;;  %v1637_v7 = vld [vmem:[%s2363_s9 + $0x80] sm:$0xff] (%p2229_p6)  ;;  %v1639_v9 = vld [vmem:[%s2363_s9 + $0x88] sm:$0xff] (%p2229_p6) }
 0x17a   : > { %1628 = vst [vmem:[%s2755_s6 + $0xb0] sm:$0xff] (%p2229_p6), %v1627_v2 }
 0x17b   : > { %v1283_v31 = vadd.f32 %v1282_v10, %v2532_v8  ;;  %v1415_v42 = vadd.f32 %v1414_v12, %v1352_v22  ;;  %1630 = vst [vmem:[%s2755_s6 + $0xc0] sm:$0xff] (%p2229_p6), %v1629_v14  ;;  %v1641_v22 = vld [vmem:[%s2363_s9 + $0x90] sm:$0xff] (%p2229_p6)  ;;  %v1643_v12 = vld [vmem:[%s2363_s9 + $0x98] sm:$0xff] (%p2229_p6)  ;;  %v1645_v10 = vld [vmem:[%s2363_s9 + $0xa0] sm:$0xff] (%p2229_p6) }
 0x17c   : > { %1632 = vst [vmem:[%s2755_s6 + $0xd0] sm:$0xff] (%p2229_p6), %v1631_v40 }
 0x17d   : > { %v1284_v50 = vadd.f32 %v1283_v31, %v2545_v47  ;;  %v1416_v13 = vadd.f32 %v1415_v42, %v1353_v26  ;;  %1634 = vst [vmem:[%s2755_s6 + $0xe0] sm:$0xff] (%p2229_p6), %v1633_v44  ;;  %v1647_v26 = vld [vmem:[%s2363_s9 + $0xa8] sm:$0xff] (%p2229_p6)  ;;  %v1649_v31 = vld [vmem:[%s2363_s9 + $0xb0] sm:$0xff] (%p2229_p6)  ;;  %v1651_v42 = vld [vmem:[%s2363_s9 + $0xb8] sm:$0xff] (%p2229_p6) }
 0x17e   : > { %1636 = vst [vmem:[%s2755_s6 + $0xf0] sm:$0xff] (%p2229_p6), %v1635_v18 }
 0x17f   : > { %v1285_v52 = vadd.f32 %v1284_v50, %v2567_v3  ;;  %v1417_v17 = vadd.f32 %v1416_v13, %v1354_v30  ;;  %1638 = vst [vmem:[%s2755_s6 + $0x100] sm:$0xff] (%p2229_p6), %v1637_v7  ;;  %v1653_v30 = vld [vmem:[%s2363_s9 + $0xc0] sm:$0xff] (%p2229_p6)  ;;  %v1655_v50 = vld [vmem:[%s2363_s9 + $0xc8] sm:$0xff] (%p2229_p6)  ;;  %v1657_v13 = vld [vmem:[%s2363_s9 + $0xd0] sm:$0xff] (%p2229_p6) }
 0x180   : > { %1640 = vst [vmem:[%s2755_s6 + $0x110] sm:$0xff] (%p2229_p6), %v1639_v9 }
 0x181   : > { %v1286_v16 = vadd.f32 %v1285_v52, %v2587_v38  ;;  %v1418_v54 = vadd.f32 %v1417_v17, %v1355_v34  ;;  %1642 = vst [vmem:[%s2755_s6 + $0x120] sm:$0xff] (%p2229_p6), %v1641_v22  ;;  %v1659_v34 = vld [vmem:[%s2363_s9 + $0xd8] sm:$0xff] (%p2229_p6)  ;;  %v1661_v52 = vld [vmem:[%s2363_s9 + $0xe0] sm:$0xff] (%p2229_p6)  ;;  %v1663_v17 = vld [vmem:[%s2363_s9 + $0xe8] sm:$0xff] (%p2229_p6) }
 0x182   : > { %1644 = vst [vmem:[%s2755_s6 + $0x130] sm:$0xff] (%p2229_p6), %v1643_v12 }
 0x183   : > { %v1287_v8 = vadd.f32 %v1286_v16, %v2607_v56  ;;  %v1419_v20 = vadd.f32 %v1418_v54, %v1356_v49  ;;  %1646 = vst [vmem:[%s2755_s6 + $0x140] sm:$0xff] (%p2229_p6), %v1645_v10  ;;  %v1665_v49 = vld [vmem:[%s2363_s9 + $0xf0] sm:$0xff] (%p2229_p6)  ;;  %v1667_v16 = vld [vmem:[%s2363_s9 + $0xf8] sm:$0xff] (%p2229_p6)  ;;  %v1669_v54 = vld [vmem:[%s2363_s9 + $0x100] sm:$0xff] (%p2229_p6) }
 0x184   : > { %1648 = vst [vmem:[%s2755_s6 + $0x150] sm:$0xff] (%p2229_p6), %v1647_v26 }
 0x185   : > { %v1420_v47 = vadd.f32 %v1419_v20, %v1357_v21  ;;  %v1288_v58 = vadd.f32 %v1287_v8, %v2625_v57  ;;  %1650 = vst [vmem:[%s2755_s6 + $0x160] sm:$0xff] (%p2229_p6), %v1649_v31  ;;  %v1671_v8 = vld [vmem:[%s2363_s9 + $0x108] sm:$0xff] (%p2229_p6)  ;;  %v1673_v21 = vld [vmem:[%s2363_s9 + $0x110] sm:$0xff] (%p2229_p6)  ;;  %v1675_v20 = vld [vmem:[%s2363_s9 + $0x118] sm:$0xff] (%p2229_p6) }
 0x186   : > { %1652 = vst [vmem:[%s2755_s6 + $0x170] sm:$0xff] (%p2229_p6), %v1651_v42 }
 0x187   : > { %v1421_v3 = vadd.f32 %v1420_v47, %v1358_v25  ;;  %v1289_v24 = vadd.f32 %v1288_v58, %v2641_v60  ;;  %1654 = vst [vmem:[%s2755_s6 + $0x180] sm:$0xff] (%p2229_p6), %v1653_v30  ;;  %v1677_v47 = vld [vmem:[%s2363_s9 + $0x120] sm:$0xff] (%p2229_p6)  ;;  %v1679_v58 = vld [vmem:[%s2363_s9 + $0x128] sm:$0xff] (%p2229_p6)  ;;  %v1681_v25 = vld [vmem:[%s2363_s9 + $0x130] sm:$0xff] (%p2229_p6) }
 0x188   : > { %1656 = vst [vmem:[%s2755_s6 + $0x190] sm:$0xff] (%p2229_p6), %v1655_v50 }
 0x189   : > { %v1422_v38 = vadd.f32 %v1421_v3, %v1359_v59  ;;  %v1290_v41 = vadd.f32 %v1289_v24, %v2657_v53  ;;  %v1228_v53 = vld [vmem:[%s2691_s28] sm:$0x3]  ;;  %1658 = vst [vmem:[%s2755_s6 + $0x1a0] sm:$0xff] (%p2229_p6), %v1657_v13  ;;  %v1683_v3 = vld [vmem:[%s2363_s9 + $0x138] sm:$0xff] (%p2229_p6)  ;;  %v1687_v59 = vld [vmem:[%s2363_s9 + $0x148] sm:$0xff] (%p2229_p6) }
 0x18a   : > { %1660 = vst [vmem:[%s2755_s6 + $0x1b0] sm:$0xff] (%p2229_p6), %v1659_v34  ;;  %v1685_v24 = vld [vmem:[%s2363_s9 + $0x140] sm:$0xff] (%p2229_p6) }
 0x18b   : > { %v1423_v56 = vadd.f32 %v1422_v38, %v1360_v29  ;;  %v1291_v28 = vadd.f32 %v1290_v41, %v2675_v61  ;;  %v1605_v61 = vld [vmem:[%s2363_s9] sm:$0xff] (%p2229_p6)  ;;  %1662 = vst [vmem:[%s2755_s6 + $0x1c0] sm:$0xff] (%p2229_p6), %v1661_v52  ;;  %v1689_v38 = vld [vmem:[%s2363_s9 + $0x150] sm:$0xff] (%p2229_p6)  ;;  %v1691_v41 = vld [vmem:[%s2363_s9 + $0x158] sm:$0xff] (%p2229_p6) }
 0x18c   : > { %1606 = vst [vmem:[%s2755_s6] sm:$0xff] (%p2229_p6), %v1605_v61  ;;  %v1693_v29 = vld [vmem:[%s2363_s9 + $0x160] sm:$0xff] (%p2229_p6) }
 0x18d   : > { %v1292_v57 = vrot.slane %v1291_v28, 4  ;;  %v1424_v33 = vadd.f32 %v1423_v56, %v1361_v62  ;;  %1664 = vst [vmem:[%s2755_s6 + $0x1d0] sm:$0xff] (%p2229_p6), %v1663_v17  ;;  %v1695_v56 = vld [vmem:[%s2363_s9 + $0x168] sm:$0xff] (%p2229_p6)  ;;  %v1699_v62 = vld [vmem:[%s2363_s9 + $0x178] sm:$0xff] (%p2229_p6) }
 0x18e   : > { %1666 = vst [vmem:[%s2755_s6 + $0x1e0] sm:$0xff] (%p2229_p6), %v1665_v49 }
 0x18f   : > { %v1293_v45 = vadd.f32 %v1292_v57, %v1291_v28  ;;  %v1425_v48 = vrot.slane %v1424_v33, 4  ;;  %1668 = vst [vmem:[%s2755_s6 + $0x1f0] sm:$0xff] (%p2229_p6), %v1667_v16  ;;  %v1697_v28 = vld [vmem:[%s2363_s9 + $0x170] sm:$0xff] (%p2229_p6)  ;;  %v1701_v57 = vld [vmem:[%s2363_s9 + $0x180] sm:$0xff] (%p2229_p6) }
 0x190   : > { %1670 = vst [vmem:[%s2755_s6 + $0x200] sm:$0xff] (%p2229_p6), %v1669_v54 }
 0x191   : > { %v1294_v4 = vrot.slane %v1293_v45, 2  ;;  %v1426_v60 = vadd.f32 %v1425_v48, %v1424_v33  ;;  %1672 = vst [vmem:[%s2755_s6 + $0x210] sm:$0xff] (%p2229_p6), %v1671_v8  ;;  %v1703_v33 = vld [vmem:[%s2363_s9 + $0x188] sm:$0xff] (%p2229_p6)  ;;  %v1707_v48 = vld [vmem:[%s2363_s9 + $0x198] sm:$0xff] (%p2229_p6) }
 0x192   : > { %1674 = vst [vmem:[%s2755_s6 + $0x220] sm:$0xff] (%p2229_p6), %v1673_v21 }
 0x193   : > { %v1295_v51 = vadd.f32 %v1294_v4, %v1293_v45  ;;  %v1427_v32 = vrot.slane %v1426_v60, 2  ;;  %1676 = vst [vmem:[%s2755_s6 + $0x230] sm:$0xff] (%p2229_p6), %v1675_v20  ;;  %v1705_v45 = vld [vmem:[%s2363_s9 + $0x190] sm:$0xff] (%p2229_p6)  ;;  %v1709_v4 = vld [vmem:[%s2363_s9 + $0x1a0] sm:$0xff] (%p2229_p6) }
 0x194   : > { %1678 = vst [vmem:[%s2755_s6 + $0x240] sm:$0xff] (%p2229_p6), %v1677_v47 }
 0x195   : > { %v1296_v5 = vrot.slane %v1295_v51, 1  ;;  %v1428_v43 = vadd.f32 %v1427_v32, %v1426_v60  ;;  %1680 = vst [vmem:[%s2755_s6 + $0x250] sm:$0xff] (%p2229_p6), %v1679_v58  ;;  %v1711_v60 = vld [vmem:[%s2363_s9 + $0x1a8] sm:$0xff] (%p2229_p6)  ;;  %v1715_v32 = vld [vmem:[%s2363_s9 + $0x1b8] sm:$0xff] (%p2229_p6) }
 0x196   : > { %1682 = vst [vmem:[%s2755_s6 + $0x260] sm:$0xff] (%p2229_p6), %v1681_v25 }
 0x197   : > { %v1429_v46 = vrot.slane %v1428_v43, 1  ;;  %v1297_v11 = vadd.f32 %v1296_v5, %v1295_v51  ;;  %1684 = vst [vmem:[%s2755_s6 + $0x270] sm:$0xff] (%p2229_p6), %v1683_v3  ;;  %v1713_v51 = vld [vmem:[%s2363_s9 + $0x1b0] sm:$0xff] (%p2229_p6)  ;;  %v1717_v5 = vld [vmem:[%s2363_s9 + $0x1c0] sm:$0xff] (%p2229_p6) }
 0x198   : > { %1686 = vst [vmem:[%s2755_s6 + $0x280] sm:$0xff] (%p2229_p6), %v1685_v24 }
 0x199   : > { %v1430_v15 = vadd.f32 %v1429_v46, %v1428_v43  ;;  %1688 = vst [vmem:[%s2755_s6 + $0x290] sm:$0xff] (%p2229_p6), %v1687_v59  ;;  %v1719_v43 = vld [vmem:[%s2363_s9 + $0x1c8] sm:$0xff] (%p2229_p6)  ;;  %v1721_v46 = vld [vmem:[%s2363_s9 + $0x1d0] sm:$0xff] (%p2229_p6) }
 0x19a   : > { %1445 = sbr.rel (!%p2229_p6) target bundleno = 433 (0x1b1), region = 85  ;;  %1690 = vst [vmem:[%s2755_s6 + $0x2a0] sm:$0xff] (%p2229_p6), %v1689_v38 }
 0x19b   : > { %v1432_v0 = vsel %vm1431_vm1, %v1297_v11, %v1430_v15  ;;  %1692 = vst [vmem:[%s2755_s6 + $0x2b0] sm:$0xff] (%p2229_p6), %v1691_v41  ;;  %v1725_v11 = vld [vmem:[%s2363_s9 + $0x1e0] sm:$0xff] (%p2229_p6)  ;;  %v1727_v15 = vld [vmem:[%s2363_s9 + $0x1e8] sm:$0xff] (%p2229_p6) }
 0x19c   : > { %v1433_v1 = vadd.f32 %v1432_v0, %v1228_v53  ;;  %1694 = vst [vmem:[%s2755_s6 + $0x2c0] sm:$0xff] (%p2229_p6), %v1693_v29  ;;  %v1723_v53 = vld [vmem:[%s2363_s9 + $0x1d8] sm:$0xff] (%p2229_p6)  ;;  %v1729_v0 = vld [vmem:[%s2363_s9 + $0x1f0] sm:$0xff] (%p2229_p6) }
 0x19d   : > { %1696 = vst [vmem:[%s2755_s6 + $0x2d0] sm:$0xff] (%p2229_p6), %v1695_v56 }
 0x19e   : > { %1434 = vst [vmem:[%s2691_s28] sm:$0x3] %v1433_v1  ;;  %v1731_v1 = vld [vmem:[%s2363_s9 + $0x1f8] sm:$0xff] (%p2229_p6) }
 0x19f   : > { %1698 = vst [vmem:[%s2755_s6 + $0x2e0] sm:$0xff] %v1697_v28 }
 0x1a0   : > { %1700 = vst [vmem:[%s2755_s6 + $0x2f0] sm:$0xff] %v1699_v62 }
 0x1a1   : > { %1702 = vst [vmem:[%s2755_s6 + $0x300] sm:$0xff] %v1701_v57 }
 0x1a2   : > { %1704 = vst [vmem:[%s2755_s6 + $0x310] sm:$0xff] %v1703_v33 }
 0x1a3   : > { %1706 = vst [vmem:[%s2755_s6 + $0x320] sm:$0xff] %v1705_v45 }
 0x1a4   : > { %1708 = vst [vmem:[%s2755_s6 + $0x330] sm:$0xff] %v1707_v48 }
 0x1a5   : > { %1710 = vst [vmem:[%s2755_s6 + $0x340] sm:$0xff] %v1709_v4 }
 0x1a6   : > { %1712 = vst [vmem:[%s2755_s6 + $0x350] sm:$0xff] %v1711_v60 }
 0x1a7   : > { %1714 = vst [vmem:[%s2755_s6 + $0x360] sm:$0xff] %v1713_v51 }
 0x1a8   : > { %1716 = vst [vmem:[%s2755_s6 + $0x370] sm:$0xff] %v1715_v32 }
 0x1a9   : > { %1718 = vst [vmem:[%s2755_s6 + $0x380] sm:$0xff] %v1717_v5 }
 0x1aa   : > { %1720 = vst [vmem:[%s2755_s6 + $0x390] sm:$0xff] %v1719_v43 }
 0x1ab   : > { %1722 = vst [vmem:[%s2755_s6 + $0x3a0] sm:$0xff] %v1721_v46 }
 0x1ac   : > { %1724 = vst [vmem:[%s2755_s6 + $0x3b0] sm:$0xff] %v1723_v53 }
 0x1ad   : > { %1726 = vst [vmem:[%s2755_s6 + $0x3c0] sm:$0xff] %v1725_v11 }
 0x1ae   : > { %1728 = vst [vmem:[%s2755_s6 + $0x3d0] sm:$0xff] %v1727_v15 }
 0x1af   : > { %1730 = vst [vmem:[%s2755_s6 + $0x3e0] sm:$0xff] %v1729_v0 }
 0x1b0   : > { %1732 = vst [vmem:[%s2755_s6 + $0x3f0] sm:$0xff] %v1731_v1 }
 0x1b1 PF: > { %s14_s16 = sadd.s32 1, %s2171_s16   ;;  %s2903_s12 = smov %s2159_s13 }
 0x1b2   : > { %p11_p12 = scmp.ge.s32.totalorder %s14_s16, 4   ;;  %s2904_s13 = smov %s2234_s22 }
 0x1b3   : > { %s2905_s14 = smov %s2167_s15  ;;  %s2906_s15 = smov %s2908_s17 }
 0x1b4   :  { %13 = sbr.rel (!%p11_p12) target bundleno = 3 (0x3), region = 169 }

// kernel: bottle_block_forward.11
= control target key start
LH: loop header
LB: loop body
LE: loop exit
PB: predicated region body
PF: predicated region fallthrough
CT: control target
= control target key end

     0   :  { %9 = vsyncpa [#allocation5], 0  ;;  %s3110_s0 = inlined_call_operand.vmem [shape: f32[512,256], index: 0, kind: input, shape index: {}]   ;;  %s3111_s1 = inlined_call_operand.vmem [shape: f32[2,256], index: 1, kind: input, shape index: {}]   ;;  %s3112_s2 = inlined_call_operand.vmem [shape: f32[512,256], index: 2, kind: input, shape index: {}]   ;;  %s3113_s3 = inlined_call_operand.vmem [shape: f32[2,256], index: 3, kind: input, shape index: {}]   ;;  %s3114_s4 = inlined_call_operand.hbm [shape: f32[512,256], index: 4, kind: output, shape index: {}]  }
   0x1   :  { %11 = vsyncpa [#allocation5 + $0x1], 0  ;;  %s1799_s15 = smov 0   ;;  %s1801_s16 = smov 0  }
   0x2   :  { %s1803_s17 = smov 0   ;;  %s1805_s18 = smov 0  }
   0x3   :  { %s1807_s19 = smov 0   ;;  %s1809_s20 = smov 0  }
   0x4 LB: > { %s1611_s21 = sadd.s32 4294967295, %s1769_s20   ;;  %s1612_s22 = sadd.s32 4294967294, %s1769_s20   ;;  %s1769_s20 = sphi %s1809_s20, %s17_s20   ;;  %s1765_s19 = sphi %s1807_s19, %s3257_s19   ;;  %s1761_s18 = sphi %s1805_s18, %s3256_s18   ;;  %s1757_s17 = sphi %s1803_s17, %s3255_s17   ;;  %s1753_s16 = sphi %s1801_s16, %s3254_s16   ;;  %s1749_s15 = sphi %s1799_s15, %s3253_s15  }
   0x5   : > { %s26_s23 = sadd.s32 1, %s1765_s19  ;;  %s38_s24 = sadd.s32 1, %s1757_s17 }
   0x6   : > { %p27_p0 = scmp.ge.s32.totalorder %s26_s23, 2  ;;  %p45_p1 = scmp.ne.s32.totalorder %s1757_s17, %s1753_s16 }
   0x7   : > { %p46_p2 = scmp.eq.s32.totalorder %s1769_s20, 0  ;;  %p157_p3 = scmp.eq.s32.totalorder %s1611_s21, 1 }
   0x8   : > { %s3259_s23 = smov (%p27_p0, %s26_s23), 0  ;;  %p162_p6 = scmp.ne.s32.totalorder %s1753_s16, %s1749_s15 }
   0x9   : > { %p1838_p4 = por %p46_p2, %p45_p1  ;;  %p1842_p5 = por %p157_p3, %p45_p1 }
   0xa   : > { %s34_s27 = ssub.s32 %s1765_s19, %s3259_s23  ;;  %p163_p8 = scmp.eq.s32.totalorder %s1612_s22, 1 }
   0xb   : > { %p36_p7 = scmp.eq.s32.totalorder %s34_s27, 0  ;;  %p1614_p10 = scmp.ge.s32.totalorder %s1769_s20, 2 }
   0xc   : > { %p1853_p9 = por %p163_p8, %p162_p6 }
   0xd   : > { %s1851_s28 = scalar_select %p36_p7, %s1757_s17, %s38_s24  }
   0xe   : > { %179 = sbr.rel (%p1614_p10) target bundleno = 155 (0x9b), region = 16 }
  0x13   : > { %182 = sbr.rel (!%p1838_p4) target bundleno = 87 (0x57), region = 20  ;;  %s184_s30 = sand.u32 (%p1838_p4), 1, %s1757_s17  }
  0x14   : > { %s1616_s5 = sshll.u32 (%p1838_p4), %s1765_s19, 3  ;;  %s1615_s6 = sshll.u32 (%p1838_p4), %s184_s30, 9 }
  0x15   : > { %s1867_s9 = scalar_lea.vmem (%p1838_p4), %s3110_s0, %s1616_s5  ;;  %s1872_s10 = scalar_lea.vmem (%p1838_p4), [#allocation2], %s1615_s6 }
  0x16   : > { %v346_v0 = vld [vmem:[%s1867_s9] sm:$0xff] (%p1838_p4)  ;;  %v348_v1 = vld [vmem:[%s1867_s9 + $0x10] sm:$0xff] (%p1838_p4) }
  0x17   : > { %v350_v2 = vld [vmem:[%s1867_s9 + $0x20] sm:$0xff] (%p1838_p4)  ;;  %347 = vst [vmem:[%s1872_s10] sm:$0xff] (%p1838_p4), %v346_v0  ;;  %v352_v3 = vld [vmem:[%s1867_s9 + $0x30] sm:$0xff] (%p1838_p4) }
  0x18   : > { %349 = vst [vmem:[%s1872_s10 + $0x8] sm:$0xff] %v348_v1  ;;  %v354_v4 = vld [vmem:[%s1867_s9 + $0x40] sm:$0xff]  ;;  %v356_v5 = vld [vmem:[%s1867_s9 + $0x50] sm:$0xff] }
  0x19   : > { %351 = vst [vmem:[%s1872_s10 + $0x10] sm:$0xff] %v350_v2  ;;  %v358_v6 = vld [vmem:[%s1867_s9 + $0x60] sm:$0xff]  ;;  %v360_v7 = vld [vmem:[%s1867_s9 + $0x70] sm:$0xff] }
  0x1a   : > { %353 = vst [vmem:[%s1872_s10 + $0x18] sm:$0xff] %v352_v3  ;;  %v362_v8 = vld [vmem:[%s1867_s9 + $0x80] sm:$0xff]  ;;  %v364_v9 = vld [vmem:[%s1867_s9 + $0x90] sm:$0xff] }
  0x1b   : > { %355 = vst [vmem:[%s1872_s10 + $0x20] sm:$0xff] %v354_v4  ;;  %v366_v10 = vld [vmem:[%s1867_s9 + $0xa0] sm:$0xff]  ;;  %v368_v11 = vld [vmem:[%s1867_s9 + $0xb0] sm:$0xff] }
  0x1c   : > { %357 = vst [vmem:[%s1872_s10 + $0x28] sm:$0xff] %v356_v5  ;;  %v370_v12 = vld [vmem:[%s1867_s9 + $0xc0] sm:$0xff]  ;;  %v372_v13 = vld [vmem:[%s1867_s9 + $0xd0] sm:$0xff] }
  0x1d   : > { %359 = vst [vmem:[%s1872_s10 + $0x30] sm:$0xff] %v358_v6  ;;  %v374_v14 = vld [vmem:[%s1867_s9 + $0xe0] sm:$0xff]  ;;  %v376_v15 = vld [vmem:[%s1867_s9 + $0xf0] sm:$0xff] }
  0x1e   : > { %361 = vst [vmem:[%s1872_s10 + $0x38] sm:$0xff] %v360_v7  ;;  %v378_v16 = vld [vmem:[%s1867_s9 + $0x100] sm:$0xff]  ;;  %v380_v17 = vld [vmem:[%s1867_s9 + $0x110] sm:$0xff] }
  0x1f   : > { %363 = vst [vmem:[%s1872_s10 + $0x40] sm:$0xff] %v362_v8  ;;  %v382_v18 = vld [vmem:[%s1867_s9 + $0x120] sm:$0xff]  ;;  %v384_v19 = vld [vmem:[%s1867_s9 + $0x130] sm:$0xff] }
  0x20   : > { %365 = vst [vmem:[%s1872_s10 + $0x48] sm:$0xff] %v364_v9  ;;  %v386_v20 = vld [vmem:[%s1867_s9 + $0x140] sm:$0xff]  ;;  %v388_v21 = vld [vmem:[%s1867_s9 + $0x150] sm:$0xff] }
  0x21   : > { %367 = vst [vmem:[%s1872_s10 + $0x50] sm:$0xff] %v366_v10  ;;  %v390_v22 = vld [vmem:[%s1867_s9 + $0x160] sm:$0xff]  ;;  %v392_v23 = vld [vmem:[%s1867_s9 + $0x170] sm:$0xff] }
  0x22   : > { %369 = vst [vmem:[%s1872_s10 + $0x58] sm:$0xff] %v368_v11  ;;  %v394_v24 = vld [vmem:[%s1867_s9 + $0x180] sm:$0xff]  ;;  %v396_v25 = vld [vmem:[%s1867_s9 + $0x190] sm:$0xff] }
  0x23   : > { %371 = vst [vmem:[%s1872_s10 + $0x60] sm:$0xff] %v370_v12  ;;  %v398_v26 = vld [vmem:[%s1867_s9 + $0x1a0] sm:$0xff]  ;;  %v400_v27 = vld [vmem:[%s1867_s9 + $0x1b0] sm:$0xff] }
  0x24   : > { %373 = vst [vmem:[%s1872_s10 + $0x68] sm:$0xff] %v372_v13  ;;  %v402_v28 = vld [vmem:[%s1867_s9 + $0x1c0] sm:$0xff]  ;;  %v404_v29 = vld [vmem:[%s1867_s9 + $0x1d0] sm:$0xff] }
  0x25   : > { %375 = vst [vmem:[%s1872_s10 + $0x70] sm:$0xff] %v374_v14  ;;  %v406_v30 = vld [vmem:[%s1867_s9 + $0x1e0] sm:$0xff]  ;;  %v408_v31 = vld [vmem:[%s1867_s9 + $0x1f0] sm:$0xff] }
  0x26   : > { %377 = vst [vmem:[%s1872_s10 + $0x78] sm:$0xff] %v376_v15  ;;  %v410_v32 = vld [vmem:[%s1867_s9 + $0x200] sm:$0xff]  ;;  %v412_v33 = vld [vmem:[%s1867_s9 + $0x210] sm:$0xff] }
  0x27   : > { %379 = vst [vmem:[%s1872_s10 + $0x80] sm:$0xff] %v378_v16  ;;  %v414_v34 = vld [vmem:[%s1867_s9 + $0x220] sm:$0xff]  ;;  %v416_v35 = vld [vmem:[%s1867_s9 + $0x230] sm:$0xff] }
  0x28   : > { %381 = vst [vmem:[%s1872_s10 + $0x88] sm:$0xff] %v380_v17  ;;  %v418_v36 = vld [vmem:[%s1867_s9 + $0x240] sm:$0xff]  ;;  %v420_v37 = vld [vmem:[%s1867_s9 + $0x250] sm:$0xff] }
  0x29   : > { %383 = vst [vmem:[%s1872_s10 + $0x90] sm:$0xff] %v382_v18  ;;  %v422_v38 = vld [vmem:[%s1867_s9 + $0x260] sm:$0xff]  ;;  %v424_v39 = vld [vmem:[%s1867_s9 + $0x270] sm:$0xff] }
  0x2a   : > { %385 = vst [vmem:[%s1872_s10 + $0x98] sm:$0xff] %v384_v19  ;;  %v426_v40 = vld [vmem:[%s1867_s9 + $0x280] sm:$0xff]  ;;  %v428_v41 = vld [vmem:[%s1867_s9 + $0x290] sm:$0xff] }
  0x2b   : > { %387 = vst [vmem:[%s1872_s10 + $0xa0] sm:$0xff] %v386_v20  ;;  %v430_v42 = vld [vmem:[%s1867_s9 + $0x2a0] sm:$0xff]  ;;  %v432_v43 = vld [vmem:[%s1867_s9 + $0x2b0] sm:$0xff] }
  0x2c   : > { %389 = vst [vmem:[%s1872_s10 + $0xa8] sm:$0xff] %v388_v21  ;;  %v434_v44 = vld [vmem:[%s1867_s9 + $0x2c0] sm:$0xff]  ;;  %v436_v45 = vld [vmem:[%s1867_s9 + $0x2d0] sm:$0xff] }
  0x2d   : > { %391 = vst [vmem:[%s1872_s10 + $0xb0] sm:$0xff] %v390_v22  ;;  %v438_v46 = vld [vmem:[%s1867_s9 + $0x2e0] sm:$0xff]  ;;  %v440_v47 = vld [vmem:[%s1867_s9 + $0x2f0] sm:$0xff] }
  0x2e   : > { %393 = vst [vmem:[%s1872_s10 + $0xb8] sm:$0xff] %v392_v23  ;;  %v442_v48 = vld [vmem:[%s1867_s9 + $0x300] sm:$0xff]  ;;  %v444_v49 = vld [vmem:[%s1867_s9 + $0x310] sm:$0xff] }
  0x2f   : > { %395 = vst [vmem:[%s1872_s10 + $0xc0] sm:$0xff] %v394_v24  ;;  %v446_v50 = vld [vmem:[%s1867_s9 + $0x320] sm:$0xff]  ;;  %v448_v51 = vld [vmem:[%s1867_s9 + $0x330] sm:$0xff] }
  0x30   : > { %397 = vst [vmem:[%s1872_s10 + $0xc8] sm:$0xff] %v396_v25  ;;  %v450_v52 = vld [vmem:[%s1867_s9 + $0x340] sm:$0xff]  ;;  %v452_v53 = vld [vmem:[%s1867_s9 + $0x350] sm:$0xff] }
  0x31   : > { %399 = vst [vmem:[%s1872_s10 + $0xd0] sm:$0xff] %v398_v26  ;;  %v454_v54 = vld [vmem:[%s1867_s9 + $0x360] sm:$0xff]  ;;  %v456_v55 = vld [vmem:[%s1867_s9 + $0x370] sm:$0xff] }
  0x32   : > { %401 = vst [vmem:[%s1872_s10 + $0xd8] sm:$0xff] %v400_v27  ;;  %v458_v56 = vld [vmem:[%s1867_s9 + $0x380] sm:$0xff]  ;;  %v460_v57 = vld [vmem:[%s1867_s9 + $0x390] sm:$0xff] }
  0x33   : > { %403 = vst [vmem:[%s1872_s10 + $0xe0] sm:$0xff] %v402_v28  ;;  %v462_v58 = vld [vmem:[%s1867_s9 + $0x3a0] sm:$0xff]  ;;  %v464_v59 = vld [vmem:[%s1867_s9 + $0x3b0] sm:$0xff] }
  0x34   : > { %405 = vst [vmem:[%s1872_s10 + $0xe8] sm:$0xff] %v404_v29  ;;  %v466_v60 = vld [vmem:[%s1867_s9 + $0x3c0] sm:$0xff]  ;;  %v468_v61 = vld [vmem:[%s1867_s9 + $0x3d0] sm:$0xff] }
  0x35   : > { %407 = vst [vmem:[%s1872_s10 + $0xf0] sm:$0xff] %v406_v30  ;;  %v470_v62 = vld [vmem:[%s1867_s9 + $0x3e0] sm:$0xff]  ;;  %v472_v63 = vld [vmem:[%s1867_s9 + $0x3f0] sm:$0xff] }
  0x36   : > { %409 = vst [vmem:[%s1872_s10 + $0xf8] sm:$0xff] %v408_v31 }
  0x37   : > { %411 = vst [vmem:[%s1872_s10 + $0x100] sm:$0xff] %v410_v32 }
  0x38   : > { %413 = vst [vmem:[%s1872_s10 + $0x108] sm:$0xff] %v412_v33 }
  0x39   : > { %415 = vst [vmem:[%s1872_s10 + $0x110] sm:$0xff] %v414_v34 }
  0x3a   : > { %417 = vst [vmem:[%s1872_s10 + $0x118] sm:$0xff] %v416_v35 }
  0x3b   : > { %419 = vst [vmem:[%s1872_s10 + $0x120] sm:$0xff] %v418_v36 }
  0x3c   : > { %421 = vst [vmem:[%s1872_s10 + $0x128] sm:$0xff] %v420_v37 }
  0x3d   : > { %423 = vst [vmem:[%s1872_s10 + $0x130] sm:$0xff] %v422_v38 }
  0x3e   : > { %425 = vst [vmem:[%s1872_s10 + $0x138] sm:$0xff] %v424_v39 }
  0x3f   : > { %427 = vst [vmem:[%s1872_s10 + $0x140] sm:$0xff] %v426_v40 }
  0x40   : > { %429 = vst [vmem:[%s1872_s10 + $0x148] sm:$0xff] %v428_v41 }
  0x41   : > { %431 = vst [vmem:[%s1872_s10 + $0x150] sm:$0xff] %v430_v42 }
  0x42   : > { %433 = vst [vmem:[%s1872_s10 + $0x158] sm:$0xff] %v432_v43 }
  0x43   : > { %435 = vst [vmem:[%s1872_s10 + $0x160] sm:$0xff] %v434_v44 }
  0x44   : > { %437 = vst [vmem:[%s1872_s10 + $0x168] sm:$0xff] %v436_v45 }
  0x45   : > { %439 = vst [vmem:[%s1872_s10 + $0x170] sm:$0xff] %v438_v46 }
  0x46   : > { %441 = vst [vmem:[%s1872_s10 + $0x178] sm:$0xff] %v440_v47 }
  0x47   : > { %443 = vst [vmem:[%s1872_s10 + $0x180] sm:$0xff] %v442_v48 }
  0x48   : > { %445 = vst [vmem:[%s1872_s10 + $0x188] sm:$0xff] %v444_v49 }
  0x49   : > { %447 = vst [vmem:[%s1872_s10 + $0x190] sm:$0xff] %v446_v50 }
  0x4a   : > { %449 = vst [vmem:[%s1872_s10 + $0x198] sm:$0xff] %v448_v51 }
  0x4b   : > { %451 = vst [vmem:[%s1872_s10 + $0x1a0] sm:$0xff] %v450_v52 }
  0x4c   : > { %453 = vst [vmem:[%s1872_s10 + $0x1a8] sm:$0xff] %v452_v53 }
  0x4d   : > { %455 = vst [vmem:[%s1872_s10 + $0x1b0] sm:$0xff] %v454_v54 }
  0x4e   : > { %457 = vst [vmem:[%s1872_s10 + $0x1b8] sm:$0xff] %v456_v55 }
  0x4f   : > { %459 = vst [vmem:[%s1872_s10 + $0x1c0] sm:$0xff] %v458_v56 }
  0x50   : > { %461 = vst [vmem:[%s1872_s10 + $0x1c8] sm:$0xff] %v460_v57 }
  0x51   : > { %463 = vst [vmem:[%s1872_s10 + $0x1d0] sm:$0xff] %v462_v58 }
  0x52   : > { %465 = vst [vmem:[%s1872_s10 + $0x1d8] sm:$0xff] %v464_v59 }
  0x53   : > { %467 = vst [vmem:[%s1872_s10 + $0x1e0] sm:$0xff] %v466_v60 }
  0x54   : > { %469 = vst [vmem:[%s1872_s10 + $0x1e8] sm:$0xff] %v468_v61 }
  0x55   : > { %471 = vst [vmem:[%s1872_s10 + $0x1f0] sm:$0xff] %v470_v62 }
  0x56   : > { %473 = vst [vmem:[%s1872_s10 + $0x1f8] sm:$0xff] %v472_v63 }
  0x57 PF: > { %486 = sbr.rel (!%p1838_p4) target bundleno = 155 (0x9b), region = 62  ;;  %s488_s11 = sand.u32 (%p1838_p4), 1, %s1757_s17  }
  0x58   : > { %s1618_s12 = sshll.u32 (%p1838_p4), %s1765_s19, 3  ;;  %s1617_s13 = sshll.u32 (%p1838_p4), %s488_s11, 9 }
  0x59   : > { %s2006_s22 = scalar_lea.vmem (%p1838_p4), %s3112_s2, %s1618_s12  ;;  %s2011_s24 = scalar_lea.vmem (%p1838_p4), [#allocation3], %s1617_s13 }
  0x5a   : > { %v650_v0 = vld [vmem:[%s2006_s22] sm:$0xff] (%p1838_p4)  ;;  %v652_v1 = vld [vmem:[%s2006_s22 + $0x10] sm:$0xff] (%p1838_p4) }
  0x5b   : > { %v654_v2 = vld [vmem:[%s2006_s22 + $0x20] sm:$0xff] (%p1838_p4)  ;;  %651 = vst [vmem:[%s2011_s24] sm:$0xff] (%p1838_p4), %v650_v0  ;;  %v656_v3 = vld [vmem:[%s2006_s22 + $0x30] sm:$0xff] (%p1838_p4) }
  0x5c   : > { %653 = vst [vmem:[%s2011_s24 + $0x8] sm:$0xff] %v652_v1  ;;  %v658_v4 = vld [vmem:[%s2006_s22 + $0x40] sm:$0xff]  ;;  %v660_v5 = vld [vmem:[%s2006_s22 + $0x50] sm:$0xff] }
  0x5d   : > { %655 = vst [vmem:[%s2011_s24 + $0x10] sm:$0xff] %v654_v2  ;;  %v662_v6 = vld [vmem:[%s2006_s22 + $0x60] sm:$0xff]  ;;  %v664_v7 = vld [vmem:[%s2006_s22 + $0x70] sm:$0xff] }
  0x5e   : > { %657 = vst [vmem:[%s2011_s24 + $0x18] sm:$0xff] %v656_v3  ;;  %v666_v8 = vld [vmem:[%s2006_s22 + $0x80] sm:$0xff]  ;;  %v668_v9 = vld [vmem:[%s2006_s22 + $0x90] sm:$0xff] }
  0x5f   : > { %659 = vst [vmem:[%s2011_s24 + $0x20] sm:$0xff] %v658_v4  ;;  %v670_v10 = vld [vmem:[%s2006_s22 + $0xa0] sm:$0xff]  ;;  %v672_v11 = vld [vmem:[%s2006_s22 + $0xb0] sm:$0xff] }
  0x60   : > { %661 = vst [vmem:[%s2011_s24 + $0x28] sm:$0xff] %v660_v5  ;;  %v674_v12 = vld [vmem:[%s2006_s22 + $0xc0] sm:$0xff]  ;;  %v676_v13 = vld [vmem:[%s2006_s22 + $0xd0] sm:$0xff] }
  0x61   : > { %663 = vst [vmem:[%s2011_s24 + $0x30] sm:$0xff] %v662_v6  ;;  %v678_v14 = vld [vmem:[%s2006_s22 + $0xe0] sm:$0xff]  ;;  %v680_v15 = vld [vmem:[%s2006_s22 + $0xf0] sm:$0xff] }
  0x62   : > { %665 = vst [vmem:[%s2011_s24 + $0x38] sm:$0xff] %v664_v7  ;;  %v682_v16 = vld [vmem:[%s2006_s22 + $0x100] sm:$0xff]  ;;  %v684_v17 = vld [vmem:[%s2006_s22 + $0x110] sm:$0xff] }
  0x63   : > { %667 = vst [vmem:[%s2011_s24 + $0x40] sm:$0xff] %v666_v8  ;;  %v686_v18 = vld [vmem:[%s2006_s22 + $0x120] sm:$0xff]  ;;  %v688_v19 = vld [vmem:[%s2006_s22 + $0x130] sm:$0xff] }
  0x64   : > { %669 = vst [vmem:[%s2011_s24 + $0x48] sm:$0xff] %v668_v9  ;;  %v690_v20 = vld [vmem:[%s2006_s22 + $0x140] sm:$0xff]  ;;  %v692_v21 = vld [vmem:[%s2006_s22 + $0x150] sm:$0xff] }
  0x65   : > { %671 = vst [vmem:[%s2011_s24 + $0x50] sm:$0xff] %v670_v10  ;;  %v694_v22 = vld [vmem:[%s2006_s22 + $0x160] sm:$0xff]  ;;  %v696_v23 = vld [vmem:[%s2006_s22 + $0x170] sm:$0xff] }
  0x66   : > { %673 = vst [vmem:[%s2011_s24 + $0x58] sm:$0xff] %v672_v11  ;;  %v698_v24 = vld [vmem:[%s2006_s22 + $0x180] sm:$0xff]  ;;  %v700_v25 = vld [vmem:[%s2006_s22 + $0x190] sm:$0xff] }
  0x67   : > { %675 = vst [vmem:[%s2011_s24 + $0x60] sm:$0xff] %v674_v12  ;;  %v702_v26 = vld [vmem:[%s2006_s22 + $0x1a0] sm:$0xff]  ;;  %v704_v27 = vld [vmem:[%s2006_s22 + $0x1b0] sm:$0xff] }
  0x68   : > { %677 = vst [vmem:[%s2011_s24 + $0x68] sm:$0xff] %v676_v13  ;;  %v706_v28 = vld [vmem:[%s2006_s22 + $0x1c0] sm:$0xff]  ;;  %v708_v29 = vld [vmem:[%s2006_s22 + $0x1d0] sm:$0xff] }
  0x69   : > { %679 = vst [vmem:[%s2011_s24 + $0x70] sm:$0xff] %v678_v14  ;;  %v710_v30 = vld [vmem:[%s2006_s22 + $0x1e0] sm:$0xff]  ;;  %v712_v31 = vld [vmem:[%s2006_s22 + $0x1f0] sm:$0xff] }
  0x6a   : > { %681 = vst [vmem:[%s2011_s24 + $0x78] sm:$0xff] %v680_v15  ;;  %v714_v32 = vld [vmem:[%s2006_s22 + $0x200] sm:$0xff]  ;;  %v716_v33 = vld [vmem:[%s2006_s22 + $0x210] sm:$0xff] }
  0x6b   : > { %683 = vst [vmem:[%s2011_s24 + $0x80] sm:$0xff] %v682_v16  ;;  %v718_v34 = vld [vmem:[%s2006_s22 + $0x220] sm:$0xff]  ;;  %v720_v35 = vld [vmem:[%s2006_s22 + $0x230] sm:$0xff] }
  0x6c   : > { %685 = vst [vmem:[%s2011_s24 + $0x88] sm:$0xff] %v684_v17  ;;  %v722_v36 = vld [vmem:[%s2006_s22 + $0x240] sm:$0xff]  ;;  %v724_v37 = vld [vmem:[%s2006_s22 + $0x250] sm:$0xff] }
  0x6d   : > { %687 = vst [vmem:[%s2011_s24 + $0x90] sm:$0xff] %v686_v18  ;;  %v726_v38 = vld [vmem:[%s2006_s22 + $0x260] sm:$0xff]  ;;  %v728_v39 = vld [vmem:[%s2006_s22 + $0x270] sm:$0xff] }
  0x6e   : > { %689 = vst [vmem:[%s2011_s24 + $0x98] sm:$0xff] %v688_v19  ;;  %v730_v40 = vld [vmem:[%s2006_s22 + $0x280] sm:$0xff]  ;;  %v732_v41 = vld [vmem:[%s2006_s22 + $0x290] sm:$0xff] }
  0x6f   : > { %691 = vst [vmem:[%s2011_s24 + $0xa0] sm:$0xff] %v690_v20  ;;  %v734_v42 = vld [vmem:[%s2006_s22 + $0x2a0] sm:$0xff]  ;;  %v736_v43 = vld [vmem:[%s2006_s22 + $0x2b0] sm:$0xff] }
  0x70   : > { %693 = vst [vmem:[%s2011_s24 + $0xa8] sm:$0xff] %v692_v21  ;;  %v738_v44 = vld [vmem:[%s2006_s22 + $0x2c0] sm:$0xff]  ;;  %v740_v45 = vld [vmem:[%s2006_s22 + $0x2d0] sm:$0xff] }
  0x71   : > { %695 = vst [vmem:[%s2011_s24 + $0xb0] sm:$0xff] %v694_v22  ;;  %v742_v46 = vld [vmem:[%s2006_s22 + $0x2e0] sm:$0xff]  ;;  %v744_v47 = vld [vmem:[%s2006_s22 + $0x2f0] sm:$0xff] }
  0x72   : > { %697 = vst [vmem:[%s2011_s24 + $0xb8] sm:$0xff] %v696_v23  ;;  %v746_v48 = vld [vmem:[%s2006_s22 + $0x300] sm:$0xff]  ;;  %v748_v49 = vld [vmem:[%s2006_s22 + $0x310] sm:$0xff] }
  0x73   : > { %699 = vst [vmem:[%s2011_s24 + $0xc0] sm:$0xff] %v698_v24  ;;  %v750_v50 = vld [vmem:[%s2006_s22 + $0x320] sm:$0xff]  ;;  %v752_v51 = vld [vmem:[%s2006_s22 + $0x330] sm:$0xff] }
  0x74   : > { %701 = vst [vmem:[%s2011_s24 + $0xc8] sm:$0xff] %v700_v25  ;;  %v754_v52 = vld [vmem:[%s2006_s22 + $0x340] sm:$0xff]  ;;  %v756_v53 = vld [vmem:[%s2006_s22 + $0x350] sm:$0xff] }
  0x75   : > { %703 = vst [vmem:[%s2011_s24 + $0xd0] sm:$0xff] %v702_v26  ;;  %v758_v54 = vld [vmem:[%s2006_s22 + $0x360] sm:$0xff]  ;;  %v760_v55 = vld [vmem:[%s2006_s22 + $0x370] sm:$0xff] }
  0x76   : > { %705 = vst [vmem:[%s2011_s24 + $0xd8] sm:$0xff] %v704_v27  ;;  %v762_v56 = vld [vmem:[%s2006_s22 + $0x380] sm:$0xff]  ;;  %v764_v57 = vld [vmem:[%s2006_s22 + $0x390] sm:$0xff] }
  0x77   : > { %707 = vst [vmem:[%s2011_s24 + $0xe0] sm:$0xff] %v706_v28  ;;  %v766_v58 = vld [vmem:[%s2006_s22 + $0x3a0] sm:$0xff]  ;;  %v768_v59 = vld [vmem:[%s2006_s22 + $0x3b0] sm:$0xff] }
  0x78   : > { %709 = vst [vmem:[%s2011_s24 + $0xe8] sm:$0xff] %v708_v29  ;;  %v770_v60 = vld [vmem:[%s2006_s22 + $0x3c0] sm:$0xff]  ;;  %v772_v61 = vld [vmem:[%s2006_s22 + $0x3d0] sm:$0xff] }
  0x79   : > { %711 = vst [vmem:[%s2011_s24 + $0xf0] sm:$0xff] %v710_v30  ;;  %v774_v62 = vld [vmem:[%s2006_s22 + $0x3e0] sm:$0xff]  ;;  %v776_v63 = vld [vmem:[%s2006_s22 + $0x3f0] sm:$0xff] }
  0x7a   : > { %713 = vst [vmem:[%s2011_s24 + $0xf8] sm:$0xff] %v712_v31 }
  0x7b   : > { %715 = vst [vmem:[%s2011_s24 + $0x100] sm:$0xff] %v714_v32 }
  0x7c   : > { %717 = vst [vmem:[%s2011_s24 + $0x108] sm:$0xff] %v716_v33 }
  0x7d   : > { %719 = vst [vmem:[%s2011_s24 + $0x110] sm:$0xff] %v718_v34 }
  0x7e   : > { %721 = vst [vmem:[%s2011_s24 + $0x118] sm:$0xff] %v720_v35 }
  0x7f   : > { %723 = vst [vmem:[%s2011_s24 + $0x120] sm:$0xff] %v722_v36 }
  0x80   : > { %725 = vst [vmem:[%s2011_s24 + $0x128] sm:$0xff] %v724_v37 }
  0x81   : > { %727 = vst [vmem:[%s2011_s24 + $0x130] sm:$0xff] %v726_v38 }
  0x82   : > { %729 = vst [vmem:[%s2011_s24 + $0x138] sm:$0xff] %v728_v39 }
  0x83   : > { %731 = vst [vmem:[%s2011_s24 + $0x140] sm:$0xff] %v730_v40 }
  0x84   : > { %733 = vst [vmem:[%s2011_s24 + $0x148] sm:$0xff] %v732_v41 }
  0x85   : > { %735 = vst [vmem:[%s2011_s24 + $0x150] sm:$0xff] %v734_v42 }
  0x86   : > { %737 = vst [vmem:[%s2011_s24 + $0x158] sm:$0xff] %v736_v43 }
  0x87   : > { %739 = vst [vmem:[%s2011_s24 + $0x160] sm:$0xff] %v738_v44 }
  0x88   : > { %741 = vst [vmem:[%s2011_s24 + $0x168] sm:$0xff] %v740_v45 }
  0x89   : > { %743 = vst [vmem:[%s2011_s24 + $0x170] sm:$0xff] %v742_v46 }
  0x8a   : > { %745 = vst [vmem:[%s2011_s24 + $0x178] sm:$0xff] %v744_v47 }
  0x8b   : > { %747 = vst [vmem:[%s2011_s24 + $0x180] sm:$0xff] %v746_v48 }
  0x8c   : > { %749 = vst [vmem:[%s2011_s24 + $0x188] sm:$0xff] %v748_v49 }
  0x8d   : > { %751 = vst [vmem:[%s2011_s24 + $0x190] sm:$0xff] %v750_v50 }
  0x8e   : > { %753 = vst [vmem:[%s2011_s24 + $0x198] sm:$0xff] %v752_v51 }
  0x8f   : > { %755 = vst [vmem:[%s2011_s24 + $0x1a0] sm:$0xff] %v754_v52 }
  0x90   : > { %757 = vst [vmem:[%s2011_s24 + $0x1a8] sm:$0xff] %v756_v53 }
  0x91   : > { %759 = vst [vmem:[%s2011_s24 + $0x1b0] sm:$0xff] %v758_v54 }
  0x92   : > { %761 = vst [vmem:[%s2011_s24 + $0x1b8] sm:$0xff] %v760_v55 }
  0x93   : > { %763 = vst [vmem:[%s2011_s24 + $0x1c0] sm:$0xff] %v762_v56 }
  0x94   : > { %765 = vst [vmem:[%s2011_s24 + $0x1c8] sm:$0xff] %v764_v57 }
  0x95   : > { %767 = vst [vmem:[%s2011_s24 + $0x1d0] sm:$0xff] %v766_v58 }
  0x96   : > { %769 = vst [vmem:[%s2011_s24 + $0x1d8] sm:$0xff] %v768_v59 }
  0x97   : > { %771 = vst [vmem:[%s2011_s24 + $0x1e0] sm:$0xff] %v770_v60 }
  0x98   : > { %773 = vst [vmem:[%s2011_s24 + $0x1e8] sm:$0xff] %v772_v61 }
  0x99   : > { %775 = vst [vmem:[%s2011_s24 + $0x1f0] sm:$0xff] %v774_v62 }
  0x9a   : > { %777 = vst [vmem:[%s2011_s24 + $0x1f8] sm:$0xff] %v776_v63 }
  0x9b PF: > { %p1619_p11 = scmp.ge.s32.totalorder %s1769_s20, 1  ;;  %p789_p12 = scmp.lt.s32.totalorder %s1769_s20, 3 }
  0x9d   : > { %p790_p13 = pnand %p1619_p11, %p789_p12 }
  0x9f   : > { %793 = sbr.rel (%p790_p13) target bundleno = 305 (0x131), region = 104 }
  0xa4   : > { %p841_p0 = scmp.lt.s32.totalorder %s1761_s18, 1  ;;  %s796_s27 = sand.u32 1, %s1753_s16  }
  0xa5   : > { %s2151_s11 = sshll.u32 %s796_s27, 9  ;;  %s1626_s21 = sshll.u32 %s1761_s18, 3 }
  0xa6   : > { %s842_s25 = scalar_select %p841_p0, %s1761_s18, 1 }
  0xa7   : > { %s2154_s12 = scalar_lea.vmem [#allocation2], %s2151_s11  ;;  %s2162_s13 = scalar_lea.vmem [#allocation3], %s2151_s11 }
  0xa8   : > { %s1623_s30 = sshll.u32 %s842_s25, 1  ;;  %v2157_v8 = vld [vmem:[%s2154_s12] sm:$0xff]  ;;  %v2170_v12 = vld [vmem:[%s2154_s12 + $0x8] sm:$0xff]  ;;  %v2176_v16 = vld [vmem:[%s2154_s12 + $0x10] sm:$0xff]  ;;  %s2612_s14 = scalar_lea.vmem [#allocation4], %s2151_s11 }
  0xa9   : > { %s844_s7 = scalar_lea.vmem %s3111_s1, %s1623_s30  ;;  %s849_s10 = scalar_lea.vmem %s3113_s3, %s1623_s30  ;;  %v2165_v10 = vld [vmem:[%s2162_s13] sm:$0xff]  ;;  %v2173_v15 = vld [vmem:[%s2162_s13 + $0x8] sm:$0xff]  ;;  %v2179_v17 = vld [vmem:[%s2162_s13 + $0x10] sm:$0xff] }
  0xaa   : > { %v851_v0 = vld [vmem:[%s844_s7] sm:$0x3]  ;;  %v2182_v18 = vld [vmem:[%s2154_s12 + $0x18] sm:$0xff]  ;;  %v2194_v24 = vld [vmem:[%s2154_s12 + $0x28] sm:$0xff]  ;;  %s1483_s24 = scalar_lea.hbm %s3114_s4, %s1626_s21  ;;  %s1484_s25 = sshll.u32 %s2612_s14, 4  ;;  %s1485_s25 = int_to_ptr.vmem [resolvable:$true] %s1484_s25 }
  0xab   : > { %v1064_v1 = vld [vmem:[%s849_s10] sm:$0x3]  ;;  %v852_v2 = vmul.f32 0.001953125, %v851_v0  ;;  %v2185_v19 = vld [vmem:[%s2162_s13 + $0x18] sm:$0xff]  ;;  %v2197_v25 = vld [vmem:[%s2162_s13 + $0x28] sm:$0xff]  ;;  %s1486_s30 = sshll.u32 %s1483_s24, 4  ;;  %s1487_s30 = int_to_ptr.hbm [resolvable:$true] %s1486_s30 }
  0xac   : > { %v1065_v3 = vmul.f32 0.001953125, %v1064_v1  ;;  %v2188_v20 = vld [vmem:[%s2154_s12 + $0x20] sm:$0xff]  ;;  %v2204_v28 = vld [vmem:[%s2154_s12 + $0x30] sm:$0xff]  ;;  %v2210_v30 = vld [vmem:[%s2154_s12 + $0x38] sm:$0xff]  ;;  %s1470_s5 = scalar_lea.sflag [#allocation5], %s796_s27  ;;  %s1705_s6 = sshra.s32 %s1487_s30, 4  ;;  %s1706_s6 = int_to_ptr.hbm [resolvable:$true] %s1705_s6 }
  0xad   : > { %v853_v4 = vmul.f32 %v852_v2, %v852_v2  ;;  %v2159_v9 = vperm.slane %v852_v2, 0  ;;  %v2191_v23 = vld [vmem:[%s2162_s13 + $0x20] sm:$0xff]  ;;  %v2207_v29 = vld [vmem:[%s2162_s13 + $0x30] sm:$0xff]  ;;  %v2221_v35 = vld [vmem:[%s2162_s13 + $0x38] sm:$0xff]  ;;  %s1707_s7 = scalar_lea.hbm %s1706_s6, 512  ;;  %s1711_s10 = scalar_lea.hbm %s3114_s4, 1024 }
  0xae   : > { %v1066_v5 = vmul.f32 %v1065_v3, %v1065_v3  ;;  %v2167_v11 = vperm.slane %v1065_v3, 0  ;;  %v2224_v36 = vld [vmem:[%s2154_s12 + $0x40] sm:$0xff]  ;;  %v2238_v42 = vld [vmem:[%s2154_s12 + $0x48] sm:$0xff]  ;;  %v2251_v47 = vld [vmem:[%s2154_s12 + $0x50] sm:$0xff]  ;;  %p1708_p1 = scmp.ne.s32.totalorder %s1706_s6, %s1707_s7  ;;  %p1712_p4 = scmp.lt.s32.totalorder %s1706_s6, %s3114_s4 }
  0xaf   : > { %v855_v6 = vrot.slane %v853_v4, 7  ;;  %v2235_v41 = vld [vmem:[%s2162_s13 + $0x40] sm:$0xff]  ;;  %v2241_v43 = vld [vmem:[%s2162_s13 + $0x48] sm:$0xff]  ;;  %v2254_v48 = vld [vmem:[%s2162_s13 + $0x50] sm:$0xff]  ;;  %p1713_p6 = scmp.lt.s32.totalorder %s1711_s10, %s1707_s7 }
  0xb0   : > { %v1068_v7 = vrot.slane %v1066_v5, 7  ;;  %v2257_v49 = vld [vmem:[%s2154_s12 + $0x58] sm:$0xff]  ;;  %v2270_v54 = vld [vmem:[%s2154_s12 + $0x60] sm:$0xff]  ;;  %v2284_v60 = vld [vmem:[%s2154_s12 + $0x68] sm:$0xff]  ;;  %p1709_p2 = pnand %p1708_p1, %p1842_p5 }
  0xb1   : > { %v857_v13 = vsub.f32 %v852_v2, %v855_v6  ;;  %v2267_v53 = vld [vmem:[%s2162_s13 + $0x58] sm:$0xff]  ;;  %v2273_v55 = vld [vmem:[%s2162_s13 + $0x60] sm:$0xff]  ;;  %v2287_v61 = vld [vmem:[%s2162_s13 + $0x68] sm:$0xff]  ;;  %p1714_p7 = por %p1713_p6, %p1712_p4 }
  0xb2   : > { %v1070_v14 = vsub.f32 %v1065_v3, %v1068_v7  ;;  %v2290_v62 = vld [vmem:[%s2154_s12 + $0x70] sm:$0xff]  ;;  %v2304_v4 = vld [vmem:[%s2154_s12 + $0x78] sm:$0xff]  ;;  %v2333_v1 = vld [vmem:[%s2162_s13 + $0x88] sm:$0xff]  ;;  %p1710_p3 = pneg %p1709_p2 }
  0xb3   : > { %v858_v21 = vmax.f32 %v857_v13, 0.0  ;;  %v2301_v3 = vld [vmem:[%s2162_s13 + $0x70] sm:$0xff]  ;;  %v2307_v5 = vld [vmem:[%s2162_s13 + $0x78] sm:$0xff]  ;;  %v2316_v13 = vld [vmem:[%s2154_s12 + $0x80] sm:$0xff] }
  0xb4   : > { %v1071_v22 = vmax.f32 %v1070_v14, 0.0  ;;  %v2319_v14 = vld [vmem:[%s2162_s13 + $0x80] sm:$0xff]  ;;  %v2336_v0 = vld [vmem:[%s2154_s12 + $0x90] sm:$0xff]  ;;  %v2352_v58 = vld [vmem:[%s2154_s12 + $0x98] sm:$0xff]  ;;  %p1715_p8 = pnand %p1714_p7, %p1710_p3 }
  0xb5   : > { %v2212_v31 = vadd.f32 1e-05, %v858_v21  ;;  %v2322_v21 = vld [vmem:[%s2154_s12 + $0x88] sm:$0xff]  ;;  %v2339_v63 = vld [vmem:[%s2162_s13 + $0x90] sm:$0xff]  ;;  %v2355_v57 = vld [vmem:[%s2162_s13 + $0x98] sm:$0xff] }
  0xb6   : > { %v2214_v32 = vadd.f32 1e-05, %v1071_v22  ;;  %3139 = vst [vmem:[#allocation7_spill] sm:$0xff] %v2355_v57  ;;  %v2358_v56 = vld [vmem:[%s2154_s12 + $0xa0] sm:$0xff]  ;;  %v2374_v50 = vld [vmem:[%s2154_s12 + $0xa8] sm:$0xff]  ;;  %v2388_v44 = vld [vmem:[%s2154_s12 + $0xb0] sm:$0xff] }
  0xb7   : > { %1687 = vrsqrt.f32 %v2212_v31  ;;  %vm995_vm0 = vweird.f32 %v2212_v31  ;;  %3140 = vst [vmem:[#allocation8_spill] sm:$0xff] %v2358_v56  ;;  %v2371_v51 = vld [vmem:[%s2162_s13 + $0xa0] sm:$0xff]  ;;  %v2385_v2 = vld [vmem:[%s2162_s13 + $0xa8] sm:$0xff]  ;;  %v2398_v34 = vld [vmem:[%s2162_s13 + $0xb0] sm:$0xff] }
  0xb8   : > { %1689 = vrsqrt.f32 %v2214_v32  ;;  %vm1208_vm1 = vweird.f32 %v2214_v32  ;;  %3141 = vst [vmem:[#allocation9_spill] sm:$0xff] %v2371_v51  ;;  %v2401_v7 = vld [vmem:[%s2154_s12 + $0xb8] sm:$0xff]  ;;  %v2413_v6 = vld [vmem:[%s2154_s12 + $0xc0] sm:$0xff]  ;;  %v2419_v37 = vld [vmem:[%s2154_s12 + $0xc8] sm:$0xff] }
  0xb9   : > { %3142 = vst [vmem:[#allocation10_spill] sm:$0xff] %v2374_v50  ;;  %v2404_v27 = vld [vmem:[%s2162_s13 + $0xb8] sm:$0xff]  ;;  %v2416_v39 = vld [vmem:[%s2162_s13 + $0xc0] sm:$0xff]  ;;  %v2427_v26 = vld [vmem:[%s2162_s13 + $0xc8] sm:$0xff] }
  0xba   : > { %3143 = vst [vmem:[#allocation11_spill] sm:$0xff] %v2385_v2  ;;  %v2430_v45 = vld [vmem:[%s2154_s12 + $0xd0] sm:$0xff]  ;;  %v2442_v2 = vld [vmem:[%s2154_s12 + $0xd8] sm:$0xff]  ;;  %v2454_v56 = vld [vmem:[%s2154_s12 + $0xe0] sm:$0xff] }
  0xbb   : > { %3144 = vst [vmem:[#allocation12_spill] sm:$0xff] %v2388_v44  ;;  %v2433_v50 = vld [vmem:[%s2162_s13 + $0xd0] sm:$0xff]  ;;  %v2445_v38 = vld [vmem:[%s2162_s13 + $0xd8] sm:$0xff] }
  0xbc   : > { %3145 = vst [vmem:[#allocation13_spill] sm:$0xff] %v2401_v7  ;;  %v2457_v7 = vld [vmem:[%s2162_s13 + $0xe0] sm:$0xff] }
  0xbd   : > { %v2341_v59 = vpop.eup %1687  ;;  %3146 = vst [vmem:[#allocation14_spill] sm:$0xff] %v2416_v39  ;;  %v2477_v39 = vld [vmem:[%s2162_s13 + $0xe8] sm:$0xff] }
  0xbe   : > { %v2360_v52 = vpop.eup %1689  ;;  %v990_v22 = vmul.f32 %v2341_v59, %v2212_v31  ;;  %vm996_vm2 = vweird.f32 %v2341_v59  ;;  %3147 = vst [vmem:[#allocation15_spill] sm:$0xff] %v2419_v37  ;;  %v2474_v37 = vld [vmem:[%s2154_s12 + $0xe8] sm:$0xff] }
  0xbf   : > { %v1203_v46 = vmul.f32 %v2360_v52, %v2214_v32  ;;  %vm1209_vm3 = vweird.f32 %v2360_v52  ;;  %3148 = vst [vmem:[#allocation16_spill] sm:$0xff] %v2430_v45  ;;  %vm2463_vm4 = vmor %vm995_vm0, %vm996_vm2  ;;  %v2538_v45 = vld [vmem:[%s2154_s12 + $0x108] sm:$0xff] }
  0xc0   : > { %v991_v40 = vmul.f32 %v2341_v59, %v990_v22  ;;  %3149 = vst [vmem:[#allocation17_spill] sm:$0xff] %v2433_v50  ;;  %vm2484_vm5 = vmor %vm1208_vm1, %vm1209_vm3  ;;  %v2498_v50 = vld [vmem:[%s2162_s13 + $0xf0] sm:$0xff] }
  0xc1   : > { %v1204_v22 = vmul.f32 %v2360_v52, %v1203_v46  ;;  %3150 = vst [vmem:[#allocation18_spill] sm:$0xff] %v2445_v38  ;;  %v2508_v38 = vld [vmem:[%s2154_s12 + $0xf8] sm:$0xff]  ;;  %v2526_v46 = vld [vmem:[%s2162_s13 + $0x100] sm:$0xff] }
  0xc2   : > { %v992_v33 = vmul.f32 0.5, %v991_v40  ;;  %3151 = vst [vmem:[#allocation19_spill] sm:$0xff] %v2454_v56 }
  0xc3   : > { %v1205_v51 = vmul.f32 0.5, %v1204_v22  ;;  %3154 = vst [vmem:[#allocation20_spill] sm:$0xff] %v2474_v37  ;;  %v2511_v22 = vld [vmem:[%s2162_s13 + $0xf8] sm:$0xff]  ;;  %v2523_v37 = vld [vmem:[%s2154_s12 + $0x100] sm:$0xff] }
  0xc4   : > { %v993_v44 = vsub.f32 1.5, %v992_v33  ;;  %3155 = vst [vmem:[#allocation21_spill] sm:$0xff] %v2477_v39 }
  0xc5   : > { %v1206_v57 = vsub.f32 1.5, %v1205_v51  ;;  %3158 = vst [vmem:[#allocation22_spill] sm:$0xff] %v2508_v38  ;;  %v3164_v51 = vsub.f32 %v2157_v8, %v2159_v9  ;;  %v3167_v38 = vsub.f32 %v2182_v18, %v2159_v9  ;;  %v3168_v8 = vsub.f32 %v2165_v10, %v2167_v11 }
  0xc6   : > { %v994_v31 = vmul.f32 %v2341_v59, %v993_v44  ;;  %v2495_v44 = vld [vmem:[%s2154_s12 + $0xf0] sm:$0xff]  ;;  %3159 = vst [vmem:[#allocation23_spill] sm:$0xff] %v2511_v22  ;;  %v3171_v18 = vsub.f32 %v2185_v19, %v2167_v11  ;;  %v3172_v10 = vsub.f32 %v2188_v20, %v2159_v9  ;;  %v3175_v19 = vsub.f32 %v2197_v25, %v2167_v11 }
  0xc7   : > { %v1207_v32 = vmul.f32 %v2360_v52, %v1206_v57  ;;  %3160 = vst [vmem:[#allocation24_spill] sm:$0xff] %v2523_v37  ;;  %v2541_v57 = vld [vmem:[%s2162_s13 + $0x108] sm:$0xff] }
  0xc8   : > { %v998_v56 = vsel %vm2463_vm4, %v2341_v59, %v994_v31  ;;  %3161 = vst [vmem:[#allocation25_spill] sm:$0xff] %v2526_v46  ;;  %v3165_v31 = vsub.f32 %v2170_v12, %v2159_v9  ;;  %v3166_v59 = vsub.f32 %v2176_v16, %v2159_v9  ;;  %v3169_v12 = vsub.f32 %v2173_v15, %v2167_v11 }
  0xc9   : > { %v2528_v39 = vperm.slane %v998_v56, 1  ;;  %v1211_v33 = vsel %vm2484_vm5, %v2360_v52, %v1207_v32  ;;  %3162 = vst [vmem:[#allocation26_spill] sm:$0xff] %v2538_v45  ;;  %v3170_v16 = vsub.f32 %v2179_v17, %v2167_v11  ;;  %v3173_v15 = vsub.f32 %v2191_v23, %v2167_v11 }
  0xca   : > { %3163 = vst [vmem:[#allocation27_spill] sm:$0xff] %v2541_v57  ;;  %v2543_v40 = vperm.slane %v1211_v33, 1  ;;  %v3174_v17 = vsub.f32 %v2194_v24, %v2159_v9  ;;  %v3176_v23 = vsub.f32 %v2204_v28, %v2159_v9  ;;  %v3177_v24 = vsub.f32 %v2207_v29, %v2167_v11 }
  0xcb   : > { %v1000_v32 = vmul.f32 %v2528_v39, %v3164_v51  ;;  %v1001_v33 = vmul.f32 %v2528_v39, %v3165_v31  ;;  %v1002_v56 = vmul.f32 %v2528_v39, %v3166_v59  ;;  %v1003_v52 = vmul.f32 %v2528_v39, %v3167_v38 }
  0xcc   : > { %v1213_v51 = vmul.f32 %v2543_v40, %v3168_v8  ;;  %v1214_v31 = vmul.f32 %v2543_v40, %v3169_v12  ;;  %v1215_v59 = vmul.f32 %v2543_v40, %v3170_v16  ;;  %v1216_v38 = vmul.f32 %v2543_v40, %v3171_v18 }
  0xcd   : > { %v1004_v8 = vmul.f32 %v2528_v39, %v3172_v10  ;;  %v1217_v12 = vmul.f32 %v2543_v40, %v3173_v15  ;;  %v1005_v16 = vmul.f32 %v2528_v39, %v3174_v17  ;;  %v1218_v18 = vmul.f32 %v2543_v40, %v3175_v19 }
  0xce   : > { %v1277_v57 = vadd.f32 %v1213_v51, %v1000_v32  ;;  %v1278_v20 = vadd.f32 %v1214_v31, %v1001_v33  ;;  %v1279_v45 = vadd.f32 %v1215_v59, %v1002_v56  ;;  %v1280_v10 = vadd.f32 %v1216_v38, %v1003_v52 }
  0xcf   : > { %v1281_v46 = vadd.f32 %v1217_v12, %v1004_v8  ;;  %v1282_v37 = vadd.f32 %v1218_v18, %v1005_v16  ;;  %v1006_v15 = vmul.f32 %v2528_v39, %v3176_v23  ;;  %v1219_v17 = vmul.f32 %v2543_v40, %v3177_v24 }
  0xd0   : > { %v1341_v25 = vmax.f32 %v1277_v57, 0.0  ;;  %v1342_v22 = vmax.f32 %v1278_v20, 0.0  ;;  %v1343_v19 = vmax.f32 %v1279_v45, 0.0  ;;  %v1344_v32 = vmax.f32 %v1280_v10, 0.0 }
  0xd1   : > { %v1345_v51 = vmax.f32 %v1281_v46, 0.0  ;;  %v1346_v33 = vmax.f32 %v1282_v37, 0.0  ;;  %v1283_v56 = vadd.f32 %v1219_v17, %v1006_v15  ;;  %v3178_v52 = vsub.f32 %v2210_v30, %v2159_v9 }
  0xd2   : > { %1405 = vst [vmem:[%s2612_s14] sm:$0xff] %v1341_v25  ;;  %v3179_v28 = vsub.f32 %v2221_v35, %v2167_v11  ;;  %v3180_v37 = vsub.f32 %v2224_v36, %v2159_v9  ;;  %v3181_v30 = vsub.f32 %v2235_v41, %v2167_v11  ;;  %v3182_v57 = vsub.f32 %v2238_v42, %v2159_v9 }
  0xd3   : > { %v1007_v31 = vmul.f32 %v2528_v39, %v3178_v52  ;;  %1406 = vst [vmem:[%s2612_s14 + $0x8] sm:$0xff] %v1342_v22  ;;  %v1347_v35 = vmax.f32 %v1283_v56, 0.0  ;;  %v3183_v38 = vsub.f32 %v2241_v43, %v2167_v11  ;;  %v3184_v8 = vsub.f32 %v2251_v47, %v2159_v9 }
  0xd4   : > { %v1220_v29 = vmul.f32 %v2543_v40, %v3179_v28  ;;  %v1008_v45 = vmul.f32 %v2528_v39, %v3180_v37  ;;  %v1221_v46 = vmul.f32 %v2543_v40, %v3181_v30  ;;  %v1009_v59 = vmul.f32 %v2528_v39, %v3182_v57  ;;  %1407 = vst [vmem:[%s2612_s14 + $0x10] sm:$0xff] %v1343_v19 }
  0xd5   : > { %v1222_v36 = vmul.f32 %v2543_v40, %v3183_v38  ;;  %v1010_v41 = vmul.f32 %v2528_v39, %v3184_v8  ;;  %v3185_v12 = vsub.f32 %v2254_v48, %v2167_v11  ;;  %v3186_v18 = vsub.f32 %v2257_v49, %v2159_v9  ;;  %1408 = vst [vmem:[%s2612_s14 + $0x18] sm:$0xff] %v1344_v32 }
  0xd6   : > { %v1284_v16 = vadd.f32 %v1220_v29, %v1007_v31  ;;  %v1285_v22 = vadd.f32 %v1221_v46, %v1008_v45  ;;  %v3187_v20 = vsub.f32 %v2267_v53, %v2167_v11  ;;  %v3188_v23 = vsub.f32 %v2270_v54, %v2159_v9  ;;  %1409 = vst [vmem:[%s2612_s14 + $0x20] sm:$0xff] %v1345_v51 }
  0xd7   : > { %v1223_v42 = vmul.f32 %v2543_v40, %v3185_v12  ;;  %v1011_v43 = vmul.f32 %v2528_v39, %v3186_v18  ;;  %v1286_v10 = vadd.f32 %v1222_v36, %v1009_v59  ;;  %v3189_v24 = vsub.f32 %v2273_v55, %v2167_v11  ;;  %1410 = vst [vmem:[%s2612_s14 + $0x28] sm:$0xff] %v1346_v33 }
  0xd8   : > { %v1224_v47 = vmul.f32 %v2543_v40, %v3187_v20  ;;  %v1012_v15 = vmul.f32 %v2528_v39, %v3188_v23  ;;  %v1348_v17 = vmax.f32 %v1284_v16, 0.0  ;;  %v1349_v53 = vmax.f32 %v1285_v22, 0.0  ;;  %1411 = vst [vmem:[%s2612_s14 + $0x30] sm:$0xff] %v1347_v35 }
  0xd9   : > { %v1287_v48 = vadd.f32 %v1223_v42, %v1010_v41  ;;  %v1225_v49 = vmul.f32 %v2543_v40, %v3189_v24  ;;  %v3190_v19 = vsub.f32 %v2284_v60, %v2159_v9  ;;  %v1350_v54 = vmax.f32 %v1286_v10, 0.0 }
  0xda   : > { %v1288_v25 = vadd.f32 %v1224_v47, %v1011_v43  ;;  %v3191_v55 = vsub.f32 %v2287_v61, %v2167_v11  ;;  %v3192_v28 = vsub.f32 %v2290_v62, %v2159_v9  ;;  %v3193_v29 = vsub.f32 %v2301_v3, %v2167_v11  ;;  %1412 = vst [vmem:[%s2612_s14 + $0x38] sm:$0xff] %v1348_v17  ;;  %v3203_v47 = vld [vmem:[#allocation7_spill] sm:$0xff] }
  0xdb   : > { %v1013_v32 = vmul.f32 %v2528_v39, %v3190_v19  ;;  %v1351_v56 = vmax.f32 %v1287_v48, 0.0  ;;  %v1289_v52 = vadd.f32 %v1225_v49, %v1012_v15  ;;  %v3194_v37 = vsub.f32 %v2304_v4, %v2159_v9  ;;  %1413 = vst [vmem:[%s2612_s14 + $0x40] sm:$0xff] %v1349_v53  ;;  %v3205_v48 = vld [vmem:[#allocation8_spill] sm:$0xff]  ;;  %v3207_v49 = vld [vmem:[#allocation9_spill] sm:$0xff] }
  0xdc   : > { %v1226_v31 = vmul.f32 %v2543_v40, %v3191_v55  ;;  %v1352_v51 = vmax.f32 %v1288_v25, 0.0  ;;  %v1014_v60 = vmul.f32 %v2528_v39, %v3192_v28  ;;  %v1227_v33 = vmul.f32 %v2543_v40, %v3193_v29  ;;  %1414 = vst [vmem:[%s2612_s14 + $0x48] sm:$0xff] %v1350_v54  ;;  %v3209_v25 = vld [vmem:[#allocation10_spill] sm:$0xff] }
  0xdd   : > { %v1015_v61 = vmul.f32 %v2528_v39, %v3194_v37  ;;  %v1353_v45 = vmax.f32 %v1289_v52, 0.0  ;;  %v3195_v46 = vsub.f32 %v2307_v5, %v2167_v11  ;;  %v3196_v57 = vsub.f32 %v2316_v13, %v2159_v9  ;;  %1415 = vst [vmem:[%s2612_s14 + $0x50] sm:$0xff] %v1351_v56  ;;  %v3211_v52 = vld [vmem:[#allocation11_spill] sm:$0xff] }
  0xde   : > { %v1290_v30 = vadd.f32 %v1226_v31, %v1013_v32  ;;  %v1291_v59 = vadd.f32 %v1227_v33, %v1014_v60  ;;  %v3197_v4 = vsub.f32 %v2319_v14, %v2167_v11  ;;  %v3198_v38 = vsub.f32 %v2322_v21, %v2159_v9  ;;  %1416 = vst [vmem:[%s2612_s14 + $0x58] sm:$0xff] %v1352_v51  ;;  %v3213_v51 = vld [vmem:[#allocation12_spill] sm:$0xff] }
  0xdf   : > { %v1228_v62 = vmul.f32 %v2543_v40, %v3195_v46  ;;  %v1016_v3 = vmul.f32 %v2528_v39, %v3196_v57  ;;  %v3199_v36 = vsub.f32 %v2333_v1, %v2167_v11  ;;  %v3200_v12 = vsub.f32 %v2336_v0, %v2159_v9  ;;  %1417 = vst [vmem:[%s2612_s14 + $0x60] sm:$0xff] %v1353_v45 }
  0xe0   : > { %v1229_v35 = vmul.f32 %v2543_v40, %v3197_v4  ;;  %v1017_v5 = vmul.f32 %v2528_v39, %v3198_v38  ;;  %v1354_v8 = vmax.f32 %v1290_v30, 0.0  ;;  %v3201_v42 = vsub.f32 %v2339_v63, %v2167_v11  ;;  %v3220_v4 = vld [vmem:[#allocation14_spill] sm:$0xff] }
  0xe1   : > { %v1230_v13 = vmul.f32 %v2543_v40, %v3199_v36  ;;  %v1292_v41 = vadd.f32 %v1228_v62, %v1015_v61  ;;  %v1018_v14 = vmul.f32 %v2528_v39, %v3200_v12  ;;  %v1355_v16 = vmax.f32 %v1291_v59, 0.0  ;;  %v3216_v61 = vld [vmem:[#allocation13_spill] sm:$0xff] }
  0xe2   : > { %v1231_v21 = vmul.f32 %v2543_v40, %v3201_v42  ;;  %v1293_v1 = vadd.f32 %v1229_v35, %v1016_v3  ;;  %v3202_v18 = vsub.f32 %v2352_v58, %v2159_v9  ;;  %v3204_v10 = vsub.f32 %v3203_v47, %v2167_v11  ;;  %1418 = vst [vmem:[%s2612_s14 + $0x68] sm:$0xff] %v1354_v8 }
  0xe3   : > { %v1294_v22 = vadd.f32 %v1230_v13, %v1017_v5  ;;  %v1356_v0 = vmax.f32 %v1292_v41, 0.0  ;;  %v3206_v23 = vsub.f32 %v3205_v48, %v2159_v9  ;;  %v3208_v17 = vsub.f32 %v3207_v49, %v2167_v11  ;;  %1419 = vst [vmem:[%s2612_s14 + $0x70] sm:$0xff] %v1355_v16  ;;  %v3222_v13 = vld [vmem:[#allocation15_spill] sm:$0xff]  ;;  %v3230_v48 = vld [vmem:[#allocation18_spill] sm:$0xff] }
  0xe4   : > { %v1019_v43 = vmul.f32 %v2528_v39, %v3202_v18  ;;  %v1295_v20 = vadd.f32 %v1231_v21, %v1018_v14  ;;  %v1232_v63 = vmul.f32 %v2543_v40, %v3204_v10  ;;  %v1357_v24 = vmax.f32 %v1293_v1, 0.0  ;;  %v3225_v21 = vld [vmem:[#allocation16_spill] sm:$0xff] }
  0xe5   : > { %v1020_v15 = vmul.f32 %v2528_v39, %v3206_v23  ;;  %v1358_v58 = vmax.f32 %v1294_v22, 0.0  ;;  %v1233_v53 = vmul.f32 %v2543_v40, %v3208_v17  ;;  %v3210_v19 = vsub.f32 %v3209_v25, %v2159_v9  ;;  %1420 = vst [vmem:[%s2612_s14 + $0x78] sm:$0xff] %v1356_v0  ;;  %v3235_v25 = vld [vmem:[#allocation20_spill] sm:$0xff] }
  0xe6   : > { %v1359_v54 = vmax.f32 %v1295_v20, 0.0  ;;  %v1296_v56 = vadd.f32 %v1232_v63, %v1019_v43  ;;  %v3212_v55 = vsub.f32 %v3211_v52, %v2167_v11  ;;  %v3214_v28 = vsub.f32 %v3213_v51, %v2159_v9  ;;  %1421 = vst [vmem:[%s2612_s14 + $0x80] sm:$0xff] %v1357_v24  ;;  %v3227_v43 = vld [vmem:[#allocation17_spill] sm:$0xff]  ;;  %v3232_v24 = vld [vmem:[#allocation19_spill] sm:$0xff] }
  0xe7   : > { %v1021_v32 = vmul.f32 %v2528_v39, %v3210_v19  ;;  %v1297_v29 = vadd.f32 %v1233_v53, %v1020_v15  ;;  %v3215_v33 = vsub.f32 %v2398_v34, %v2167_v11  ;;  %v3217_v45 = vsub.f32 %v3216_v61, %v2159_v9  ;;  %1422 = vst [vmem:[%s2612_s14 + $0x88] sm:$0xff] %v1358_v58  ;;  %v3241_v61 = vld [vmem:[#allocation22_spill] sm:$0xff] }
  0xe8   : > { %v1234_v31 = vmul.f32 %v2543_v40, %v3212_v55  ;;  %v1022_v60 = vmul.f32 %v2528_v39, %v3214_v28  ;;  %v3218_v46 = vsub.f32 %v2404_v27, %v2167_v11  ;;  %v1360_v57 = vmax.f32 %v1296_v56, 0.0  ;;  %1423 = vst [vmem:[%s2612_s14 + $0x90] sm:$0xff] %v1359_v54  ;;  %v3237_v54 = vld [vmem:[#allocation21_spill] sm:$0xff] }
  0xe9   : > { %v1235_v37 = vmul.f32 %v2543_v40, %v3215_v33  ;;  %v1023_v30 = vmul.f32 %v2528_v39, %v3217_v45  ;;  %v3219_v59 = vsub.f32 %v2413_v6, %v2159_v9  ;;  %v3221_v35 = vsub.f32 %v3220_v4, %v2167_v11 }
  0xea   : > { %v1236_v62 = vmul.f32 %v2543_v40, %v3218_v46  ;;  %v1298_v3 = vadd.f32 %v1234_v31, %v1021_v32  ;;  %v1361_v5 = vmax.f32 %v1297_v29, 0.0  ;;  %v3223_v8 = vsub.f32 %v3222_v13, %v2159_v9  ;;  %1424 = vst [vmem:[%s2612_s14 + $0x98] sm:$0xff] %v1360_v57  ;;  %v3243_v57 = vld [vmem:[#allocation23_spill] sm:$0xff]  ;;  %v3247_v13 = vld [vmem:[#allocation25_spill] sm:$0xff] }
  0xeb   : > { %v1024_v34 = vmul.f32 %v2528_v39, %v3219_v59  ;;  %v1237_v38 = vmul.f32 %v2543_v40, %v3221_v35  ;;  %v1299_v27 = vadd.f32 %v1235_v37, %v1022_v60  ;;  %v3224_v14 = vsub.f32 %v2427_v26, %v2167_v11  ;;  %v3245_v59 = vld [vmem:[#allocation24_spill] sm:$0xff]  ;;  %v1106_v35 = vld [vmem:[%s2162_s13 + $0x110] sm:$0xff] }
  0xec   : > { %v1300_v36 = vadd.f32 %v1236_v62, %v1023_v30  ;;  %v1025_v41 = vmul.f32 %v2528_v39, %v3223_v8  ;;  %v1362_v6 = vmax.f32 %v1298_v3, 0.0  ;;  %v3226_v16 = vsub.f32 %v3225_v21, %v2159_v9  ;;  %1425 = vst [vmem:[%s2612_s14 + $0xa0] sm:$0xff] %v1361_v5  ;;  %v1107_v5 = vld [vmem:[%s2162_s13 + $0x118] sm:$0xff] }
  0xed   : > { %v1301_v12 = vadd.f32 %v1237_v38, %v1024_v34  ;;  %v1238_v42 = vmul.f32 %v2543_v40, %v3224_v14  ;;  %v1363_v22 = vmax.f32 %v1299_v27, 0.0  ;;  %v3228_v0 = vsub.f32 %v3227_v43, %v2167_v11  ;;  %v894_v38 = vld [vmem:[%s2154_s12 + $0x118] sm:$0xff] }
  0xee   : > { %v1026_v1 = vmul.f32 %v2528_v39, %v3226_v16  ;;  %v1364_v18 = vmax.f32 %v1300_v36, 0.0  ;;  %v3229_v47 = vsub.f32 %v2442_v2, %v2159_v9  ;;  %v3231_v23 = vsub.f32 %v3230_v48, %v2167_v11  ;;  %1426 = vst [vmem:[%s2612_s14 + $0xa8] sm:$0xff] %v1362_v6  ;;  %v3249_v6 = vld [vmem:[#allocation26_spill] sm:$0xff] }
  0xef   : > { %v1239_v20 = vmul.f32 %v2543_v40, %v3228_v0  ;;  %v1365_v10 = vmax.f32 %v1301_v12, 0.0  ;;  %v1302_v63 = vadd.f32 %v1238_v42, %v1025_v41  ;;  %v3233_v58 = vsub.f32 %v3232_v24, %v2159_v9  ;;  %1427 = vst [vmem:[%s2612_s14 + $0xb0] sm:$0xff] %v1363_v22  ;;  %v895_v42 = vld [vmem:[%s2154_s12 + $0x120] sm:$0xff] }
  0xf0   : > { %v1027_v26 = vmul.f32 %v2528_v39, %v3229_v47  ;;  %v1240_v15 = vmul.f32 %v2543_v40, %v3231_v23  ;;  %v3234_v17 = vsub.f32 %v2457_v7, %v2167_v11  ;;  %v3236_v19 = vsub.f32 %v3235_v25, %v2159_v9  ;;  %1428 = vst [vmem:[%s2612_s14 + $0xb8] sm:$0xff] %v1364_v18 }
  0xf1   : > { %v1028_v49 = vmul.f32 %v2528_v39, %v3233_v58  ;;  %v1303_v2 = vadd.f32 %v1239_v20, %v1026_v1  ;;  %v3238_v56 = vsub.f32 %v3237_v54, %v2167_v11  ;;  %v1366_v55 = vmax.f32 %v1302_v63, 0.0  ;;  %1429 = vst [vmem:[%s2612_s14 + $0xc0] sm:$0xff] %v1365_v10  ;;  %v3251_v1 = vld [vmem:[#allocation27_spill] sm:$0xff]  ;;  %v896_v63 = vld [vmem:[%s2154_s12 + $0x128] sm:$0xff] }
  0xf2   : > { %v1241_v53 = vmul.f32 %v2543_v40, %v3234_v17  ;;  %v1029_v32 = vmul.f32 %v2528_v39, %v3236_v19  ;;  %v1304_v31 = vadd.f32 %v1240_v15, %v1027_v26  ;;  %v3239_v7 = vsub.f32 %v2495_v44, %v2159_v9  ;;  %v893_v44 = vld [vmem:[%s2154_s12 + $0x110] sm:$0xff]  ;;  %v1108_v10 = vld [vmem:[%s2162_s13 + $0x120] sm:$0xff]  ;;  %v1109_v58 = vld [vmem:[%s2162_s13 + $0x128] sm:$0xff] }
  0xf3   : > { %v1242_v52 = vmul.f32 %v2543_v40, %v3238_v56  ;;  %v3240_v28 = vsub.f32 %v2498_v50, %v2167_v11  ;;  %v1367_v29 = vmax.f32 %v1303_v2, 0.0  ;;  %v3242_v45 = vsub.f32 %v3241_v61, %v2159_v9  ;;  %1430 = vst [vmem:[%s2612_s14 + $0xc8] sm:$0xff] %v1366_v55  ;;  %v1110_v19 = vld [vmem:[%s2162_s13 + $0x130] sm:$0xff] }
  0xf4   : > { %v1030_v51 = vmul.f32 %v2528_v39, %v3239_v7  ;;  %v1305_v33 = vadd.f32 %v1241_v53, %v1028_v49  ;;  %v1368_v46 = vmax.f32 %v1304_v31, 0.0  ;;  %v3244_v50 = vsub.f32 %v3243_v57, %v2167_v11  ;;  %v897_v49 = vld [vmem:[%s2154_s12 + $0x130] sm:$0xff] }
  0xf5   : > { %v1243_v60 = vmul.f32 %v2543_v40, %v3240_v28  ;;  %v1306_v37 = vadd.f32 %v1242_v52, %v1029_v32  ;;  %v1031_v30 = vmul.f32 %v2528_v39, %v3242_v45  ;;  %v3246_v34 = vsub.f32 %v3245_v59, %v2159_v9  ;;  %1431 = vst [vmem:[%s2612_s14 + $0xd0] sm:$0xff] %v1367_v29  ;;  %v898_v32 = vld [vmem:[%s2154_s12 + $0x138] sm:$0xff]  ;;  %v899_v45 = vld [vmem:[%s2154_s12 + $0x140] sm:$0xff] }
  0xf6   : > { %v1244_v3 = vmul.f32 %v2543_v40, %v3244_v50  ;;  %v1369_v27 = vmax.f32 %v1305_v33, 0.0  ;;  %v3248_v8 = vsub.f32 %v3247_v13, %v2167_v11  ;;  %v3250_v12 = vsub.f32 %v3249_v6, %v2159_v9  ;;  %1432 = vst [vmem:[%s2612_s14 + $0xd8] sm:$0xff] %v1368_v46  ;;  %v901_v13 = vld [vmem:[%s2154_s12 + $0x150] sm:$0xff] }
  0xf7   : > { %v1307_v62 = vadd.f32 %v1243_v60, %v1030_v51  ;;  %v1032_v4 = vmul.f32 %v2528_v39, %v3246_v34  ;;  %v1370_v36 = vmax.f32 %v1306_v37, 0.0  ;;  %v3252_v22 = vsub.f32 %v3251_v1, %v2167_v11  ;;  %v1111_v60 = vld [vmem:[%s2162_s13 + $0x138] sm:$0xff] }
  0xf8   : > { %v1245_v41 = vmul.f32 %v2543_v40, %v3248_v8  ;;  %v1033_v14 = vmul.f32 %v2528_v39, %v3250_v12  ;;  %v1308_v16 = vadd.f32 %v1244_v3, %v1031_v30  ;;  %v958_v43 = vsub.f32 %v893_v44, %v2159_v9  ;;  %1433 = vst [vmem:[%s2612_s14 + $0xe0] sm:$0xff] %v1369_v27  ;;  %v1112_v30 = vld [vmem:[%s2162_s13 + $0x140] sm:$0xff]  ;;  %v900_v44 = vld [vmem:[%s2154_s12 + $0x148] sm:$0xff] }
  0xf9   : > { %v1371_v21 = vmax.f32 %v1307_v62, 0.0  ;;  %v1246_v18 = vmul.f32 %v2543_v40, %v3252_v22  ;;  %v1171_v20 = vsub.f32 %v1106_v35, %v2167_v11  ;;  %v959_v47 = vsub.f32 %v894_v38, %v2159_v9  ;;  %1434 = vst [vmem:[%s2612_s14 + $0xe8] sm:$0xff] %v1370_v36  ;;  %v1113_v3 = vld [vmem:[%s2162_s13 + $0x148] sm:$0xff] }
  0xfa   : > { %v1309_v0 = vadd.f32 %v1245_v41, %v1032_v4  ;;  %v1172_v26 = vsub.f32 %v1107_v5, %v2167_v11  ;;  %v1372_v48 = vmax.f32 %v1308_v16, 0.0  ;;  %v1034_v15 = vmul.f32 %v2528_v39, %v958_v43  ;;  %v903_v43 = vld [vmem:[%s2154_s12 + $0x160] sm:$0xff] }
  0xfb   : > { %v1310_v23 = vadd.f32 %v1246_v18, %v1033_v14  ;;  %v960_v24 = vsub.f32 %v895_v42, %v2159_v9  ;;  %v1247_v17 = vmul.f32 %v2543_v40, %v1171_v20  ;;  %v1035_v53 = vmul.f32 %v2528_v39, %v959_v47  ;;  %1435 = vst [vmem:[%s2612_s14 + $0xf0] sm:$0xff] %v1371_v21  ;;  %v1114_v14 = vld [vmem:[%s2162_s13 + $0x150] sm:$0xff]  ;;  %v902_v42 = vld [vmem:[%s2154_s12 + $0x158] sm:$0xff] }
  0xfc   : > { %v1373_v2 = vmax.f32 %v1309_v0, 0.0  ;;  %v1248_v25 = vmul.f32 %v2543_v40, %v1172_v26  ;;  %v1173_v52 = vsub.f32 %v1108_v10, %v2167_v11  ;;  %v961_v55 = vsub.f32 %v896_v63, %v2159_v9  ;;  %1436 = vst [vmem:[%s2612_s14 + $0xf8] sm:$0xff] %v1372_v48  ;;  %v1115_v21 = vld [vmem:[%s2162_s13 + $0x158] sm:$0xff] }
  0xfd   : > { %v1374_v54 = vmax.f32 %v1310_v23, 0.0  ;;  %v1036_v56 = vmul.f32 %v2528_v39, %v960_v24  ;;  %v1311_v31 = vadd.f32 %v1247_v17, %v1034_v15  ;;  %v1174_v51 = vsub.f32 %v1109_v58, %v2167_v11  ;;  %v1116_v15 = vld [vmem:[%s2162_s13 + $0x160] sm:$0xff]  ;;  %v904_v24 = vld [vmem:[%s2154_s12 + $0x168] sm:$0xff] }
  0xfe   : > { %v1312_v7 = vadd.f32 %v1248_v25, %v1035_v53  ;;  %v962_v28 = vsub.f32 %v897_v49, %v2159_v9  ;;  %v1249_v29 = vmul.f32 %v2543_v40, %v1173_v52  ;;  %v1037_v33 = vmul.f32 %v2528_v39, %v961_v55  ;;  %1437 = vst [vmem:[%s2612_s14 + $0x100] sm:$0xff] %v1373_v2  ;;  %v1117_v53 = vld [vmem:[%s2162_s13 + $0x168] sm:$0xff]  ;;  %v905_v25 = vld [vmem:[%s2154_s12 + $0x170] sm:$0xff]  ;;  %v906_v55 = vld [vmem:[%s2154_s12 + $0x178] sm:$0xff] }
  0xff   : > { %v1175_v37 = vsub.f32 %v1110_v19, %v2167_v11  ;;  %v963_v61 = vsub.f32 %v898_v32, %v2159_v9  ;;  %v1375_v46 = vmax.f32 %v1311_v31, 0.0  ;;  %v1250_v57 = vmul.f32 %v2543_v40, %v1174_v51  ;;  %1438 = vst [vmem:[%s2612_s14 + $0x108] sm:$0xff] %v1374_v54  ;;  %v1118_v52 = vld [vmem:[%s2162_s13 + $0x170] sm:$0xff] }
 0x100   : > { %v1376_v62 = vmax.f32 %v1312_v7, 0.0  ;;  %v1038_v50 = vmul.f32 %v2528_v39, %v962_v28  ;;  %v1313_v59 = vadd.f32 %v1249_v29, %v1036_v56  ;;  %v1176_v35 = vsub.f32 %v1111_v60, %v2167_v11 }
 0x101   : > { %v1251_v34 = vmul.f32 %v2543_v40, %v1175_v37  ;;  %v1039_v4 = vmul.f32 %v2528_v39, %v963_v61  ;;  %1439 = vst [vmem:[%s2612_s14 + $0x110] sm:$0xff] %v1375_v46  ;;  %v1314_v38 = vadd.f32 %v1250_v57, %v1037_v33  ;;  %v964_v5 = vsub.f32 %v899_v45, %v2159_v9  ;;  %v1119_v61 = vld [vmem:[%s2162_s13 + $0x178] sm:$0xff]  ;;  %v1120_v57 = vld [vmem:[%s2162_s13 + $0x180] sm:$0xff] }
 0x102   : > { %v1177_v27 = vsub.f32 %v1112_v30, %v2167_v11  ;;  %v965_v36 = vsub.f32 %v900_v44, %v2159_v9  ;;  %1440 = vst [vmem:[%s2612_s14 + $0x118] sm:$0xff] %v1376_v62  ;;  %v1377_v8 = vmax.f32 %v1313_v59, 0.0  ;;  %v1252_v6 = vmul.f32 %v2543_v40, %v1176_v35  ;;  %v907_v62 = vld [vmem:[%s2154_s12 + $0x180] sm:$0xff]  ;;  %v1121_v35 = vld [vmem:[%s2162_s13 + $0x188] sm:$0xff] }
 0x103   : > { %v1315_v41 = vadd.f32 %v1251_v34, %v1038_v50  ;;  %v1178_v12 = vsub.f32 %v1113_v3, %v2167_v11  ;;  %v1378_v16 = vmax.f32 %v1314_v38, 0.0  ;;  %v1040_v1 = vmul.f32 %v2528_v39, %v964_v5  ;;  %v908_v50 = vld [vmem:[%s2154_s12 + $0x188] sm:$0xff] }
 0x104   : > { %v1253_v22 = vmul.f32 %v2543_v40, %v1177_v27  ;;  %v1041_v18 = vmul.f32 %v2528_v39, %v965_v36  ;;  %1441 = vst [vmem:[%s2612_s14 + $0x120] sm:$0xff] %v1377_v8  ;;  %v1316_v20 = vadd.f32 %v1252_v6, %v1039_v4  ;;  %v966_v26 = vsub.f32 %v901_v13, %v2159_v9 }
 0x105   : > { %v1379_v0 = vmax.f32 %v1315_v41, 0.0  ;;  %v1254_v47 = vmul.f32 %v2543_v40, %v1178_v12  ;;  %1442 = vst [vmem:[%s2612_s14 + $0x128] sm:$0xff] %v1378_v16  ;;  %v1179_v63 = vsub.f32 %v1114_v14, %v2167_v11  ;;  %v967_v48 = vsub.f32 %v902_v42, %v2159_v9  ;;  %v909_v12 = vld [vmem:[%s2154_s12 + $0x190] sm:$0xff] }
 0x106   : > { %v1317_v10 = vadd.f32 %v1253_v22, %v1040_v1  ;;  %v1180_v23 = vsub.f32 %v1115_v21, %v2167_v11  ;;  %v1380_v58 = vmax.f32 %v1316_v20, 0.0  ;;  %v1042_v2 = vmul.f32 %v2528_v39, %v966_v26  ;;  %v1122_v1 = vld [vmem:[%s2162_s13 + $0x190] sm:$0xff]  ;;  %v910_v22 = vld [vmem:[%s2154_s12 + $0x198] sm:$0xff]  ;;  %v911_v26 = vld [vmem:[%s2154_s12 + $0x1a0] sm:$0xff] }
 0x107   : > { %1443 = vst [vmem:[%s2612_s14 + $0x130] sm:$0xff] %v1379_v0  ;;  %v1318_v49 = vadd.f32 %v1254_v47, %v1041_v18  ;;  %v968_v17 = vsub.f32 %v903_v43, %v2159_v9  ;;  %v1255_v32 = vmul.f32 %v2543_v40, %v1179_v63  ;;  %v1043_v54 = vmul.f32 %v2528_v39, %v967_v48  ;;  %v1123_v18 = vld [vmem:[%s2162_s13 + $0x198] sm:$0xff] }
 0x108   : > { %v1381_v19 = vmax.f32 %v1317_v10, 0.0  ;;  %v1256_v56 = vmul.f32 %v2543_v40, %v1180_v23  ;;  %1444 = vst [vmem:[%s2612_s14 + $0x138] sm:$0xff] %v1380_v58  ;;  %v1181_v51 = vsub.f32 %v1116_v15, %v2167_v11  ;;  %v969_v28 = vsub.f32 %v904_v24, %v2159_v9 }
 0x109   : > { %v1382_v31 = vmax.f32 %v1318_v49, 0.0  ;;  %v1044_v7 = vmul.f32 %v2528_v39, %v968_v17  ;;  %v1319_v60 = vadd.f32 %v1255_v32, %v1042_v2  ;;  %v1182_v33 = vsub.f32 %v1117_v53, %v2167_v11  ;;  %v1124_v2 = vld [vmem:[%s2162_s13 + $0x1a0] sm:$0xff]  ;;  %v912_v17 = vld [vmem:[%s2154_s12 + $0x1a8] sm:$0xff] }
 0x10a   : > { %1445 = vst [vmem:[%s2612_s14 + $0x140] sm:$0xff] %v1381_v19  ;;  %v1320_v29 = vadd.f32 %v1256_v56, %v1043_v54  ;;  %v970_v37 = vsub.f32 %v905_v25, %v2159_v9  ;;  %v1257_v45 = vmul.f32 %v2543_v40, %v1181_v51  ;;  %v1045_v30 = vmul.f32 %v2528_v39, %v969_v28  ;;  %v1125_v54 = vld [vmem:[%s2162_s13 + $0x1a8] sm:$0xff]  ;;  %v913_v56 = vld [vmem:[%s2154_s12 + $0x1b0] sm:$0xff]  ;;  %v914_v28 = vld [vmem:[%s2154_s12 + $0x1b8] sm:$0xff] }
 0x10b   : > { %1446 = vst [vmem:[%s2612_s14 + $0x148] sm:$0xff] %v1382_v31  ;;  %v1183_v44 = vsub.f32 %v1118_v52, %v2167_v11  ;;  %v971_v46 = vsub.f32 %v906_v55, %v2159_v9  ;;  %v1383_v3 = vmax.f32 %v1319_v60, 0.0  ;;  %v1258_v34 = vmul.f32 %v2543_v40, %v1182_v33  ;;  %v1126_v51 = vld [vmem:[%s2162_s13 + $0x1b0] sm:$0xff] }
 0x10c   : > { %v1384_v59 = vmax.f32 %v1320_v29, 0.0  ;;  %v1046_v4 = vmul.f32 %v2528_v39, %v970_v37  ;;  %v1321_v38 = vadd.f32 %v1257_v45, %v1044_v7  ;;  %v1184_v36 = vsub.f32 %v1119_v61, %v2167_v11 }
 0x10d   : > { %v1259_v5 = vmul.f32 %v2543_v40, %v1183_v44  ;;  %v1047_v27 = vmul.f32 %v2528_v39, %v971_v46  ;;  %1447 = vst [vmem:[%s2612_s14 + $0x150] sm:$0xff] %v1383_v3  ;;  %v1322_v13 = vadd.f32 %v1258_v34, %v1045_v30  ;;  %v972_v8 = vsub.f32 %v907_v62, %v2159_v9  ;;  %v1127_v46 = vld [vmem:[%s2162_s13 + $0x1b8] sm:$0xff]  ;;  %v1128_v34 = vld [vmem:[%s2162_s13 + $0x1c0] sm:$0xff] }
 0x10e   : > { %v1185_v41 = vsub.f32 %v1120_v57, %v2167_v11  ;;  %v973_v6 = vsub.f32 %v908_v50, %v2159_v9  ;;  %1448 = vst [vmem:[%s2612_s14 + $0x158] sm:$0xff] %v1384_v59  ;;  %v1385_v14 = vmax.f32 %v1321_v38, 0.0  ;;  %v1260_v21 = vmul.f32 %v2543_v40, %v1184_v36  ;;  %v915_v59 = vld [vmem:[%s2154_s12 + $0x1c0] sm:$0xff]  ;;  %v1129_v36 = vld [vmem:[%s2162_s13 + $0x1c8] sm:$0xff] }
 0x10f   : > { %v1323_v42 = vadd.f32 %v1259_v5, %v1046_v4  ;;  %v1186_v16 = vsub.f32 %v1121_v35, %v2167_v11  ;;  %v1386_v43 = vmax.f32 %v1322_v13, 0.0  ;;  %v1048_v0 = vmul.f32 %v2528_v39, %v972_v8  ;;  %v916_v4 = vld [vmem:[%s2154_s12 + $0x1c8] sm:$0xff] }
 0x110   : > { %v1261_v20 = vmul.f32 %v2543_v40, %v1185_v41  ;;  %v1049_v47 = vmul.f32 %v2528_v39, %v973_v6  ;;  %1449 = vst [vmem:[%s2612_s14 + $0x160] sm:$0xff] %v1385_v14  ;;  %v1324_v63 = vadd.f32 %v1260_v21, %v1047_v27  ;;  %v974_v23 = vsub.f32 %v909_v12, %v2159_v9 }
 0x111   : > { %v1387_v10 = vmax.f32 %v1323_v42, 0.0  ;;  %v1262_v48 = vmul.f32 %v2543_v40, %v1186_v16  ;;  %1450 = vst [vmem:[%s2612_s14 + $0x168] sm:$0xff] %v1386_v43  ;;  %v1187_v24 = vsub.f32 %v1122_v1, %v2167_v11  ;;  %v975_v58 = vsub.f32 %v910_v22, %v2159_v9  ;;  %v917_v16 = vld [vmem:[%s2154_s12 + $0x1d0] sm:$0xff] }
 0x112   : > { %v1325_v15 = vadd.f32 %v1261_v20, %v1048_v0  ;;  %v1188_v49 = vsub.f32 %v1123_v18, %v2167_v11  ;;  %v1388_v53 = vmax.f32 %v1324_v63, 0.0  ;;  %v1050_v19 = vmul.f32 %v2528_v39, %v974_v23  ;;  %v1130_v0 = vld [vmem:[%s2162_s13 + $0x1d0] sm:$0xff]  ;;  %v918_v20 = vld [vmem:[%s2154_s12 + $0x1d8] sm:$0xff]  ;;  %v919_v23 = vld [vmem:[%s2154_s12 + $0x1e0] sm:$0xff] }
 0x113   : > { %1451 = vst [vmem:[%s2612_s14 + $0x170] sm:$0xff] %v1387_v10  ;;  %v1326_v25 = vadd.f32 %v1262_v48, %v1049_v47  ;;  %v976_v32 = vsub.f32 %v911_v26, %v2159_v9  ;;  %v1263_v55 = vmul.f32 %v2543_v40, %v1187_v24  ;;  %v1051_v31 = vmul.f32 %v2528_v39, %v975_v58  ;;  %v1131_v47 = vld [vmem:[%s2162_s13 + $0x1d8] sm:$0xff] }
 0x114   : > { %v1389_v52 = vmax.f32 %v1325_v15, 0.0  ;;  %v1264_v7 = vmul.f32 %v2543_v40, %v1188_v49  ;;  %1452 = vst [vmem:[%s2612_s14 + $0x178] sm:$0xff] %v1388_v53  ;;  %v1189_v33 = vsub.f32 %v1124_v2, %v2167_v11  ;;  %v977_v37 = vsub.f32 %v912_v17, %v2159_v9 }
 0x115   : > { %v1390_v60 = vmax.f32 %v1326_v25, 0.0  ;;  %v1052_v29 = vmul.f32 %v2528_v39, %v976_v32  ;;  %v1327_v61 = vadd.f32 %v1263_v55, %v1050_v19  ;;  %v1190_v30 = vsub.f32 %v1125_v54, %v2167_v11  ;;  %v1132_v19 = vld [vmem:[%s2162_s13 + $0x1e0] sm:$0xff]  ;;  %v920_v32 = vld [vmem:[%s2154_s12 + $0x1e8] sm:$0xff] }
 0x116   : > { %1453 = vst [vmem:[%s2612_s14 + $0x180] sm:$0xff] %v1389_v52  ;;  %v1328_v45 = vadd.f32 %v1264_v7, %v1051_v31  ;;  %v978_v44 = vsub.f32 %v913_v56, %v2159_v9  ;;  %v1265_v62 = vmul.f32 %v2543_v40, %v1189_v33  ;;  %v1053_v57 = vmul.f32 %v2528_v39, %v977_v37  ;;  %v1133_v31 = vld [vmem:[%s2162_s13 + $0x1e8] sm:$0xff]  ;;  %v921_v7 = vld [vmem:[%s2154_s12 + $0x1f0] sm:$0xff]  ;;  %v922_v37 = vld [vmem:[%s2154_s12 + $0x1f8] sm:$0xff] }
 0x117   : > { %1454 = vst [vmem:[%s2612_s14 + $0x188] sm:$0xff] %v1390_v60  ;;  %v1191_v50 = vsub.f32 %v1126_v51, %v2167_v11  ;;  %v979_v3 = vsub.f32 %v914_v28, %v2159_v9  ;;  %v1391_v35 = vmax.f32 %v1327_v61, 0.0  ;;  %v1266_v5 = vmul.f32 %v2543_v40, %v1190_v30  ;;  %v1134_v33 = vld [vmem:[%s2162_s13 + $0x1f0] sm:$0xff] }
 0x118   : > { %v1392_v38 = vmax.f32 %v1328_v45, 0.0  ;;  %v1054_v27 = vmul.f32 %v2528_v39, %v978_v44  ;;  %v1329_v13 = vadd.f32 %v1265_v62, %v1052_v29  ;;  %v1192_v6 = vsub.f32 %v1127_v46, %v2167_v11 }
 0x119   : > { %v1267_v8 = vmul.f32 %v2543_v40, %v1191_v50  ;;  %v1055_v41 = vmul.f32 %v2528_v39, %v979_v3  ;;  %1455 = vst [vmem:[%s2612_s14 + $0x190] sm:$0xff] %v1391_v35  ;;  %v1330_v12 = vadd.f32 %v1266_v5, %v1053_v57  ;;  %v980_v14 = vsub.f32 %v915_v59, %v2159_v9  ;;  %v1135_v3 = vld [vmem:[%s2162_s13 + $0x1f8] sm:$0xff] }
 0x11a   : > { %v1193_v42 = vsub.f32 %v1128_v34, %v2167_v11  ;;  %v981_v21 = vsub.f32 %v916_v4, %v2159_v9  ;;  %1456 = vst [vmem:[%s2612_s14 + $0x198] sm:$0xff] %v1392_v38  ;;  %v1393_v1 = vmax.f32 %v1329_v13, 0.0  ;;  %v1268_v18 = vmul.f32 %v2543_v40, %v1192_v6 }
 0x11b   : > { %v1331_v22 = vadd.f32 %v1267_v8, %v1054_v27  ;;  %v1194_v43 = vsub.f32 %v1129_v36, %v2167_v11  ;;  %v1394_v26 = vmax.f32 %v1330_v12, 0.0  ;;  %v1056_v10 = vmul.f32 %v2528_v39, %v980_v14 }
 0x11c   : > { %v1269_v63 = vmul.f32 %v2543_v40, %v1193_v42  ;;  %v1057_v48 = vmul.f32 %v2528_v39, %v981_v21  ;;  %1457 = vst [vmem:[%s2612_s14 + $0x1a0] sm:$0xff] %v1393_v1  ;;  %v1332_v24 = vadd.f32 %v1268_v18, %v1055_v41  ;;  %v982_v49 = vsub.f32 %v917_v16, %v2159_v9 }
 0x11d   : > { %v1395_v15 = vmax.f32 %v1331_v22, 0.0  ;;  %v1270_v58 = vmul.f32 %v2543_v40, %v1194_v43  ;;  %1458 = vst [vmem:[%s2612_s14 + $0x1a8] sm:$0xff] %v1394_v26  ;;  %v1195_v17 = vsub.f32 %v1130_v0, %v2167_v11  ;;  %v983_v53 = vsub.f32 %v918_v20, %v2159_v9 }
 0x11e   : > { %v1333_v2 = vadd.f32 %v1269_v63, %v1056_v10  ;;  %v1196_v25 = vsub.f32 %v1131_v47, %v2167_v11  ;;  %v1396_v54 = vmax.f32 %v1332_v24, 0.0  ;;  %v1058_v52 = vmul.f32 %v2528_v39, %v982_v49 }
 0x11f   : > { %1459 = vst [vmem:[%s2612_s14 + $0x1b0] sm:$0xff] %v1395_v15  ;;  %v1334_v56 = vadd.f32 %v1270_v58, %v1057_v48  ;;  %v984_v55 = vsub.f32 %v919_v23, %v2159_v9  ;;  %v1271_v28 = vmul.f32 %v2543_v40, %v1195_v17  ;;  %v1059_v60 = vmul.f32 %v2528_v39, %v983_v53 }
 0x120   : > { %v1397_v51 = vmax.f32 %v1333_v2, 0.0  ;;  %v1272_v29 = vmul.f32 %v2543_v40, %v1196_v25  ;;  %1460 = vst [vmem:[%s2612_s14 + $0x1b8] sm:$0xff] %v1396_v54  ;;  %v1197_v30 = vsub.f32 %v1132_v19, %v2167_v11  ;;  %v985_v44 = vsub.f32 %v920_v32, %v2159_v9 }
 0x121   : > { %v1398_v61 = vmax.f32 %v1334_v56, 0.0  ;;  %v1060_v45 = vmul.f32 %v2528_v39, %v984_v55  ;;  %v1335_v46 = vadd.f32 %v1271_v28, %v1058_v52  ;;  %v1198_v57 = vsub.f32 %v1133_v31, %v2167_v11 }
 0x122   : > { %1461 = vst [vmem:[%s2612_s14 + $0x1c0] sm:$0xff] %v1397_v51  ;;  %v1336_v62 = vadd.f32 %v1272_v29, %v1059_v60  ;;  %v986_v50 = vsub.f32 %v921_v7, %v2159_v9  ;;  %v1273_v59 = vmul.f32 %v2543_v40, %v1197_v30  ;;  %v1061_v34 = vmul.f32 %v2528_v39, %v985_v44 }
 0x123   : > { %1462 = vst [vmem:[%s2612_s14 + $0x1c8] sm:$0xff] %v1398_v61  ;;  %v1199_v4 = vsub.f32 %v1134_v33, %v2167_v11  ;;  %v987_v35 = vsub.f32 %v922_v37, %v2159_v9  ;;  %v1399_v38 = vmax.f32 %v1335_v46, 0.0  ;;  %v1274_v27 = vmul.f32 %v2543_v40, %v1198_v57 }
 0x124   : > { %v1400_v5 = vmax.f32 %v1336_v62, 0.0  ;;  %v1062_v36 = vmul.f32 %v2528_v39, %v986_v50  ;;  %v1337_v13 = vadd.f32 %v1273_v59, %v1060_v45  ;;  %v1200_v6 = vsub.f32 %v1135_v3, %v2167_v11 }
 0x125   : > { %v1275_v8 = vmul.f32 %v2543_v40, %v1199_v4  ;;  %v1063_v41 = vmul.f32 %v2528_v39, %v987_v35  ;;  %1463 = vst [vmem:[%s2612_s14 + $0x1d0] sm:$0xff] %v1399_v38  ;;  %v1338_v9 = vadd.f32 %v1274_v27, %v1061_v34 }
 0x126   : > { %1464 = vst [vmem:[%s2612_s14 + $0x1d8] sm:$0xff] %v1400_v5  ;;  %v1401_v12 = vmax.f32 %v1337_v13, 0.0  ;;  %v1276_v42 = vmul.f32 %v2543_v40, %v1200_v6 }
 0x127   : > { %v1339_v14 = vadd.f32 %v1275_v8, %v1062_v36  ;;  %v1402_v21 = vmax.f32 %v1338_v9, 0.0 }
 0x128   : > { %1465 = vst [vmem:[%s2612_s14 + $0x1e0] sm:$0xff] %v1401_v12  ;;  %v1340_v1 = vadd.f32 %v1276_v42, %v1063_v41 }
 0x129   : > { %v1403_v16 = vmax.f32 %v1339_v14, 0.0  ;;  %1466 = vst [vmem:[%s2612_s14 + $0x1e8] sm:$0xff] %v1402_v21 }
 0x12a   : > { %v1404_v11 = vmax.f32 %v1340_v1, 0.0 }
 0x12b   : > { %1467 = vst [vmem:[%s2612_s14 + $0x1f0] sm:$0xff] %v1403_v16 }
 0x12c   : > { %1468 = vst [vmem:[%s2612_s14 + $0x1f8] sm:$0xff] %v1404_v11 }
 0x12d   : > { %1718 = shalt.err (!%p1715_p8)
}
 0x12e   : > { %s1771_s27 = smov 128   ;;  %s1772_s13 = smov 256  }
 0x12f   : > { %s1773_s14 = smov 8  }
 0x130   : > { %1629 = dma.vmem_to_hbm [thread:$0]  (%p1842_p5), %s1485_s25, 8192, %s1487_s30, %s1470_s5, %s1771_s27, %s1772_s13, %s1773_s14  }
 0x131 PF: > { %s1501_s21 = sand.u32 1, %s1749_s15   ;;  %p1632_p11 = pnand %p1614_p10, %p1853_p9 }
 0x132   : > { %s1502_s18 = scalar_lea.sflag [#allocation5], %s1501_s21 }
 0x133   : > { %p1633_p12 = pneg %p1632_p11 }
 0x135   : > { %1744 = dma.done.wait (%p1633_p12), %s1502_s18, 8192  }
 0x136   : > { %1746 = vsyncadd (%p1633_p12), %s1502_s18, 4294959104  ;;  %s17_s20 = sadd.s32 1, %s1769_s20   ;;  %s3253_s15 = smov %s1753_s16 }
 0x137   : > { %p14_p13 = scmp.ge.s32.totalorder %s17_s20, 4   ;;  %s3254_s16 = smov %s1757_s17 }
 0x138   : > { %s3255_s17 = smov %s1851_s28  ;;  %s3256_s18 = smov %s1765_s19 }
 0x139   : > { %s3257_s19 = smov %s3259_s23  ;;  %16 = sbr.rel (!%p14_p13) target bundleno = 4 (0x4), region = 166 }
 0x13e   :  { %1508 = vsyncpa [#allocation5], 1 }
 0x13f   :  { %1510 = vsyncpa [#allocation5 + $0x1], 1 }

</bundles_post_ra>
